<compile_context>
chip_gen: v7x
topology: tpu7x:2x2x1
jax: 0.10.0
libtpu: 0.0.40
codegen_flags: <defaults>
</compile_context>

<pallas_src>
import functools

import numpy as np
import jax
import jax.numpy as jnp
from jax import lax
from jax.experimental import pallas as pl
from jax.experimental.pallas import tpu as pltpu


# ----------------------------------------------------------------------------
# Config helper (same semantics as the PyTorch module)
# ----------------------------------------------------------------------------
def exponential_linspace_int(start, end, num, divisible_by=1, in_channels=None):
    def _round(x):
        return int(round(x / divisible_by) * divisible_by)

    if num < 2:
        raise ValueError("num must be at least 2 to include X and one more value.")
    base = np.exp(np.log(end / start) / (num - 2))
    sequence = [in_channels] if in_channels is not None else [_round(start)]
    for i in range(1, num):
        sequence.append(_round(start * base ** (i - 1)))
    return sequence


# ----------------------------------------------------------------------------
# Host-side constant 0/1 selection matrices (gather-as-matmul).
#
# The PyTorch code concatenates the 3 taps along the length axis
# (rearrange 'b c k l -> b c (k l)', flat index m = k*L + l) and then applies
# Conv1d(kernel=3, stride=3): output position j consumes flat indices 3j + t.
# These matrices map each tap's (C, L) weighted_data straight to the per-(t, r)
# conv inputs, so the kernel needs no reshape / transpose / strided gather.
# ----------------------------------------------------------------------------
def _sel_matrix_maxpool(L):
    """Columns grouped by (tap t, pool slot r): r picks conv position j = 2*j' + r."""
    NL = L // 2
    T = np.zeros((3, L, 6 * NL), np.float32)
    for jp in range(NL):
        for r in range(2):
            for t in range(3):
                m = 3 * (2 * jp + r) + t          # flat index on the (k l) axis
                k, l = m // L, m % L
                T[k, l, (t * 2 + r) * NL + jp] = 1.0
    return jnp.asarray(T)


def _sel_matrix_full(L):
    """Columns grouped by tap t only (all conv positions j kept, for attention pool)."""
    T = np.zeros((3, L, 3 * L), np.float32)
    for j in range(L):
        for t in range(3):
            m = 3 * j + t
            k, l = m // L, m % L
            T[k, l, t * L + j] = 1.0
    return jnp.asarray(T)


# ----------------------------------------------------------------------------
# In-kernel building blocks (traced inside the pallas kernels).
# Activations are carried as per-batch lists of (C, L) values so only 2-D
# elementwise ops / reductions / matmuls are ever emitted.
# ----------------------------------------------------------------------------
def _rfa_front(xs, gw_ref, wf_ref, gamma_ref, beta_ref, L):
    """AvgPool(3,pad1) -> depthwise 1x1 conv -> softmax over taps (get_weight);
    depthwise k=3 conv -> BatchNorm (training-mode batch stats) -> ReLU
    (generate_feature); elementwise product.  Returns wds[k][b] of shape (C, L)."""
    B = len(xs)
    gw = gw_ref[...]        # (3, C, 1)
    wf = wf_ref[...]        # (3, 3, C, 1)
    gamma = gamma_ref[...]  # (3, C, 1)
    beta = beta_ref[...]    # (3, C, 1)

    # single (1, L) lane mask reused for both edges (no full-tile int32 iota)
    lane = lax.broadcasted_iota(jnp.int32, (1, L), 1)
    first = lane == 0
    last = lane == L - 1

    xm1s, xp1s, avgs = [], [], []
    for xb in xs:
        xm1 = jnp.where(first, 0.0, pltpu.roll(xb, shift=1, axis=1))       # x[l-1]
        xp1 = jnp.where(last, 0.0, pltpu.roll(xb, shift=L - 1, axis=1))    # x[l+1]
        xm1s.append(xm1)
        xp1s.append(xp1)
        avgs.append((xm1 + xb + xp1) * (1.0 / 3.0))   # AvgPool1d(3, pad=1, stride=1)

    # softmax over the 3 taps of the depthwise 1x1 "get_weight" conv
    soft = []
    for b in range(B):
        w_raw = [avgs[b] * gw[k] for k in range(3)]
        m = jnp.maximum(jnp.maximum(w_raw[0], w_raw[1]), w_raw[2])
        e = [jnp.exp(w - m) for w in w_raw]
        inv_den = 1.0 / (e[0] + e[1] + e[2])
        soft.append([ek * inv_den for ek in e])

    # Per-tap (streamed): depthwise k=3 conv -> BN (biased batch stats over (B, L)
    # per (tap, channel), matching torch BatchNorm1d(3*C) in training mode) ->
    # ReLU -> multiply by the softmax weight.
    inv_n = 1.0 / float(B * L)
    wds = []
    for k in range(3):
        feats = [xm1s[b] * wf[k, 0] + xs[b] * wf[k, 1] + xp1s[b] * wf[k, 2]
                 for b in range(B)]
        ssum = jnp.sum(feats[0], axis=1, keepdims=True)
        for b in range(1, B):
            ssum = ssum + jnp.sum(feats[b], axis=1, keepdims=True)
        mean = ssum * inv_n                                     # (C, 1)
        vsum = None
        for b in range(B):
            d = feats[b] - mean
            vb = jnp.sum(d * d, axis=1, keepdims=True)
            vsum = vb if vsum is None else vsum + vb
        var = vsum * inv_n                                      # biased variance
        scale = gamma[k] * lax.rsqrt(var + 1e-5)                # (C, 1)
        shift = beta[k] - mean * scale
        wds.append([jnp.maximum(feats[b] * scale + shift, 0.0) * soft[b][k]
                    for b in range(B)])
    return wds


def _rfa_conv_maxpool(wds, wt_ref, bias_ref, sel_ref, L):
    """Conv1d(C,O,k=3,stride=3) over the rearranged (k l) axis, via selection
    matmuls, fused with MaxPool1d(2,2).  Returns per-batch (O, NL) in NCL layout."""
    B = len(wds[0])
    NL = L // 2
    bias = bias_ref[...]                        # (O, 1)
    selk = [sel_ref[k] for k in range(3)]       # each (L, 6*NL)
    wtt = [wt_ref[t] for t in range(3)]         # each (O, C)
    outs = []
    for b in range(B):
        q = jnp.dot(wds[0][b], selk[0], preferred_element_type=jnp.float32)
        for k in range(1, 3):
            q = q + jnp.dot(wds[k][b], selk[k], preferred_element_type=jnp.float32)
        pre = []
        for r in range(2):
            acc = bias
            for t in range(3):
                col = (t * 2 + r) * NL
                acc = acc + jnp.dot(wtt[t], q[:, col:col + NL],
                                    preferred_element_type=jnp.float32)
            pre.append(acc)                      # conv output at positions 2j'+r
        outs.append(jnp.maximum(pre[0], pre[1]))  # MaxPool1d(2, stride=2)
    return outs


def _rfa_conv_full(wds, wt_ref, bias_ref, sel_ref, L):
    """Conv1d(C,O,k=3,stride=3) over the rearranged (k l) axis (no pooling).
    Returns per-batch (O, L) in NCL layout."""
    B = len(wds[0])
    bias = bias_ref[...]
    selk = [sel_ref[k] for k in range(3)]       # each (L, 3*L)
    wtt = [wt_ref[t] for t in range(3)]
    outs = []
    for b in range(B):
        q = jnp.dot(wds[0][b], selk[0], preferred_element_type=jnp.float32)
        for k in range(1, 3):
            q = q + jnp.dot(wds[k][b], selk[k], preferred_element_type=jnp.float32)
        acc = bias
        for t in range(3):
            acc = acc + jnp.dot(wtt[t], q[:, t * L:(t + 1) * L],
                                preferred_element_type=jnp.float32)
        outs.append(acc)
    return outs


# ----------------------------------------------------------------------------
# Kernel factories
# ----------------------------------------------------------------------------
def _make_fused_max_kernel(B, block_cfgs):
    """Single kernel that runs ALL ConvStack blocks ('max' pooling) back-to-back,
    keeping every intermediate in VMEM."""
    n_blocks = len(block_cfgs)

    def kernel(*refs):
        x_ref = refs[0]
        out_ref = refs[-1]
        prefs = refs[1:-1]
        xs = [x_ref[b] for b in range(B)]                 # per-batch (C, L)
        for bi in range(n_blocks):
            _, _, L = block_cfgs[bi]
            gw, wf, gamma, beta, wt, bias, sel = prefs[7 * bi:7 * bi + 7]
            wds = _rfa_front(xs, gw, wf, gamma, beta, L)
            xs = _rfa_conv_maxpool(wds, wt, bias, sel, L)  # per-batch (O, L//2)
        for b in range(B):
            out_ref[b] = xs[b]

    return kernel


def _make_attn_block_kernel(B, L):
    """One fused kernel per block for the attention variant: front + conv +
    pooling logits + softmax over length, emitting NCL conv output + weights."""

    def kernel(x_ref, gw_ref, wf_ref, gamma_ref, beta_ref, wt_ref, bias_ref,
               sel_ref, lw_ref, conv_ref, wts_ref):
        xs = [x_ref[b] for b in range(B)]
        wds = _rfa_front(xs, gw_ref, wf_ref, gamma_ref, beta_ref, L)
        convs = _rfa_conv_full(wds, wt_ref, bias_ref, sel_ref, L)
        lw = lw_ref[...]                                        # (1, O)
        for b in range(B):
            conv_ref[b] = convs[b]                              # (O, L) NCL
            logits = jnp.dot(lw, convs[b], preferred_element_type=jnp.float32)  # (1, L)
            m = jnp.max(logits, axis=1, keepdims=True)
            e = jnp.exp(logits - m)
            wts_ref[b] = e / jnp.sum(e, axis=1, keepdims=True)  # softmax over length

    return kernel


# ----------------------------------------------------------------------------
# Wrappers / pallas_call plumbing
# ----------------------------------------------------------------------------
def _full_block_spec(shape):
    nd = len(shape)
    return pl.BlockSpec(tuple(shape), lambda i, _nd=nd: (0,) * _nd)


def _prep_block_params(p):
    O = p["conv_w"].shape[0]
    wt = jnp.transpose(p["conv_w"], (2, 0, 1))    # (3, O, C): per-tap matrices
    bias = p["conv_b"].reshape(O, 1)
    return wt, bias


def _conv_stack_forward_max(x, params):
    B, _, L = x.shape
    block_cfgs, inputs = [], [x]
    for p in params:
        assert L % 2 == 0, "length must stay even through the stack"
        C = p["gw"].shape[1]
        O = p["conv_w"].shape[0]
        wt, bias = _prep_block_params(p)
        inputs += [p["gw"], p["wf"], p["gamma"], p["beta"], wt, bias,
                   _sel_matrix_maxpool(L)]
        block_cfgs.append((C, O, L))
        L //= 2
    O_last = block_cfgs[-1][1]

    return pl.pallas_call(
        _make_fused_max_kernel(B, block_cfgs),
        out_shape=jax.ShapeDtypeStruct((B, O_last, L), jnp.float32),
        grid=(1,),
        in_specs=[_full_block_spec(a.shape) for a in inputs],
        out_specs=_full_block_spec((B, O_last, L)),
        compiler_params=pltpu.CompilerParams(dimension_semantics=("arbitrary",)),
    )(*inputs)


def _attn_block_apply(x, p):
    B, C, L = x.shape
    assert L % 2 == 0, "length must stay even through the stack"
    O = p["conv_w"].shape[0]
    wt, bias = _prep_block_params(p)
    sel = _sel_matrix_full(L)
    args = (x, p["gw"], p["wf"], p["gamma"], p["beta"], wt, bias, sel, p["logit_w"])

    conv_out, wts = pl.pallas_call(
        _make_attn_block_kernel(B, L),
        out_shape=(jax.ShapeDtypeStruct((B, O, L), jnp.float32),
                   jax.ShapeDtypeStruct((B, 1, L), jnp.float32)),
        grid=(1,),
        in_specs=[_full_block_spec(a.shape) for a in args],
        out_specs=(_full_block_spec((B, O, L)), _full_block_spec((B, 1, L))),
        compiler_params=pltpu.CompilerParams(dimension_semantics=("arbitrary",)),
    )(*args)

    # SoftmaxPooling1D: faithful reproduction of the PyTorch memory-reinterpreting
    # `inputs.view(B, new_length, pool_size, num_features)` on the NCL buffer.
    # TODO(synk): this pure relayout (no arithmetic) stays in plain JAX, and the
    #             odd-length zero-pad branch is never exercised (lengths are even).
    NL = L // 2
    pooled = jnp.sum(conv_out.reshape(B, NL, 2, O) * wts.reshape(B, NL, 2, 1), axis=2)
    return jnp.transpose(pooled, (0, 2, 1))                      # (B, O, NL)


def conv_stack_forward(x, params, pooling_type):
    if pooling_type == "max":
        return _conv_stack_forward_max(x, params)
    elif pooling_type == "attention":
        for p in params:
            x = _attn_block_apply(x, p)
        return x
    raise ValueError(f"Invalid pooling kind: {pooling_type}.")


# ----------------------------------------------------------------------------
# Deterministic parameter construction (matches the module __init__ shapes)
# ----------------------------------------------------------------------------
def init_conv_stack_params(key, channels, pooling_type, stack_num=6):
    filter_list = exponential_linspace_int(
        start=channels // 2, end=channels, num=stack_num,
        divisible_by=8, in_channels=channels // 2)
    params = []
    for i in range(len(filter_list) - 1):
        cin, cout = filter_list[i], filter_list[i + 1]
        key, k1, k2, k3, k4 = jax.random.split(key, 5)
        p = dict(
            # get_weight depthwise 1x1 conv  (torch weight (3*cin, 1, 1))
            gw=jax.random.normal(k1, (3, cin, 1), dtype=jnp.float32),
            # generate_feature depthwise k=3 conv (torch weight (3*cin, 1, 3))
            wf=(jax.random.normal(k2, (3, 3, cin, 1), dtype=jnp.float32)
                / np.sqrt(3.0)).astype(jnp.float32),
            # BatchNorm1d(3*cin) default init
            gamma=jnp.ones((3, cin, 1), jnp.float32),
            beta=jnp.zeros((3, cin, 1), jnp.float32),
            # final Conv1d(cin, cout, k=3, stride=3) weight + bias
            conv_w=(jax.random.normal(k3, (cout, cin, 3), dtype=jnp.float32)
                    / np.sqrt(3.0 * cin)).astype(jnp.float32),
            conv_b=(0.01 * jax.random.normal(k4, (cout,), dtype=jnp.float32)),
        )
        if pooling_type == "attention":
            # SoftmaxPooling1D: Linear(cout, 1, bias=False), w_init_scale=0.0 -> zeros
            p["logit_w"] = jnp.zeros((1, cout), jnp.float32)
        params.append(p)
    return params, filter_list


# ----------------------------------------------------------------------------
if __name__ == "__main__":
    channels = 16          # ConvStack(channels=16, pooling_type='max')
    pooling_type = "max"
    stack_num = 6          # -> filter_list [8, 8, 8, 8, 16, 16] (5 blocks)
    B, L = 2, 128

    key = jax.random.PRNGKey(0)
    key_x, key_p = jax.random.split(key)
    params, filter_list = init_conv_stack_params(key_p, channels, pooling_type, stack_num)

    # input follows the module: filter_list[0] = channels // 2 input channels (NCL)
    x = jax.random.normal(key_x, (B, filter_list[0], L), dtype=jnp.float32)

    fwd = jax.jit(functools.partial(conv_stack_forward, pooling_type=pooling_type))
    y = fwd(x, params)
    jax.block_until_ready(y)

    n_blocks = len(filter_list) - 1
    expected = (B, filter_list[-1], L // (2 ** n_blocks))
    assert y.shape == expected, (y.shape, expected)
    assert bool(jnp.all(jnp.isfinite(y)))
    print("KERNEL_OK")
</pallas_src>

<mosaic_0001>
module attributes {stable_mosaic.version = 11 : i64} {
  func.func @kernel(%arg0: i32, %arg1: memref<2x8x128xf32, #tpu.memory_space<vmem>>, %arg2: memref<3x8x1xf32, #tpu.memory_space<vmem>>, %arg3: memref<3x3x8x1xf32, #tpu.memory_space<vmem>>, %arg4: memref<3x8x1xf32, #tpu.memory_space<vmem>>, %arg5: memref<3x8x1xf32, #tpu.memory_space<vmem>>, %arg6: memref<3x8x8xf32, #tpu.memory_space<vmem>>, %arg7: memref<8x1xf32, #tpu.memory_space<vmem>>, %arg8: memref<3x128x384xf32, #tpu.memory_space<vmem>>, %arg9: memref<3x8x1xf32, #tpu.memory_space<vmem>>, %arg10: memref<3x3x8x1xf32, #tpu.memory_space<vmem>>, %arg11: memref<3x8x1xf32, #tpu.memory_space<vmem>>, %arg12: memref<3x8x1xf32, #tpu.memory_space<vmem>>, %arg13: memref<3x8x8xf32, #tpu.memory_space<vmem>>, %arg14: memref<8x1xf32, #tpu.memory_space<vmem>>, %arg15: memref<3x64x192xf32, #tpu.memory_space<vmem>>, %arg16: memref<3x8x1xf32, #tpu.memory_space<vmem>>, %arg17: memref<3x3x8x1xf32, #tpu.memory_space<vmem>>, %arg18: memref<3x8x1xf32, #tpu.memory_space<vmem>>, %arg19: memref<3x8x1xf32, #tpu.memory_space<vmem>>, %arg20: memref<3x8x8xf32, #tpu.memory_space<vmem>>, %arg21: memref<8x1xf32, #tpu.memory_space<vmem>>, %arg22: memref<3x32x96xf32, #tpu.memory_space<vmem>>, %arg23: memref<3x8x1xf32, #tpu.memory_space<vmem>>, %arg24: memref<3x3x8x1xf32, #tpu.memory_space<vmem>>, %arg25: memref<3x8x1xf32, #tpu.memory_space<vmem>>, %arg26: memref<3x8x1xf32, #tpu.memory_space<vmem>>, %arg27: memref<3x16x8xf32, #tpu.memory_space<vmem>>, %arg28: memref<16x1xf32, #tpu.memory_space<vmem>>, %arg29: memref<3x16x48xf32, #tpu.memory_space<vmem>>, %arg30: memref<3x16x1xf32, #tpu.memory_space<vmem>>, %arg31: memref<3x3x16x1xf32, #tpu.memory_space<vmem>>, %arg32: memref<3x16x1xf32, #tpu.memory_space<vmem>>, %arg33: memref<3x16x1xf32, #tpu.memory_space<vmem>>, %arg34: memref<3x16x16xf32, #tpu.memory_space<vmem>>, %arg35: memref<16x1xf32, #tpu.memory_space<vmem>>, %arg36: memref<3x8x24xf32, #tpu.memory_space<vmem>>, %arg37: memref<2x16x4xf32, #tpu.memory_space<vmem>>) attributes {dimension_semantics = [#tpu.dimension_semantics<arbitrary>], iteration_bounds = array<i64: 1>, scalar_prefetch = 0 : i64, scratch_operands = 0 : i64, tpu.core_type = #tpu.core_type<tc>, window_params = [{pipeline_mode = #tpu.pipeline_mode<synchronous>, transform_indices = @transform_0, window_bounds = array<i64: 2, 8, 128>}, {pipeline_mode = #tpu.pipeline_mode<synchronous>, transform_indices = @transform_1, window_bounds = array<i64: 3, 8, 1>}, {pipeline_mode = #tpu.pipeline_mode<synchronous>, transform_indices = @transform_2, window_bounds = array<i64: 3, 3, 8, 1>}, {pipeline_mode = #tpu.pipeline_mode<synchronous>, transform_indices = @transform_3, window_bounds = array<i64: 3, 8, 1>}, {pipeline_mode = #tpu.pipeline_mode<synchronous>, transform_indices = @transform_4, window_bounds = array<i64: 3, 8, 1>}, {pipeline_mode = #tpu.pipeline_mode<synchronous>, transform_indices = @transform_5, window_bounds = array<i64: 3, 8, 8>}, {pipeline_mode = #tpu.pipeline_mode<synchronous>, transform_indices = @transform_6, window_bounds = array<i64: 8, 1>}, {pipeline_mode = #tpu.pipeline_mode<synchronous>, transform_indices = @transform_7, window_bounds = array<i64: 3, 128, 384>}, {pipeline_mode = #tpu.pipeline_mode<synchronous>, transform_indices = @transform_8, window_bounds = array<i64: 3, 8, 1>}, {pipeline_mode = #tpu.pipeline_mode<synchronous>, transform_indices = @transform_9, window_bounds = array<i64: 3, 3, 8, 1>}, {pipeline_mode = #tpu.pipeline_mode<synchronous>, transform_indices = @transform_10, window_bounds = array<i64: 3, 8, 1>}, {pipeline_mode = #tpu.pipeline_mode<synchronous>, transform_indices = @transform_11, window_bounds = array<i64: 3, 8, 1>}, {pipeline_mode = #tpu.pipeline_mode<synchronous>, transform_indices = @transform_12, window_bounds = array<i64: 3, 8, 8>}, {pipeline_mode = #tpu.pipeline_mode<synchronous>, transform_indices = @transform_13, window_bounds = array<i64: 8, 1>}, {pipeline_mode = #tpu.pipeline_mode<synchronous>, transform_indices = @transform_14, window_bounds = array<i64: 3, 64, 192>}, {pipeline_mode = #tpu.pipeline_mode<synchronous>, transform_indices = @transform_15, window_bounds = array<i64: 3, 8, 1>}, {pipeline_mode = #tpu.pipeline_mode<synchronous>, transform_indices = @transform_16, window_bounds = array<i64: 3, 3, 8, 1>}, {pipeline_mode = #tpu.pipeline_mode<synchronous>, transform_indices = @transform_17, window_bounds = array<i64: 3, 8, 1>}, {pipeline_mode = #tpu.pipeline_mode<synchronous>, transform_indices = @transform_18, window_bounds = array<i64: 3, 8, 1>}, {pipeline_mode = #tpu.pipeline_mode<synchronous>, transform_indices = @transform_19, window_bounds = array<i64: 3, 8, 8>}, {pipeline_mode = #tpu.pipeline_mode<synchronous>, transform_indices = @transform_20, window_bounds = array<i64: 8, 1>}, {pipeline_mode = #tpu.pipeline_mode<synchronous>, transform_indices = @transform_21, window_bounds = array<i64: 3, 32, 96>}, {pipeline_mode = #tpu.pipeline_mode<synchronous>, transform_indices = @transform_22, window_bounds = array<i64: 3, 8, 1>}, {pipeline_mode = #tpu.pipeline_mode<synchronous>, transform_indices = @transform_23, window_bounds = array<i64: 3, 3, 8, 1>}, {pipeline_mode = #tpu.pipeline_mode<synchronous>, transform_indices = @transform_24, window_bounds = array<i64: 3, 8, 1>}, {pipeline_mode = #tpu.pipeline_mode<synchronous>, transform_indices = @transform_25, window_bounds = array<i64: 3, 8, 1>}, {pipeline_mode = #tpu.pipeline_mode<synchronous>, transform_indices = @transform_26, window_bounds = array<i64: 3, 16, 8>}, {pipeline_mode = #tpu.pipeline_mode<synchronous>, transform_indices = @transform_27, window_bounds = array<i64: 16, 1>}, {pipeline_mode = #tpu.pipeline_mode<synchronous>, transform_indices = @transform_28, window_bounds = array<i64: 3, 16, 48>}, {pipeline_mode = #tpu.pipeline_mode<synchronous>, transform_indices = @transform_29, window_bounds = array<i64: 3, 16, 1>}, {pipeline_mode = #tpu.pipeline_mode<synchronous>, transform_indices = @transform_30, window_bounds = array<i64: 3, 3, 16, 1>}, {pipeline_mode = #tpu.pipeline_mode<synchronous>, transform_indices = @transform_31, window_bounds = array<i64: 3, 16, 1>}, {pipeline_mode = #tpu.pipeline_mode<synchronous>, transform_indices = @transform_32, window_bounds = array<i64: 3, 16, 1>}, {pipeline_mode = #tpu.pipeline_mode<synchronous>, transform_indices = @transform_33, window_bounds = array<i64: 3, 16, 16>}, {pipeline_mode = #tpu.pipeline_mode<synchronous>, transform_indices = @transform_34, window_bounds = array<i64: 16, 1>}, {pipeline_mode = #tpu.pipeline_mode<synchronous>, transform_indices = @transform_35, window_bounds = array<i64: 3, 8, 24>}, {pipeline_mode = #tpu.pipeline_mode<synchronous>, transform_indices = @transform_36, window_bounds = array<i64: 2, 16, 4>}]} {
    %c0 = arith.constant 0 : index
    %c0_0 = arith.constant 0 : index
    %c0_1 = arith.constant 0 : index
    %0 = vector.load %arg1[%c0, %c0_0, %c0_1] : memref<2x8x128xf32, #tpu.memory_space<vmem>>, vector<1x8x128xf32>
    %1 = vector.shape_cast %0 : vector<1x8x128xf32> to vector<8x128xf32>
    %c1 = arith.constant 1 : index
    %c0_2 = arith.constant 0 : index
    %c0_3 = arith.constant 0 : index
    %2 = vector.load %arg1[%c1, %c0_2, %c0_3] : memref<2x8x128xf32, #tpu.memory_space<vmem>>, vector<1x8x128xf32>
    %3 = vector.shape_cast %2 : vector<1x8x128xf32> to vector<8x128xf32>
    %c0_4 = arith.constant 0 : index
    %c0_5 = arith.constant 0 : index
    %c0_6 = arith.constant 0 : index
    %4 = vector.load %arg2[%c0_4, %c0_5, %c0_6] : memref<3x8x1xf32, #tpu.memory_space<vmem>>, vector<3x8x1xf32>
    %c0_7 = arith.constant 0 : index
    %c0_8 = arith.constant 0 : index
    %c0_9 = arith.constant 0 : index
    %c0_10 = arith.constant 0 : index
    %5 = vector.load %arg3[%c0_7, %c0_8, %c0_9, %c0_10] : memref<3x3x8x1xf32, #tpu.memory_space<vmem>>, vector<3x3x8x1xf32>
    %c0_11 = arith.constant 0 : index
    %c0_12 = arith.constant 0 : index
    %c0_13 = arith.constant 0 : index
    %6 = vector.load %arg4[%c0_11, %c0_12, %c0_13] : memref<3x8x1xf32, #tpu.memory_space<vmem>>, vector<3x8x1xf32>
    %c0_14 = arith.constant 0 : index
    %c0_15 = arith.constant 0 : index
    %c0_16 = arith.constant 0 : index
    %7 = vector.load %arg5[%c0_14, %c0_15, %c0_16] : memref<3x8x1xf32, #tpu.memory_space<vmem>>, vector<3x8x1xf32>
    %8 = tpu.iota {dimensions = array<i32: 1>} : vector<1x128xi32>
    %c0_i32 = arith.constant 0 : i32
    %9 = vector.broadcast %c0_i32 : i32 to vector<1x128xi32>
    %10 = arith.cmpi eq, %8, %9 : vector<1x128xi32>
    %c127_i32 = arith.constant 127 : i32
    %11 = vector.broadcast %c127_i32 : i32 to vector<1x128xi32>
    %12 = arith.cmpi eq, %8, %11 : vector<1x128xi32>
    %c1_i32 = arith.constant 1 : i32
    %13 = tpu.dynamic_rotate %1 by %c1_i32 dim 1 : vector<8x128xf32>, i32 -> vector<8x128xf32>
    %cst = arith.constant 0.000000e+00 : f32
    %14 = vector.shape_cast %10 : vector<1x128xi1> to vector<1x128xi1>
    %15 = vector.broadcast %14 : vector<1x128xi1> to vector<8x128xi1>
    %16 = vector.broadcast %cst : f32 to vector<8x128xf32>
    %17 = arith.select %15, %16, %13 : vector<8x128xi1>, vector<8x128xf32>
    %c127_i32_17 = arith.constant 127 : i32
    %18 = tpu.dynamic_rotate %1 by %c127_i32_17 dim 1 : vector<8x128xf32>, i32 -> vector<8x128xf32>
    %cst_18 = arith.constant 0.000000e+00 : f32
    %19 = vector.shape_cast %12 : vector<1x128xi1> to vector<1x128xi1>
    %20 = vector.broadcast %19 : vector<1x128xi1> to vector<8x128xi1>
    %21 = vector.broadcast %cst_18 : f32 to vector<8x128xf32>
    %22 = arith.select %20, %21, %18 : vector<8x128xi1>, vector<8x128xf32>
    %23 = arith.addf %17, %1 : vector<8x128xf32>
    %24 = arith.addf %23, %22 : vector<8x128xf32>
    %cst_19 = arith.constant 0.333333343 : f32
    %25 = vector.broadcast %cst_19 : f32 to vector<8x128xf32>
    %26 = arith.mulf %24, %25 : vector<8x128xf32>
    %c1_i32_20 = arith.constant 1 : i32
    %27 = tpu.dynamic_rotate %3 by %c1_i32_20 dim 1 : vector<8x128xf32>, i32 -> vector<8x128xf32>
    %cst_21 = arith.constant 0.000000e+00 : f32
    %28 = vector.shape_cast %10 : vector<1x128xi1> to vector<1x128xi1>
    %29 = vector.broadcast %28 : vector<1x128xi1> to vector<8x128xi1>
    %30 = vector.broadcast %cst_21 : f32 to vector<8x128xf32>
    %31 = arith.select %29, %30, %27 : vector<8x128xi1>, vector<8x128xf32>
    %c127_i32_22 = arith.constant 127 : i32
    %32 = tpu.dynamic_rotate %3 by %c127_i32_22 dim 1 : vector<8x128xf32>, i32 -> vector<8x128xf32>
    %cst_23 = arith.constant 0.000000e+00 : f32
    %33 = vector.shape_cast %12 : vector<1x128xi1> to vector<1x128xi1>
    %34 = vector.broadcast %33 : vector<1x128xi1> to vector<8x128xi1>
    %35 = vector.broadcast %cst_23 : f32 to vector<8x128xf32>
    %36 = arith.select %34, %35, %32 : vector<8x128xi1>, vector<8x128xf32>
    %37 = arith.addf %31, %3 : vector<8x128xf32>
    %38 = arith.addf %37, %36 : vector<8x128xf32>
    %cst_24 = arith.constant 0.333333343 : f32
    %39 = vector.broadcast %cst_24 : f32 to vector<8x128xf32>
    %40 = arith.mulf %38, %39 : vector<8x128xf32>
    %41 = vector.extract_strided_slice %4 {offsets = [0, 0, 0], sizes = [1, 8, 1], strides = [1, 1, 1]} : vector<3x8x1xf32> to vector<1x8x1xf32>
    %42 = vector.shape_cast %41 : vector<1x8x1xf32> to vector<8x1xf32>
    %43 = vector.broadcast %42 : vector<8x1xf32> to vector<8x128xf32>
    %44 = arith.mulf %26, %43 : vector<8x128xf32>
    %45 = vector.extract_strided_slice %4 {offsets = [1, 0, 0], sizes = [1, 8, 1], strides = [1, 1, 1]} : vector<3x8x1xf32> to vector<1x8x1xf32>
    %46 = vector.shape_cast %45 : vector<1x8x1xf32> to vector<8x1xf32>
    %47 = vector.broadcast %46 : vector<8x1xf32> to vector<8x128xf32>
    %48 = arith.mulf %26, %47 : vector<8x128xf32>
    %49 = vector.extract_strided_slice %4 {offsets = [2, 0, 0], sizes = [1, 8, 1], strides = [1, 1, 1]} : vector<3x8x1xf32> to vector<1x8x1xf32>
    %50 = vector.shape_cast %49 : vector<1x8x1xf32> to vector<8x1xf32>
    %51 = vector.broadcast %50 : vector<8x1xf32> to vector<8x128xf32>
    %52 = arith.mulf %26, %51 : vector<8x128xf32>
    %53 = arith.maximumf %44, %48 : vector<8x128xf32>
    %54 = arith.maximumf %53, %52 : vector<8x128xf32>
    %55 = arith.subf %44, %54 : vector<8x128xf32>
    %56 = math.exp %55 : vector<8x128xf32>
    %57 = arith.subf %48, %54 : vector<8x128xf32>
    %58 = math.exp %57 : vector<8x128xf32>
    %59 = arith.subf %52, %54 : vector<8x128xf32>
    %60 = math.exp %59 : vector<8x128xf32>
    %61 = arith.addf %56, %58 : vector<8x128xf32>
    %62 = arith.addf %61, %60 : vector<8x128xf32>
    %cst_25 = arith.constant 1.000000e+00 : f32
    %63 = vector.broadcast %cst_25 : f32 to vector<8x128xf32>
    %64 = arith.divf %63, %62 : vector<8x128xf32>
    %65 = arith.mulf %56, %64 : vector<8x128xf32>
    %66 = arith.mulf %58, %64 : vector<8x128xf32>
    %67 = arith.mulf %60, %64 : vector<8x128xf32>
    %68 = vector.extract_strided_slice %4 {offsets = [0, 0, 0], sizes = [1, 8, 1], strides = [1, 1, 1]} : vector<3x8x1xf32> to vector<1x8x1xf32>
    %69 = vector.shape_cast %68 : vector<1x8x1xf32> to vector<8x1xf32>
    %70 = vector.broadcast %69 : vector<8x1xf32> to vector<8x128xf32>
    %71 = arith.mulf %40, %70 : vector<8x128xf32>
    %72 = vector.extract_strided_slice %4 {offsets = [1, 0, 0], sizes = [1, 8, 1], strides = [1, 1, 1]} : vector<3x8x1xf32> to vector<1x8x1xf32>
    %73 = vector.shape_cast %72 : vector<1x8x1xf32> to vector<8x1xf32>
    %74 = vector.broadcast %73 : vector<8x1xf32> to vector<8x128xf32>
    %75 = arith.mulf %40, %74 : vector<8x128xf32>
    %76 = vector.extract_strided_slice %4 {offsets = [2, 0, 0], sizes = [1, 8, 1], strides = [1, 1, 1]} : vector<3x8x1xf32> to vector<1x8x1xf32>
    %77 = vector.shape_cast %76 : vector<1x8x1xf32> to vector<8x1xf32>
    %78 = vector.broadcast %77 : vector<8x1xf32> to vector<8x128xf32>
    %79 = arith.mulf %40, %78 : vector<8x128xf32>
    %80 = arith.maximumf %71, %75 : vector<8x128xf32>
    %81 = arith.maximumf %80, %79 : vector<8x128xf32>
    %82 = arith.subf %71, %81 : vector<8x128xf32>
    %83 = math.exp %82 : vector<8x128xf32>
    %84 = arith.subf %75, %81 : vector<8x128xf32>
    %85 = math.exp %84 : vector<8x128xf32>
    %86 = arith.subf %79, %81 : vector<8x128xf32>
    %87 = math.exp %86 : vector<8x128xf32>
    %88 = arith.addf %83, %85 : vector<8x128xf32>
    %89 = arith.addf %88, %87 : vector<8x128xf32>
    %cst_26 = arith.constant 1.000000e+00 : f32
    %90 = vector.broadcast %cst_26 : f32 to vector<8x128xf32>
    %91 = arith.divf %90, %89 : vector<8x128xf32>
    %92 = arith.mulf %83, %91 : vector<8x128xf32>
    %93 = arith.mulf %85, %91 : vector<8x128xf32>
    %94 = arith.mulf %87, %91 : vector<8x128xf32>
    %95 = vector.extract_strided_slice %5 {offsets = [0, 0, 0, 0], sizes = [1, 1, 8, 1], strides = [1, 1, 1, 1]} : vector<3x3x8x1xf32> to vector<1x1x8x1xf32>
    %96 = vector.shape_cast %95 : vector<1x1x8x1xf32> to vector<8x1xf32>
    %97 = vector.broadcast %96 : vector<8x1xf32> to vector<8x128xf32>
    %98 = arith.mulf %17, %97 : vector<8x128xf32>
    %99 = vector.extract_strided_slice %5 {offsets = [0, 1, 0, 0], sizes = [1, 1, 8, 1], strides = [1, 1, 1, 1]} : vector<3x3x8x1xf32> to vector<1x1x8x1xf32>
    %100 = vector.shape_cast %99 : vector<1x1x8x1xf32> to vector<8x1xf32>
    %101 = vector.broadcast %100 : vector<8x1xf32> to vector<8x128xf32>
    %102 = arith.mulf %1, %101 : vector<8x128xf32>
    %103 = arith.addf %98, %102 : vector<8x128xf32>
    %104 = vector.extract_strided_slice %5 {offsets = [0, 2, 0, 0], sizes = [1, 1, 8, 1], strides = [1, 1, 1, 1]} : vector<3x3x8x1xf32> to vector<1x1x8x1xf32>
    %105 = vector.shape_cast %104 : vector<1x1x8x1xf32> to vector<8x1xf32>
    %106 = vector.broadcast %105 : vector<8x1xf32> to vector<8x128xf32>
    %107 = arith.mulf %22, %106 : vector<8x128xf32>
    %108 = arith.addf %103, %107 : vector<8x128xf32>
    %109 = vector.extract_strided_slice %5 {offsets = [0, 0, 0, 0], sizes = [1, 1, 8, 1], strides = [1, 1, 1, 1]} : vector<3x3x8x1xf32> to vector<1x1x8x1xf32>
    %110 = vector.shape_cast %109 : vector<1x1x8x1xf32> to vector<8x1xf32>
    %111 = vector.broadcast %110 : vector<8x1xf32> to vector<8x128xf32>
    %112 = arith.mulf %31, %111 : vector<8x128xf32>
    %113 = vector.extract_strided_slice %5 {offsets = [0, 1, 0, 0], sizes = [1, 1, 8, 1], strides = [1, 1, 1, 1]} : vector<3x3x8x1xf32> to vector<1x1x8x1xf32>
    %114 = vector.shape_cast %113 : vector<1x1x8x1xf32> to vector<8x1xf32>
    %115 = vector.broadcast %114 : vector<8x1xf32> to vector<8x128xf32>
    %116 = arith.mulf %3, %115 : vector<8x128xf32>
    %117 = arith.addf %112, %116 : vector<8x128xf32>
    %118 = vector.extract_strided_slice %5 {offsets = [0, 2, 0, 0], sizes = [1, 1, 8, 1], strides = [1, 1, 1, 1]} : vector<3x3x8x1xf32> to vector<1x1x8x1xf32>
    %119 = vector.shape_cast %118 : vector<1x1x8x1xf32> to vector<8x1xf32>
    %120 = vector.broadcast %119 : vector<8x1xf32> to vector<8x128xf32>
    %121 = arith.mulf %36, %120 : vector<8x128xf32>
    %122 = arith.addf %117, %121 : vector<8x128xf32>
    %cst_27 = arith.constant dense<0.000000e+00> : vector<8xf32>
    %123 = vector.multi_reduction <add>, %108, %cst_27 [1] : vector<8x128xf32> to vector<8xf32>
    %124 = vector.shape_cast %123 : vector<8xf32> to vector<8x1xf32>
    %cst_28 = arith.constant dense<0.000000e+00> : vector<8xf32>
    %125 = vector.multi_reduction <add>, %122, %cst_28 [1] : vector<8x128xf32> to vector<8xf32>
    %126 = vector.shape_cast %125 : vector<8xf32> to vector<8x1xf32>
    %127 = arith.addf %124, %126 : vector<8x1xf32>
    %cst_29 = arith.constant 3.906250e-03 : f32
    %128 = vector.broadcast %cst_29 : f32 to vector<8x1xf32>
    %129 = arith.mulf %127, %128 : vector<8x1xf32>
    %130 = vector.broadcast %129 : vector<8x1xf32> to vector<8x128xf32>
    %131 = arith.subf %108, %130 : vector<8x128xf32>
    %132 = arith.mulf %131, %131 : vector<8x128xf32>
    %cst_30 = arith.constant dense<0.000000e+00> : vector<8xf32>
    %133 = vector.multi_reduction <add>, %132, %cst_30 [1] : vector<8x128xf32> to vector<8xf32>
    %134 = vector.shape_cast %133 : vector<8xf32> to vector<8x1xf32>
    %135 = vector.broadcast %129 : vector<8x1xf32> to vector<8x128xf32>
    %136 = arith.subf %122, %135 : vector<8x128xf32>
    %137 = arith.mulf %136, %136 : vector<8x128xf32>
    %cst_31 = arith.constant dense<0.000000e+00> : vector<8xf32>
    %138 = vector.multi_reduction <add>, %137, %cst_31 [1] : vector<8x128xf32> to vector<8xf32>
    %139 = vector.shape_cast %138 : vector<8xf32> to vector<8x1xf32>
    %140 = arith.addf %134, %139 : vector<8x1xf32>
    %cst_32 = arith.constant 3.906250e-03 : f32
    %141 = vector.broadcast %cst_32 : f32 to vector<8x1xf32>
    %142 = arith.mulf %140, %141 : vector<8x1xf32>
    %143 = vector.extract_strided_slice %6 {offsets = [0, 0, 0], sizes = [1, 8, 1], strides = [1, 1, 1]} : vector<3x8x1xf32> to vector<1x8x1xf32>
    %144 = vector.shape_cast %143 : vector<1x8x1xf32> to vector<8x1xf32>
    %cst_33 = arith.constant 9.99999974E-6 : f32
    %145 = vector.broadcast %cst_33 : f32 to vector<8x1xf32>
    %146 = arith.addf %142, %145 : vector<8x1xf32>
    %147 = math.rsqrt %146 : vector<8x1xf32>
    %148 = arith.mulf %144, %147 : vector<8x1xf32>
    %149 = vector.extract_strided_slice %7 {offsets = [0, 0, 0], sizes = [1, 8, 1], strides = [1, 1, 1]} : vector<3x8x1xf32> to vector<1x8x1xf32>
    %150 = vector.shape_cast %149 : vector<1x8x1xf32> to vector<8x1xf32>
    %151 = arith.mulf %129, %148 : vector<8x1xf32>
    %152 = arith.subf %150, %151 : vector<8x1xf32>
    %153 = vector.broadcast %148 : vector<8x1xf32> to vector<8x128xf32>
    %154 = arith.mulf %108, %153 : vector<8x128xf32>
    %155 = vector.broadcast %152 : vector<8x1xf32> to vector<8x128xf32>
    %156 = arith.addf %154, %155 : vector<8x128xf32>
    %cst_34 = arith.constant 0.000000e+00 : f32
    %157 = vector.broadcast %cst_34 : f32 to vector<8x128xf32>
    %158 = arith.maximumf %156, %157 : vector<8x128xf32>
    %159 = arith.mulf %158, %65 : vector<8x128xf32>
    %160 = vector.broadcast %148 : vector<8x1xf32> to vector<8x128xf32>
    %161 = arith.mulf %122, %160 : vector<8x128xf32>
    %162 = vector.broadcast %152 : vector<8x1xf32> to vector<8x128xf32>
    %163 = arith.addf %161, %162 : vector<8x128xf32>
    %cst_35 = arith.constant 0.000000e+00 : f32
    %164 = vector.broadcast %cst_35 : f32 to vector<8x128xf32>
    %165 = arith.maximumf %163, %164 : vector<8x128xf32>
    %166 = arith.mulf %165, %92 : vector<8x128xf32>
    %167 = vector.extract_strided_slice %5 {offsets = [1, 0, 0, 0], sizes = [1, 1, 8, 1], strides = [1, 1, 1, 1]} : vector<3x3x8x1xf32> to vector<1x1x8x1xf32>
    %168 = vector.shape_cast %167 : vector<1x1x8x1xf32> to vector<8x1xf32>
    %169 = vector.broadcast %168 : vector<8x1xf32> to vector<8x128xf32>
    %170 = arith.mulf %17, %169 : vector<8x128xf32>
    %171 = vector.extract_strided_slice %5 {offsets = [1, 1, 0, 0], sizes = [1, 1, 8, 1], strides = [1, 1, 1, 1]} : vector<3x3x8x1xf32> to vector<1x1x8x1xf32>
    %172 = vector.shape_cast %171 : vector<1x1x8x1xf32> to vector<8x1xf32>
    %173 = vector.broadcast %172 : vector<8x1xf32> to vector<8x128xf32>
    %174 = arith.mulf %1, %173 : vector<8x128xf32>
    %175 = arith.addf %170, %174 : vector<8x128xf32>
    %176 = vector.extract_strided_slice %5 {offsets = [1, 2, 0, 0], sizes = [1, 1, 8, 1], strides = [1, 1, 1, 1]} : vector<3x3x8x1xf32> to vector<1x1x8x1xf32>
    %177 = vector.shape_cast %176 : vector<1x1x8x1xf32> to vector<8x1xf32>
    %178 = vector.broadcast %177 : vector<8x1xf32> to vector<8x128xf32>
    %179 = arith.mulf %22, %178 : vector<8x128xf32>
    %180 = arith.addf %175, %179 : vector<8x128xf32>
    %181 = vector.extract_strided_slice %5 {offsets = [1, 0, 0, 0], sizes = [1, 1, 8, 1], strides = [1, 1, 1, 1]} : vector<3x3x8x1xf32> to vector<1x1x8x1xf32>
    %182 = vector.shape_cast %181 : vector<1x1x8x1xf32> to vector<8x1xf32>
    %183 = vector.broadcast %182 : vector<8x1xf32> to vector<8x128xf32>
    %184 = arith.mulf %31, %183 : vector<8x128xf32>
    %185 = vector.extract_strided_slice %5 {offsets = [1, 1, 0, 0], sizes = [1, 1, 8, 1], strides = [1, 1, 1, 1]} : vector<3x3x8x1xf32> to vector<1x1x8x1xf32>
    %186 = vector.shape_cast %185 : vector<1x1x8x1xf32> to vector<8x1xf32>
    %187 = vector.broadcast %186 : vector<8x1xf32> to vector<8x128xf32>
    %188 = arith.mulf %3, %187 : vector<8x128xf32>
    %189 = arith.addf %184, %188 : vector<8x128xf32>
    %190 = vector.extract_strided_slice %5 {offsets = [1, 2, 0, 0], sizes = [1, 1, 8, 1], strides = [1, 1, 1, 1]} : vector<3x3x8x1xf32> to vector<1x1x8x1xf32>
    %191 = vector.shape_cast %190 : vector<1x1x8x1xf32> to vector<8x1xf32>
    %192 = vector.broadcast %191 : vector<8x1xf32> to vector<8x128xf32>
    %193 = arith.mulf %36, %192 : vector<8x128xf32>
    %194 = arith.addf %189, %193 : vector<8x128xf32>
    %cst_36 = arith.constant dense<0.000000e+00> : vector<8xf32>
    %195 = vector.multi_reduction <add>, %180, %cst_36 [1] : vector<8x128xf32> to vector<8xf32>
    %196 = vector.shape_cast %195 : vector<8xf32> to vector<8x1xf32>
    %cst_37 = arith.constant dense<0.000000e+00> : vector<8xf32>
    %197 = vector.multi_reduction <add>, %194, %cst_37 [1] : vector<8x128xf32> to vector<8xf32>
    %198 = vector.shape_cast %197 : vector<8xf32> to vector<8x1xf32>
    %199 = arith.addf %196, %198 : vector<8x1xf32>
    %cst_38 = arith.constant 3.906250e-03 : f32
    %200 = vector.broadcast %cst_38 : f32 to vector<8x1xf32>
    %201 = arith.mulf %199, %200 : vector<8x1xf32>
    %202 = vector.broadcast %201 : vector<8x1xf32> to vector<8x128xf32>
    %203 = arith.subf %180, %202 : vector<8x128xf32>
    %204 = arith.mulf %203, %203 : vector<8x128xf32>
    %cst_39 = arith.constant dense<0.000000e+00> : vector<8xf32>
    %205 = vector.multi_reduction <add>, %204, %cst_39 [1] : vector<8x128xf32> to vector<8xf32>
    %206 = vector.shape_cast %205 : vector<8xf32> to vector<8x1xf32>
    %207 = vector.broadcast %201 : vector<8x1xf32> to vector<8x128xf32>
    %208 = arith.subf %194, %207 : vector<8x128xf32>
    %209 = arith.mulf %208, %208 : vector<8x128xf32>
    %cst_40 = arith.constant dense<0.000000e+00> : vector<8xf32>
    %210 = vector.multi_reduction <add>, %209, %cst_40 [1] : vector<8x128xf32> to vector<8xf32>
    %211 = vector.shape_cast %210 : vector<8xf32> to vector<8x1xf32>
    %212 = arith.addf %206, %211 : vector<8x1xf32>
    %cst_41 = arith.constant 3.906250e-03 : f32
    %213 = vector.broadcast %cst_41 : f32 to vector<8x1xf32>
    %214 = arith.mulf %212, %213 : vector<8x1xf32>
    %215 = vector.extract_strided_slice %6 {offsets = [1, 0, 0], sizes = [1, 8, 1], strides = [1, 1, 1]} : vector<3x8x1xf32> to vector<1x8x1xf32>
    %216 = vector.shape_cast %215 : vector<1x8x1xf32> to vector<8x1xf32>
    %cst_42 = arith.constant 9.99999974E-6 : f32
    %217 = vector.broadcast %cst_42 : f32 to vector<8x1xf32>
    %218 = arith.addf %214, %217 : vector<8x1xf32>
    %219 = math.rsqrt %218 : vector<8x1xf32>
    %220 = arith.mulf %216, %219 : vector<8x1xf32>
    %221 = vector.extract_strided_slice %7 {offsets = [1, 0, 0], sizes = [1, 8, 1], strides = [1, 1, 1]} : vector<3x8x1xf32> to vector<1x8x1xf32>
    %222 = vector.shape_cast %221 : vector<1x8x1xf32> to vector<8x1xf32>
    %223 = arith.mulf %201, %220 : vector<8x1xf32>
    %224 = arith.subf %222, %223 : vector<8x1xf32>
    %225 = vector.broadcast %220 : vector<8x1xf32> to vector<8x128xf32>
    %226 = arith.mulf %180, %225 : vector<8x128xf32>
    %227 = vector.broadcast %224 : vector<8x1xf32> to vector<8x128xf32>
    %228 = arith.addf %226, %227 : vector<8x128xf32>
    %cst_43 = arith.constant 0.000000e+00 : f32
    %229 = vector.broadcast %cst_43 : f32 to vector<8x128xf32>
    %230 = arith.maximumf %228, %229 : vector<8x128xf32>
    %231 = arith.mulf %230, %66 : vector<8x128xf32>
    %232 = vector.broadcast %220 : vector<8x1xf32> to vector<8x128xf32>
    %233 = arith.mulf %194, %232 : vector<8x128xf32>
    %234 = vector.broadcast %224 : vector<8x1xf32> to vector<8x128xf32>
    %235 = arith.addf %233, %234 : vector<8x128xf32>
    %cst_44 = arith.constant 0.000000e+00 : f32
    %236 = vector.broadcast %cst_44 : f32 to vector<8x128xf32>
    %237 = arith.maximumf %235, %236 : vector<8x128xf32>
    %238 = arith.mulf %237, %93 : vector<8x128xf32>
    %239 = vector.extract_strided_slice %5 {offsets = [2, 0, 0, 0], sizes = [1, 1, 8, 1], strides = [1, 1, 1, 1]} : vector<3x3x8x1xf32> to vector<1x1x8x1xf32>
    %240 = vector.shape_cast %239 : vector<1x1x8x1xf32> to vector<8x1xf32>
    %241 = vector.broadcast %240 : vector<8x1xf32> to vector<8x128xf32>
    %242 = arith.mulf %17, %241 : vector<8x128xf32>
    %243 = vector.extract_strided_slice %5 {offsets = [2, 1, 0, 0], sizes = [1, 1, 8, 1], strides = [1, 1, 1, 1]} : vector<3x3x8x1xf32> to vector<1x1x8x1xf32>
    %244 = vector.shape_cast %243 : vector<1x1x8x1xf32> to vector<8x1xf32>
    %245 = vector.broadcast %244 : vector<8x1xf32> to vector<8x128xf32>
    %246 = arith.mulf %1, %245 : vector<8x128xf32>
    %247 = arith.addf %242, %246 : vector<8x128xf32>
    %248 = vector.extract_strided_slice %5 {offsets = [2, 2, 0, 0], sizes = [1, 1, 8, 1], strides = [1, 1, 1, 1]} : vector<3x3x8x1xf32> to vector<1x1x8x1xf32>
    %249 = vector.shape_cast %248 : vector<1x1x8x1xf32> to vector<8x1xf32>
    %250 = vector.broadcast %249 : vector<8x1xf32> to vector<8x128xf32>
    %251 = arith.mulf %22, %250 : vector<8x128xf32>
    %252 = arith.addf %247, %251 : vector<8x128xf32>
    %253 = vector.extract_strided_slice %5 {offsets = [2, 0, 0, 0], sizes = [1, 1, 8, 1], strides = [1, 1, 1, 1]} : vector<3x3x8x1xf32> to vector<1x1x8x1xf32>
    %254 = vector.shape_cast %253 : vector<1x1x8x1xf32> to vector<8x1xf32>
    %255 = vector.broadcast %254 : vector<8x1xf32> to vector<8x128xf32>
    %256 = arith.mulf %31, %255 : vector<8x128xf32>
    %257 = vector.extract_strided_slice %5 {offsets = [2, 1, 0, 0], sizes = [1, 1, 8, 1], strides = [1, 1, 1, 1]} : vector<3x3x8x1xf32> to vector<1x1x8x1xf32>
    %258 = vector.shape_cast %257 : vector<1x1x8x1xf32> to vector<8x1xf32>
    %259 = vector.broadcast %258 : vector<8x1xf32> to vector<8x128xf32>
    %260 = arith.mulf %3, %259 : vector<8x128xf32>
    %261 = arith.addf %256, %260 : vector<8x128xf32>
    %262 = vector.extract_strided_slice %5 {offsets = [2, 2, 0, 0], sizes = [1, 1, 8, 1], strides = [1, 1, 1, 1]} : vector<3x3x8x1xf32> to vector<1x1x8x1xf32>
    %263 = vector.shape_cast %262 : vector<1x1x8x1xf32> to vector<8x1xf32>
    %264 = vector.broadcast %263 : vector<8x1xf32> to vector<8x128xf32>
    %265 = arith.mulf %36, %264 : vector<8x128xf32>
    %266 = arith.addf %261, %265 : vector<8x128xf32>
    %cst_45 = arith.constant dense<0.000000e+00> : vector<8xf32>
    %267 = vector.multi_reduction <add>, %252, %cst_45 [1] : vector<8x128xf32> to vector<8xf32>
    %268 = vector.shape_cast %267 : vector<8xf32> to vector<8x1xf32>
    %cst_46 = arith.constant dense<0.000000e+00> : vector<8xf32>
    %269 = vector.multi_reduction <add>, %266, %cst_46 [1] : vector<8x128xf32> to vector<8xf32>
    %270 = vector.shape_cast %269 : vector<8xf32> to vector<8x1xf32>
    %271 = arith.addf %268, %270 : vector<8x1xf32>
    %cst_47 = arith.constant 3.906250e-03 : f32
    %272 = vector.broadcast %cst_47 : f32 to vector<8x1xf32>
    %273 = arith.mulf %271, %272 : vector<8x1xf32>
    %274 = vector.broadcast %273 : vector<8x1xf32> to vector<8x128xf32>
    %275 = arith.subf %252, %274 : vector<8x128xf32>
    %276 = arith.mulf %275, %275 : vector<8x128xf32>
    %cst_48 = arith.constant dense<0.000000e+00> : vector<8xf32>
    %277 = vector.multi_reduction <add>, %276, %cst_48 [1] : vector<8x128xf32> to vector<8xf32>
    %278 = vector.shape_cast %277 : vector<8xf32> to vector<8x1xf32>
    %279 = vector.broadcast %273 : vector<8x1xf32> to vector<8x128xf32>
    %280 = arith.subf %266, %279 : vector<8x128xf32>
    %281 = arith.mulf %280, %280 : vector<8x128xf32>
    %cst_49 = arith.constant dense<0.000000e+00> : vector<8xf32>
    %282 = vector.multi_reduction <add>, %281, %cst_49 [1] : vector<8x128xf32> to vector<8xf32>
    %283 = vector.shape_cast %282 : vector<8xf32> to vector<8x1xf32>
    %284 = arith.addf %278, %283 : vector<8x1xf32>
    %cst_50 = arith.constant 3.906250e-03 : f32
    %285 = vector.broadcast %cst_50 : f32 to vector<8x1xf32>
    %286 = arith.mulf %284, %285 : vector<8x1xf32>
    %287 = vector.extract_strided_slice %6 {offsets = [2, 0, 0], sizes = [1, 8, 1], strides = [1, 1, 1]} : vector<3x8x1xf32> to vector<1x8x1xf32>
    %288 = vector.shape_cast %287 : vector<1x8x1xf32> to vector<8x1xf32>
    %cst_51 = arith.constant 9.99999974E-6 : f32
    %289 = vector.broadcast %cst_51 : f32 to vector<8x1xf32>
    %290 = arith.addf %286, %289 : vector<8x1xf32>
    %291 = math.rsqrt %290 : vector<8x1xf32>
    %292 = arith.mulf %288, %291 : vector<8x1xf32>
    %293 = vector.extract_strided_slice %7 {offsets = [2, 0, 0], sizes = [1, 8, 1], strides = [1, 1, 1]} : vector<3x8x1xf32> to vector<1x8x1xf32>
    %294 = vector.shape_cast %293 : vector<1x8x1xf32> to vector<8x1xf32>
    %295 = arith.mulf %273, %292 : vector<8x1xf32>
    %296 = arith.subf %294, %295 : vector<8x1xf32>
    %297 = vector.broadcast %292 : vector<8x1xf32> to vector<8x128xf32>
    %298 = arith.mulf %252, %297 : vector<8x128xf32>
    %299 = vector.broadcast %296 : vector<8x1xf32> to vector<8x128xf32>
    %300 = arith.addf %298, %299 : vector<8x128xf32>
    %cst_52 = arith.constant 0.000000e+00 : f32
    %301 = vector.broadcast %cst_52 : f32 to vector<8x128xf32>
    %302 = arith.maximumf %300, %301 : vector<8x128xf32>
    %303 = arith.mulf %302, %67 : vector<8x128xf32>
    %304 = vector.broadcast %292 : vector<8x1xf32> to vector<8x128xf32>
    %305 = arith.mulf %266, %304 : vector<8x128xf32>
    %306 = vector.broadcast %296 : vector<8x1xf32> to vector<8x128xf32>
    %307 = arith.addf %305, %306 : vector<8x128xf32>
    %cst_53 = arith.constant 0.000000e+00 : f32
    %308 = vector.broadcast %cst_53 : f32 to vector<8x128xf32>
    %309 = arith.maximumf %307, %308 : vector<8x128xf32>
    %310 = arith.mulf %309, %94 : vector<8x128xf32>
    %c0_54 = arith.constant 0 : index
    %c0_55 = arith.constant 0 : index
    %311 = vector.load %arg7[%c0_54, %c0_55] : memref<8x1xf32, #tpu.memory_space<vmem>>, vector<8x1xf32>
    %c0_56 = arith.constant 0 : index
    %c0_57 = arith.constant 0 : index
    %c0_58 = arith.constant 0 : index
    %312 = vector.load %arg8[%c0_56, %c0_57, %c0_58] : memref<3x128x384xf32, #tpu.memory_space<vmem>>, vector<1x128x384xf32>
    %313 = vector.shape_cast %312 : vector<1x128x384xf32> to vector<128x384xf32>
    %c1_59 = arith.constant 1 : index
    %c0_60 = arith.constant 0 : index
    %c0_61 = arith.constant 0 : index
    %314 = vector.load %arg8[%c1_59, %c0_60, %c0_61] : memref<3x128x384xf32, #tpu.memory_space<vmem>>, vector<1x128x384xf32>
    %315 = vector.shape_cast %314 : vector<1x128x384xf32> to vector<128x384xf32>
    %c2 = arith.constant 2 : index
    %c0_62 = arith.constant 0 : index
    %c0_63 = arith.constant 0 : index
    %316 = vector.load %arg8[%c2, %c0_62, %c0_63] : memref<3x128x384xf32, #tpu.memory_space<vmem>>, vector<1x128x384xf32>
    %317 = vector.shape_cast %316 : vector<1x128x384xf32> to vector<128x384xf32>
    %c0_64 = arith.constant 0 : index
    %c0_65 = arith.constant 0 : index
    %c0_66 = arith.constant 0 : index
    %318 = vector.load %arg6[%c0_64, %c0_65, %c0_66] : memref<3x8x8xf32, #tpu.memory_space<vmem>>, vector<1x8x8xf32>
    %319 = vector.shape_cast %318 : vector<1x8x8xf32> to vector<8x8xf32>
    %c1_67 = arith.constant 1 : index
    %c0_68 = arith.constant 0 : index
    %c0_69 = arith.constant 0 : index
    %320 = vector.load %arg6[%c1_67, %c0_68, %c0_69] : memref<3x8x8xf32, #tpu.memory_space<vmem>>, vector<1x8x8xf32>
    %321 = vector.shape_cast %320 : vector<1x8x8xf32> to vector<8x8xf32>
    %c2_70 = arith.constant 2 : index
    %c0_71 = arith.constant 0 : index
    %c0_72 = arith.constant 0 : index
    %322 = vector.load %arg6[%c2_70, %c0_71, %c0_72] : memref<3x8x8xf32, #tpu.memory_space<vmem>>, vector<1x8x8xf32>
    %323 = vector.shape_cast %322 : vector<1x8x8xf32> to vector<8x8xf32>
    %cst_73 = arith.constant dense<0.000000e+00> : vector<8x384xf32>
    %324 = tpu.matmul %159, %313, %cst_73 {dimension_numbers = #tpu.dot_dimension_numbers<[1], [0], [0], [1], [0, 0, 1, 1], [], []>} : vector<8x128xf32>, vector<128x384xf32>, vector<8x384xf32> -> vector<8x384xf32>
    %cst_74 = arith.constant dense<0.000000e+00> : vector<8x384xf32>
    %325 = tpu.matmul %231, %315, %cst_74 {dimension_numbers = #tpu.dot_dimension_numbers<[1], [0], [0], [1], [0, 0, 1, 1], [], []>} : vector<8x128xf32>, vector<128x384xf32>, vector<8x384xf32> -> vector<8x384xf32>
    %326 = arith.addf %324, %325 : vector<8x384xf32>
    %cst_75 = arith.constant dense<0.000000e+00> : vector<8x384xf32>
    %327 = tpu.matmul %303, %317, %cst_75 {dimension_numbers = #tpu.dot_dimension_numbers<[1], [0], [0], [1], [0, 0, 1, 1], [], []>} : vector<8x128xf32>, vector<128x384xf32>, vector<8x384xf32> -> vector<8x384xf32>
    %328 = arith.addf %326, %327 : vector<8x384xf32>
    %329 = vector.extract_strided_slice %328 {offsets = [0, 0], sizes = [8, 64], strides = [1, 1]} : vector<8x384xf32> to vector<8x64xf32>
    %cst_76 = arith.constant dense<0.000000e+00> : vector<8x64xf32>
    %330 = tpu.matmul %319, %329, %cst_76 {dimension_numbers = #tpu.dot_dimension_numbers<[1], [0], [0], [1], [0, 0, 1, 1], [], []>} : vector<8x8xf32>, vector<8x64xf32>, vector<8x64xf32> -> vector<8x64xf32>
    %331 = vector.broadcast %311 : vector<8x1xf32> to vector<8x64xf32>
    %332 = arith.addf %331, %330 : vector<8x64xf32>
    %333 = vector.extract_strided_slice %328 {offsets = [0, 128], sizes = [8, 64], strides = [1, 1]} : vector<8x384xf32> to vector<8x64xf32>
    %cst_77 = arith.constant dense<0.000000e+00> : vector<8x64xf32>
    %334 = tpu.matmul %321, %333, %cst_77 {dimension_numbers = #tpu.dot_dimension_numbers<[1], [0], [0], [1], [0, 0, 1, 1], [], []>} : vector<8x8xf32>, vector<8x64xf32>, vector<8x64xf32> -> vector<8x64xf32>
    %335 = arith.addf %332, %334 : vector<8x64xf32>
    %336 = vector.extract_strided_slice %328 {offsets = [0, 256], sizes = [8, 64], strides = [1, 1]} : vector<8x384xf32> to vector<8x64xf32>
    %cst_78 = arith.constant dense<0.000000e+00> : vector<8x64xf32>
    %337 = tpu.matmul %323, %336, %cst_78 {dimension_numbers = #tpu.dot_dimension_numbers<[1], [0], [0], [1], [0, 0, 1, 1], [], []>} : vector<8x8xf32>, vector<8x64xf32>, vector<8x64xf32> -> vector<8x64xf32>
    %338 = arith.addf %335, %337 : vector<8x64xf32>
    %339 = vector.extract_strided_slice %328 {offsets = [0, 64], sizes = [8, 64], strides = [1, 1]} : vector<8x384xf32> to vector<8x64xf32>
    %cst_79 = arith.constant dense<0.000000e+00> : vector<8x64xf32>
    %340 = tpu.matmul %319, %339, %cst_79 {dimension_numbers = #tpu.dot_dimension_numbers<[1], [0], [0], [1], [0, 0, 1, 1], [], []>} : vector<8x8xf32>, vector<8x64xf32>, vector<8x64xf32> -> vector<8x64xf32>
    %341 = vector.broadcast %311 : vector<8x1xf32> to vector<8x64xf32>
    %342 = arith.addf %341, %340 : vector<8x64xf32>
    %343 = vector.extract_strided_slice %328 {offsets = [0, 192], sizes = [8, 64], strides = [1, 1]} : vector<8x384xf32> to vector<8x64xf32>
    %cst_80 = arith.constant dense<0.000000e+00> : vector<8x64xf32>
    %344 = tpu.matmul %321, %343, %cst_80 {dimension_numbers = #tpu.dot_dimension_numbers<[1], [0], [0], [1], [0, 0, 1, 1], [], []>} : vector<8x8xf32>, vector<8x64xf32>, vector<8x64xf32> -> vector<8x64xf32>
    %345 = arith.addf %342, %344 : vector<8x64xf32>
    %346 = vector.extract_strided_slice %328 {offsets = [0, 320], sizes = [8, 64], strides = [1, 1]} : vector<8x384xf32> to vector<8x64xf32>
    %cst_81 = arith.constant dense<0.000000e+00> : vector<8x64xf32>
    %347 = tpu.matmul %323, %346, %cst_81 {dimension_numbers = #tpu.dot_dimension_numbers<[1], [0], [0], [1], [0, 0, 1, 1], [], []>} : vector<8x8xf32>, vector<8x64xf32>, vector<8x64xf32> -> vector<8x64xf32>
    %348 = arith.addf %345, %347 : vector<8x64xf32>
    %349 = arith.maximumf %338, %348 : vector<8x64xf32>
    %cst_82 = arith.constant dense<0.000000e+00> : vector<8x384xf32>
    %350 = tpu.matmul %166, %313, %cst_82 {dimension_numbers = #tpu.dot_dimension_numbers<[1], [0], [0], [1], [0, 0, 1, 1], [], []>} : vector<8x128xf32>, vector<128x384xf32>, vector<8x384xf32> -> vector<8x384xf32>
    %cst_83 = arith.constant dense<0.000000e+00> : vector<8x384xf32>
    %351 = tpu.matmul %238, %315, %cst_83 {dimension_numbers = #tpu.dot_dimension_numbers<[1], [0], [0], [1], [0, 0, 1, 1], [], []>} : vector<8x128xf32>, vector<128x384xf32>, vector<8x384xf32> -> vector<8x384xf32>
    %352 = arith.addf %350, %351 : vector<8x384xf32>
    %cst_84 = arith.constant dense<0.000000e+00> : vector<8x384xf32>
    %353 = tpu.matmul %310, %317, %cst_84 {dimension_numbers = #tpu.dot_dimension_numbers<[1], [0], [0], [1], [0, 0, 1, 1], [], []>} : vector<8x128xf32>, vector<128x384xf32>, vector<8x384xf32> -> vector<8x384xf32>
    %354 = arith.addf %352, %353 : vector<8x384xf32>
    %355 = vector.extract_strided_slice %354 {offsets = [0, 0], sizes = [8, 64], strides = [1, 1]} : vector<8x384xf32> to vector<8x64xf32>
    %cst_85 = arith.constant dense<0.000000e+00> : vector<8x64xf32>
    %356 = tpu.matmul %319, %355, %cst_85 {dimension_numbers = #tpu.dot_dimension_numbers<[1], [0], [0], [1], [0, 0, 1, 1], [], []>} : vector<8x8xf32>, vector<8x64xf32>, vector<8x64xf32> -> vector<8x64xf32>
    %357 = vector.broadcast %311 : vector<8x1xf32> to vector<8x64xf32>
    %358 = arith.addf %357, %356 : vector<8x64xf32>
    %359 = vector.extract_strided_slice %354 {offsets = [0, 128], sizes = [8, 64], strides = [1, 1]} : vector<8x384xf32> to vector<8x64xf32>
    %cst_86 = arith.constant dense<0.000000e+00> : vector<8x64xf32>
    %360 = tpu.matmul %321, %359, %cst_86 {dimension_numbers = #tpu.dot_dimension_numbers<[1], [0], [0], [1], [0, 0, 1, 1], [], []>} : vector<8x8xf32>, vector<8x64xf32>, vector<8x64xf32> -> vector<8x64xf32>
    %361 = arith.addf %358, %360 : vector<8x64xf32>
    %362 = vector.extract_strided_slice %354 {offsets = [0, 256], sizes = [8, 64], strides = [1, 1]} : vector<8x384xf32> to vector<8x64xf32>
    %cst_87 = arith.constant dense<0.000000e+00> : vector<8x64xf32>
    %363 = tpu.matmul %323, %362, %cst_87 {dimension_numbers = #tpu.dot_dimension_numbers<[1], [0], [0], [1], [0, 0, 1, 1], [], []>} : vector<8x8xf32>, vector<8x64xf32>, vector<8x64xf32> -> vector<8x64xf32>
    %364 = arith.addf %361, %363 : vector<8x64xf32>
    %365 = vector.extract_strided_slice %354 {offsets = [0, 64], sizes = [8, 64], strides = [1, 1]} : vector<8x384xf32> to vector<8x64xf32>
    %cst_88 = arith.constant dense<0.000000e+00> : vector<8x64xf32>
    %366 = tpu.matmul %319, %365, %cst_88 {dimension_numbers = #tpu.dot_dimension_numbers<[1], [0], [0], [1], [0, 0, 1, 1], [], []>} : vector<8x8xf32>, vector<8x64xf32>, vector<8x64xf32> -> vector<8x64xf32>
    %367 = vector.broadcast %311 : vector<8x1xf32> to vector<8x64xf32>
    %368 = arith.addf %367, %366 : vector<8x64xf32>
    %369 = vector.extract_strided_slice %354 {offsets = [0, 192], sizes = [8, 64], strides = [1, 1]} : vector<8x384xf32> to vector<8x64xf32>
    %cst_89 = arith.constant dense<0.000000e+00> : vector<8x64xf32>
    %370 = tpu.matmul %321, %369, %cst_89 {dimension_numbers = #tpu.dot_dimension_numbers<[1], [0], [0], [1], [0, 0, 1, 1], [], []>} : vector<8x8xf32>, vector<8x64xf32>, vector<8x64xf32> -> vector<8x64xf32>
    %371 = arith.addf %368, %370 : vector<8x64xf32>
    %372 = vector.extract_strided_slice %354 {offsets = [0, 320], sizes = [8, 64], strides = [1, 1]} : vector<8x384xf32> to vector<8x64xf32>
    %cst_90 = arith.constant dense<0.000000e+00> : vector<8x64xf32>
    %373 = tpu.matmul %323, %372, %cst_90 {dimension_numbers = #tpu.dot_dimension_numbers<[1], [0], [0], [1], [0, 0, 1, 1], [], []>} : vector<8x8xf32>, vector<8x64xf32>, vector<8x64xf32> -> vector<8x64xf32>
    %374 = arith.addf %371, %373 : vector<8x64xf32>
    %375 = arith.maximumf %364, %374 : vector<8x64xf32>
    %c0_91 = arith.constant 0 : index
    %c0_92 = arith.constant 0 : index
    %c0_93 = arith.constant 0 : index
    %376 = vector.load %arg9[%c0_91, %c0_92, %c0_93] : memref<3x8x1xf32, #tpu.memory_space<vmem>>, vector<3x8x1xf32>
    %c0_94 = arith.constant 0 : index
    %c0_95 = arith.constant 0 : index
    %c0_96 = arith.constant 0 : index
    %c0_97 = arith.constant 0 : index
    %377 = vector.load %arg10[%c0_94, %c0_95, %c0_96, %c0_97] : memref<3x3x8x1xf32, #tpu.memory_space<vmem>>, vector<3x3x8x1xf32>
    %c0_98 = arith.constant 0 : index
    %c0_99 = arith.constant 0 : index
    %c0_100 = arith.constant 0 : index
    %378 = vector.load %arg11[%c0_98, %c0_99, %c0_100] : memref<3x8x1xf32, #tpu.memory_space<vmem>>, vector<3x8x1xf32>
    %c0_101 = arith.constant 0 : index
    %c0_102 = arith.constant 0 : index
    %c0_103 = arith.constant 0 : index
    %379 = vector.load %arg12[%c0_101, %c0_102, %c0_103] : memref<3x8x1xf32, #tpu.memory_space<vmem>>, vector<3x8x1xf32>
    %380 = tpu.iota {dimensions = array<i32: 1>} : vector<1x64xi32>
    %c0_i32_104 = arith.constant 0 : i32
    %381 = vector.broadcast %c0_i32_104 : i32 to vector<1x64xi32>
    %382 = arith.cmpi eq, %380, %381 : vector<1x64xi32>
    %c63_i32 = arith.constant 63 : i32
    %383 = vector.broadcast %c63_i32 : i32 to vector<1x64xi32>
    %384 = arith.cmpi eq, %380, %383 : vector<1x64xi32>
    %c1_i32_105 = arith.constant 1 : i32
    %385 = tpu.dynamic_rotate %349 by %c1_i32_105 dim 1 : vector<8x64xf32>, i32 -> vector<8x64xf32>
    %cst_106 = arith.constant 0.000000e+00 : f32
    %386 = vector.shape_cast %382 : vector<1x64xi1> to vector<1x64xi1>
    %387 = vector.broadcast %386 : vector<1x64xi1> to vector<8x64xi1>
    %388 = vector.broadcast %cst_106 : f32 to vector<8x64xf32>
    %389 = arith.select %387, %388, %385 : vector<8x64xi1>, vector<8x64xf32>
    %c63_i32_107 = arith.constant 63 : i32
    %390 = tpu.dynamic_rotate %349 by %c63_i32_107 dim 1 : vector<8x64xf32>, i32 -> vector<8x64xf32>
    %cst_108 = arith.constant 0.000000e+00 : f32
    %391 = vector.shape_cast %384 : vector<1x64xi1> to vector<1x64xi1>
    %392 = vector.broadcast %391 : vector<1x64xi1> to vector<8x64xi1>
    %393 = vector.broadcast %cst_108 : f32 to vector<8x64xf32>
    %394 = arith.select %392, %393, %390 : vector<8x64xi1>, vector<8x64xf32>
    %395 = arith.addf %389, %349 : vector<8x64xf32>
    %396 = arith.addf %395, %394 : vector<8x64xf32>
    %cst_109 = arith.constant 0.333333343 : f32
    %397 = vector.broadcast %cst_109 : f32 to vector<8x64xf32>
    %398 = arith.mulf %396, %397 : vector<8x64xf32>
    %c1_i32_110 = arith.constant 1 : i32
    %399 = tpu.dynamic_rotate %375 by %c1_i32_110 dim 1 : vector<8x64xf32>, i32 -> vector<8x64xf32>
    %cst_111 = arith.constant 0.000000e+00 : f32
    %400 = vector.shape_cast %382 : vector<1x64xi1> to vector<1x64xi1>
    %401 = vector.broadcast %400 : vector<1x64xi1> to vector<8x64xi1>
    %402 = vector.broadcast %cst_111 : f32 to vector<8x64xf32>
    %403 = arith.select %401, %402, %399 : vector<8x64xi1>, vector<8x64xf32>
    %c63_i32_112 = arith.constant 63 : i32
    %404 = tpu.dynamic_rotate %375 by %c63_i32_112 dim 1 : vector<8x64xf32>, i32 -> vector<8x64xf32>
    %cst_113 = arith.constant 0.000000e+00 : f32
    %405 = vector.shape_cast %384 : vector<1x64xi1> to vector<1x64xi1>
    %406 = vector.broadcast %405 : vector<1x64xi1> to vector<8x64xi1>
    %407 = vector.broadcast %cst_113 : f32 to vector<8x64xf32>
    %408 = arith.select %406, %407, %404 : vector<8x64xi1>, vector<8x64xf32>
    %409 = arith.addf %403, %375 : vector<8x64xf32>
    %410 = arith.addf %409, %408 : vector<8x64xf32>
    %cst_114 = arith.constant 0.333333343 : f32
    %411 = vector.broadcast %cst_114 : f32 to vector<8x64xf32>
    %412 = arith.mulf %410, %411 : vector<8x64xf32>
    %413 = vector.extract_strided_slice %376 {offsets = [0, 0, 0], sizes = [1, 8, 1], strides = [1, 1, 1]} : vector<3x8x1xf32> to vector<1x8x1xf32>
    %414 = vector.shape_cast %413 : vector<1x8x1xf32> to vector<8x1xf32>
    %415 = vector.broadcast %414 : vector<8x1xf32> to vector<8x64xf32>
    %416 = arith.mulf %398, %415 : vector<8x64xf32>
    %417 = vector.extract_strided_slice %376 {offsets = [1, 0, 0], sizes = [1, 8, 1], strides = [1, 1, 1]} : vector<3x8x1xf32> to vector<1x8x1xf32>
    %418 = vector.shape_cast %417 : vector<1x8x1xf32> to vector<8x1xf32>
    %419 = vector.broadcast %418 : vector<8x1xf32> to vector<8x64xf32>
    %420 = arith.mulf %398, %419 : vector<8x64xf32>
    %421 = vector.extract_strided_slice %376 {offsets = [2, 0, 0], sizes = [1, 8, 1], strides = [1, 1, 1]} : vector<3x8x1xf32> to vector<1x8x1xf32>
    %422 = vector.shape_cast %421 : vector<1x8x1xf32> to vector<8x1xf32>
    %423 = vector.broadcast %422 : vector<8x1xf32> to vector<8x64xf32>
    %424 = arith.mulf %398, %423 : vector<8x64xf32>
    %425 = arith.maximumf %416, %420 : vector<8x64xf32>
    %426 = arith.maximumf %425, %424 : vector<8x64xf32>
    %427 = arith.subf %416, %426 : vector<8x64xf32>
    %428 = math.exp %427 : vector<8x64xf32>
    %429 = arith.subf %420, %426 : vector<8x64xf32>
    %430 = math.exp %429 : vector<8x64xf32>
    %431 = arith.subf %424, %426 : vector<8x64xf32>
    %432 = math.exp %431 : vector<8x64xf32>
    %433 = arith.addf %428, %430 : vector<8x64xf32>
    %434 = arith.addf %433, %432 : vector<8x64xf32>
    %cst_115 = arith.constant 1.000000e+00 : f32
    %435 = vector.broadcast %cst_115 : f32 to vector<8x64xf32>
    %436 = arith.divf %435, %434 : vector<8x64xf32>
    %437 = arith.mulf %428, %436 : vector<8x64xf32>
    %438 = arith.mulf %430, %436 : vector<8x64xf32>
    %439 = arith.mulf %432, %436 : vector<8x64xf32>
    %440 = vector.extract_strided_slice %376 {offsets = [0, 0, 0], sizes = [1, 8, 1], strides = [1, 1, 1]} : vector<3x8x1xf32> to vector<1x8x1xf32>
    %441 = vector.shape_cast %440 : vector<1x8x1xf32> to vector<8x1xf32>
    %442 = vector.broadcast %441 : vector<8x1xf32> to vector<8x64xf32>
    %443 = arith.mulf %412, %442 : vector<8x64xf32>
    %444 = vector.extract_strided_slice %376 {offsets = [1, 0, 0], sizes = [1, 8, 1], strides = [1, 1, 1]} : vector<3x8x1xf32> to vector<1x8x1xf32>
    %445 = vector.shape_cast %444 : vector<1x8x1xf32> to vector<8x1xf32>
    %446 = vector.broadcast %445 : vector<8x1xf32> to vector<8x64xf32>
    %447 = arith.mulf %412, %446 : vector<8x64xf32>
    %448 = vector.extract_strided_slice %376 {offsets = [2, 0, 0], sizes = [1, 8, 1], strides = [1, 1, 1]} : vector<3x8x1xf32> to vector<1x8x1xf32>
    %449 = vector.shape_cast %448 : vector<1x8x1xf32> to vector<8x1xf32>
    %450 = vector.broadcast %449 : vector<8x1xf32> to vector<8x64xf32>
    %451 = arith.mulf %412, %450 : vector<8x64xf32>
    %452 = arith.maximumf %443, %447 : vector<8x64xf32>
    %453 = arith.maximumf %452, %451 : vector<8x64xf32>
    %454 = arith.subf %443, %453 : vector<8x64xf32>
    %455 = math.exp %454 : vector<8x64xf32>
    %456 = arith.subf %447, %453 : vector<8x64xf32>
    %457 = math.exp %456 : vector<8x64xf32>
    %458 = arith.subf %451, %453 : vector<8x64xf32>
    %459 = math.exp %458 : vector<8x64xf32>
    %460 = arith.addf %455, %457 : vector<8x64xf32>
    %461 = arith.addf %460, %459 : vector<8x64xf32>
    %cst_116 = arith.constant 1.000000e+00 : f32
    %462 = vector.broadcast %cst_116 : f32 to vector<8x64xf32>
    %463 = arith.divf %462, %461 : vector<8x64xf32>
    %464 = arith.mulf %455, %463 : vector<8x64xf32>
    %465 = arith.mulf %457, %463 : vector<8x64xf32>
    %466 = arith.mulf %459, %463 : vector<8x64xf32>
    %467 = vector.extract_strided_slice %377 {offsets = [0, 0, 0, 0], sizes = [1, 1, 8, 1], strides = [1, 1, 1, 1]} : vector<3x3x8x1xf32> to vector<1x1x8x1xf32>
    %468 = vector.shape_cast %467 : vector<1x1x8x1xf32> to vector<8x1xf32>
    %469 = vector.broadcast %468 : vector<8x1xf32> to vector<8x64xf32>
    %470 = arith.mulf %389, %469 : vector<8x64xf32>
    %471 = vector.extract_strided_slice %377 {offsets = [0, 1, 0, 0], sizes = [1, 1, 8, 1], strides = [1, 1, 1, 1]} : vector<3x3x8x1xf32> to vector<1x1x8x1xf32>
    %472 = vector.shape_cast %471 : vector<1x1x8x1xf32> to vector<8x1xf32>
    %473 = vector.broadcast %472 : vector<8x1xf32> to vector<8x64xf32>
    %474 = arith.mulf %349, %473 : vector<8x64xf32>
    %475 = arith.addf %470, %474 : vector<8x64xf32>
    %476 = vector.extract_strided_slice %377 {offsets = [0, 2, 0, 0], sizes = [1, 1, 8, 1], strides = [1, 1, 1, 1]} : vector<3x3x8x1xf32> to vector<1x1x8x1xf32>
    %477 = vector.shape_cast %476 : vector<1x1x8x1xf32> to vector<8x1xf32>
    %478 = vector.broadcast %477 : vector<8x1xf32> to vector<8x64xf32>
    %479 = arith.mulf %394, %478 : vector<8x64xf32>
    %480 = arith.addf %475, %479 : vector<8x64xf32>
    %481 = vector.extract_strided_slice %377 {offsets = [0, 0, 0, 0], sizes = [1, 1, 8, 1], strides = [1, 1, 1, 1]} : vector<3x3x8x1xf32> to vector<1x1x8x1xf32>
    %482 = vector.shape_cast %481 : vector<1x1x8x1xf32> to vector<8x1xf32>
    %483 = vector.broadcast %482 : vector<8x1xf32> to vector<8x64xf32>
    %484 = arith.mulf %403, %483 : vector<8x64xf32>
    %485 = vector.extract_strided_slice %377 {offsets = [0, 1, 0, 0], sizes = [1, 1, 8, 1], strides = [1, 1, 1, 1]} : vector<3x3x8x1xf32> to vector<1x1x8x1xf32>
    %486 = vector.shape_cast %485 : vector<1x1x8x1xf32> to vector<8x1xf32>
    %487 = vector.broadcast %486 : vector<8x1xf32> to vector<8x64xf32>
    %488 = arith.mulf %375, %487 : vector<8x64xf32>
    %489 = arith.addf %484, %488 : vector<8x64xf32>
    %490 = vector.extract_strided_slice %377 {offsets = [0, 2, 0, 0], sizes = [1, 1, 8, 1], strides = [1, 1, 1, 1]} : vector<3x3x8x1xf32> to vector<1x1x8x1xf32>
    %491 = vector.shape_cast %490 : vector<1x1x8x1xf32> to vector<8x1xf32>
    %492 = vector.broadcast %491 : vector<8x1xf32> to vector<8x64xf32>
    %493 = arith.mulf %408, %492 : vector<8x64xf32>
    %494 = arith.addf %489, %493 : vector<8x64xf32>
    %cst_117 = arith.constant dense<0.000000e+00> : vector<8xf32>
    %495 = vector.multi_reduction <add>, %480, %cst_117 [1] : vector<8x64xf32> to vector<8xf32>
    %496 = vector.shape_cast %495 : vector<8xf32> to vector<8x1xf32>
    %cst_118 = arith.constant dense<0.000000e+00> : vector<8xf32>
    %497 = vector.multi_reduction <add>, %494, %cst_118 [1] : vector<8x64xf32> to vector<8xf32>
    %498 = vector.shape_cast %497 : vector<8xf32> to vector<8x1xf32>
    %499 = arith.addf %496, %498 : vector<8x1xf32>
    %cst_119 = arith.constant 7.812500e-03 : f32
    %500 = vector.broadcast %cst_119 : f32 to vector<8x1xf32>
    %501 = arith.mulf %499, %500 : vector<8x1xf32>
    %502 = vector.broadcast %501 : vector<8x1xf32> to vector<8x64xf32>
    %503 = arith.subf %480, %502 : vector<8x64xf32>
    %504 = arith.mulf %503, %503 : vector<8x64xf32>
    %cst_120 = arith.constant dense<0.000000e+00> : vector<8xf32>
    %505 = vector.multi_reduction <add>, %504, %cst_120 [1] : vector<8x64xf32> to vector<8xf32>
    %506 = vector.shape_cast %505 : vector<8xf32> to vector<8x1xf32>
    %507 = vector.broadcast %501 : vector<8x1xf32> to vector<8x64xf32>
    %508 = arith.subf %494, %507 : vector<8x64xf32>
    %509 = arith.mulf %508, %508 : vector<8x64xf32>
    %cst_121 = arith.constant dense<0.000000e+00> : vector<8xf32>
    %510 = vector.multi_reduction <add>, %509, %cst_121 [1] : vector<8x64xf32> to vector<8xf32>
    %511 = vector.shape_cast %510 : vector<8xf32> to vector<8x1xf32>
    %512 = arith.addf %506, %511 : vector<8x1xf32>
    %cst_122 = arith.constant 7.812500e-03 : f32
    %513 = vector.broadcast %cst_122 : f32 to vector<8x1xf32>
    %514 = arith.mulf %512, %513 : vector<8x1xf32>
    %515 = vector.extract_strided_slice %378 {offsets = [0, 0, 0], sizes = [1, 8, 1], strides = [1, 1, 1]} : vector<3x8x1xf32> to vector<1x8x1xf32>
    %516 = vector.shape_cast %515 : vector<1x8x1xf32> to vector<8x1xf32>
    %cst_123 = arith.constant 9.99999974E-6 : f32
    %517 = vector.broadcast %cst_123 : f32 to vector<8x1xf32>
    %518 = arith.addf %514, %517 : vector<8x1xf32>
    %519 = math.rsqrt %518 : vector<8x1xf32>
    %520 = arith.mulf %516, %519 : vector<8x1xf32>
    %521 = vector.extract_strided_slice %379 {offsets = [0, 0, 0], sizes = [1, 8, 1], strides = [1, 1, 1]} : vector<3x8x1xf32> to vector<1x8x1xf32>
    %522 = vector.shape_cast %521 : vector<1x8x1xf32> to vector<8x1xf32>
    %523 = arith.mulf %501, %520 : vector<8x1xf32>
    %524 = arith.subf %522, %523 : vector<8x1xf32>
    %525 = vector.broadcast %520 : vector<8x1xf32> to vector<8x64xf32>
    %526 = arith.mulf %480, %525 : vector<8x64xf32>
    %527 = vector.broadcast %524 : vector<8x1xf32> to vector<8x64xf32>
    %528 = arith.addf %526, %527 : vector<8x64xf32>
    %cst_124 = arith.constant 0.000000e+00 : f32
    %529 = vector.broadcast %cst_124 : f32 to vector<8x64xf32>
    %530 = arith.maximumf %528, %529 : vector<8x64xf32>
    %531 = arith.mulf %530, %437 : vector<8x64xf32>
    %532 = vector.broadcast %520 : vector<8x1xf32> to vector<8x64xf32>
    %533 = arith.mulf %494, %532 : vector<8x64xf32>
    %534 = vector.broadcast %524 : vector<8x1xf32> to vector<8x64xf32>
    %535 = arith.addf %533, %534 : vector<8x64xf32>
    %cst_125 = arith.constant 0.000000e+00 : f32
    %536 = vector.broadcast %cst_125 : f32 to vector<8x64xf32>
    %537 = arith.maximumf %535, %536 : vector<8x64xf32>
    %538 = arith.mulf %537, %464 : vector<8x64xf32>
    %539 = vector.extract_strided_slice %377 {offsets = [1, 0, 0, 0], sizes = [1, 1, 8, 1], strides = [1, 1, 1, 1]} : vector<3x3x8x1xf32> to vector<1x1x8x1xf32>
    %540 = vector.shape_cast %539 : vector<1x1x8x1xf32> to vector<8x1xf32>
    %541 = vector.broadcast %540 : vector<8x1xf32> to vector<8x64xf32>
    %542 = arith.mulf %389, %541 : vector<8x64xf32>
    %543 = vector.extract_strided_slice %377 {offsets = [1, 1, 0, 0], sizes = [1, 1, 8, 1], strides = [1, 1, 1, 1]} : vector<3x3x8x1xf32> to vector<1x1x8x1xf32>
    %544 = vector.shape_cast %543 : vector<1x1x8x1xf32> to vector<8x1xf32>
    %545 = vector.broadcast %544 : vector<8x1xf32> to vector<8x64xf32>
    %546 = arith.mulf %349, %545 : vector<8x64xf32>
    %547 = arith.addf %542, %546 : vector<8x64xf32>
    %548 = vector.extract_strided_slice %377 {offsets = [1, 2, 0, 0], sizes = [1, 1, 8, 1], strides = [1, 1, 1, 1]} : vector<3x3x8x1xf32> to vector<1x1x8x1xf32>
    %549 = vector.shape_cast %548 : vector<1x1x8x1xf32> to vector<8x1xf32>
    %550 = vector.broadcast %549 : vector<8x1xf32> to vector<8x64xf32>
    %551 = arith.mulf %394, %550 : vector<8x64xf32>
    %552 = arith.addf %547, %551 : vector<8x64xf32>
    %553 = vector.extract_strided_slice %377 {offsets = [1, 0, 0, 0], sizes = [1, 1, 8, 1], strides = [1, 1, 1, 1]} : vector<3x3x8x1xf32> to vector<1x1x8x1xf32>
    %554 = vector.shape_cast %553 : vector<1x1x8x1xf32> to vector<8x1xf32>
    %555 = vector.broadcast %554 : vector<8x1xf32> to vector<8x64xf32>
    %556 = arith.mulf %403, %555 : vector<8x64xf32>
    %557 = vector.extract_strided_slice %377 {offsets = [1, 1, 0, 0], sizes = [1, 1, 8, 1], strides = [1, 1, 1, 1]} : vector<3x3x8x1xf32> to vector<1x1x8x1xf32>
    %558 = vector.shape_cast %557 : vector<1x1x8x1xf32> to vector<8x1xf32>
    %559 = vector.broadcast %558 : vector<8x1xf32> to vector<8x64xf32>
    %560 = arith.mulf %375, %559 : vector<8x64xf32>
    %561 = arith.addf %556, %560 : vector<8x64xf32>
    %562 = vector.extract_strided_slice %377 {offsets = [1, 2, 0, 0], sizes = [1, 1, 8, 1], strides = [1, 1, 1, 1]} : vector<3x3x8x1xf32> to vector<1x1x8x1xf32>
    %563 = vector.shape_cast %562 : vector<1x1x8x1xf32> to vector<8x1xf32>
    %564 = vector.broadcast %563 : vector<8x1xf32> to vector<8x64xf32>
    %565 = arith.mulf %408, %564 : vector<8x64xf32>
    %566 = arith.addf %561, %565 : vector<8x64xf32>
    %cst_126 = arith.constant dense<0.000000e+00> : vector<8xf32>
    %567 = vector.multi_reduction <add>, %552, %cst_126 [1] : vector<8x64xf32> to vector<8xf32>
    %568 = vector.shape_cast %567 : vector<8xf32> to vector<8x1xf32>
    %cst_127 = arith.constant dense<0.000000e+00> : vector<8xf32>
    %569 = vector.multi_reduction <add>, %566, %cst_127 [1] : vector<8x64xf32> to vector<8xf32>
    %570 = vector.shape_cast %569 : vector<8xf32> to vector<8x1xf32>
    %571 = arith.addf %568, %570 : vector<8x1xf32>
    %cst_128 = arith.constant 7.812500e-03 : f32
    %572 = vector.broadcast %cst_128 : f32 to vector<8x1xf32>
    %573 = arith.mulf %571, %572 : vector<8x1xf32>
    %574 = vector.broadcast %573 : vector<8x1xf32> to vector<8x64xf32>
    %575 = arith.subf %552, %574 : vector<8x64xf32>
    %576 = arith.mulf %575, %575 : vector<8x64xf32>
    %cst_129 = arith.constant dense<0.000000e+00> : vector<8xf32>
    %577 = vector.multi_reduction <add>, %576, %cst_129 [1] : vector<8x64xf32> to vector<8xf32>
    %578 = vector.shape_cast %577 : vector<8xf32> to vector<8x1xf32>
    %579 = vector.broadcast %573 : vector<8x1xf32> to vector<8x64xf32>
    %580 = arith.subf %566, %579 : vector<8x64xf32>
    %581 = arith.mulf %580, %580 : vector<8x64xf32>
    %cst_130 = arith.constant dense<0.000000e+00> : vector<8xf32>
    %582 = vector.multi_reduction <add>, %581, %cst_130 [1] : vector<8x64xf32> to vector<8xf32>
    %583 = vector.shape_cast %582 : vector<8xf32> to vector<8x1xf32>
    %584 = arith.addf %578, %583 : vector<8x1xf32>
    %cst_131 = arith.constant 7.812500e-03 : f32
    %585 = vector.broadcast %cst_131 : f32 to vector<8x1xf32>
    %586 = arith.mulf %584, %585 : vector<8x1xf32>
    %587 = vector.extract_strided_slice %378 {offsets = [1, 0, 0], sizes = [1, 8, 1], strides = [1, 1, 1]} : vector<3x8x1xf32> to vector<1x8x1xf32>
    %588 = vector.shape_cast %587 : vector<1x8x1xf32> to vector<8x1xf32>
    %cst_132 = arith.constant 9.99999974E-6 : f32
    %589 = vector.broadcast %cst_132 : f32 to vector<8x1xf32>
    %590 = arith.addf %586, %589 : vector<8x1xf32>
    %591 = math.rsqrt %590 : vector<8x1xf32>
    %592 = arith.mulf %588, %591 : vector<8x1xf32>
    %593 = vector.extract_strided_slice %379 {offsets = [1, 0, 0], sizes = [1, 8, 1], strides = [1, 1, 1]} : vector<3x8x1xf32> to vector<1x8x1xf32>
    %594 = vector.shape_cast %593 : vector<1x8x1xf32> to vector<8x1xf32>
    %595 = arith.mulf %573, %592 : vector<8x1xf32>
    %596 = arith.subf %594, %595 : vector<8x1xf32>
    %597 = vector.broadcast %592 : vector<8x1xf32> to vector<8x64xf32>
    %598 = arith.mulf %552, %597 : vector<8x64xf32>
    %599 = vector.broadcast %596 : vector<8x1xf32> to vector<8x64xf32>
    %600 = arith.addf %598, %599 : vector<8x64xf32>
    %cst_133 = arith.constant 0.000000e+00 : f32
    %601 = vector.broadcast %cst_133 : f32 to vector<8x64xf32>
    %602 = arith.maximumf %600, %601 : vector<8x64xf32>
    %603 = arith.mulf %602, %438 : vector<8x64xf32>
    %604 = vector.broadcast %592 : vector<8x1xf32> to vector<8x64xf32>
    %605 = arith.mulf %566, %604 : vector<8x64xf32>
    %606 = vector.broadcast %596 : vector<8x1xf32> to vector<8x64xf32>
    %607 = arith.addf %605, %606 : vector<8x64xf32>
    %cst_134 = arith.constant 0.000000e+00 : f32
    %608 = vector.broadcast %cst_134 : f32 to vector<8x64xf32>
    %609 = arith.maximumf %607, %608 : vector<8x64xf32>
    %610 = arith.mulf %609, %465 : vector<8x64xf32>
    %611 = vector.extract_strided_slice %377 {offsets = [2, 0, 0, 0], sizes = [1, 1, 8, 1], strides = [1, 1, 1, 1]} : vector<3x3x8x1xf32> to vector<1x1x8x1xf32>
    %612 = vector.shape_cast %611 : vector<1x1x8x1xf32> to vector<8x1xf32>
    %613 = vector.broadcast %612 : vector<8x1xf32> to vector<8x64xf32>
    %614 = arith.mulf %389, %613 : vector<8x64xf32>
    %615 = vector.extract_strided_slice %377 {offsets = [2, 1, 0, 0], sizes = [1, 1, 8, 1], strides = [1, 1, 1, 1]} : vector<3x3x8x1xf32> to vector<1x1x8x1xf32>
    %616 = vector.shape_cast %615 : vector<1x1x8x1xf32> to vector<8x1xf32>
    %617 = vector.broadcast %616 : vector<8x1xf32> to vector<8x64xf32>
    %618 = arith.mulf %349, %617 : vector<8x64xf32>
    %619 = arith.addf %614, %618 : vector<8x64xf32>
    %620 = vector.extract_strided_slice %377 {offsets = [2, 2, 0, 0], sizes = [1, 1, 8, 1], strides = [1, 1, 1, 1]} : vector<3x3x8x1xf32> to vector<1x1x8x1xf32>
    %621 = vector.shape_cast %620 : vector<1x1x8x1xf32> to vector<8x1xf32>
    %622 = vector.broadcast %621 : vector<8x1xf32> to vector<8x64xf32>
    %623 = arith.mulf %394, %622 : vector<8x64xf32>
    %624 = arith.addf %619, %623 : vector<8x64xf32>
    %625 = vector.extract_strided_slice %377 {offsets = [2, 0, 0, 0], sizes = [1, 1, 8, 1], strides = [1, 1, 1, 1]} : vector<3x3x8x1xf32> to vector<1x1x8x1xf32>
    %626 = vector.shape_cast %625 : vector<1x1x8x1xf32> to vector<8x1xf32>
    %627 = vector.broadcast %626 : vector<8x1xf32> to vector<8x64xf32>
    %628 = arith.mulf %403, %627 : vector<8x64xf32>
    %629 = vector.extract_strided_slice %377 {offsets = [2, 1, 0, 0], sizes = [1, 1, 8, 1], strides = [1, 1, 1, 1]} : vector<3x3x8x1xf32> to vector<1x1x8x1xf32>
    %630 = vector.shape_cast %629 : vector<1x1x8x1xf32> to vector<8x1xf32>
    %631 = vector.broadcast %630 : vector<8x1xf32> to vector<8x64xf32>
    %632 = arith.mulf %375, %631 : vector<8x64xf32>
    %633 = arith.addf %628, %632 : vector<8x64xf32>
    %634 = vector.extract_strided_slice %377 {offsets = [2, 2, 0, 0], sizes = [1, 1, 8, 1], strides = [1, 1, 1, 1]} : vector<3x3x8x1xf32> to vector<1x1x8x1xf32>
    %635 = vector.shape_cast %634 : vector<1x1x8x1xf32> to vector<8x1xf32>
    %636 = vector.broadcast %635 : vector<8x1xf32> to vector<8x64xf32>
    %637 = arith.mulf %408, %636 : vector<8x64xf32>
    %638 = arith.addf %633, %637 : vector<8x64xf32>
    %cst_135 = arith.constant dense<0.000000e+00> : vector<8xf32>
    %639 = vector.multi_reduction <add>, %624, %cst_135 [1] : vector<8x64xf32> to vector<8xf32>
    %640 = vector.shape_cast %639 : vector<8xf32> to vector<8x1xf32>
    %cst_136 = arith.constant dense<0.000000e+00> : vector<8xf32>
    %641 = vector.multi_reduction <add>, %638, %cst_136 [1] : vector<8x64xf32> to vector<8xf32>
    %642 = vector.shape_cast %641 : vector<8xf32> to vector<8x1xf32>
    %643 = arith.addf %640, %642 : vector<8x1xf32>
    %cst_137 = arith.constant 7.812500e-03 : f32
    %644 = vector.broadcast %cst_137 : f32 to vector<8x1xf32>
    %645 = arith.mulf %643, %644 : vector<8x1xf32>
    %646 = vector.broadcast %645 : vector<8x1xf32> to vector<8x64xf32>
    %647 = arith.subf %624, %646 : vector<8x64xf32>
    %648 = arith.mulf %647, %647 : vector<8x64xf32>
    %cst_138 = arith.constant dense<0.000000e+00> : vector<8xf32>
    %649 = vector.multi_reduction <add>, %648, %cst_138 [1] : vector<8x64xf32> to vector<8xf32>
    %650 = vector.shape_cast %649 : vector<8xf32> to vector<8x1xf32>
    %651 = vector.broadcast %645 : vector<8x1xf32> to vector<8x64xf32>
    %652 = arith.subf %638, %651 : vector<8x64xf32>
    %653 = arith.mulf %652, %652 : vector<8x64xf32>
    %cst_139 = arith.constant dense<0.000000e+00> : vector<8xf32>
    %654 = vector.multi_reduction <add>, %653, %cst_139 [1] : vector<8x64xf32> to vector<8xf32>
    %655 = vector.shape_cast %654 : vector<8xf32> to vector<8x1xf32>
    %656 = arith.addf %650, %655 : vector<8x1xf32>
    %cst_140 = arith.constant 7.812500e-03 : f32
    %657 = vector.broadcast %cst_140 : f32 to vector<8x1xf32>
    %658 = arith.mulf %656, %657 : vector<8x1xf32>
    %659 = vector.extract_strided_slice %378 {offsets = [2, 0, 0], sizes = [1, 8, 1], strides = [1, 1, 1]} : vector<3x8x1xf32> to vector<1x8x1xf32>
    %660 = vector.shape_cast %659 : vector<1x8x1xf32> to vector<8x1xf32>
    %cst_141 = arith.constant 9.99999974E-6 : f32
    %661 = vector.broadcast %cst_141 : f32 to vector<8x1xf32>
    %662 = arith.addf %658, %661 : vector<8x1xf32>
    %663 = math.rsqrt %662 : vector<8x1xf32>
    %664 = arith.mulf %660, %663 : vector<8x1xf32>
    %665 = vector.extract_strided_slice %379 {offsets = [2, 0, 0], sizes = [1, 8, 1], strides = [1, 1, 1]} : vector<3x8x1xf32> to vector<1x8x1xf32>
    %666 = vector.shape_cast %665 : vector<1x8x1xf32> to vector<8x1xf32>
    %667 = arith.mulf %645, %664 : vector<8x1xf32>
    %668 = arith.subf %666, %667 : vector<8x1xf32>
    %669 = vector.broadcast %664 : vector<8x1xf32> to vector<8x64xf32>
    %670 = arith.mulf %624, %669 : vector<8x64xf32>
    %671 = vector.broadcast %668 : vector<8x1xf32> to vector<8x64xf32>
    %672 = arith.addf %670, %671 : vector<8x64xf32>
    %cst_142 = arith.constant 0.000000e+00 : f32
    %673 = vector.broadcast %cst_142 : f32 to vector<8x64xf32>
    %674 = arith.maximumf %672, %673 : vector<8x64xf32>
    %675 = arith.mulf %674, %439 : vector<8x64xf32>
    %676 = vector.broadcast %664 : vector<8x1xf32> to vector<8x64xf32>
    %677 = arith.mulf %638, %676 : vector<8x64xf32>
    %678 = vector.broadcast %668 : vector<8x1xf32> to vector<8x64xf32>
    %679 = arith.addf %677, %678 : vector<8x64xf32>
    %cst_143 = arith.constant 0.000000e+00 : f32
    %680 = vector.broadcast %cst_143 : f32 to vector<8x64xf32>
    %681 = arith.maximumf %679, %680 : vector<8x64xf32>
    %682 = arith.mulf %681, %466 : vector<8x64xf32>
    %c0_144 = arith.constant 0 : index
    %c0_145 = arith.constant 0 : index
    %683 = vector.load %arg14[%c0_144, %c0_145] : memref<8x1xf32, #tpu.memory_space<vmem>>, vector<8x1xf32>
    %c0_146 = arith.constant 0 : index
    %c0_147 = arith.constant 0 : index
    %c0_148 = arith.constant 0 : index
    %684 = vector.load %arg15[%c0_146, %c0_147, %c0_148] : memref<3x64x192xf32, #tpu.memory_space<vmem>>, vector<1x64x192xf32>
    %685 = vector.shape_cast %684 : vector<1x64x192xf32> to vector<64x192xf32>
    %c1_149 = arith.constant 1 : index
    %c0_150 = arith.constant 0 : index
    %c0_151 = arith.constant 0 : index
    %686 = vector.load %arg15[%c1_149, %c0_150, %c0_151] : memref<3x64x192xf32, #tpu.memory_space<vmem>>, vector<1x64x192xf32>
    %687 = vector.shape_cast %686 : vector<1x64x192xf32> to vector<64x192xf32>
    %c2_152 = arith.constant 2 : index
    %c0_153 = arith.constant 0 : index
    %c0_154 = arith.constant 0 : index
    %688 = vector.load %arg15[%c2_152, %c0_153, %c0_154] : memref<3x64x192xf32, #tpu.memory_space<vmem>>, vector<1x64x192xf32>
    %689 = vector.shape_cast %688 : vector<1x64x192xf32> to vector<64x192xf32>
    %c0_155 = arith.constant 0 : index
    %c0_156 = arith.constant 0 : index
    %c0_157 = arith.constant 0 : index
    %690 = vector.load %arg13[%c0_155, %c0_156, %c0_157] : memref<3x8x8xf32, #tpu.memory_space<vmem>>, vector<1x8x8xf32>
    %691 = vector.shape_cast %690 : vector<1x8x8xf32> to vector<8x8xf32>
    %c1_158 = arith.constant 1 : index
    %c0_159 = arith.constant 0 : index
    %c0_160 = arith.constant 0 : index
    %692 = vector.load %arg13[%c1_158, %c0_159, %c0_160] : memref<3x8x8xf32, #tpu.memory_space<vmem>>, vector<1x8x8xf32>
    %693 = vector.shape_cast %692 : vector<1x8x8xf32> to vector<8x8xf32>
    %c2_161 = arith.constant 2 : index
    %c0_162 = arith.constant 0 : index
    %c0_163 = arith.constant 0 : index
    %694 = vector.load %arg13[%c2_161, %c0_162, %c0_163] : memref<3x8x8xf32, #tpu.memory_space<vmem>>, vector<1x8x8xf32>
    %695 = vector.shape_cast %694 : vector<1x8x8xf32> to vector<8x8xf32>
    %cst_164 = arith.constant dense<0.000000e+00> : vector<8x192xf32>
    %696 = tpu.matmul %531, %685, %cst_164 {dimension_numbers = #tpu.dot_dimension_numbers<[1], [0], [0], [1], [0, 0, 1, 1], [], []>} : vector<8x64xf32>, vector<64x192xf32>, vector<8x192xf32> -> vector<8x192xf32>
    %cst_165 = arith.constant dense<0.000000e+00> : vector<8x192xf32>
    %697 = tpu.matmul %603, %687, %cst_165 {dimension_numbers = #tpu.dot_dimension_numbers<[1], [0], [0], [1], [0, 0, 1, 1], [], []>} : vector<8x64xf32>, vector<64x192xf32>, vector<8x192xf32> -> vector<8x192xf32>
    %698 = arith.addf %696, %697 : vector<8x192xf32>
    %cst_166 = arith.constant dense<0.000000e+00> : vector<8x192xf32>
    %699 = tpu.matmul %675, %689, %cst_166 {dimension_numbers = #tpu.dot_dimension_numbers<[1], [0], [0], [1], [0, 0, 1, 1], [], []>} : vector<8x64xf32>, vector<64x192xf32>, vector<8x192xf32> -> vector<8x192xf32>
    %700 = arith.addf %698, %699 : vector<8x192xf32>
    %701 = vector.extract_strided_slice %700 {offsets = [0, 0], sizes = [8, 32], strides = [1, 1]} : vector<8x192xf32> to vector<8x32xf32>
    %cst_167 = arith.constant dense<0.000000e+00> : vector<8x32xf32>
    %702 = tpu.matmul %691, %701, %cst_167 {dimension_numbers = #tpu.dot_dimension_numbers<[1], [0], [0], [1], [0, 0, 1, 1], [], []>} : vector<8x8xf32>, vector<8x32xf32>, vector<8x32xf32> -> vector<8x32xf32>
    %703 = vector.broadcast %683 : vector<8x1xf32> to vector<8x32xf32>
    %704 = arith.addf %703, %702 : vector<8x32xf32>
    %705 = vector.extract_strided_slice %700 {offsets = [0, 64], sizes = [8, 32], strides = [1, 1]} : vector<8x192xf32> to vector<8x32xf32>
    %cst_168 = arith.constant dense<0.000000e+00> : vector<8x32xf32>
    %706 = tpu.matmul %693, %705, %cst_168 {dimension_numbers = #tpu.dot_dimension_numbers<[1], [0], [0], [1], [0, 0, 1, 1], [], []>} : vector<8x8xf32>, vector<8x32xf32>, vector<8x32xf32> -> vector<8x32xf32>
    %707 = arith.addf %704, %706 : vector<8x32xf32>
    %708 = vector.extract_strided_slice %700 {offsets = [0, 128], sizes = [8, 32], strides = [1, 1]} : vector<8x192xf32> to vector<8x32xf32>
    %cst_169 = arith.constant dense<0.000000e+00> : vector<8x32xf32>
    %709 = tpu.matmul %695, %708, %cst_169 {dimension_numbers = #tpu.dot_dimension_numbers<[1], [0], [0], [1], [0, 0, 1, 1], [], []>} : vector<8x8xf32>, vector<8x32xf32>, vector<8x32xf32> -> vector<8x32xf32>
    %710 = arith.addf %707, %709 : vector<8x32xf32>
    %711 = vector.extract_strided_slice %700 {offsets = [0, 32], sizes = [8, 32], strides = [1, 1]} : vector<8x192xf32> to vector<8x32xf32>
    %cst_170 = arith.constant dense<0.000000e+00> : vector<8x32xf32>
    %712 = tpu.matmul %691, %711, %cst_170 {dimension_numbers = #tpu.dot_dimension_numbers<[1], [0], [0], [1], [0, 0, 1, 1], [], []>} : vector<8x8xf32>, vector<8x32xf32>, vector<8x32xf32> -> vector<8x32xf32>
    %713 = vector.broadcast %683 : vector<8x1xf32> to vector<8x32xf32>
    %714 = arith.addf %713, %712 : vector<8x32xf32>
    %715 = vector.extract_strided_slice %700 {offsets = [0, 96], sizes = [8, 32], strides = [1, 1]} : vector<8x192xf32> to vector<8x32xf32>
    %cst_171 = arith.constant dense<0.000000e+00> : vector<8x32xf32>
    %716 = tpu.matmul %693, %715, %cst_171 {dimension_numbers = #tpu.dot_dimension_numbers<[1], [0], [0], [1], [0, 0, 1, 1], [], []>} : vector<8x8xf32>, vector<8x32xf32>, vector<8x32xf32> -> vector<8x32xf32>
    %717 = arith.addf %714, %716 : vector<8x32xf32>
    %718 = vector.extract_strided_slice %700 {offsets = [0, 160], sizes = [8, 32], strides = [1, 1]} : vector<8x192xf32> to vector<8x32xf32>
    %cst_172 = arith.constant dense<0.000000e+00> : vector<8x32xf32>
    %719 = tpu.matmul %695, %718, %cst_172 {dimension_numbers = #tpu.dot_dimension_numbers<[1], [0], [0], [1], [0, 0, 1, 1], [], []>} : vector<8x8xf32>, vector<8x32xf32>, vector<8x32xf32> -> vector<8x32xf32>
    %720 = arith.addf %717, %719 : vector<8x32xf32>
    %721 = arith.maximumf %710, %720 : vector<8x32xf32>
    %cst_173 = arith.constant dense<0.000000e+00> : vector<8x192xf32>
    %722 = tpu.matmul %538, %685, %cst_173 {dimension_numbers = #tpu.dot_dimension_numbers<[1], [0], [0], [1], [0, 0, 1, 1], [], []>} : vector<8x64xf32>, vector<64x192xf32>, vector<8x192xf32> -> vector<8x192xf32>
    %cst_174 = arith.constant dense<0.000000e+00> : vector<8x192xf32>
    %723 = tpu.matmul %610, %687, %cst_174 {dimension_numbers = #tpu.dot_dimension_numbers<[1], [0], [0], [1], [0, 0, 1, 1], [], []>} : vector<8x64xf32>, vector<64x192xf32>, vector<8x192xf32> -> vector<8x192xf32>
    %724 = arith.addf %722, %723 : vector<8x192xf32>
    %cst_175 = arith.constant dense<0.000000e+00> : vector<8x192xf32>
    %725 = tpu.matmul %682, %689, %cst_175 {dimension_numbers = #tpu.dot_dimension_numbers<[1], [0], [0], [1], [0, 0, 1, 1], [], []>} : vector<8x64xf32>, vector<64x192xf32>, vector<8x192xf32> -> vector<8x192xf32>
    %726 = arith.addf %724, %725 : vector<8x192xf32>
    %727 = vector.extract_strided_slice %726 {offsets = [0, 0], sizes = [8, 32], strides = [1, 1]} : vector<8x192xf32> to vector<8x32xf32>
    %cst_176 = arith.constant dense<0.000000e+00> : vector<8x32xf32>
    %728 = tpu.matmul %691, %727, %cst_176 {dimension_numbers = #tpu.dot_dimension_numbers<[1], [0], [0], [1], [0, 0, 1, 1], [], []>} : vector<8x8xf32>, vector<8x32xf32>, vector<8x32xf32> -> vector<8x32xf32>
    %729 = vector.broadcast %683 : vector<8x1xf32> to vector<8x32xf32>
    %730 = arith.addf %729, %728 : vector<8x32xf32>
    %731 = vector.extract_strided_slice %726 {offsets = [0, 64], sizes = [8, 32], strides = [1, 1]} : vector<8x192xf32> to vector<8x32xf32>
    %cst_177 = arith.constant dense<0.000000e+00> : vector<8x32xf32>
    %732 = tpu.matmul %693, %731, %cst_177 {dimension_numbers = #tpu.dot_dimension_numbers<[1], [0], [0], [1], [0, 0, 1, 1], [], []>} : vector<8x8xf32>, vector<8x32xf32>, vector<8x32xf32> -> vector<8x32xf32>
    %733 = arith.addf %730, %732 : vector<8x32xf32>
    %734 = vector.extract_strided_slice %726 {offsets = [0, 128], sizes = [8, 32], strides = [1, 1]} : vector<8x192xf32> to vector<8x32xf32>
    %cst_178 = arith.constant dense<0.000000e+00> : vector<8x32xf32>
    %735 = tpu.matmul %695, %734, %cst_178 {dimension_numbers = #tpu.dot_dimension_numbers<[1], [0], [0], [1], [0, 0, 1, 1], [], []>} : vector<8x8xf32>, vector<8x32xf32>, vector<8x32xf32> -> vector<8x32xf32>
    %736 = arith.addf %733, %735 : vector<8x32xf32>
    %737 = vector.extract_strided_slice %726 {offsets = [0, 32], sizes = [8, 32], strides = [1, 1]} : vector<8x192xf32> to vector<8x32xf32>
    %cst_179 = arith.constant dense<0.000000e+00> : vector<8x32xf32>
    %738 = tpu.matmul %691, %737, %cst_179 {dimension_numbers = #tpu.dot_dimension_numbers<[1], [0], [0], [1], [0, 0, 1, 1], [], []>} : vector<8x8xf32>, vector<8x32xf32>, vector<8x32xf32> -> vector<8x32xf32>
    %739 = vector.broadcast %683 : vector<8x1xf32> to vector<8x32xf32>
    %740 = arith.addf %739, %738 : vector<8x32xf32>
    %741 = vector.extract_strided_slice %726 {offsets = [0, 96], sizes = [8, 32], strides = [1, 1]} : vector<8x192xf32> to vector<8x32xf32>
    %cst_180 = arith.constant dense<0.000000e+00> : vector<8x32xf32>
    %742 = tpu.matmul %693, %741, %cst_180 {dimension_numbers = #tpu.dot_dimension_numbers<[1], [0], [0], [1], [0, 0, 1, 1], [], []>} : vector<8x8xf32>, vector<8x32xf32>, vector<8x32xf32> -> vector<8x32xf32>
    %743 = arith.addf %740, %742 : vector<8x32xf32>
    %744 = vector.extract_strided_slice %726 {offsets = [0, 160], sizes = [8, 32], strides = [1, 1]} : vector<8x192xf32> to vector<8x32xf32>
    %cst_181 = arith.constant dense<0.000000e+00> : vector<8x32xf32>
    %745 = tpu.matmul %695, %744, %cst_181 {dimension_numbers = #tpu.dot_dimension_numbers<[1], [0], [0], [1], [0, 0, 1, 1], [], []>} : vector<8x8xf32>, vector<8x32xf32>, vector<8x32xf32> -> vector<8x32xf32>
    %746 = arith.addf %743, %745 : vector<8x32xf32>
    %747 = arith.maximumf %736, %746 : vector<8x32xf32>
    %c0_182 = arith.constant 0 : index
    %c0_183 = arith.constant 0 : index
    %c0_184 = arith.constant 0 : index
    %748 = vector.load %arg16[%c0_182, %c0_183, %c0_184] : memref<3x8x1xf32, #tpu.memory_space<vmem>>, vector<3x8x1xf32>
    %c0_185 = arith.constant 0 : index
    %c0_186 = arith.constant 0 : index
    %c0_187 = arith.constant 0 : index
    %c0_188 = arith.constant 0 : index
    %749 = vector.load %arg17[%c0_185, %c0_186, %c0_187, %c0_188] : memref<3x3x8x1xf32, #tpu.memory_space<vmem>>, vector<3x3x8x1xf32>
    %c0_189 = arith.constant 0 : index
    %c0_190 = arith.constant 0 : index
    %c0_191 = arith.constant 0 : index
    %750 = vector.load %arg18[%c0_189, %c0_190, %c0_191] : memref<3x8x1xf32, #tpu.memory_space<vmem>>, vector<3x8x1xf32>
    %c0_192 = arith.constant 0 : index
    %c0_193 = arith.constant 0 : index
    %c0_194 = arith.constant 0 : index
    %751 = vector.load %arg19[%c0_192, %c0_193, %c0_194] : memref<3x8x1xf32, #tpu.memory_space<vmem>>, vector<3x8x1xf32>
    %752 = tpu.iota {dimensions = array<i32: 1>} : vector<1x32xi32>
    %c0_i32_195 = arith.constant 0 : i32
    %753 = vector.broadcast %c0_i32_195 : i32 to vector<1x32xi32>
    %754 = arith.cmpi eq, %752, %753 : vector<1x32xi32>
    %c31_i32 = arith.constant 31 : i32
    %755 = vector.broadcast %c31_i32 : i32 to vector<1x32xi32>
    %756 = arith.cmpi eq, %752, %755 : vector<1x32xi32>
    %c1_i32_196 = arith.constant 1 : i32
    %757 = tpu.dynamic_rotate %721 by %c1_i32_196 dim 1 : vector<8x32xf32>, i32 -> vector<8x32xf32>
    %cst_197 = arith.constant 0.000000e+00 : f32
    %758 = vector.shape_cast %754 : vector<1x32xi1> to vector<1x32xi1>
    %759 = vector.broadcast %758 : vector<1x32xi1> to vector<8x32xi1>
    %760 = vector.broadcast %cst_197 : f32 to vector<8x32xf32>
    %761 = arith.select %759, %760, %757 : vector<8x32xi1>, vector<8x32xf32>
    %c31_i32_198 = arith.constant 31 : i32
    %762 = tpu.dynamic_rotate %721 by %c31_i32_198 dim 1 : vector<8x32xf32>, i32 -> vector<8x32xf32>
    %cst_199 = arith.constant 0.000000e+00 : f32
    %763 = vector.shape_cast %756 : vector<1x32xi1> to vector<1x32xi1>
    %764 = vector.broadcast %763 : vector<1x32xi1> to vector<8x32xi1>
    %765 = vector.broadcast %cst_199 : f32 to vector<8x32xf32>
    %766 = arith.select %764, %765, %762 : vector<8x32xi1>, vector<8x32xf32>
    %767 = arith.addf %761, %721 : vector<8x32xf32>
    %768 = arith.addf %767, %766 : vector<8x32xf32>
    %cst_200 = arith.constant 0.333333343 : f32
    %769 = vector.broadcast %cst_200 : f32 to vector<8x32xf32>
    %770 = arith.mulf %768, %769 : vector<8x32xf32>
    %c1_i32_201 = arith.constant 1 : i32
    %771 = tpu.dynamic_rotate %747 by %c1_i32_201 dim 1 : vector<8x32xf32>, i32 -> vector<8x32xf32>
    %cst_202 = arith.constant 0.000000e+00 : f32
    %772 = vector.shape_cast %754 : vector<1x32xi1> to vector<1x32xi1>
    %773 = vector.broadcast %772 : vector<1x32xi1> to vector<8x32xi1>
    %774 = vector.broadcast %cst_202 : f32 to vector<8x32xf32>
    %775 = arith.select %773, %774, %771 : vector<8x32xi1>, vector<8x32xf32>
    %c31_i32_203 = arith.constant 31 : i32
    %776 = tpu.dynamic_rotate %747 by %c31_i32_203 dim 1 : vector<8x32xf32>, i32 -> vector<8x32xf32>
    %cst_204 = arith.constant 0.000000e+00 : f32
    %777 = vector.shape_cast %756 : vector<1x32xi1> to vector<1x32xi1>
    %778 = vector.broadcast %777 : vector<1x32xi1> to vector<8x32xi1>
    %779 = vector.broadcast %cst_204 : f32 to vector<8x32xf32>
    %780 = arith.select %778, %779, %776 : vector<8x32xi1>, vector<8x32xf32>
    %781 = arith.addf %775, %747 : vector<8x32xf32>
    %782 = arith.addf %781, %780 : vector<8x32xf32>
    %cst_205 = arith.constant 0.333333343 : f32
    %783 = vector.broadcast %cst_205 : f32 to vector<8x32xf32>
    %784 = arith.mulf %782, %783 : vector<8x32xf32>
    %785 = vector.extract_strided_slice %748 {offsets = [0, 0, 0], sizes = [1, 8, 1], strides = [1, 1, 1]} : vector<3x8x1xf32> to vector<1x8x1xf32>
    %786 = vector.shape_cast %785 : vector<1x8x1xf32> to vector<8x1xf32>
    %787 = vector.broadcast %786 : vector<8x1xf32> to vector<8x32xf32>
    %788 = arith.mulf %770, %787 : vector<8x32xf32>
    %789 = vector.extract_strided_slice %748 {offsets = [1, 0, 0], sizes = [1, 8, 1], strides = [1, 1, 1]} : vector<3x8x1xf32> to vector<1x8x1xf32>
    %790 = vector.shape_cast %789 : vector<1x8x1xf32> to vector<8x1xf32>
    %791 = vector.broadcast %790 : vector<8x1xf32> to vector<8x32xf32>
    %792 = arith.mulf %770, %791 : vector<8x32xf32>
    %793 = vector.extract_strided_slice %748 {offsets = [2, 0, 0], sizes = [1, 8, 1], strides = [1, 1, 1]} : vector<3x8x1xf32> to vector<1x8x1xf32>
    %794 = vector.shape_cast %793 : vector<1x8x1xf32> to vector<8x1xf32>
    %795 = vector.broadcast %794 : vector<8x1xf32> to vector<8x32xf32>
    %796 = arith.mulf %770, %795 : vector<8x32xf32>
    %797 = arith.maximumf %788, %792 : vector<8x32xf32>
    %798 = arith.maximumf %797, %796 : vector<8x32xf32>
    %799 = arith.subf %788, %798 : vector<8x32xf32>
    %800 = math.exp %799 : vector<8x32xf32>
    %801 = arith.subf %792, %798 : vector<8x32xf32>
    %802 = math.exp %801 : vector<8x32xf32>
    %803 = arith.subf %796, %798 : vector<8x32xf32>
    %804 = math.exp %803 : vector<8x32xf32>
    %805 = arith.addf %800, %802 : vector<8x32xf32>
    %806 = arith.addf %805, %804 : vector<8x32xf32>
    %cst_206 = arith.constant 1.000000e+00 : f32
    %807 = vector.broadcast %cst_206 : f32 to vector<8x32xf32>
    %808 = arith.divf %807, %806 : vector<8x32xf32>
    %809 = arith.mulf %800, %808 : vector<8x32xf32>
    %810 = arith.mulf %802, %808 : vector<8x32xf32>
    %811 = arith.mulf %804, %808 : vector<8x32xf32>
    %812 = vector.extract_strided_slice %748 {offsets = [0, 0, 0], sizes = [1, 8, 1], strides = [1, 1, 1]} : vector<3x8x1xf32> to vector<1x8x1xf32>
    %813 = vector.shape_cast %812 : vector<1x8x1xf32> to vector<8x1xf32>
    %814 = vector.broadcast %813 : vector<8x1xf32> to vector<8x32xf32>
    %815 = arith.mulf %784, %814 : vector<8x32xf32>
    %816 = vector.extract_strided_slice %748 {offsets = [1, 0, 0], sizes = [1, 8, 1], strides = [1, 1, 1]} : vector<3x8x1xf32> to vector<1x8x1xf32>
    %817 = vector.shape_cast %816 : vector<1x8x1xf32> to vector<8x1xf32>
    %818 = vector.broadcast %817 : vector<8x1xf32> to vector<8x32xf32>
    %819 = arith.mulf %784, %818 : vector<8x32xf32>
    %820 = vector.extract_strided_slice %748 {offsets = [2, 0, 0], sizes = [1, 8, 1], strides = [1, 1, 1]} : vector<3x8x1xf32> to vector<1x8x1xf32>
    %821 = vector.shape_cast %820 : vector<1x8x1xf32> to vector<8x1xf32>
    %822 = vector.broadcast %821 : vector<8x1xf32> to vector<8x32xf32>
    %823 = arith.mulf %784, %822 : vector<8x32xf32>
    %824 = arith.maximumf %815, %819 : vector<8x32xf32>
    %825 = arith.maximumf %824, %823 : vector<8x32xf32>
    %826 = arith.subf %815, %825 : vector<8x32xf32>
    %827 = math.exp %826 : vector<8x32xf32>
    %828 = arith.subf %819, %825 : vector<8x32xf32>
    %829 = math.exp %828 : vector<8x32xf32>
    %830 = arith.subf %823, %825 : vector<8x32xf32>
    %831 = math.exp %830 : vector<8x32xf32>
    %832 = arith.addf %827, %829 : vector<8x32xf32>
    %833 = arith.addf %832, %831 : vector<8x32xf32>
    %cst_207 = arith.constant 1.000000e+00 : f32
    %834 = vector.broadcast %cst_207 : f32 to vector<8x32xf32>
    %835 = arith.divf %834, %833 : vector<8x32xf32>
    %836 = arith.mulf %827, %835 : vector<8x32xf32>
    %837 = arith.mulf %829, %835 : vector<8x32xf32>
    %838 = arith.mulf %831, %835 : vector<8x32xf32>
    %839 = vector.extract_strided_slice %749 {offsets = [0, 0, 0, 0], sizes = [1, 1, 8, 1], strides = [1, 1, 1, 1]} : vector<3x3x8x1xf32> to vector<1x1x8x1xf32>
    %840 = vector.shape_cast %839 : vector<1x1x8x1xf32> to vector<8x1xf32>
    %841 = vector.broadcast %840 : vector<8x1xf32> to vector<8x32xf32>
    %842 = arith.mulf %761, %841 : vector<8x32xf32>
    %843 = vector.extract_strided_slice %749 {offsets = [0, 1, 0, 0], sizes = [1, 1, 8, 1], strides = [1, 1, 1, 1]} : vector<3x3x8x1xf32> to vector<1x1x8x1xf32>
    %844 = vector.shape_cast %843 : vector<1x1x8x1xf32> to vector<8x1xf32>
    %845 = vector.broadcast %844 : vector<8x1xf32> to vector<8x32xf32>
    %846 = arith.mulf %721, %845 : vector<8x32xf32>
    %847 = arith.addf %842, %846 : vector<8x32xf32>
    %848 = vector.extract_strided_slice %749 {offsets = [0, 2, 0, 0], sizes = [1, 1, 8, 1], strides = [1, 1, 1, 1]} : vector<3x3x8x1xf32> to vector<1x1x8x1xf32>
    %849 = vector.shape_cast %848 : vector<1x1x8x1xf32> to vector<8x1xf32>
    %850 = vector.broadcast %849 : vector<8x1xf32> to vector<8x32xf32>
    %851 = arith.mulf %766, %850 : vector<8x32xf32>
    %852 = arith.addf %847, %851 : vector<8x32xf32>
    %853 = vector.extract_strided_slice %749 {offsets = [0, 0, 0, 0], sizes = [1, 1, 8, 1], strides = [1, 1, 1, 1]} : vector<3x3x8x1xf32> to vector<1x1x8x1xf32>
    %854 = vector.shape_cast %853 : vector<1x1x8x1xf32> to vector<8x1xf32>
    %855 = vector.broadcast %854 : vector<8x1xf32> to vector<8x32xf32>
    %856 = arith.mulf %775, %855 : vector<8x32xf32>
    %857 = vector.extract_strided_slice %749 {offsets = [0, 1, 0, 0], sizes = [1, 1, 8, 1], strides = [1, 1, 1, 1]} : vector<3x3x8x1xf32> to vector<1x1x8x1xf32>
    %858 = vector.shape_cast %857 : vector<1x1x8x1xf32> to vector<8x1xf32>
    %859 = vector.broadcast %858 : vector<8x1xf32> to vector<8x32xf32>
    %860 = arith.mulf %747, %859 : vector<8x32xf32>
    %861 = arith.addf %856, %860 : vector<8x32xf32>
    %862 = vector.extract_strided_slice %749 {offsets = [0, 2, 0, 0], sizes = [1, 1, 8, 1], strides = [1, 1, 1, 1]} : vector<3x3x8x1xf32> to vector<1x1x8x1xf32>
    %863 = vector.shape_cast %862 : vector<1x1x8x1xf32> to vector<8x1xf32>
    %864 = vector.broadcast %863 : vector<8x1xf32> to vector<8x32xf32>
    %865 = arith.mulf %780, %864 : vector<8x32xf32>
    %866 = arith.addf %861, %865 : vector<8x32xf32>
    %cst_208 = arith.constant dense<0.000000e+00> : vector<8xf32>
    %867 = vector.multi_reduction <add>, %852, %cst_208 [1] : vector<8x32xf32> to vector<8xf32>
    %868 = vector.shape_cast %867 : vector<8xf32> to vector<8x1xf32>
    %cst_209 = arith.constant dense<0.000000e+00> : vector<8xf32>
    %869 = vector.multi_reduction <add>, %866, %cst_209 [1] : vector<8x32xf32> to vector<8xf32>
    %870 = vector.shape_cast %869 : vector<8xf32> to vector<8x1xf32>
    %871 = arith.addf %868, %870 : vector<8x1xf32>
    %cst_210 = arith.constant 1.562500e-02 : f32
    %872 = vector.broadcast %cst_210 : f32 to vector<8x1xf32>
    %873 = arith.mulf %871, %872 : vector<8x1xf32>
    %874 = vector.broadcast %873 : vector<8x1xf32> to vector<8x32xf32>
    %875 = arith.subf %852, %874 : vector<8x32xf32>
    %876 = arith.mulf %875, %875 : vector<8x32xf32>
    %cst_211 = arith.constant dense<0.000000e+00> : vector<8xf32>
    %877 = vector.multi_reduction <add>, %876, %cst_211 [1] : vector<8x32xf32> to vector<8xf32>
    %878 = vector.shape_cast %877 : vector<8xf32> to vector<8x1xf32>
    %879 = vector.broadcast %873 : vector<8x1xf32> to vector<8x32xf32>
    %880 = arith.subf %866, %879 : vector<8x32xf32>
    %881 = arith.mulf %880, %880 : vector<8x32xf32>
    %cst_212 = arith.constant dense<0.000000e+00> : vector<8xf32>
    %882 = vector.multi_reduction <add>, %881, %cst_212 [1] : vector<8x32xf32> to vector<8xf32>
    %883 = vector.shape_cast %882 : vector<8xf32> to vector<8x1xf32>
    %884 = arith.addf %878, %883 : vector<8x1xf32>
    %cst_213 = arith.constant 1.562500e-02 : f32
    %885 = vector.broadcast %cst_213 : f32 to vector<8x1xf32>
    %886 = arith.mulf %884, %885 : vector<8x1xf32>
    %887 = vector.extract_strided_slice %750 {offsets = [0, 0, 0], sizes = [1, 8, 1], strides = [1, 1, 1]} : vector<3x8x1xf32> to vector<1x8x1xf32>
    %888 = vector.shape_cast %887 : vector<1x8x1xf32> to vector<8x1xf32>
    %cst_214 = arith.constant 9.99999974E-6 : f32
    %889 = vector.broadcast %cst_214 : f32 to vector<8x1xf32>
    %890 = arith.addf %886, %889 : vector<8x1xf32>
    %891 = math.rsqrt %890 : vector<8x1xf32>
    %892 = arith.mulf %888, %891 : vector<8x1xf32>
    %893 = vector.extract_strided_slice %751 {offsets = [0, 0, 0], sizes = [1, 8, 1], strides = [1, 1, 1]} : vector<3x8x1xf32> to vector<1x8x1xf32>
    %894 = vector.shape_cast %893 : vector<1x8x1xf32> to vector<8x1xf32>
    %895 = arith.mulf %873, %892 : vector<8x1xf32>
    %896 = arith.subf %894, %895 : vector<8x1xf32>
    %897 = vector.broadcast %892 : vector<8x1xf32> to vector<8x32xf32>
    %898 = arith.mulf %852, %897 : vector<8x32xf32>
    %899 = vector.broadcast %896 : vector<8x1xf32> to vector<8x32xf32>
    %900 = arith.addf %898, %899 : vector<8x32xf32>
    %cst_215 = arith.constant 0.000000e+00 : f32
    %901 = vector.broadcast %cst_215 : f32 to vector<8x32xf32>
    %902 = arith.maximumf %900, %901 : vector<8x32xf32>
    %903 = arith.mulf %902, %809 : vector<8x32xf32>
    %904 = vector.broadcast %892 : vector<8x1xf32> to vector<8x32xf32>
    %905 = arith.mulf %866, %904 : vector<8x32xf32>
    %906 = vector.broadcast %896 : vector<8x1xf32> to vector<8x32xf32>
    %907 = arith.addf %905, %906 : vector<8x32xf32>
    %cst_216 = arith.constant 0.000000e+00 : f32
    %908 = vector.broadcast %cst_216 : f32 to vector<8x32xf32>
    %909 = arith.maximumf %907, %908 : vector<8x32xf32>
    %910 = arith.mulf %909, %836 : vector<8x32xf32>
    %911 = vector.extract_strided_slice %749 {offsets = [1, 0, 0, 0], sizes = [1, 1, 8, 1], strides = [1, 1, 1, 1]} : vector<3x3x8x1xf32> to vector<1x1x8x1xf32>
    %912 = vector.shape_cast %911 : vector<1x1x8x1xf32> to vector<8x1xf32>
    %913 = vector.broadcast %912 : vector<8x1xf32> to vector<8x32xf32>
    %914 = arith.mulf %761, %913 : vector<8x32xf32>
    %915 = vector.extract_strided_slice %749 {offsets = [1, 1, 0, 0], sizes = [1, 1, 8, 1], strides = [1, 1, 1, 1]} : vector<3x3x8x1xf32> to vector<1x1x8x1xf32>
    %916 = vector.shape_cast %915 : vector<1x1x8x1xf32> to vector<8x1xf32>
    %917 = vector.broadcast %916 : vector<8x1xf32> to vector<8x32xf32>
    %918 = arith.mulf %721, %917 : vector<8x32xf32>
    %919 = arith.addf %914, %918 : vector<8x32xf32>
    %920 = vector.extract_strided_slice %749 {offsets = [1, 2, 0, 0], sizes = [1, 1, 8, 1], strides = [1, 1, 1, 1]} : vector<3x3x8x1xf32> to vector<1x1x8x1xf32>
    %921 = vector.shape_cast %920 : vector<1x1x8x1xf32> to vector<8x1xf32>
    %922 = vector.broadcast %921 : vector<8x1xf32> to vector<8x32xf32>
    %923 = arith.mulf %766, %922 : vector<8x32xf32>
    %924 = arith.addf %919, %923 : vector<8x32xf32>
    %925 = vector.extract_strided_slice %749 {offsets = [1, 0, 0, 0], sizes = [1, 1, 8, 1], strides = [1, 1, 1, 1]} : vector<3x3x8x1xf32> to vector<1x1x8x1xf32>
    %926 = vector.shape_cast %925 : vector<1x1x8x1xf32> to vector<8x1xf32>
    %927 = vector.broadcast %926 : vector<8x1xf32> to vector<8x32xf32>
    %928 = arith.mulf %775, %927 : vector<8x32xf32>
    %929 = vector.extract_strided_slice %749 {offsets = [1, 1, 0, 0], sizes = [1, 1, 8, 1], strides = [1, 1, 1, 1]} : vector<3x3x8x1xf32> to vector<1x1x8x1xf32>
    %930 = vector.shape_cast %929 : vector<1x1x8x1xf32> to vector<8x1xf32>
    %931 = vector.broadcast %930 : vector<8x1xf32> to vector<8x32xf32>
    %932 = arith.mulf %747, %931 : vector<8x32xf32>
    %933 = arith.addf %928, %932 : vector<8x32xf32>
    %934 = vector.extract_strided_slice %749 {offsets = [1, 2, 0, 0], sizes = [1, 1, 8, 1], strides = [1, 1, 1, 1]} : vector<3x3x8x1xf32> to vector<1x1x8x1xf32>
    %935 = vector.shape_cast %934 : vector<1x1x8x1xf32> to vector<8x1xf32>
    %936 = vector.broadcast %935 : vector<8x1xf32> to vector<8x32xf32>
    %937 = arith.mulf %780, %936 : vector<8x32xf32>
    %938 = arith.addf %933, %937 : vector<8x32xf32>
    %cst_217 = arith.constant dense<0.000000e+00> : vector<8xf32>
    %939 = vector.multi_reduction <add>, %924, %cst_217 [1] : vector<8x32xf32> to vector<8xf32>
    %940 = vector.shape_cast %939 : vector<8xf32> to vector<8x1xf32>
    %cst_218 = arith.constant dense<0.000000e+00> : vector<8xf32>
    %941 = vector.multi_reduction <add>, %938, %cst_218 [1] : vector<8x32xf32> to vector<8xf32>
    %942 = vector.shape_cast %941 : vector<8xf32> to vector<8x1xf32>
    %943 = arith.addf %940, %942 : vector<8x1xf32>
    %cst_219 = arith.constant 1.562500e-02 : f32
    %944 = vector.broadcast %cst_219 : f32 to vector<8x1xf32>
    %945 = arith.mulf %943, %944 : vector<8x1xf32>
    %946 = vector.broadcast %945 : vector<8x1xf32> to vector<8x32xf32>
    %947 = arith.subf %924, %946 : vector<8x32xf32>
    %948 = arith.mulf %947, %947 : vector<8x32xf32>
    %cst_220 = arith.constant dense<0.000000e+00> : vector<8xf32>
    %949 = vector.multi_reduction <add>, %948, %cst_220 [1] : vector<8x32xf32> to vector<8xf32>
    %950 = vector.shape_cast %949 : vector<8xf32> to vector<8x1xf32>
    %951 = vector.broadcast %945 : vector<8x1xf32> to vector<8x32xf32>
    %952 = arith.subf %938, %951 : vector<8x32xf32>
    %953 = arith.mulf %952, %952 : vector<8x32xf32>
    %cst_221 = arith.constant dense<0.000000e+00> : vector<8xf32>
    %954 = vector.multi_reduction <add>, %953, %cst_221 [1] : vector<8x32xf32> to vector<8xf32>
    %955 = vector.shape_cast %954 : vector<8xf32> to vector<8x1xf32>
    %956 = arith.addf %950, %955 : vector<8x1xf32>
    %cst_222 = arith.constant 1.562500e-02 : f32
    %957 = vector.broadcast %cst_222 : f32 to vector<8x1xf32>
    %958 = arith.mulf %956, %957 : vector<8x1xf32>
    %959 = vector.extract_strided_slice %750 {offsets = [1, 0, 0], sizes = [1, 8, 1], strides = [1, 1, 1]} : vector<3x8x1xf32> to vector<1x8x1xf32>
    %960 = vector.shape_cast %959 : vector<1x8x1xf32> to vector<8x1xf32>
    %cst_223 = arith.constant 9.99999974E-6 : f32
    %961 = vector.broadcast %cst_223 : f32 to vector<8x1xf32>
    %962 = arith.addf %958, %961 : vector<8x1xf32>
    %963 = math.rsqrt %962 : vector<8x1xf32>
    %964 = arith.mulf %960, %963 : vector<8x1xf32>
    %965 = vector.extract_strided_slice %751 {offsets = [1, 0, 0], sizes = [1, 8, 1], strides = [1, 1, 1]} : vector<3x8x1xf32> to vector<1x8x1xf32>
    %966 = vector.shape_cast %965 : vector<1x8x1xf32> to vector<8x1xf32>
    %967 = arith.mulf %945, %964 : vector<8x1xf32>
    %968 = arith.subf %966, %967 : vector<8x1xf32>
    %969 = vector.broadcast %964 : vector<8x1xf32> to vector<8x32xf32>
    %970 = arith.mulf %924, %969 : vector<8x32xf32>
    %971 = vector.broadcast %968 : vector<8x1xf32> to vector<8x32xf32>
    %972 = arith.addf %970, %971 : vector<8x32xf32>
    %cst_224 = arith.constant 0.000000e+00 : f32
    %973 = vector.broadcast %cst_224 : f32 to vector<8x32xf32>
    %974 = arith.maximumf %972, %973 : vector<8x32xf32>
    %975 = arith.mulf %974, %810 : vector<8x32xf32>
    %976 = vector.broadcast %964 : vector<8x1xf32> to vector<8x32xf32>
    %977 = arith.mulf %938, %976 : vector<8x32xf32>
    %978 = vector.broadcast %968 : vector<8x1xf32> to vector<8x32xf32>
    %979 = arith.addf %977, %978 : vector<8x32xf32>
    %cst_225 = arith.constant 0.000000e+00 : f32
    %980 = vector.broadcast %cst_225 : f32 to vector<8x32xf32>
    %981 = arith.maximumf %979, %980 : vector<8x32xf32>
    %982 = arith.mulf %981, %837 : vector<8x32xf32>
    %983 = vector.extract_strided_slice %749 {offsets = [2, 0, 0, 0], sizes = [1, 1, 8, 1], strides = [1, 1, 1, 1]} : vector<3x3x8x1xf32> to vector<1x1x8x1xf32>
    %984 = vector.shape_cast %983 : vector<1x1x8x1xf32> to vector<8x1xf32>
    %985 = vector.broadcast %984 : vector<8x1xf32> to vector<8x32xf32>
    %986 = arith.mulf %761, %985 : vector<8x32xf32>
    %987 = vector.extract_strided_slice %749 {offsets = [2, 1, 0, 0], sizes = [1, 1, 8, 1], strides = [1, 1, 1, 1]} : vector<3x3x8x1xf32> to vector<1x1x8x1xf32>
    %988 = vector.shape_cast %987 : vector<1x1x8x1xf32> to vector<8x1xf32>
    %989 = vector.broadcast %988 : vector<8x1xf32> to vector<8x32xf32>
    %990 = arith.mulf %721, %989 : vector<8x32xf32>
    %991 = arith.addf %986, %990 : vector<8x32xf32>
    %992 = vector.extract_strided_slice %749 {offsets = [2, 2, 0, 0], sizes = [1, 1, 8, 1], strides = [1, 1, 1, 1]} : vector<3x3x8x1xf32> to vector<1x1x8x1xf32>
    %993 = vector.shape_cast %992 : vector<1x1x8x1xf32> to vector<8x1xf32>
    %994 = vector.broadcast %993 : vector<8x1xf32> to vector<8x32xf32>
    %995 = arith.mulf %766, %994 : vector<8x32xf32>
    %996 = arith.addf %991, %995 : vector<8x32xf32>
    %997 = vector.extract_strided_slice %749 {offsets = [2, 0, 0, 0], sizes = [1, 1, 8, 1], strides = [1, 1, 1, 1]} : vector<3x3x8x1xf32> to vector<1x1x8x1xf32>
    %998 = vector.shape_cast %997 : vector<1x1x8x1xf32> to vector<8x1xf32>
    %999 = vector.broadcast %998 : vector<8x1xf32> to vector<8x32xf32>
    %1000 = arith.mulf %775, %999 : vector<8x32xf32>
    %1001 = vector.extract_strided_slice %749 {offsets = [2, 1, 0, 0], sizes = [1, 1, 8, 1], strides = [1, 1, 1, 1]} : vector<3x3x8x1xf32> to vector<1x1x8x1xf32>
    %1002 = vector.shape_cast %1001 : vector<1x1x8x1xf32> to vector<8x1xf32>
    %1003 = vector.broadcast %1002 : vector<8x1xf32> to vector<8x32xf32>
    %1004 = arith.mulf %747, %1003 : vector<8x32xf32>
    %1005 = arith.addf %1000, %1004 : vector<8x32xf32>
    %1006 = vector.extract_strided_slice %749 {offsets = [2, 2, 0, 0], sizes = [1, 1, 8, 1], strides = [1, 1, 1, 1]} : vector<3x3x8x1xf32> to vector<1x1x8x1xf32>
    %1007 = vector.shape_cast %1006 : vector<1x1x8x1xf32> to vector<8x1xf32>
    %1008 = vector.broadcast %1007 : vector<8x1xf32> to vector<8x32xf32>
    %1009 = arith.mulf %780, %1008 : vector<8x32xf32>
    %1010 = arith.addf %1005, %1009 : vector<8x32xf32>
    %cst_226 = arith.constant dense<0.000000e+00> : vector<8xf32>
    %1011 = vector.multi_reduction <add>, %996, %cst_226 [1] : vector<8x32xf32> to vector<8xf32>
    %1012 = vector.shape_cast %1011 : vector<8xf32> to vector<8x1xf32>
    %cst_227 = arith.constant dense<0.000000e+00> : vector<8xf32>
    %1013 = vector.multi_reduction <add>, %1010, %cst_227 [1] : vector<8x32xf32> to vector<8xf32>
    %1014 = vector.shape_cast %1013 : vector<8xf32> to vector<8x1xf32>
    %1015 = arith.addf %1012, %1014 : vector<8x1xf32>
    %cst_228 = arith.constant 1.562500e-02 : f32
    %1016 = vector.broadcast %cst_228 : f32 to vector<8x1xf32>
    %1017 = arith.mulf %1015, %1016 : vector<8x1xf32>
    %1018 = vector.broadcast %1017 : vector<8x1xf32> to vector<8x32xf32>
    %1019 = arith.subf %996, %1018 : vector<8x32xf32>
    %1020 = arith.mulf %1019, %1019 : vector<8x32xf32>
    %cst_229 = arith.constant dense<0.000000e+00> : vector<8xf32>
    %1021 = vector.multi_reduction <add>, %1020, %cst_229 [1] : vector<8x32xf32> to vector<8xf32>
    %1022 = vector.shape_cast %1021 : vector<8xf32> to vector<8x1xf32>
    %1023 = vector.broadcast %1017 : vector<8x1xf32> to vector<8x32xf32>
    %1024 = arith.subf %1010, %1023 : vector<8x32xf32>
    %1025 = arith.mulf %1024, %1024 : vector<8x32xf32>
    %cst_230 = arith.constant dense<0.000000e+00> : vector<8xf32>
    %1026 = vector.multi_reduction <add>, %1025, %cst_230 [1] : vector<8x32xf32> to vector<8xf32>
    %1027 = vector.shape_cast %1026 : vector<8xf32> to vector<8x1xf32>
    %1028 = arith.addf %1022, %1027 : vector<8x1xf32>
    %cst_231 = arith.constant 1.562500e-02 : f32
    %1029 = vector.broadcast %cst_231 : f32 to vector<8x1xf32>
    %1030 = arith.mulf %1028, %1029 : vector<8x1xf32>
    %1031 = vector.extract_strided_slice %750 {offsets = [2, 0, 0], sizes = [1, 8, 1], strides = [1, 1, 1]} : vector<3x8x1xf32> to vector<1x8x1xf32>
    %1032 = vector.shape_cast %1031 : vector<1x8x1xf32> to vector<8x1xf32>
    %cst_232 = arith.constant 9.99999974E-6 : f32
    %1033 = vector.broadcast %cst_232 : f32 to vector<8x1xf32>
    %1034 = arith.addf %1030, %1033 : vector<8x1xf32>
    %1035 = math.rsqrt %1034 : vector<8x1xf32>
    %1036 = arith.mulf %1032, %1035 : vector<8x1xf32>
    %1037 = vector.extract_strided_slice %751 {offsets = [2, 0, 0], sizes = [1, 8, 1], strides = [1, 1, 1]} : vector<3x8x1xf32> to vector<1x8x1xf32>
    %1038 = vector.shape_cast %1037 : vector<1x8x1xf32> to vector<8x1xf32>
    %1039 = arith.mulf %1017, %1036 : vector<8x1xf32>
    %1040 = arith.subf %1038, %1039 : vector<8x1xf32>
    %1041 = vector.broadcast %1036 : vector<8x1xf32> to vector<8x32xf32>
    %1042 = arith.mulf %996, %1041 : vector<8x32xf32>
    %1043 = vector.broadcast %1040 : vector<8x1xf32> to vector<8x32xf32>
    %1044 = arith.addf %1042, %1043 : vector<8x32xf32>
    %cst_233 = arith.constant 0.000000e+00 : f32
    %1045 = vector.broadcast %cst_233 : f32 to vector<8x32xf32>
    %1046 = arith.maximumf %1044, %1045 : vector<8x32xf32>
    %1047 = arith.mulf %1046, %811 : vector<8x32xf32>
    %1048 = vector.broadcast %1036 : vector<8x1xf32> to vector<8x32xf32>
    %1049 = arith.mulf %1010, %1048 : vector<8x32xf32>
    %1050 = vector.broadcast %1040 : vector<8x1xf32> to vector<8x32xf32>
    %1051 = arith.addf %1049, %1050 : vector<8x32xf32>
    %cst_234 = arith.constant 0.000000e+00 : f32
    %1052 = vector.broadcast %cst_234 : f32 to vector<8x32xf32>
    %1053 = arith.maximumf %1051, %1052 : vector<8x32xf32>
    %1054 = arith.mulf %1053, %838 : vector<8x32xf32>
    %c0_235 = arith.constant 0 : index
    %c0_236 = arith.constant 0 : index
    %1055 = vector.load %arg21[%c0_235, %c0_236] : memref<8x1xf32, #tpu.memory_space<vmem>>, vector<8x1xf32>
    %c0_237 = arith.constant 0 : index
    %c0_238 = arith.constant 0 : index
    %c0_239 = arith.constant 0 : index
    %1056 = vector.load %arg22[%c0_237, %c0_238, %c0_239] : memref<3x32x96xf32, #tpu.memory_space<vmem>>, vector<1x32x96xf32>
    %1057 = vector.shape_cast %1056 : vector<1x32x96xf32> to vector<32x96xf32>
    %c1_240 = arith.constant 1 : index
    %c0_241 = arith.constant 0 : index
    %c0_242 = arith.constant 0 : index
    %1058 = vector.load %arg22[%c1_240, %c0_241, %c0_242] : memref<3x32x96xf32, #tpu.memory_space<vmem>>, vector<1x32x96xf32>
    %1059 = vector.shape_cast %1058 : vector<1x32x96xf32> to vector<32x96xf32>
    %c2_243 = arith.constant 2 : index
    %c0_244 = arith.constant 0 : index
    %c0_245 = arith.constant 0 : index
    %1060 = vector.load %arg22[%c2_243, %c0_244, %c0_245] : memref<3x32x96xf32, #tpu.memory_space<vmem>>, vector<1x32x96xf32>
    %1061 = vector.shape_cast %1060 : vector<1x32x96xf32> to vector<32x96xf32>
    %c0_246 = arith.constant 0 : index
    %c0_247 = arith.constant 0 : index
    %c0_248 = arith.constant 0 : index
    %1062 = vector.load %arg20[%c0_246, %c0_247, %c0_248] : memref<3x8x8xf32, #tpu.memory_space<vmem>>, vector<1x8x8xf32>
    %1063 = vector.shape_cast %1062 : vector<1x8x8xf32> to vector<8x8xf32>
    %c1_249 = arith.constant 1 : index
    %c0_250 = arith.constant 0 : index
    %c0_251 = arith.constant 0 : index
    %1064 = vector.load %arg20[%c1_249, %c0_250, %c0_251] : memref<3x8x8xf32, #tpu.memory_space<vmem>>, vector<1x8x8xf32>
    %1065 = vector.shape_cast %1064 : vector<1x8x8xf32> to vector<8x8xf32>
    %c2_252 = arith.constant 2 : index
    %c0_253 = arith.constant 0 : index
    %c0_254 = arith.constant 0 : index
    %1066 = vector.load %arg20[%c2_252, %c0_253, %c0_254] : memref<3x8x8xf32, #tpu.memory_space<vmem>>, vector<1x8x8xf32>
    %1067 = vector.shape_cast %1066 : vector<1x8x8xf32> to vector<8x8xf32>
    %cst_255 = arith.constant dense<0.000000e+00> : vector<8x96xf32>
    %1068 = tpu.matmul %903, %1057, %cst_255 {dimension_numbers = #tpu.dot_dimension_numbers<[1], [0], [0], [1], [0, 0, 1, 1], [], []>} : vector<8x32xf32>, vector<32x96xf32>, vector<8x96xf32> -> vector<8x96xf32>
    %cst_256 = arith.constant dense<0.000000e+00> : vector<8x96xf32>
    %1069 = tpu.matmul %975, %1059, %cst_256 {dimension_numbers = #tpu.dot_dimension_numbers<[1], [0], [0], [1], [0, 0, 1, 1], [], []>} : vector<8x32xf32>, vector<32x96xf32>, vector<8x96xf32> -> vector<8x96xf32>
    %1070 = arith.addf %1068, %1069 : vector<8x96xf32>
    %cst_257 = arith.constant dense<0.000000e+00> : vector<8x96xf32>
    %1071 = tpu.matmul %1047, %1061, %cst_257 {dimension_numbers = #tpu.dot_dimension_numbers<[1], [0], [0], [1], [0, 0, 1, 1], [], []>} : vector<8x32xf32>, vector<32x96xf32>, vector<8x96xf32> -> vector<8x96xf32>
    %1072 = arith.addf %1070, %1071 : vector<8x96xf32>
    %1073 = vector.extract_strided_slice %1072 {offsets = [0, 0], sizes = [8, 16], strides = [1, 1]} : vector<8x96xf32> to vector<8x16xf32>
    %cst_258 = arith.constant dense<0.000000e+00> : vector<8x16xf32>
    %1074 = tpu.matmul %1063, %1073, %cst_258 {dimension_numbers = #tpu.dot_dimension_numbers<[1], [0], [0], [1], [0, 0, 1, 1], [], []>} : vector<8x8xf32>, vector<8x16xf32>, vector<8x16xf32> -> vector<8x16xf32>
    %1075 = vector.broadcast %1055 : vector<8x1xf32> to vector<8x16xf32>
    %1076 = arith.addf %1075, %1074 : vector<8x16xf32>
    %1077 = vector.extract_strided_slice %1072 {offsets = [0, 32], sizes = [8, 16], strides = [1, 1]} : vector<8x96xf32> to vector<8x16xf32>
    %cst_259 = arith.constant dense<0.000000e+00> : vector<8x16xf32>
    %1078 = tpu.matmul %1065, %1077, %cst_259 {dimension_numbers = #tpu.dot_dimension_numbers<[1], [0], [0], [1], [0, 0, 1, 1], [], []>} : vector<8x8xf32>, vector<8x16xf32>, vector<8x16xf32> -> vector<8x16xf32>
    %1079 = arith.addf %1076, %1078 : vector<8x16xf32>
    %1080 = vector.extract_strided_slice %1072 {offsets = [0, 64], sizes = [8, 16], strides = [1, 1]} : vector<8x96xf32> to vector<8x16xf32>
    %cst_260 = arith.constant dense<0.000000e+00> : vector<8x16xf32>
    %1081 = tpu.matmul %1067, %1080, %cst_260 {dimension_numbers = #tpu.dot_dimension_numbers<[1], [0], [0], [1], [0, 0, 1, 1], [], []>} : vector<8x8xf32>, vector<8x16xf32>, vector<8x16xf32> -> vector<8x16xf32>
    %1082 = arith.addf %1079, %1081 : vector<8x16xf32>
    %1083 = vector.extract_strided_slice %1072 {offsets = [0, 16], sizes = [8, 16], strides = [1, 1]} : vector<8x96xf32> to vector<8x16xf32>
    %cst_261 = arith.constant dense<0.000000e+00> : vector<8x16xf32>
    %1084 = tpu.matmul %1063, %1083, %cst_261 {dimension_numbers = #tpu.dot_dimension_numbers<[1], [0], [0], [1], [0, 0, 1, 1], [], []>} : vector<8x8xf32>, vector<8x16xf32>, vector<8x16xf32> -> vector<8x16xf32>
    %1085 = vector.broadcast %1055 : vector<8x1xf32> to vector<8x16xf32>
    %1086 = arith.addf %1085, %1084 : vector<8x16xf32>
    %1087 = vector.extract_strided_slice %1072 {offsets = [0, 48], sizes = [8, 16], strides = [1, 1]} : vector<8x96xf32> to vector<8x16xf32>
    %cst_262 = arith.constant dense<0.000000e+00> : vector<8x16xf32>
    %1088 = tpu.matmul %1065, %1087, %cst_262 {dimension_numbers = #tpu.dot_dimension_numbers<[1], [0], [0], [1], [0, 0, 1, 1], [], []>} : vector<8x8xf32>, vector<8x16xf32>, vector<8x16xf32> -> vector<8x16xf32>
    %1089 = arith.addf %1086, %1088 : vector<8x16xf32>
    %1090 = vector.extract_strided_slice %1072 {offsets = [0, 80], sizes = [8, 16], strides = [1, 1]} : vector<8x96xf32> to vector<8x16xf32>
    %cst_263 = arith.constant dense<0.000000e+00> : vector<8x16xf32>
    %1091 = tpu.matmul %1067, %1090, %cst_263 {dimension_numbers = #tpu.dot_dimension_numbers<[1], [0], [0], [1], [0, 0, 1, 1], [], []>} : vector<8x8xf32>, vector<8x16xf32>, vector<8x16xf32> -> vector<8x16xf32>
    %1092 = arith.addf %1089, %1091 : vector<8x16xf32>
    %1093 = arith.maximumf %1082, %1092 : vector<8x16xf32>
    %cst_264 = arith.constant dense<0.000000e+00> : vector<8x96xf32>
    %1094 = tpu.matmul %910, %1057, %cst_264 {dimension_numbers = #tpu.dot_dimension_numbers<[1], [0], [0], [1], [0, 0, 1, 1], [], []>} : vector<8x32xf32>, vector<32x96xf32>, vector<8x96xf32> -> vector<8x96xf32>
    %cst_265 = arith.constant dense<0.000000e+00> : vector<8x96xf32>
    %1095 = tpu.matmul %982, %1059, %cst_265 {dimension_numbers = #tpu.dot_dimension_numbers<[1], [0], [0], [1], [0, 0, 1, 1], [], []>} : vector<8x32xf32>, vector<32x96xf32>, vector<8x96xf32> -> vector<8x96xf32>
    %1096 = arith.addf %1094, %1095 : vector<8x96xf32>
    %cst_266 = arith.constant dense<0.000000e+00> : vector<8x96xf32>
    %1097 = tpu.matmul %1054, %1061, %cst_266 {dimension_numbers = #tpu.dot_dimension_numbers<[1], [0], [0], [1], [0, 0, 1, 1], [], []>} : vector<8x32xf32>, vector<32x96xf32>, vector<8x96xf32> -> vector<8x96xf32>
    %1098 = arith.addf %1096, %1097 : vector<8x96xf32>
    %1099 = vector.extract_strided_slice %1098 {offsets = [0, 0], sizes = [8, 16], strides = [1, 1]} : vector<8x96xf32> to vector<8x16xf32>
    %cst_267 = arith.constant dense<0.000000e+00> : vector<8x16xf32>
    %1100 = tpu.matmul %1063, %1099, %cst_267 {dimension_numbers = #tpu.dot_dimension_numbers<[1], [0], [0], [1], [0, 0, 1, 1], [], []>} : vector<8x8xf32>, vector<8x16xf32>, vector<8x16xf32> -> vector<8x16xf32>
    %1101 = vector.broadcast %1055 : vector<8x1xf32> to vector<8x16xf32>
    %1102 = arith.addf %1101, %1100 : vector<8x16xf32>
    %1103 = vector.extract_strided_slice %1098 {offsets = [0, 32], sizes = [8, 16], strides = [1, 1]} : vector<8x96xf32> to vector<8x16xf32>
    %cst_268 = arith.constant dense<0.000000e+00> : vector<8x16xf32>
    %1104 = tpu.matmul %1065, %1103, %cst_268 {dimension_numbers = #tpu.dot_dimension_numbers<[1], [0], [0], [1], [0, 0, 1, 1], [], []>} : vector<8x8xf32>, vector<8x16xf32>, vector<8x16xf32> -> vector<8x16xf32>
    %1105 = arith.addf %1102, %1104 : vector<8x16xf32>
    %1106 = vector.extract_strided_slice %1098 {offsets = [0, 64], sizes = [8, 16], strides = [1, 1]} : vector<8x96xf32> to vector<8x16xf32>
    %cst_269 = arith.constant dense<0.000000e+00> : vector<8x16xf32>
    %1107 = tpu.matmul %1067, %1106, %cst_269 {dimension_numbers = #tpu.dot_dimension_numbers<[1], [0], [0], [1], [0, 0, 1, 1], [], []>} : vector<8x8xf32>, vector<8x16xf32>, vector<8x16xf32> -> vector<8x16xf32>
    %1108 = arith.addf %1105, %1107 : vector<8x16xf32>
    %1109 = vector.extract_strided_slice %1098 {offsets = [0, 16], sizes = [8, 16], strides = [1, 1]} : vector<8x96xf32> to vector<8x16xf32>
    %cst_270 = arith.constant dense<0.000000e+00> : vector<8x16xf32>
    %1110 = tpu.matmul %1063, %1109, %cst_270 {dimension_numbers = #tpu.dot_dimension_numbers<[1], [0], [0], [1], [0, 0, 1, 1], [], []>} : vector<8x8xf32>, vector<8x16xf32>, vector<8x16xf32> -> vector<8x16xf32>
    %1111 = vector.broadcast %1055 : vector<8x1xf32> to vector<8x16xf32>
    %1112 = arith.addf %1111, %1110 : vector<8x16xf32>
    %1113 = vector.extract_strided_slice %1098 {offsets = [0, 48], sizes = [8, 16], strides = [1, 1]} : vector<8x96xf32> to vector<8x16xf32>
    %cst_271 = arith.constant dense<0.000000e+00> : vector<8x16xf32>
    %1114 = tpu.matmul %1065, %1113, %cst_271 {dimension_numbers = #tpu.dot_dimension_numbers<[1], [0], [0], [1], [0, 0, 1, 1], [], []>} : vector<8x8xf32>, vector<8x16xf32>, vector<8x16xf32> -> vector<8x16xf32>
    %1115 = arith.addf %1112, %1114 : vector<8x16xf32>
    %1116 = vector.extract_strided_slice %1098 {offsets = [0, 80], sizes = [8, 16], strides = [1, 1]} : vector<8x96xf32> to vector<8x16xf32>
    %cst_272 = arith.constant dense<0.000000e+00> : vector<8x16xf32>
    %1117 = tpu.matmul %1067, %1116, %cst_272 {dimension_numbers = #tpu.dot_dimension_numbers<[1], [0], [0], [1], [0, 0, 1, 1], [], []>} : vector<8x8xf32>, vector<8x16xf32>, vector<8x16xf32> -> vector<8x16xf32>
    %1118 = arith.addf %1115, %1117 : vector<8x16xf32>
    %1119 = arith.maximumf %1108, %1118 : vector<8x16xf32>
    %c0_273 = arith.constant 0 : index
    %c0_274 = arith.constant 0 : index
    %c0_275 = arith.constant 0 : index
    %1120 = vector.load %arg23[%c0_273, %c0_274, %c0_275] : memref<3x8x1xf32, #tpu.memory_space<vmem>>, vector<3x8x1xf32>
    %c0_276 = arith.constant 0 : index
    %c0_277 = arith.constant 0 : index
    %c0_278 = arith.constant 0 : index
    %c0_279 = arith.constant 0 : index
    %1121 = vector.load %arg24[%c0_276, %c0_277, %c0_278, %c0_279] : memref<3x3x8x1xf32, #tpu.memory_space<vmem>>, vector<3x3x8x1xf32>
    %c0_280 = arith.constant 0 : index
    %c0_281 = arith.constant 0 : index
    %c0_282 = arith.constant 0 : index
    %1122 = vector.load %arg25[%c0_280, %c0_281, %c0_282] : memref<3x8x1xf32, #tpu.memory_space<vmem>>, vector<3x8x1xf32>
    %c0_283 = arith.constant 0 : index
    %c0_284 = arith.constant 0 : index
    %c0_285 = arith.constant 0 : index
    %1123 = vector.load %arg26[%c0_283, %c0_284, %c0_285] : memref<3x8x1xf32, #tpu.memory_space<vmem>>, vector<3x8x1xf32>
    %1124 = tpu.iota {dimensions = array<i32: 1>} : vector<1x16xi32>
    %c0_i32_286 = arith.constant 0 : i32
    %1125 = vector.broadcast %c0_i32_286 : i32 to vector<1x16xi32>
    %1126 = arith.cmpi eq, %1124, %1125 : vector<1x16xi32>
    %c15_i32 = arith.constant 15 : i32
    %1127 = vector.broadcast %c15_i32 : i32 to vector<1x16xi32>
    %1128 = arith.cmpi eq, %1124, %1127 : vector<1x16xi32>
    %c1_i32_287 = arith.constant 1 : i32
    %1129 = tpu.dynamic_rotate %1093 by %c1_i32_287 dim 1 : vector<8x16xf32>, i32 -> vector<8x16xf32>
    %cst_288 = arith.constant 0.000000e+00 : f32
    %1130 = vector.shape_cast %1126 : vector<1x16xi1> to vector<1x16xi1>
    %1131 = vector.broadcast %1130 : vector<1x16xi1> to vector<8x16xi1>
    %1132 = vector.broadcast %cst_288 : f32 to vector<8x16xf32>
    %1133 = arith.select %1131, %1132, %1129 : vector<8x16xi1>, vector<8x16xf32>
    %c15_i32_289 = arith.constant 15 : i32
    %1134 = tpu.dynamic_rotate %1093 by %c15_i32_289 dim 1 : vector<8x16xf32>, i32 -> vector<8x16xf32>
    %cst_290 = arith.constant 0.000000e+00 : f32
    %1135 = vector.shape_cast %1128 : vector<1x16xi1> to vector<1x16xi1>
    %1136 = vector.broadcast %1135 : vector<1x16xi1> to vector<8x16xi1>
    %1137 = vector.broadcast %cst_290 : f32 to vector<8x16xf32>
    %1138 = arith.select %1136, %1137, %1134 : vector<8x16xi1>, vector<8x16xf32>
    %1139 = arith.addf %1133, %1093 : vector<8x16xf32>
    %1140 = arith.addf %1139, %1138 : vector<8x16xf32>
    %cst_291 = arith.constant 0.333333343 : f32
    %1141 = vector.broadcast %cst_291 : f32 to vector<8x16xf32>
    %1142 = arith.mulf %1140, %1141 : vector<8x16xf32>
    %c1_i32_292 = arith.constant 1 : i32
    %1143 = tpu.dynamic_rotate %1119 by %c1_i32_292 dim 1 : vector<8x16xf32>, i32 -> vector<8x16xf32>
    %cst_293 = arith.constant 0.000000e+00 : f32
    %1144 = vector.shape_cast %1126 : vector<1x16xi1> to vector<1x16xi1>
    %1145 = vector.broadcast %1144 : vector<1x16xi1> to vector<8x16xi1>
    %1146 = vector.broadcast %cst_293 : f32 to vector<8x16xf32>
    %1147 = arith.select %1145, %1146, %1143 : vector<8x16xi1>, vector<8x16xf32>
    %c15_i32_294 = arith.constant 15 : i32
    %1148 = tpu.dynamic_rotate %1119 by %c15_i32_294 dim 1 : vector<8x16xf32>, i32 -> vector<8x16xf32>
    %cst_295 = arith.constant 0.000000e+00 : f32
    %1149 = vector.shape_cast %1128 : vector<1x16xi1> to vector<1x16xi1>
    %1150 = vector.broadcast %1149 : vector<1x16xi1> to vector<8x16xi1>
    %1151 = vector.broadcast %cst_295 : f32 to vector<8x16xf32>
    %1152 = arith.select %1150, %1151, %1148 : vector<8x16xi1>, vector<8x16xf32>
    %1153 = arith.addf %1147, %1119 : vector<8x16xf32>
    %1154 = arith.addf %1153, %1152 : vector<8x16xf32>
    %cst_296 = arith.constant 0.333333343 : f32
    %1155 = vector.broadcast %cst_296 : f32 to vector<8x16xf32>
    %1156 = arith.mulf %1154, %1155 : vector<8x16xf32>
    %1157 = vector.extract_strided_slice %1120 {offsets = [0, 0, 0], sizes = [1, 8, 1], strides = [1, 1, 1]} : vector<3x8x1xf32> to vector<1x8x1xf32>
    %1158 = vector.shape_cast %1157 : vector<1x8x1xf32> to vector<8x1xf32>
    %1159 = vector.broadcast %1158 : vector<8x1xf32> to vector<8x16xf32>
    %1160 = arith.mulf %1142, %1159 : vector<8x16xf32>
    %1161 = vector.extract_strided_slice %1120 {offsets = [1, 0, 0], sizes = [1, 8, 1], strides = [1, 1, 1]} : vector<3x8x1xf32> to vector<1x8x1xf32>
    %1162 = vector.shape_cast %1161 : vector<1x8x1xf32> to vector<8x1xf32>
    %1163 = vector.broadcast %1162 : vector<8x1xf32> to vector<8x16xf32>
    %1164 = arith.mulf %1142, %1163 : vector<8x16xf32>
    %1165 = vector.extract_strided_slice %1120 {offsets = [2, 0, 0], sizes = [1, 8, 1], strides = [1, 1, 1]} : vector<3x8x1xf32> to vector<1x8x1xf32>
    %1166 = vector.shape_cast %1165 : vector<1x8x1xf32> to vector<8x1xf32>
    %1167 = vector.broadcast %1166 : vector<8x1xf32> to vector<8x16xf32>
    %1168 = arith.mulf %1142, %1167 : vector<8x16xf32>
    %1169 = arith.maximumf %1160, %1164 : vector<8x16xf32>
    %1170 = arith.maximumf %1169, %1168 : vector<8x16xf32>
    %1171 = arith.subf %1160, %1170 : vector<8x16xf32>
    %1172 = math.exp %1171 : vector<8x16xf32>
    %1173 = arith.subf %1164, %1170 : vector<8x16xf32>
    %1174 = math.exp %1173 : vector<8x16xf32>
    %1175 = arith.subf %1168, %1170 : vector<8x16xf32>
    %1176 = math.exp %1175 : vector<8x16xf32>
    %1177 = arith.addf %1172, %1174 : vector<8x16xf32>
    %1178 = arith.addf %1177, %1176 : vector<8x16xf32>
    %cst_297 = arith.constant 1.000000e+00 : f32
    %1179 = vector.broadcast %cst_297 : f32 to vector<8x16xf32>
    %1180 = arith.divf %1179, %1178 : vector<8x16xf32>
    %1181 = arith.mulf %1172, %1180 : vector<8x16xf32>
    %1182 = arith.mulf %1174, %1180 : vector<8x16xf32>
    %1183 = arith.mulf %1176, %1180 : vector<8x16xf32>
    %1184 = vector.extract_strided_slice %1120 {offsets = [0, 0, 0], sizes = [1, 8, 1], strides = [1, 1, 1]} : vector<3x8x1xf32> to vector<1x8x1xf32>
    %1185 = vector.shape_cast %1184 : vector<1x8x1xf32> to vector<8x1xf32>
    %1186 = vector.broadcast %1185 : vector<8x1xf32> to vector<8x16xf32>
    %1187 = arith.mulf %1156, %1186 : vector<8x16xf32>
    %1188 = vector.extract_strided_slice %1120 {offsets = [1, 0, 0], sizes = [1, 8, 1], strides = [1, 1, 1]} : vector<3x8x1xf32> to vector<1x8x1xf32>
    %1189 = vector.shape_cast %1188 : vector<1x8x1xf32> to vector<8x1xf32>
    %1190 = vector.broadcast %1189 : vector<8x1xf32> to vector<8x16xf32>
    %1191 = arith.mulf %1156, %1190 : vector<8x16xf32>
    %1192 = vector.extract_strided_slice %1120 {offsets = [2, 0, 0], sizes = [1, 8, 1], strides = [1, 1, 1]} : vector<3x8x1xf32> to vector<1x8x1xf32>
    %1193 = vector.shape_cast %1192 : vector<1x8x1xf32> to vector<8x1xf32>
    %1194 = vector.broadcast %1193 : vector<8x1xf32> to vector<8x16xf32>
    %1195 = arith.mulf %1156, %1194 : vector<8x16xf32>
    %1196 = arith.maximumf %1187, %1191 : vector<8x16xf32>
    %1197 = arith.maximumf %1196, %1195 : vector<8x16xf32>
    %1198 = arith.subf %1187, %1197 : vector<8x16xf32>
    %1199 = math.exp %1198 : vector<8x16xf32>
    %1200 = arith.subf %1191, %1197 : vector<8x16xf32>
    %1201 = math.exp %1200 : vector<8x16xf32>
    %1202 = arith.subf %1195, %1197 : vector<8x16xf32>
    %1203 = math.exp %1202 : vector<8x16xf32>
    %1204 = arith.addf %1199, %1201 : vector<8x16xf32>
    %1205 = arith.addf %1204, %1203 : vector<8x16xf32>
    %cst_298 = arith.constant 1.000000e+00 : f32
    %1206 = vector.broadcast %cst_298 : f32 to vector<8x16xf32>
    %1207 = arith.divf %1206, %1205 : vector<8x16xf32>
    %1208 = arith.mulf %1199, %1207 : vector<8x16xf32>
    %1209 = arith.mulf %1201, %1207 : vector<8x16xf32>
    %1210 = arith.mulf %1203, %1207 : vector<8x16xf32>
    %1211 = vector.extract_strided_slice %1121 {offsets = [0, 0, 0, 0], sizes = [1, 1, 8, 1], strides = [1, 1, 1, 1]} : vector<3x3x8x1xf32> to vector<1x1x8x1xf32>
    %1212 = vector.shape_cast %1211 : vector<1x1x8x1xf32> to vector<8x1xf32>
    %1213 = vector.broadcast %1212 : vector<8x1xf32> to vector<8x16xf32>
    %1214 = arith.mulf %1133, %1213 : vector<8x16xf32>
    %1215 = vector.extract_strided_slice %1121 {offsets = [0, 1, 0, 0], sizes = [1, 1, 8, 1], strides = [1, 1, 1, 1]} : vector<3x3x8x1xf32> to vector<1x1x8x1xf32>
    %1216 = vector.shape_cast %1215 : vector<1x1x8x1xf32> to vector<8x1xf32>
    %1217 = vector.broadcast %1216 : vector<8x1xf32> to vector<8x16xf32>
    %1218 = arith.mulf %1093, %1217 : vector<8x16xf32>
    %1219 = arith.addf %1214, %1218 : vector<8x16xf32>
    %1220 = vector.extract_strided_slice %1121 {offsets = [0, 2, 0, 0], sizes = [1, 1, 8, 1], strides = [1, 1, 1, 1]} : vector<3x3x8x1xf32> to vector<1x1x8x1xf32>
    %1221 = vector.shape_cast %1220 : vector<1x1x8x1xf32> to vector<8x1xf32>
    %1222 = vector.broadcast %1221 : vector<8x1xf32> to vector<8x16xf32>
    %1223 = arith.mulf %1138, %1222 : vector<8x16xf32>
    %1224 = arith.addf %1219, %1223 : vector<8x16xf32>
    %1225 = vector.extract_strided_slice %1121 {offsets = [0, 0, 0, 0], sizes = [1, 1, 8, 1], strides = [1, 1, 1, 1]} : vector<3x3x8x1xf32> to vector<1x1x8x1xf32>
    %1226 = vector.shape_cast %1225 : vector<1x1x8x1xf32> to vector<8x1xf32>
    %1227 = vector.broadcast %1226 : vector<8x1xf32> to vector<8x16xf32>
    %1228 = arith.mulf %1147, %1227 : vector<8x16xf32>
    %1229 = vector.extract_strided_slice %1121 {offsets = [0, 1, 0, 0], sizes = [1, 1, 8, 1], strides = [1, 1, 1, 1]} : vector<3x3x8x1xf32> to vector<1x1x8x1xf32>
    %1230 = vector.shape_cast %1229 : vector<1x1x8x1xf32> to vector<8x1xf32>
    %1231 = vector.broadcast %1230 : vector<8x1xf32> to vector<8x16xf32>
    %1232 = arith.mulf %1119, %1231 : vector<8x16xf32>
    %1233 = arith.addf %1228, %1232 : vector<8x16xf32>
    %1234 = vector.extract_strided_slice %1121 {offsets = [0, 2, 0, 0], sizes = [1, 1, 8, 1], strides = [1, 1, 1, 1]} : vector<3x3x8x1xf32> to vector<1x1x8x1xf32>
    %1235 = vector.shape_cast %1234 : vector<1x1x8x1xf32> to vector<8x1xf32>
    %1236 = vector.broadcast %1235 : vector<8x1xf32> to vector<8x16xf32>
    %1237 = arith.mulf %1152, %1236 : vector<8x16xf32>
    %1238 = arith.addf %1233, %1237 : vector<8x16xf32>
    %cst_299 = arith.constant dense<0.000000e+00> : vector<8xf32>
    %1239 = vector.multi_reduction <add>, %1224, %cst_299 [1] : vector<8x16xf32> to vector<8xf32>
    %1240 = vector.shape_cast %1239 : vector<8xf32> to vector<8x1xf32>
    %cst_300 = arith.constant dense<0.000000e+00> : vector<8xf32>
    %1241 = vector.multi_reduction <add>, %1238, %cst_300 [1] : vector<8x16xf32> to vector<8xf32>
    %1242 = vector.shape_cast %1241 : vector<8xf32> to vector<8x1xf32>
    %1243 = arith.addf %1240, %1242 : vector<8x1xf32>
    %cst_301 = arith.constant 3.125000e-02 : f32
    %1244 = vector.broadcast %cst_301 : f32 to vector<8x1xf32>
    %1245 = arith.mulf %1243, %1244 : vector<8x1xf32>
    %1246 = vector.broadcast %1245 : vector<8x1xf32> to vector<8x16xf32>
    %1247 = arith.subf %1224, %1246 : vector<8x16xf32>
    %1248 = arith.mulf %1247, %1247 : vector<8x16xf32>
    %cst_302 = arith.constant dense<0.000000e+00> : vector<8xf32>
    %1249 = vector.multi_reduction <add>, %1248, %cst_302 [1] : vector<8x16xf32> to vector<8xf32>
    %1250 = vector.shape_cast %1249 : vector<8xf32> to vector<8x1xf32>
    %1251 = vector.broadcast %1245 : vector<8x1xf32> to vector<8x16xf32>
    %1252 = arith.subf %1238, %1251 : vector<8x16xf32>
    %1253 = arith.mulf %1252, %1252 : vector<8x16xf32>
    %cst_303 = arith.constant dense<0.000000e+00> : vector<8xf32>
    %1254 = vector.multi_reduction <add>, %1253, %cst_303 [1] : vector<8x16xf32> to vector<8xf32>
    %1255 = vector.shape_cast %1254 : vector<8xf32> to vector<8x1xf32>
    %1256 = arith.addf %1250, %1255 : vector<8x1xf32>
    %cst_304 = arith.constant 3.125000e-02 : f32
    %1257 = vector.broadcast %cst_304 : f32 to vector<8x1xf32>
    %1258 = arith.mulf %1256, %1257 : vector<8x1xf32>
    %1259 = vector.extract_strided_slice %1122 {offsets = [0, 0, 0], sizes = [1, 8, 1], strides = [1, 1, 1]} : vector<3x8x1xf32> to vector<1x8x1xf32>
    %1260 = vector.shape_cast %1259 : vector<1x8x1xf32> to vector<8x1xf32>
    %cst_305 = arith.constant 9.99999974E-6 : f32
    %1261 = vector.broadcast %cst_305 : f32 to vector<8x1xf32>
    %1262 = arith.addf %1258, %1261 : vector<8x1xf32>
    %1263 = math.rsqrt %1262 : vector<8x1xf32>
    %1264 = arith.mulf %1260, %1263 : vector<8x1xf32>
    %1265 = vector.extract_strided_slice %1123 {offsets = [0, 0, 0], sizes = [1, 8, 1], strides = [1, 1, 1]} : vector<3x8x1xf32> to vector<1x8x1xf32>
    %1266 = vector.shape_cast %1265 : vector<1x8x1xf32> to vector<8x1xf32>
    %1267 = arith.mulf %1245, %1264 : vector<8x1xf32>
    %1268 = arith.subf %1266, %1267 : vector<8x1xf32>
    %1269 = vector.broadcast %1264 : vector<8x1xf32> to vector<8x16xf32>
    %1270 = arith.mulf %1224, %1269 : vector<8x16xf32>
    %1271 = vector.broadcast %1268 : vector<8x1xf32> to vector<8x16xf32>
    %1272 = arith.addf %1270, %1271 : vector<8x16xf32>
    %cst_306 = arith.constant 0.000000e+00 : f32
    %1273 = vector.broadcast %cst_306 : f32 to vector<8x16xf32>
    %1274 = arith.maximumf %1272, %1273 : vector<8x16xf32>
    %1275 = arith.mulf %1274, %1181 : vector<8x16xf32>
    %1276 = vector.broadcast %1264 : vector<8x1xf32> to vector<8x16xf32>
    %1277 = arith.mulf %1238, %1276 : vector<8x16xf32>
    %1278 = vector.broadcast %1268 : vector<8x1xf32> to vector<8x16xf32>
    %1279 = arith.addf %1277, %1278 : vector<8x16xf32>
    %cst_307 = arith.constant 0.000000e+00 : f32
    %1280 = vector.broadcast %cst_307 : f32 to vector<8x16xf32>
    %1281 = arith.maximumf %1279, %1280 : vector<8x16xf32>
    %1282 = arith.mulf %1281, %1208 : vector<8x16xf32>
    %1283 = vector.extract_strided_slice %1121 {offsets = [1, 0, 0, 0], sizes = [1, 1, 8, 1], strides = [1, 1, 1, 1]} : vector<3x3x8x1xf32> to vector<1x1x8x1xf32>
    %1284 = vector.shape_cast %1283 : vector<1x1x8x1xf32> to vector<8x1xf32>
    %1285 = vector.broadcast %1284 : vector<8x1xf32> to vector<8x16xf32>
    %1286 = arith.mulf %1133, %1285 : vector<8x16xf32>
    %1287 = vector.extract_strided_slice %1121 {offsets = [1, 1, 0, 0], sizes = [1, 1, 8, 1], strides = [1, 1, 1, 1]} : vector<3x3x8x1xf32> to vector<1x1x8x1xf32>
    %1288 = vector.shape_cast %1287 : vector<1x1x8x1xf32> to vector<8x1xf32>
    %1289 = vector.broadcast %1288 : vector<8x1xf32> to vector<8x16xf32>
    %1290 = arith.mulf %1093, %1289 : vector<8x16xf32>
    %1291 = arith.addf %1286, %1290 : vector<8x16xf32>
    %1292 = vector.extract_strided_slice %1121 {offsets = [1, 2, 0, 0], sizes = [1, 1, 8, 1], strides = [1, 1, 1, 1]} : vector<3x3x8x1xf32> to vector<1x1x8x1xf32>
    %1293 = vector.shape_cast %1292 : vector<1x1x8x1xf32> to vector<8x1xf32>
    %1294 = vector.broadcast %1293 : vector<8x1xf32> to vector<8x16xf32>
    %1295 = arith.mulf %1138, %1294 : vector<8x16xf32>
    %1296 = arith.addf %1291, %1295 : vector<8x16xf32>
    %1297 = vector.extract_strided_slice %1121 {offsets = [1, 0, 0, 0], sizes = [1, 1, 8, 1], strides = [1, 1, 1, 1]} : vector<3x3x8x1xf32> to vector<1x1x8x1xf32>
    %1298 = vector.shape_cast %1297 : vector<1x1x8x1xf32> to vector<8x1xf32>
    %1299 = vector.broadcast %1298 : vector<8x1xf32> to vector<8x16xf32>
    %1300 = arith.mulf %1147, %1299 : vector<8x16xf32>
    %1301 = vector.extract_strided_slice %1121 {offsets = [1, 1, 0, 0], sizes = [1, 1, 8, 1], strides = [1, 1, 1, 1]} : vector<3x3x8x1xf32> to vector<1x1x8x1xf32>
    %1302 = vector.shape_cast %1301 : vector<1x1x8x1xf32> to vector<8x1xf32>
    %1303 = vector.broadcast %1302 : vector<8x1xf32> to vector<8x16xf32>
    %1304 = arith.mulf %1119, %1303 : vector<8x16xf32>
    %1305 = arith.addf %1300, %1304 : vector<8x16xf32>
    %1306 = vector.extract_strided_slice %1121 {offsets = [1, 2, 0, 0], sizes = [1, 1, 8, 1], strides = [1, 1, 1, 1]} : vector<3x3x8x1xf32> to vector<1x1x8x1xf32>
    %1307 = vector.shape_cast %1306 : vector<1x1x8x1xf32> to vector<8x1xf32>
    %1308 = vector.broadcast %1307 : vector<8x1xf32> to vector<8x16xf32>
    %1309 = arith.mulf %1152, %1308 : vector<8x16xf32>
    %1310 = arith.addf %1305, %1309 : vector<8x16xf32>
    %cst_308 = arith.constant dense<0.000000e+00> : vector<8xf32>
    %1311 = vector.multi_reduction <add>, %1296, %cst_308 [1] : vector<8x16xf32> to vector<8xf32>
    %1312 = vector.shape_cast %1311 : vector<8xf32> to vector<8x1xf32>
    %cst_309 = arith.constant dense<0.000000e+00> : vector<8xf32>
    %1313 = vector.multi_reduction <add>, %1310, %cst_309 [1] : vector<8x16xf32> to vector<8xf32>
    %1314 = vector.shape_cast %1313 : vector<8xf32> to vector<8x1xf32>
    %1315 = arith.addf %1312, %1314 : vector<8x1xf32>
    %cst_310 = arith.constant 3.125000e-02 : f32
    %1316 = vector.broadcast %cst_310 : f32 to vector<8x1xf32>
    %1317 = arith.mulf %1315, %1316 : vector<8x1xf32>
    %1318 = vector.broadcast %1317 : vector<8x1xf32> to vector<8x16xf32>
    %1319 = arith.subf %1296, %1318 : vector<8x16xf32>
    %1320 = arith.mulf %1319, %1319 : vector<8x16xf32>
    %cst_311 = arith.constant dense<0.000000e+00> : vector<8xf32>
    %1321 = vector.multi_reduction <add>, %1320, %cst_311 [1] : vector<8x16xf32> to vector<8xf32>
    %1322 = vector.shape_cast %1321 : vector<8xf32> to vector<8x1xf32>
    %1323 = vector.broadcast %1317 : vector<8x1xf32> to vector<8x16xf32>
    %1324 = arith.subf %1310, %1323 : vector<8x16xf32>
    %1325 = arith.mulf %1324, %1324 : vector<8x16xf32>
    %cst_312 = arith.constant dense<0.000000e+00> : vector<8xf32>
    %1326 = vector.multi_reduction <add>, %1325, %cst_312 [1] : vector<8x16xf32> to vector<8xf32>
    %1327 = vector.shape_cast %1326 : vector<8xf32> to vector<8x1xf32>
    %1328 = arith.addf %1322, %1327 : vector<8x1xf32>
    %cst_313 = arith.constant 3.125000e-02 : f32
    %1329 = vector.broadcast %cst_313 : f32 to vector<8x1xf32>
    %1330 = arith.mulf %1328, %1329 : vector<8x1xf32>
    %1331 = vector.extract_strided_slice %1122 {offsets = [1, 0, 0], sizes = [1, 8, 1], strides = [1, 1, 1]} : vector<3x8x1xf32> to vector<1x8x1xf32>
    %1332 = vector.shape_cast %1331 : vector<1x8x1xf32> to vector<8x1xf32>
    %cst_314 = arith.constant 9.99999974E-6 : f32
    %1333 = vector.broadcast %cst_314 : f32 to vector<8x1xf32>
    %1334 = arith.addf %1330, %1333 : vector<8x1xf32>
    %1335 = math.rsqrt %1334 : vector<8x1xf32>
    %1336 = arith.mulf %1332, %1335 : vector<8x1xf32>
    %1337 = vector.extract_strided_slice %1123 {offsets = [1, 0, 0], sizes = [1, 8, 1], strides = [1, 1, 1]} : vector<3x8x1xf32> to vector<1x8x1xf32>
    %1338 = vector.shape_cast %1337 : vector<1x8x1xf32> to vector<8x1xf32>
    %1339 = arith.mulf %1317, %1336 : vector<8x1xf32>
    %1340 = arith.subf %1338, %1339 : vector<8x1xf32>
    %1341 = vector.broadcast %1336 : vector<8x1xf32> to vector<8x16xf32>
    %1342 = arith.mulf %1296, %1341 : vector<8x16xf32>
    %1343 = vector.broadcast %1340 : vector<8x1xf32> to vector<8x16xf32>
    %1344 = arith.addf %1342, %1343 : vector<8x16xf32>
    %cst_315 = arith.constant 0.000000e+00 : f32
    %1345 = vector.broadcast %cst_315 : f32 to vector<8x16xf32>
    %1346 = arith.maximumf %1344, %1345 : vector<8x16xf32>
    %1347 = arith.mulf %1346, %1182 : vector<8x16xf32>
    %1348 = vector.broadcast %1336 : vector<8x1xf32> to vector<8x16xf32>
    %1349 = arith.mulf %1310, %1348 : vector<8x16xf32>
    %1350 = vector.broadcast %1340 : vector<8x1xf32> to vector<8x16xf32>
    %1351 = arith.addf %1349, %1350 : vector<8x16xf32>
    %cst_316 = arith.constant 0.000000e+00 : f32
    %1352 = vector.broadcast %cst_316 : f32 to vector<8x16xf32>
    %1353 = arith.maximumf %1351, %1352 : vector<8x16xf32>
    %1354 = arith.mulf %1353, %1209 : vector<8x16xf32>
    %1355 = vector.extract_strided_slice %1121 {offsets = [2, 0, 0, 0], sizes = [1, 1, 8, 1], strides = [1, 1, 1, 1]} : vector<3x3x8x1xf32> to vector<1x1x8x1xf32>
    %1356 = vector.shape_cast %1355 : vector<1x1x8x1xf32> to vector<8x1xf32>
    %1357 = vector.broadcast %1356 : vector<8x1xf32> to vector<8x16xf32>
    %1358 = arith.mulf %1133, %1357 : vector<8x16xf32>
    %1359 = vector.extract_strided_slice %1121 {offsets = [2, 1, 0, 0], sizes = [1, 1, 8, 1], strides = [1, 1, 1, 1]} : vector<3x3x8x1xf32> to vector<1x1x8x1xf32>
    %1360 = vector.shape_cast %1359 : vector<1x1x8x1xf32> to vector<8x1xf32>
    %1361 = vector.broadcast %1360 : vector<8x1xf32> to vector<8x16xf32>
    %1362 = arith.mulf %1093, %1361 : vector<8x16xf32>
    %1363 = arith.addf %1358, %1362 : vector<8x16xf32>
    %1364 = vector.extract_strided_slice %1121 {offsets = [2, 2, 0, 0], sizes = [1, 1, 8, 1], strides = [1, 1, 1, 1]} : vector<3x3x8x1xf32> to vector<1x1x8x1xf32>
    %1365 = vector.shape_cast %1364 : vector<1x1x8x1xf32> to vector<8x1xf32>
    %1366 = vector.broadcast %1365 : vector<8x1xf32> to vector<8x16xf32>
    %1367 = arith.mulf %1138, %1366 : vector<8x16xf32>
    %1368 = arith.addf %1363, %1367 : vector<8x16xf32>
    %1369 = vector.extract_strided_slice %1121 {offsets = [2, 0, 0, 0], sizes = [1, 1, 8, 1], strides = [1, 1, 1, 1]} : vector<3x3x8x1xf32> to vector<1x1x8x1xf32>
    %1370 = vector.shape_cast %1369 : vector<1x1x8x1xf32> to vector<8x1xf32>
    %1371 = vector.broadcast %1370 : vector<8x1xf32> to vector<8x16xf32>
    %1372 = arith.mulf %1147, %1371 : vector<8x16xf32>
    %1373 = vector.extract_strided_slice %1121 {offsets = [2, 1, 0, 0], sizes = [1, 1, 8, 1], strides = [1, 1, 1, 1]} : vector<3x3x8x1xf32> to vector<1x1x8x1xf32>
    %1374 = vector.shape_cast %1373 : vector<1x1x8x1xf32> to vector<8x1xf32>
    %1375 = vector.broadcast %1374 : vector<8x1xf32> to vector<8x16xf32>
    %1376 = arith.mulf %1119, %1375 : vector<8x16xf32>
    %1377 = arith.addf %1372, %1376 : vector<8x16xf32>
    %1378 = vector.extract_strided_slice %1121 {offsets = [2, 2, 0, 0], sizes = [1, 1, 8, 1], strides = [1, 1, 1, 1]} : vector<3x3x8x1xf32> to vector<1x1x8x1xf32>
    %1379 = vector.shape_cast %1378 : vector<1x1x8x1xf32> to vector<8x1xf32>
    %1380 = vector.broadcast %1379 : vector<8x1xf32> to vector<8x16xf32>
    %1381 = arith.mulf %1152, %1380 : vector<8x16xf32>
    %1382 = arith.addf %1377, %1381 : vector<8x16xf32>
    %cst_317 = arith.constant dense<0.000000e+00> : vector<8xf32>
    %1383 = vector.multi_reduction <add>, %1368, %cst_317 [1] : vector<8x16xf32> to vector<8xf32>
    %1384 = vector.shape_cast %1383 : vector<8xf32> to vector<8x1xf32>
    %cst_318 = arith.constant dense<0.000000e+00> : vector<8xf32>
    %1385 = vector.multi_reduction <add>, %1382, %cst_318 [1] : vector<8x16xf32> to vector<8xf32>
    %1386 = vector.shape_cast %1385 : vector<8xf32> to vector<8x1xf32>
    %1387 = arith.addf %1384, %1386 : vector<8x1xf32>
    %cst_319 = arith.constant 3.125000e-02 : f32
    %1388 = vector.broadcast %cst_319 : f32 to vector<8x1xf32>
    %1389 = arith.mulf %1387, %1388 : vector<8x1xf32>
    %1390 = vector.broadcast %1389 : vector<8x1xf32> to vector<8x16xf32>
    %1391 = arith.subf %1368, %1390 : vector<8x16xf32>
    %1392 = arith.mulf %1391, %1391 : vector<8x16xf32>
    %cst_320 = arith.constant dense<0.000000e+00> : vector<8xf32>
    %1393 = vector.multi_reduction <add>, %1392, %cst_320 [1] : vector<8x16xf32> to vector<8xf32>
    %1394 = vector.shape_cast %1393 : vector<8xf32> to vector<8x1xf32>
    %1395 = vector.broadcast %1389 : vector<8x1xf32> to vector<8x16xf32>
    %1396 = arith.subf %1382, %1395 : vector<8x16xf32>
    %1397 = arith.mulf %1396, %1396 : vector<8x16xf32>
    %cst_321 = arith.constant dense<0.000000e+00> : vector<8xf32>
    %1398 = vector.multi_reduction <add>, %1397, %cst_321 [1] : vector<8x16xf32> to vector<8xf32>
    %1399 = vector.shape_cast %1398 : vector<8xf32> to vector<8x1xf32>
    %1400 = arith.addf %1394, %1399 : vector<8x1xf32>
    %cst_322 = arith.constant 3.125000e-02 : f32
    %1401 = vector.broadcast %cst_322 : f32 to vector<8x1xf32>
    %1402 = arith.mulf %1400, %1401 : vector<8x1xf32>
    %1403 = vector.extract_strided_slice %1122 {offsets = [2, 0, 0], sizes = [1, 8, 1], strides = [1, 1, 1]} : vector<3x8x1xf32> to vector<1x8x1xf32>
    %1404 = vector.shape_cast %1403 : vector<1x8x1xf32> to vector<8x1xf32>
    %cst_323 = arith.constant 9.99999974E-6 : f32
    %1405 = vector.broadcast %cst_323 : f32 to vector<8x1xf32>
    %1406 = arith.addf %1402, %1405 : vector<8x1xf32>
    %1407 = math.rsqrt %1406 : vector<8x1xf32>
    %1408 = arith.mulf %1404, %1407 : vector<8x1xf32>
    %1409 = vector.extract_strided_slice %1123 {offsets = [2, 0, 0], sizes = [1, 8, 1], strides = [1, 1, 1]} : vector<3x8x1xf32> to vector<1x8x1xf32>
    %1410 = vector.shape_cast %1409 : vector<1x8x1xf32> to vector<8x1xf32>
    %1411 = arith.mulf %1389, %1408 : vector<8x1xf32>
    %1412 = arith.subf %1410, %1411 : vector<8x1xf32>
    %1413 = vector.broadcast %1408 : vector<8x1xf32> to vector<8x16xf32>
    %1414 = arith.mulf %1368, %1413 : vector<8x16xf32>
    %1415 = vector.broadcast %1412 : vector<8x1xf32> to vector<8x16xf32>
    %1416 = arith.addf %1414, %1415 : vector<8x16xf32>
    %cst_324 = arith.constant 0.000000e+00 : f32
    %1417 = vector.broadcast %cst_324 : f32 to vector<8x16xf32>
    %1418 = arith.maximumf %1416, %1417 : vector<8x16xf32>
    %1419 = arith.mulf %1418, %1183 : vector<8x16xf32>
    %1420 = vector.broadcast %1408 : vector<8x1xf32> to vector<8x16xf32>
    %1421 = arith.mulf %1382, %1420 : vector<8x16xf32>
    %1422 = vector.broadcast %1412 : vector<8x1xf32> to vector<8x16xf32>
    %1423 = arith.addf %1421, %1422 : vector<8x16xf32>
    %cst_325 = arith.constant 0.000000e+00 : f32
    %1424 = vector.broadcast %cst_325 : f32 to vector<8x16xf32>
    %1425 = arith.maximumf %1423, %1424 : vector<8x16xf32>
    %1426 = arith.mulf %1425, %1210 : vector<8x16xf32>
    %c0_326 = arith.constant 0 : index
    %c0_327 = arith.constant 0 : index
    %1427 = vector.load %arg28[%c0_326, %c0_327] : memref<16x1xf32, #tpu.memory_space<vmem>>, vector<16x1xf32>
    %c0_328 = arith.constant 0 : index
    %c0_329 = arith.constant 0 : index
    %c0_330 = arith.constant 0 : index
    %1428 = vector.load %arg29[%c0_328, %c0_329, %c0_330] : memref<3x16x48xf32, #tpu.memory_space<vmem>>, vector<1x16x48xf32>
    %1429 = vector.shape_cast %1428 : vector<1x16x48xf32> to vector<16x48xf32>
    %c1_331 = arith.constant 1 : index
    %c0_332 = arith.constant 0 : index
    %c0_333 = arith.constant 0 : index
    %1430 = vector.load %arg29[%c1_331, %c0_332, %c0_333] : memref<3x16x48xf32, #tpu.memory_space<vmem>>, vector<1x16x48xf32>
    %1431 = vector.shape_cast %1430 : vector<1x16x48xf32> to vector<16x48xf32>
    %c2_334 = arith.constant 2 : index
    %c0_335 = arith.constant 0 : index
    %c0_336 = arith.constant 0 : index
    %1432 = vector.load %arg29[%c2_334, %c0_335, %c0_336] : memref<3x16x48xf32, #tpu.memory_space<vmem>>, vector<1x16x48xf32>
    %1433 = vector.shape_cast %1432 : vector<1x16x48xf32> to vector<16x48xf32>
    %c0_337 = arith.constant 0 : index
    %c0_338 = arith.constant 0 : index
    %c0_339 = arith.constant 0 : index
    %1434 = vector.load %arg27[%c0_337, %c0_338, %c0_339] : memref<3x16x8xf32, #tpu.memory_space<vmem>>, vector<1x16x8xf32>
    %1435 = vector.shape_cast %1434 : vector<1x16x8xf32> to vector<16x8xf32>
    %c1_340 = arith.constant 1 : index
    %c0_341 = arith.constant 0 : index
    %c0_342 = arith.constant 0 : index
    %1436 = vector.load %arg27[%c1_340, %c0_341, %c0_342] : memref<3x16x8xf32, #tpu.memory_space<vmem>>, vector<1x16x8xf32>
    %1437 = vector.shape_cast %1436 : vector<1x16x8xf32> to vector<16x8xf32>
    %c2_343 = arith.constant 2 : index
    %c0_344 = arith.constant 0 : index
    %c0_345 = arith.constant 0 : index
    %1438 = vector.load %arg27[%c2_343, %c0_344, %c0_345] : memref<3x16x8xf32, #tpu.memory_space<vmem>>, vector<1x16x8xf32>
    %1439 = vector.shape_cast %1438 : vector<1x16x8xf32> to vector<16x8xf32>
    %cst_346 = arith.constant dense<0.000000e+00> : vector<8x48xf32>
    %1440 = tpu.matmul %1275, %1429, %cst_346 {dimension_numbers = #tpu.dot_dimension_numbers<[1], [0], [0], [1], [0, 0, 1, 1], [], []>} : vector<8x16xf32>, vector<16x48xf32>, vector<8x48xf32> -> vector<8x48xf32>
    %cst_347 = arith.constant dense<0.000000e+00> : vector<8x48xf32>
    %1441 = tpu.matmul %1347, %1431, %cst_347 {dimension_numbers = #tpu.dot_dimension_numbers<[1], [0], [0], [1], [0, 0, 1, 1], [], []>} : vector<8x16xf32>, vector<16x48xf32>, vector<8x48xf32> -> vector<8x48xf32>
    %1442 = arith.addf %1440, %1441 : vector<8x48xf32>
    %cst_348 = arith.constant dense<0.000000e+00> : vector<8x48xf32>
    %1443 = tpu.matmul %1419, %1433, %cst_348 {dimension_numbers = #tpu.dot_dimension_numbers<[1], [0], [0], [1], [0, 0, 1, 1], [], []>} : vector<8x16xf32>, vector<16x48xf32>, vector<8x48xf32> -> vector<8x48xf32>
    %1444 = arith.addf %1442, %1443 : vector<8x48xf32>
    %1445 = vector.extract_strided_slice %1444 {offsets = [0, 0], sizes = [8, 8], strides = [1, 1]} : vector<8x48xf32> to vector<8x8xf32>
    %cst_349 = arith.constant dense<0.000000e+00> : vector<16x8xf32>
    %1446 = tpu.matmul %1435, %1445, %cst_349 {dimension_numbers = #tpu.dot_dimension_numbers<[1], [0], [0], [1], [0, 0, 1, 1], [], []>} : vector<16x8xf32>, vector<8x8xf32>, vector<16x8xf32> -> vector<16x8xf32>
    %1447 = vector.broadcast %1427 : vector<16x1xf32> to vector<16x8xf32>
    %1448 = arith.addf %1447, %1446 : vector<16x8xf32>
    %1449 = vector.extract_strided_slice %1444 {offsets = [0, 16], sizes = [8, 8], strides = [1, 1]} : vector<8x48xf32> to vector<8x8xf32>
    %cst_350 = arith.constant dense<0.000000e+00> : vector<16x8xf32>
    %1450 = tpu.matmul %1437, %1449, %cst_350 {dimension_numbers = #tpu.dot_dimension_numbers<[1], [0], [0], [1], [0, 0, 1, 1], [], []>} : vector<16x8xf32>, vector<8x8xf32>, vector<16x8xf32> -> vector<16x8xf32>
    %1451 = arith.addf %1448, %1450 : vector<16x8xf32>
    %1452 = vector.extract_strided_slice %1444 {offsets = [0, 32], sizes = [8, 8], strides = [1, 1]} : vector<8x48xf32> to vector<8x8xf32>
    %cst_351 = arith.constant dense<0.000000e+00> : vector<16x8xf32>
    %1453 = tpu.matmul %1439, %1452, %cst_351 {dimension_numbers = #tpu.dot_dimension_numbers<[1], [0], [0], [1], [0, 0, 1, 1], [], []>} : vector<16x8xf32>, vector<8x8xf32>, vector<16x8xf32> -> vector<16x8xf32>
    %1454 = arith.addf %1451, %1453 : vector<16x8xf32>
    %1455 = vector.extract_strided_slice %1444 {offsets = [0, 8], sizes = [8, 8], strides = [1, 1]} : vector<8x48xf32> to vector<8x8xf32>
    %cst_352 = arith.constant dense<0.000000e+00> : vector<16x8xf32>
    %1456 = tpu.matmul %1435, %1455, %cst_352 {dimension_numbers = #tpu.dot_dimension_numbers<[1], [0], [0], [1], [0, 0, 1, 1], [], []>} : vector<16x8xf32>, vector<8x8xf32>, vector<16x8xf32> -> vector<16x8xf32>
    %1457 = vector.broadcast %1427 : vector<16x1xf32> to vector<16x8xf32>
    %1458 = arith.addf %1457, %1456 : vector<16x8xf32>
    %1459 = vector.extract_strided_slice %1444 {offsets = [0, 24], sizes = [8, 8], strides = [1, 1]} : vector<8x48xf32> to vector<8x8xf32>
    %cst_353 = arith.constant dense<0.000000e+00> : vector<16x8xf32>
    %1460 = tpu.matmul %1437, %1459, %cst_353 {dimension_numbers = #tpu.dot_dimension_numbers<[1], [0], [0], [1], [0, 0, 1, 1], [], []>} : vector<16x8xf32>, vector<8x8xf32>, vector<16x8xf32> -> vector<16x8xf32>
    %1461 = arith.addf %1458, %1460 : vector<16x8xf32>
    %1462 = vector.extract_strided_slice %1444 {offsets = [0, 40], sizes = [8, 8], strides = [1, 1]} : vector<8x48xf32> to vector<8x8xf32>
    %cst_354 = arith.constant dense<0.000000e+00> : vector<16x8xf32>
    %1463 = tpu.matmul %1439, %1462, %cst_354 {dimension_numbers = #tpu.dot_dimension_numbers<[1], [0], [0], [1], [0, 0, 1, 1], [], []>} : vector<16x8xf32>, vector<8x8xf32>, vector<16x8xf32> -> vector<16x8xf32>
    %1464 = arith.addf %1461, %1463 : vector<16x8xf32>
    %1465 = arith.maximumf %1454, %1464 : vector<16x8xf32>
    %cst_355 = arith.constant dense<0.000000e+00> : vector<8x48xf32>
    %1466 = tpu.matmul %1282, %1429, %cst_355 {dimension_numbers = #tpu.dot_dimension_numbers<[1], [0], [0], [1], [0, 0, 1, 1], [], []>} : vector<8x16xf32>, vector<16x48xf32>, vector<8x48xf32> -> vector<8x48xf32>
    %cst_356 = arith.constant dense<0.000000e+00> : vector<8x48xf32>
    %1467 = tpu.matmul %1354, %1431, %cst_356 {dimension_numbers = #tpu.dot_dimension_numbers<[1], [0], [0], [1], [0, 0, 1, 1], [], []>} : vector<8x16xf32>, vector<16x48xf32>, vector<8x48xf32> -> vector<8x48xf32>
    %1468 = arith.addf %1466, %1467 : vector<8x48xf32>
    %cst_357 = arith.constant dense<0.000000e+00> : vector<8x48xf32>
    %1469 = tpu.matmul %1426, %1433, %cst_357 {dimension_numbers = #tpu.dot_dimension_numbers<[1], [0], [0], [1], [0, 0, 1, 1], [], []>} : vector<8x16xf32>, vector<16x48xf32>, vector<8x48xf32> -> vector<8x48xf32>
    %1470 = arith.addf %1468, %1469 : vector<8x48xf32>
    %1471 = vector.extract_strided_slice %1470 {offsets = [0, 0], sizes = [8, 8], strides = [1, 1]} : vector<8x48xf32> to vector<8x8xf32>
    %cst_358 = arith.constant dense<0.000000e+00> : vector<16x8xf32>
    %1472 = tpu.matmul %1435, %1471, %cst_358 {dimension_numbers = #tpu.dot_dimension_numbers<[1], [0], [0], [1], [0, 0, 1, 1], [], []>} : vector<16x8xf32>, vector<8x8xf32>, vector<16x8xf32> -> vector<16x8xf32>
    %1473 = vector.broadcast %1427 : vector<16x1xf32> to vector<16x8xf32>
    %1474 = arith.addf %1473, %1472 : vector<16x8xf32>
    %1475 = vector.extract_strided_slice %1470 {offsets = [0, 16], sizes = [8, 8], strides = [1, 1]} : vector<8x48xf32> to vector<8x8xf32>
    %cst_359 = arith.constant dense<0.000000e+00> : vector<16x8xf32>
    %1476 = tpu.matmul %1437, %1475, %cst_359 {dimension_numbers = #tpu.dot_dimension_numbers<[1], [0], [0], [1], [0, 0, 1, 1], [], []>} : vector<16x8xf32>, vector<8x8xf32>, vector<16x8xf32> -> vector<16x8xf32>
    %1477 = arith.addf %1474, %1476 : vector<16x8xf32>
    %1478 = vector.extract_strided_slice %1470 {offsets = [0, 32], sizes = [8, 8], strides = [1, 1]} : vector<8x48xf32> to vector<8x8xf32>
    %cst_360 = arith.constant dense<0.000000e+00> : vector<16x8xf32>
    %1479 = tpu.matmul %1439, %1478, %cst_360 {dimension_numbers = #tpu.dot_dimension_numbers<[1], [0], [0], [1], [0, 0, 1, 1], [], []>} : vector<16x8xf32>, vector<8x8xf32>, vector<16x8xf32> -> vector<16x8xf32>
    %1480 = arith.addf %1477, %1479 : vector<16x8xf32>
    %1481 = vector.extract_strided_slice %1470 {offsets = [0, 8], sizes = [8, 8], strides = [1, 1]} : vector<8x48xf32> to vector<8x8xf32>
    %cst_361 = arith.constant dense<0.000000e+00> : vector<16x8xf32>
    %1482 = tpu.matmul %1435, %1481, %cst_361 {dimension_numbers = #tpu.dot_dimension_numbers<[1], [0], [0], [1], [0, 0, 1, 1], [], []>} : vector<16x8xf32>, vector<8x8xf32>, vector<16x8xf32> -> vector<16x8xf32>
    %1483 = vector.broadcast %1427 : vector<16x1xf32> to vector<16x8xf32>
    %1484 = arith.addf %1483, %1482 : vector<16x8xf32>
    %1485 = vector.extract_strided_slice %1470 {offsets = [0, 24], sizes = [8, 8], strides = [1, 1]} : vector<8x48xf32> to vector<8x8xf32>
    %cst_362 = arith.constant dense<0.000000e+00> : vector<16x8xf32>
    %1486 = tpu.matmul %1437, %1485, %cst_362 {dimension_numbers = #tpu.dot_dimension_numbers<[1], [0], [0], [1], [0, 0, 1, 1], [], []>} : vector<16x8xf32>, vector<8x8xf32>, vector<16x8xf32> -> vector<16x8xf32>
    %1487 = arith.addf %1484, %1486 : vector<16x8xf32>
    %1488 = vector.extract_strided_slice %1470 {offsets = [0, 40], sizes = [8, 8], strides = [1, 1]} : vector<8x48xf32> to vector<8x8xf32>
    %cst_363 = arith.constant dense<0.000000e+00> : vector<16x8xf32>
    %1489 = tpu.matmul %1439, %1488, %cst_363 {dimension_numbers = #tpu.dot_dimension_numbers<[1], [0], [0], [1], [0, 0, 1, 1], [], []>} : vector<16x8xf32>, vector<8x8xf32>, vector<16x8xf32> -> vector<16x8xf32>
    %1490 = arith.addf %1487, %1489 : vector<16x8xf32>
    %1491 = arith.maximumf %1480, %1490 : vector<16x8xf32>
    %c0_364 = arith.constant 0 : index
    %c0_365 = arith.constant 0 : index
    %c0_366 = arith.constant 0 : index
    %1492 = vector.load %arg30[%c0_364, %c0_365, %c0_366] : memref<3x16x1xf32, #tpu.memory_space<vmem>>, vector<3x16x1xf32>
    %c0_367 = arith.constant 0 : index
    %c0_368 = arith.constant 0 : index
    %c0_369 = arith.constant 0 : index
    %c0_370 = arith.constant 0 : index
    %1493 = vector.load %arg31[%c0_367, %c0_368, %c0_369, %c0_370] : memref<3x3x16x1xf32, #tpu.memory_space<vmem>>, vector<3x3x16x1xf32>
    %c0_371 = arith.constant 0 : index
    %c0_372 = arith.constant 0 : index
    %c0_373 = arith.constant 0 : index
    %1494 = vector.load %arg32[%c0_371, %c0_372, %c0_373] : memref<3x16x1xf32, #tpu.memory_space<vmem>>, vector<3x16x1xf32>
    %c0_374 = arith.constant 0 : index
    %c0_375 = arith.constant 0 : index
    %c0_376 = arith.constant 0 : index
    %1495 = vector.load %arg33[%c0_374, %c0_375, %c0_376] : memref<3x16x1xf32, #tpu.memory_space<vmem>>, vector<3x16x1xf32>
    %1496 = tpu.iota {dimensions = array<i32: 1>} : vector<1x8xi32>
    %c0_i32_377 = arith.constant 0 : i32
    %1497 = vector.broadcast %c0_i32_377 : i32 to vector<1x8xi32>
    %1498 = arith.cmpi eq, %1496, %1497 : vector<1x8xi32>
    %c7_i32 = arith.constant 7 : i32
    %1499 = vector.broadcast %c7_i32 : i32 to vector<1x8xi32>
    %1500 = arith.cmpi eq, %1496, %1499 : vector<1x8xi32>
    %c1_i32_378 = arith.constant 1 : i32
    %1501 = tpu.dynamic_rotate %1465 by %c1_i32_378 dim 1 : vector<16x8xf32>, i32 -> vector<16x8xf32>
    %cst_379 = arith.constant 0.000000e+00 : f32
    %1502 = vector.shape_cast %1498 : vector<1x8xi1> to vector<1x8xi1>
    %1503 = vector.broadcast %1502 : vector<1x8xi1> to vector<16x8xi1>
    %1504 = vector.broadcast %cst_379 : f32 to vector<16x8xf32>
    %1505 = arith.select %1503, %1504, %1501 : vector<16x8xi1>, vector<16x8xf32>
    %c7_i32_380 = arith.constant 7 : i32
    %1506 = tpu.dynamic_rotate %1465 by %c7_i32_380 dim 1 : vector<16x8xf32>, i32 -> vector<16x8xf32>
    %cst_381 = arith.constant 0.000000e+00 : f32
    %1507 = vector.shape_cast %1500 : vector<1x8xi1> to vector<1x8xi1>
    %1508 = vector.broadcast %1507 : vector<1x8xi1> to vector<16x8xi1>
    %1509 = vector.broadcast %cst_381 : f32 to vector<16x8xf32>
    %1510 = arith.select %1508, %1509, %1506 : vector<16x8xi1>, vector<16x8xf32>
    %1511 = arith.addf %1505, %1465 : vector<16x8xf32>
    %1512 = arith.addf %1511, %1510 : vector<16x8xf32>
    %cst_382 = arith.constant 0.333333343 : f32
    %1513 = vector.broadcast %cst_382 : f32 to vector<16x8xf32>
    %1514 = arith.mulf %1512, %1513 : vector<16x8xf32>
    %c1_i32_383 = arith.constant 1 : i32
    %1515 = tpu.dynamic_rotate %1491 by %c1_i32_383 dim 1 : vector<16x8xf32>, i32 -> vector<16x8xf32>
    %cst_384 = arith.constant 0.000000e+00 : f32
    %1516 = vector.shape_cast %1498 : vector<1x8xi1> to vector<1x8xi1>
    %1517 = vector.broadcast %1516 : vector<1x8xi1> to vector<16x8xi1>
    %1518 = vector.broadcast %cst_384 : f32 to vector<16x8xf32>
    %1519 = arith.select %1517, %1518, %1515 : vector<16x8xi1>, vector<16x8xf32>
    %c7_i32_385 = arith.constant 7 : i32
    %1520 = tpu.dynamic_rotate %1491 by %c7_i32_385 dim 1 : vector<16x8xf32>, i32 -> vector<16x8xf32>
    %cst_386 = arith.constant 0.000000e+00 : f32
    %1521 = vector.shape_cast %1500 : vector<1x8xi1> to vector<1x8xi1>
    %1522 = vector.broadcast %1521 : vector<1x8xi1> to vector<16x8xi1>
    %1523 = vector.broadcast %cst_386 : f32 to vector<16x8xf32>
    %1524 = arith.select %1522, %1523, %1520 : vector<16x8xi1>, vector<16x8xf32>
    %1525 = arith.addf %1519, %1491 : vector<16x8xf32>
    %1526 = arith.addf %1525, %1524 : vector<16x8xf32>
    %cst_387 = arith.constant 0.333333343 : f32
    %1527 = vector.broadcast %cst_387 : f32 to vector<16x8xf32>
    %1528 = arith.mulf %1526, %1527 : vector<16x8xf32>
    %1529 = vector.extract_strided_slice %1492 {offsets = [0, 0, 0], sizes = [1, 16, 1], strides = [1, 1, 1]} : vector<3x16x1xf32> to vector<1x16x1xf32>
    %1530 = vector.shape_cast %1529 : vector<1x16x1xf32> to vector<16x1xf32>
    %1531 = vector.broadcast %1530 : vector<16x1xf32> to vector<16x8xf32>
    %1532 = arith.mulf %1514, %1531 : vector<16x8xf32>
    %1533 = vector.extract_strided_slice %1492 {offsets = [1, 0, 0], sizes = [1, 16, 1], strides = [1, 1, 1]} : vector<3x16x1xf32> to vector<1x16x1xf32>
    %1534 = vector.shape_cast %1533 : vector<1x16x1xf32> to vector<16x1xf32>
    %1535 = vector.broadcast %1534 : vector<16x1xf32> to vector<16x8xf32>
    %1536 = arith.mulf %1514, %1535 : vector<16x8xf32>
    %1537 = vector.extract_strided_slice %1492 {offsets = [2, 0, 0], sizes = [1, 16, 1], strides = [1, 1, 1]} : vector<3x16x1xf32> to vector<1x16x1xf32>
    %1538 = vector.shape_cast %1537 : vector<1x16x1xf32> to vector<16x1xf32>
    %1539 = vector.broadcast %1538 : vector<16x1xf32> to vector<16x8xf32>
    %1540 = arith.mulf %1514, %1539 : vector<16x8xf32>
    %1541 = arith.maximumf %1532, %1536 : vector<16x8xf32>
    %1542 = arith.maximumf %1541, %1540 : vector<16x8xf32>
    %1543 = arith.subf %1532, %1542 : vector<16x8xf32>
    %1544 = math.exp %1543 : vector<16x8xf32>
    %1545 = arith.subf %1536, %1542 : vector<16x8xf32>
    %1546 = math.exp %1545 : vector<16x8xf32>
    %1547 = arith.subf %1540, %1542 : vector<16x8xf32>
    %1548 = math.exp %1547 : vector<16x8xf32>
    %1549 = arith.addf %1544, %1546 : vector<16x8xf32>
    %1550 = arith.addf %1549, %1548 : vector<16x8xf32>
    %cst_388 = arith.constant 1.000000e+00 : f32
    %1551 = vector.broadcast %cst_388 : f32 to vector<16x8xf32>
    %1552 = arith.divf %1551, %1550 : vector<16x8xf32>
    %1553 = arith.mulf %1544, %1552 : vector<16x8xf32>
    %1554 = arith.mulf %1546, %1552 : vector<16x8xf32>
    %1555 = arith.mulf %1548, %1552 : vector<16x8xf32>
    %1556 = vector.extract_strided_slice %1492 {offsets = [0, 0, 0], sizes = [1, 16, 1], strides = [1, 1, 1]} : vector<3x16x1xf32> to vector<1x16x1xf32>
    %1557 = vector.shape_cast %1556 : vector<1x16x1xf32> to vector<16x1xf32>
    %1558 = vector.broadcast %1557 : vector<16x1xf32> to vector<16x8xf32>
    %1559 = arith.mulf %1528, %1558 : vector<16x8xf32>
    %1560 = vector.extract_strided_slice %1492 {offsets = [1, 0, 0], sizes = [1, 16, 1], strides = [1, 1, 1]} : vector<3x16x1xf32> to vector<1x16x1xf32>
    %1561 = vector.shape_cast %1560 : vector<1x16x1xf32> to vector<16x1xf32>
    %1562 = vector.broadcast %1561 : vector<16x1xf32> to vector<16x8xf32>
    %1563 = arith.mulf %1528, %1562 : vector<16x8xf32>
    %1564 = vector.extract_strided_slice %1492 {offsets = [2, 0, 0], sizes = [1, 16, 1], strides = [1, 1, 1]} : vector<3x16x1xf32> to vector<1x16x1xf32>
    %1565 = vector.shape_cast %1564 : vector<1x16x1xf32> to vector<16x1xf32>
    %1566 = vector.broadcast %1565 : vector<16x1xf32> to vector<16x8xf32>
    %1567 = arith.mulf %1528, %1566 : vector<16x8xf32>
    %1568 = arith.maximumf %1559, %1563 : vector<16x8xf32>
    %1569 = arith.maximumf %1568, %1567 : vector<16x8xf32>
    %1570 = arith.subf %1559, %1569 : vector<16x8xf32>
    %1571 = math.exp %1570 : vector<16x8xf32>
    %1572 = arith.subf %1563, %1569 : vector<16x8xf32>
    %1573 = math.exp %1572 : vector<16x8xf32>
    %1574 = arith.subf %1567, %1569 : vector<16x8xf32>
    %1575 = math.exp %1574 : vector<16x8xf32>
    %1576 = arith.addf %1571, %1573 : vector<16x8xf32>
    %1577 = arith.addf %1576, %1575 : vector<16x8xf32>
    %cst_389 = arith.constant 1.000000e+00 : f32
    %1578 = vector.broadcast %cst_389 : f32 to vector<16x8xf32>
    %1579 = arith.divf %1578, %1577 : vector<16x8xf32>
    %1580 = arith.mulf %1571, %1579 : vector<16x8xf32>
    %1581 = arith.mulf %1573, %1579 : vector<16x8xf32>
    %1582 = arith.mulf %1575, %1579 : vector<16x8xf32>
    %1583 = vector.extract_strided_slice %1493 {offsets = [0, 0, 0, 0], sizes = [1, 1, 16, 1], strides = [1, 1, 1, 1]} : vector<3x3x16x1xf32> to vector<1x1x16x1xf32>
    %1584 = vector.shape_cast %1583 : vector<1x1x16x1xf32> to vector<16x1xf32>
    %1585 = vector.broadcast %1584 : vector<16x1xf32> to vector<16x8xf32>
    %1586 = arith.mulf %1505, %1585 : vector<16x8xf32>
    %1587 = vector.extract_strided_slice %1493 {offsets = [0, 1, 0, 0], sizes = [1, 1, 16, 1], strides = [1, 1, 1, 1]} : vector<3x3x16x1xf32> to vector<1x1x16x1xf32>
    %1588 = vector.shape_cast %1587 : vector<1x1x16x1xf32> to vector<16x1xf32>
    %1589 = vector.broadcast %1588 : vector<16x1xf32> to vector<16x8xf32>
    %1590 = arith.mulf %1465, %1589 : vector<16x8xf32>
    %1591 = arith.addf %1586, %1590 : vector<16x8xf32>
    %1592 = vector.extract_strided_slice %1493 {offsets = [0, 2, 0, 0], sizes = [1, 1, 16, 1], strides = [1, 1, 1, 1]} : vector<3x3x16x1xf32> to vector<1x1x16x1xf32>
    %1593 = vector.shape_cast %1592 : vector<1x1x16x1xf32> to vector<16x1xf32>
    %1594 = vector.broadcast %1593 : vector<16x1xf32> to vector<16x8xf32>
    %1595 = arith.mulf %1510, %1594 : vector<16x8xf32>
    %1596 = arith.addf %1591, %1595 : vector<16x8xf32>
    %1597 = vector.extract_strided_slice %1493 {offsets = [0, 0, 0, 0], sizes = [1, 1, 16, 1], strides = [1, 1, 1, 1]} : vector<3x3x16x1xf32> to vector<1x1x16x1xf32>
    %1598 = vector.shape_cast %1597 : vector<1x1x16x1xf32> to vector<16x1xf32>
    %1599 = vector.broadcast %1598 : vector<16x1xf32> to vector<16x8xf32>
    %1600 = arith.mulf %1519, %1599 : vector<16x8xf32>
    %1601 = vector.extract_strided_slice %1493 {offsets = [0, 1, 0, 0], sizes = [1, 1, 16, 1], strides = [1, 1, 1, 1]} : vector<3x3x16x1xf32> to vector<1x1x16x1xf32>
    %1602 = vector.shape_cast %1601 : vector<1x1x16x1xf32> to vector<16x1xf32>
    %1603 = vector.broadcast %1602 : vector<16x1xf32> to vector<16x8xf32>
    %1604 = arith.mulf %1491, %1603 : vector<16x8xf32>
    %1605 = arith.addf %1600, %1604 : vector<16x8xf32>
    %1606 = vector.extract_strided_slice %1493 {offsets = [0, 2, 0, 0], sizes = [1, 1, 16, 1], strides = [1, 1, 1, 1]} : vector<3x3x16x1xf32> to vector<1x1x16x1xf32>
    %1607 = vector.shape_cast %1606 : vector<1x1x16x1xf32> to vector<16x1xf32>
    %1608 = vector.broadcast %1607 : vector<16x1xf32> to vector<16x8xf32>
    %1609 = arith.mulf %1524, %1608 : vector<16x8xf32>
    %1610 = arith.addf %1605, %1609 : vector<16x8xf32>
    %cst_390 = arith.constant dense<0.000000e+00> : vector<16xf32>
    %1611 = vector.multi_reduction <add>, %1596, %cst_390 [1] : vector<16x8xf32> to vector<16xf32>
    %1612 = vector.shape_cast %1611 : vector<16xf32> to vector<16x1xf32>
    %cst_391 = arith.constant dense<0.000000e+00> : vector<16xf32>
    %1613 = vector.multi_reduction <add>, %1610, %cst_391 [1] : vector<16x8xf32> to vector<16xf32>
    %1614 = vector.shape_cast %1613 : vector<16xf32> to vector<16x1xf32>
    %1615 = arith.addf %1612, %1614 : vector<16x1xf32>
    %cst_392 = arith.constant 6.250000e-02 : f32
    %1616 = vector.broadcast %cst_392 : f32 to vector<16x1xf32>
    %1617 = arith.mulf %1615, %1616 : vector<16x1xf32>
    %1618 = vector.broadcast %1617 : vector<16x1xf32> to vector<16x8xf32>
    %1619 = arith.subf %1596, %1618 : vector<16x8xf32>
    %1620 = arith.mulf %1619, %1619 : vector<16x8xf32>
    %cst_393 = arith.constant dense<0.000000e+00> : vector<16xf32>
    %1621 = vector.multi_reduction <add>, %1620, %cst_393 [1] : vector<16x8xf32> to vector<16xf32>
    %1622 = vector.shape_cast %1621 : vector<16xf32> to vector<16x1xf32>
    %1623 = vector.broadcast %1617 : vector<16x1xf32> to vector<16x8xf32>
    %1624 = arith.subf %1610, %1623 : vector<16x8xf32>
    %1625 = arith.mulf %1624, %1624 : vector<16x8xf32>
    %cst_394 = arith.constant dense<0.000000e+00> : vector<16xf32>
    %1626 = vector.multi_reduction <add>, %1625, %cst_394 [1] : vector<16x8xf32> to vector<16xf32>
    %1627 = vector.shape_cast %1626 : vector<16xf32> to vector<16x1xf32>
    %1628 = arith.addf %1622, %1627 : vector<16x1xf32>
    %cst_395 = arith.constant 6.250000e-02 : f32
    %1629 = vector.broadcast %cst_395 : f32 to vector<16x1xf32>
    %1630 = arith.mulf %1628, %1629 : vector<16x1xf32>
    %1631 = vector.extract_strided_slice %1494 {offsets = [0, 0, 0], sizes = [1, 16, 1], strides = [1, 1, 1]} : vector<3x16x1xf32> to vector<1x16x1xf32>
    %1632 = vector.shape_cast %1631 : vector<1x16x1xf32> to vector<16x1xf32>
    %cst_396 = arith.constant 9.99999974E-6 : f32
    %1633 = vector.broadcast %cst_396 : f32 to vector<16x1xf32>
    %1634 = arith.addf %1630, %1633 : vector<16x1xf32>
    %1635 = math.rsqrt %1634 : vector<16x1xf32>
    %1636 = arith.mulf %1632, %1635 : vector<16x1xf32>
    %1637 = vector.extract_strided_slice %1495 {offsets = [0, 0, 0], sizes = [1, 16, 1], strides = [1, 1, 1]} : vector<3x16x1xf32> to vector<1x16x1xf32>
    %1638 = vector.shape_cast %1637 : vector<1x16x1xf32> to vector<16x1xf32>
    %1639 = arith.mulf %1617, %1636 : vector<16x1xf32>
    %1640 = arith.subf %1638, %1639 : vector<16x1xf32>
    %1641 = vector.broadcast %1636 : vector<16x1xf32> to vector<16x8xf32>
    %1642 = arith.mulf %1596, %1641 : vector<16x8xf32>
    %1643 = vector.broadcast %1640 : vector<16x1xf32> to vector<16x8xf32>
    %1644 = arith.addf %1642, %1643 : vector<16x8xf32>
    %cst_397 = arith.constant 0.000000e+00 : f32
    %1645 = vector.broadcast %cst_397 : f32 to vector<16x8xf32>
    %1646 = arith.maximumf %1644, %1645 : vector<16x8xf32>
    %1647 = arith.mulf %1646, %1553 : vector<16x8xf32>
    %1648 = vector.broadcast %1636 : vector<16x1xf32> to vector<16x8xf32>
    %1649 = arith.mulf %1610, %1648 : vector<16x8xf32>
    %1650 = vector.broadcast %1640 : vector<16x1xf32> to vector<16x8xf32>
    %1651 = arith.addf %1649, %1650 : vector<16x8xf32>
    %cst_398 = arith.constant 0.000000e+00 : f32
    %1652 = vector.broadcast %cst_398 : f32 to vector<16x8xf32>
    %1653 = arith.maximumf %1651, %1652 : vector<16x8xf32>
    %1654 = arith.mulf %1653, %1580 : vector<16x8xf32>
    %1655 = vector.extract_strided_slice %1493 {offsets = [1, 0, 0, 0], sizes = [1, 1, 16, 1], strides = [1, 1, 1, 1]} : vector<3x3x16x1xf32> to vector<1x1x16x1xf32>
    %1656 = vector.shape_cast %1655 : vector<1x1x16x1xf32> to vector<16x1xf32>
    %1657 = vector.broadcast %1656 : vector<16x1xf32> to vector<16x8xf32>
    %1658 = arith.mulf %1505, %1657 : vector<16x8xf32>
    %1659 = vector.extract_strided_slice %1493 {offsets = [1, 1, 0, 0], sizes = [1, 1, 16, 1], strides = [1, 1, 1, 1]} : vector<3x3x16x1xf32> to vector<1x1x16x1xf32>
    %1660 = vector.shape_cast %1659 : vector<1x1x16x1xf32> to vector<16x1xf32>
    %1661 = vector.broadcast %1660 : vector<16x1xf32> to vector<16x8xf32>
    %1662 = arith.mulf %1465, %1661 : vector<16x8xf32>
    %1663 = arith.addf %1658, %1662 : vector<16x8xf32>
    %1664 = vector.extract_strided_slice %1493 {offsets = [1, 2, 0, 0], sizes = [1, 1, 16, 1], strides = [1, 1, 1, 1]} : vector<3x3x16x1xf32> to vector<1x1x16x1xf32>
    %1665 = vector.shape_cast %1664 : vector<1x1x16x1xf32> to vector<16x1xf32>
    %1666 = vector.broadcast %1665 : vector<16x1xf32> to vector<16x8xf32>
    %1667 = arith.mulf %1510, %1666 : vector<16x8xf32>
    %1668 = arith.addf %1663, %1667 : vector<16x8xf32>
    %1669 = vector.extract_strided_slice %1493 {offsets = [1, 0, 0, 0], sizes = [1, 1, 16, 1], strides = [1, 1, 1, 1]} : vector<3x3x16x1xf32> to vector<1x1x16x1xf32>
    %1670 = vector.shape_cast %1669 : vector<1x1x16x1xf32> to vector<16x1xf32>
    %1671 = vector.broadcast %1670 : vector<16x1xf32> to vector<16x8xf32>
    %1672 = arith.mulf %1519, %1671 : vector<16x8xf32>
    %1673 = vector.extract_strided_slice %1493 {offsets = [1, 1, 0, 0], sizes = [1, 1, 16, 1], strides = [1, 1, 1, 1]} : vector<3x3x16x1xf32> to vector<1x1x16x1xf32>
    %1674 = vector.shape_cast %1673 : vector<1x1x16x1xf32> to vector<16x1xf32>
    %1675 = vector.broadcast %1674 : vector<16x1xf32> to vector<16x8xf32>
    %1676 = arith.mulf %1491, %1675 : vector<16x8xf32>
    %1677 = arith.addf %1672, %1676 : vector<16x8xf32>
    %1678 = vector.extract_strided_slice %1493 {offsets = [1, 2, 0, 0], sizes = [1, 1, 16, 1], strides = [1, 1, 1, 1]} : vector<3x3x16x1xf32> to vector<1x1x16x1xf32>
    %1679 = vector.shape_cast %1678 : vector<1x1x16x1xf32> to vector<16x1xf32>
    %1680 = vector.broadcast %1679 : vector<16x1xf32> to vector<16x8xf32>
    %1681 = arith.mulf %1524, %1680 : vector<16x8xf32>
    %1682 = arith.addf %1677, %1681 : vector<16x8xf32>
    %cst_399 = arith.constant dense<0.000000e+00> : vector<16xf32>
    %1683 = vector.multi_reduction <add>, %1668, %cst_399 [1] : vector<16x8xf32> to vector<16xf32>
    %1684 = vector.shape_cast %1683 : vector<16xf32> to vector<16x1xf32>
    %cst_400 = arith.constant dense<0.000000e+00> : vector<16xf32>
    %1685 = vector.multi_reduction <add>, %1682, %cst_400 [1] : vector<16x8xf32> to vector<16xf32>
    %1686 = vector.shape_cast %1685 : vector<16xf32> to vector<16x1xf32>
    %1687 = arith.addf %1684, %1686 : vector<16x1xf32>
    %cst_401 = arith.constant 6.250000e-02 : f32
    %1688 = vector.broadcast %cst_401 : f32 to vector<16x1xf32>
    %1689 = arith.mulf %1687, %1688 : vector<16x1xf32>
    %1690 = vector.broadcast %1689 : vector<16x1xf32> to vector<16x8xf32>
    %1691 = arith.subf %1668, %1690 : vector<16x8xf32>
    %1692 = arith.mulf %1691, %1691 : vector<16x8xf32>
    %cst_402 = arith.constant dense<0.000000e+00> : vector<16xf32>
    %1693 = vector.multi_reduction <add>, %1692, %cst_402 [1] : vector<16x8xf32> to vector<16xf32>
    %1694 = vector.shape_cast %1693 : vector<16xf32> to vector<16x1xf32>
    %1695 = vector.broadcast %1689 : vector<16x1xf32> to vector<16x8xf32>
    %1696 = arith.subf %1682, %1695 : vector<16x8xf32>
    %1697 = arith.mulf %1696, %1696 : vector<16x8xf32>
    %cst_403 = arith.constant dense<0.000000e+00> : vector<16xf32>
    %1698 = vector.multi_reduction <add>, %1697, %cst_403 [1] : vector<16x8xf32> to vector<16xf32>
    %1699 = vector.shape_cast %1698 : vector<16xf32> to vector<16x1xf32>
    %1700 = arith.addf %1694, %1699 : vector<16x1xf32>
    %cst_404 = arith.constant 6.250000e-02 : f32
    %1701 = vector.broadcast %cst_404 : f32 to vector<16x1xf32>
    %1702 = arith.mulf %1700, %1701 : vector<16x1xf32>
    %1703 = vector.extract_strided_slice %1494 {offsets = [1, 0, 0], sizes = [1, 16, 1], strides = [1, 1, 1]} : vector<3x16x1xf32> to vector<1x16x1xf32>
    %1704 = vector.shape_cast %1703 : vector<1x16x1xf32> to vector<16x1xf32>
    %cst_405 = arith.constant 9.99999974E-6 : f32
    %1705 = vector.broadcast %cst_405 : f32 to vector<16x1xf32>
    %1706 = arith.addf %1702, %1705 : vector<16x1xf32>
    %1707 = math.rsqrt %1706 : vector<16x1xf32>
    %1708 = arith.mulf %1704, %1707 : vector<16x1xf32>
    %1709 = vector.extract_strided_slice %1495 {offsets = [1, 0, 0], sizes = [1, 16, 1], strides = [1, 1, 1]} : vector<3x16x1xf32> to vector<1x16x1xf32>
    %1710 = vector.shape_cast %1709 : vector<1x16x1xf32> to vector<16x1xf32>
    %1711 = arith.mulf %1689, %1708 : vector<16x1xf32>
    %1712 = arith.subf %1710, %1711 : vector<16x1xf32>
    %1713 = vector.broadcast %1708 : vector<16x1xf32> to vector<16x8xf32>
    %1714 = arith.mulf %1668, %1713 : vector<16x8xf32>
    %1715 = vector.broadcast %1712 : vector<16x1xf32> to vector<16x8xf32>
    %1716 = arith.addf %1714, %1715 : vector<16x8xf32>
    %cst_406 = arith.constant 0.000000e+00 : f32
    %1717 = vector.broadcast %cst_406 : f32 to vector<16x8xf32>
    %1718 = arith.maximumf %1716, %1717 : vector<16x8xf32>
    %1719 = arith.mulf %1718, %1554 : vector<16x8xf32>
    %1720 = vector.broadcast %1708 : vector<16x1xf32> to vector<16x8xf32>
    %1721 = arith.mulf %1682, %1720 : vector<16x8xf32>
    %1722 = vector.broadcast %1712 : vector<16x1xf32> to vector<16x8xf32>
    %1723 = arith.addf %1721, %1722 : vector<16x8xf32>
    %cst_407 = arith.constant 0.000000e+00 : f32
    %1724 = vector.broadcast %cst_407 : f32 to vector<16x8xf32>
    %1725 = arith.maximumf %1723, %1724 : vector<16x8xf32>
    %1726 = arith.mulf %1725, %1581 : vector<16x8xf32>
    %1727 = vector.extract_strided_slice %1493 {offsets = [2, 0, 0, 0], sizes = [1, 1, 16, 1], strides = [1, 1, 1, 1]} : vector<3x3x16x1xf32> to vector<1x1x16x1xf32>
    %1728 = vector.shape_cast %1727 : vector<1x1x16x1xf32> to vector<16x1xf32>
    %1729 = vector.broadcast %1728 : vector<16x1xf32> to vector<16x8xf32>
    %1730 = arith.mulf %1505, %1729 : vector<16x8xf32>
    %1731 = vector.extract_strided_slice %1493 {offsets = [2, 1, 0, 0], sizes = [1, 1, 16, 1], strides = [1, 1, 1, 1]} : vector<3x3x16x1xf32> to vector<1x1x16x1xf32>
    %1732 = vector.shape_cast %1731 : vector<1x1x16x1xf32> to vector<16x1xf32>
    %1733 = vector.broadcast %1732 : vector<16x1xf32> to vector<16x8xf32>
    %1734 = arith.mulf %1465, %1733 : vector<16x8xf32>
    %1735 = arith.addf %1730, %1734 : vector<16x8xf32>
    %1736 = vector.extract_strided_slice %1493 {offsets = [2, 2, 0, 0], sizes = [1, 1, 16, 1], strides = [1, 1, 1, 1]} : vector<3x3x16x1xf32> to vector<1x1x16x1xf32>
    %1737 = vector.shape_cast %1736 : vector<1x1x16x1xf32> to vector<16x1xf32>
    %1738 = vector.broadcast %1737 : vector<16x1xf32> to vector<16x8xf32>
    %1739 = arith.mulf %1510, %1738 : vector<16x8xf32>
    %1740 = arith.addf %1735, %1739 : vector<16x8xf32>
    %1741 = vector.extract_strided_slice %1493 {offsets = [2, 0, 0, 0], sizes = [1, 1, 16, 1], strides = [1, 1, 1, 1]} : vector<3x3x16x1xf32> to vector<1x1x16x1xf32>
    %1742 = vector.shape_cast %1741 : vector<1x1x16x1xf32> to vector<16x1xf32>
    %1743 = vector.broadcast %1742 : vector<16x1xf32> to vector<16x8xf32>
    %1744 = arith.mulf %1519, %1743 : vector<16x8xf32>
    %1745 = vector.extract_strided_slice %1493 {offsets = [2, 1, 0, 0], sizes = [1, 1, 16, 1], strides = [1, 1, 1, 1]} : vector<3x3x16x1xf32> to vector<1x1x16x1xf32>
    %1746 = vector.shape_cast %1745 : vector<1x1x16x1xf32> to vector<16x1xf32>
    %1747 = vector.broadcast %1746 : vector<16x1xf32> to vector<16x8xf32>
    %1748 = arith.mulf %1491, %1747 : vector<16x8xf32>
    %1749 = arith.addf %1744, %1748 : vector<16x8xf32>
    %1750 = vector.extract_strided_slice %1493 {offsets = [2, 2, 0, 0], sizes = [1, 1, 16, 1], strides = [1, 1, 1, 1]} : vector<3x3x16x1xf32> to vector<1x1x16x1xf32>
    %1751 = vector.shape_cast %1750 : vector<1x1x16x1xf32> to vector<16x1xf32>
    %1752 = vector.broadcast %1751 : vector<16x1xf32> to vector<16x8xf32>
    %1753 = arith.mulf %1524, %1752 : vector<16x8xf32>
    %1754 = arith.addf %1749, %1753 : vector<16x8xf32>
    %cst_408 = arith.constant dense<0.000000e+00> : vector<16xf32>
    %1755 = vector.multi_reduction <add>, %1740, %cst_408 [1] : vector<16x8xf32> to vector<16xf32>
    %1756 = vector.shape_cast %1755 : vector<16xf32> to vector<16x1xf32>
    %cst_409 = arith.constant dense<0.000000e+00> : vector<16xf32>
    %1757 = vector.multi_reduction <add>, %1754, %cst_409 [1] : vector<16x8xf32> to vector<16xf32>
    %1758 = vector.shape_cast %1757 : vector<16xf32> to vector<16x1xf32>
    %1759 = arith.addf %1756, %1758 : vector<16x1xf32>
    %cst_410 = arith.constant 6.250000e-02 : f32
    %1760 = vector.broadcast %cst_410 : f32 to vector<16x1xf32>
    %1761 = arith.mulf %1759, %1760 : vector<16x1xf32>
    %1762 = vector.broadcast %1761 : vector<16x1xf32> to vector<16x8xf32>
    %1763 = arith.subf %1740, %1762 : vector<16x8xf32>
    %1764 = arith.mulf %1763, %1763 : vector<16x8xf32>
    %cst_411 = arith.constant dense<0.000000e+00> : vector<16xf32>
    %1765 = vector.multi_reduction <add>, %1764, %cst_411 [1] : vector<16x8xf32> to vector<16xf32>
    %1766 = vector.shape_cast %1765 : vector<16xf32> to vector<16x1xf32>
    %1767 = vector.broadcast %1761 : vector<16x1xf32> to vector<16x8xf32>
    %1768 = arith.subf %1754, %1767 : vector<16x8xf32>
    %1769 = arith.mulf %1768, %1768 : vector<16x8xf32>
    %cst_412 = arith.constant dense<0.000000e+00> : vector<16xf32>
    %1770 = vector.multi_reduction <add>, %1769, %cst_412 [1] : vector<16x8xf32> to vector<16xf32>
    %1771 = vector.shape_cast %1770 : vector<16xf32> to vector<16x1xf32>
    %1772 = arith.addf %1766, %1771 : vector<16x1xf32>
    %cst_413 = arith.constant 6.250000e-02 : f32
    %1773 = vector.broadcast %cst_413 : f32 to vector<16x1xf32>
    %1774 = arith.mulf %1772, %1773 : vector<16x1xf32>
    %1775 = vector.extract_strided_slice %1494 {offsets = [2, 0, 0], sizes = [1, 16, 1], strides = [1, 1, 1]} : vector<3x16x1xf32> to vector<1x16x1xf32>
    %1776 = vector.shape_cast %1775 : vector<1x16x1xf32> to vector<16x1xf32>
    %cst_414 = arith.constant 9.99999974E-6 : f32
    %1777 = vector.broadcast %cst_414 : f32 to vector<16x1xf32>
    %1778 = arith.addf %1774, %1777 : vector<16x1xf32>
    %1779 = math.rsqrt %1778 : vector<16x1xf32>
    %1780 = arith.mulf %1776, %1779 : vector<16x1xf32>
    %1781 = vector.extract_strided_slice %1495 {offsets = [2, 0, 0], sizes = [1, 16, 1], strides = [1, 1, 1]} : vector<3x16x1xf32> to vector<1x16x1xf32>
    %1782 = vector.shape_cast %1781 : vector<1x16x1xf32> to vector<16x1xf32>
    %1783 = arith.mulf %1761, %1780 : vector<16x1xf32>
    %1784 = arith.subf %1782, %1783 : vector<16x1xf32>
    %1785 = vector.broadcast %1780 : vector<16x1xf32> to vector<16x8xf32>
    %1786 = arith.mulf %1740, %1785 : vector<16x8xf32>
    %1787 = vector.broadcast %1784 : vector<16x1xf32> to vector<16x8xf32>
    %1788 = arith.addf %1786, %1787 : vector<16x8xf32>
    %cst_415 = arith.constant 0.000000e+00 : f32
    %1789 = vector.broadcast %cst_415 : f32 to vector<16x8xf32>
    %1790 = arith.maximumf %1788, %1789 : vector<16x8xf32>
    %1791 = arith.mulf %1790, %1555 : vector<16x8xf32>
    %1792 = vector.broadcast %1780 : vector<16x1xf32> to vector<16x8xf32>
    %1793 = arith.mulf %1754, %1792 : vector<16x8xf32>
    %1794 = vector.broadcast %1784 : vector<16x1xf32> to vector<16x8xf32>
    %1795 = arith.addf %1793, %1794 : vector<16x8xf32>
    %cst_416 = arith.constant 0.000000e+00 : f32
    %1796 = vector.broadcast %cst_416 : f32 to vector<16x8xf32>
    %1797 = arith.maximumf %1795, %1796 : vector<16x8xf32>
    %1798 = arith.mulf %1797, %1582 : vector<16x8xf32>
    %c0_417 = arith.constant 0 : index
    %c0_418 = arith.constant 0 : index
    %1799 = vector.load %arg35[%c0_417, %c0_418] : memref<16x1xf32, #tpu.memory_space<vmem>>, vector<16x1xf32>
    %c0_419 = arith.constant 0 : index
    %c0_420 = arith.constant 0 : index
    %c0_421 = arith.constant 0 : index
    %1800 = vector.load %arg36[%c0_419, %c0_420, %c0_421] : memref<3x8x24xf32, #tpu.memory_space<vmem>>, vector<1x8x24xf32>
    %1801 = vector.shape_cast %1800 : vector<1x8x24xf32> to vector<8x24xf32>
    %c1_422 = arith.constant 1 : index
    %c0_423 = arith.constant 0 : index
    %c0_424 = arith.constant 0 : index
    %1802 = vector.load %arg36[%c1_422, %c0_423, %c0_424] : memref<3x8x24xf32, #tpu.memory_space<vmem>>, vector<1x8x24xf32>
    %1803 = vector.shape_cast %1802 : vector<1x8x24xf32> to vector<8x24xf32>
    %c2_425 = arith.constant 2 : index
    %c0_426 = arith.constant 0 : index
    %c0_427 = arith.constant 0 : index
    %1804 = vector.load %arg36[%c2_425, %c0_426, %c0_427] : memref<3x8x24xf32, #tpu.memory_space<vmem>>, vector<1x8x24xf32>
    %1805 = vector.shape_cast %1804 : vector<1x8x24xf32> to vector<8x24xf32>
    %c0_428 = arith.constant 0 : index
    %c0_429 = arith.constant 0 : index
    %c0_430 = arith.constant 0 : index
    %1806 = vector.load %arg34[%c0_428, %c0_429, %c0_430] : memref<3x16x16xf32, #tpu.memory_space<vmem>>, vector<1x16x16xf32>
    %1807 = vector.shape_cast %1806 : vector<1x16x16xf32> to vector<16x16xf32>
    %c1_431 = arith.constant 1 : index
    %c0_432 = arith.constant 0 : index
    %c0_433 = arith.constant 0 : index
    %1808 = vector.load %arg34[%c1_431, %c0_432, %c0_433] : memref<3x16x16xf32, #tpu.memory_space<vmem>>, vector<1x16x16xf32>
    %1809 = vector.shape_cast %1808 : vector<1x16x16xf32> to vector<16x16xf32>
    %c2_434 = arith.constant 2 : index
    %c0_435 = arith.constant 0 : index
    %c0_436 = arith.constant 0 : index
    %1810 = vector.load %arg34[%c2_434, %c0_435, %c0_436] : memref<3x16x16xf32, #tpu.memory_space<vmem>>, vector<1x16x16xf32>
    %1811 = vector.shape_cast %1810 : vector<1x16x16xf32> to vector<16x16xf32>
    %cst_437 = arith.constant dense<0.000000e+00> : vector<16x24xf32>
    %1812 = tpu.matmul %1647, %1801, %cst_437 {dimension_numbers = #tpu.dot_dimension_numbers<[1], [0], [0], [1], [0, 0, 1, 1], [], []>} : vector<16x8xf32>, vector<8x24xf32>, vector<16x24xf32> -> vector<16x24xf32>
    %cst_438 = arith.constant dense<0.000000e+00> : vector<16x24xf32>
    %1813 = tpu.matmul %1719, %1803, %cst_438 {dimension_numbers = #tpu.dot_dimension_numbers<[1], [0], [0], [1], [0, 0, 1, 1], [], []>} : vector<16x8xf32>, vector<8x24xf32>, vector<16x24xf32> -> vector<16x24xf32>
    %1814 = arith.addf %1812, %1813 : vector<16x24xf32>
    %cst_439 = arith.constant dense<0.000000e+00> : vector<16x24xf32>
    %1815 = tpu.matmul %1791, %1805, %cst_439 {dimension_numbers = #tpu.dot_dimension_numbers<[1], [0], [0], [1], [0, 0, 1, 1], [], []>} : vector<16x8xf32>, vector<8x24xf32>, vector<16x24xf32> -> vector<16x24xf32>
    %1816 = arith.addf %1814, %1815 : vector<16x24xf32>
    %1817 = vector.extract_strided_slice %1816 {offsets = [0, 0], sizes = [16, 4], strides = [1, 1]} : vector<16x24xf32> to vector<16x4xf32>
    %cst_440 = arith.constant dense<0.000000e+00> : vector<16x4xf32>
    %1818 = tpu.matmul %1807, %1817, %cst_440 {dimension_numbers = #tpu.dot_dimension_numbers<[1], [0], [0], [1], [0, 0, 1, 1], [], []>} : vector<16x16xf32>, vector<16x4xf32>, vector<16x4xf32> -> vector<16x4xf32>
    %1819 = vector.broadcast %1799 : vector<16x1xf32> to vector<16x4xf32>
    %1820 = arith.addf %1819, %1818 : vector<16x4xf32>
    %1821 = vector.extract_strided_slice %1816 {offsets = [0, 8], sizes = [16, 4], strides = [1, 1]} : vector<16x24xf32> to vector<16x4xf32>
    %cst_441 = arith.constant dense<0.000000e+00> : vector<16x4xf32>
    %1822 = tpu.matmul %1809, %1821, %cst_441 {dimension_numbers = #tpu.dot_dimension_numbers<[1], [0], [0], [1], [0, 0, 1, 1], [], []>} : vector<16x16xf32>, vector<16x4xf32>, vector<16x4xf32> -> vector<16x4xf32>
    %1823 = arith.addf %1820, %1822 : vector<16x4xf32>
    %1824 = vector.extract_strided_slice %1816 {offsets = [0, 16], sizes = [16, 4], strides = [1, 1]} : vector<16x24xf32> to vector<16x4xf32>
    %cst_442 = arith.constant dense<0.000000e+00> : vector<16x4xf32>
    %1825 = tpu.matmul %1811, %1824, %cst_442 {dimension_numbers = #tpu.dot_dimension_numbers<[1], [0], [0], [1], [0, 0, 1, 1], [], []>} : vector<16x16xf32>, vector<16x4xf32>, vector<16x4xf32> -> vector<16x4xf32>
    %1826 = arith.addf %1823, %1825 : vector<16x4xf32>
    %1827 = vector.extract_strided_slice %1816 {offsets = [0, 4], sizes = [16, 4], strides = [1, 1]} : vector<16x24xf32> to vector<16x4xf32>
    %cst_443 = arith.constant dense<0.000000e+00> : vector<16x4xf32>
    %1828 = tpu.matmul %1807, %1827, %cst_443 {dimension_numbers = #tpu.dot_dimension_numbers<[1], [0], [0], [1], [0, 0, 1, 1], [], []>} : vector<16x16xf32>, vector<16x4xf32>, vector<16x4xf32> -> vector<16x4xf32>
    %1829 = vector.broadcast %1799 : vector<16x1xf32> to vector<16x4xf32>
    %1830 = arith.addf %1829, %1828 : vector<16x4xf32>
    %1831 = vector.extract_strided_slice %1816 {offsets = [0, 12], sizes = [16, 4], strides = [1, 1]} : vector<16x24xf32> to vector<16x4xf32>
    %cst_444 = arith.constant dense<0.000000e+00> : vector<16x4xf32>
    %1832 = tpu.matmul %1809, %1831, %cst_444 {dimension_numbers = #tpu.dot_dimension_numbers<[1], [0], [0], [1], [0, 0, 1, 1], [], []>} : vector<16x16xf32>, vector<16x4xf32>, vector<16x4xf32> -> vector<16x4xf32>
    %1833 = arith.addf %1830, %1832 : vector<16x4xf32>
    %1834 = vector.extract_strided_slice %1816 {offsets = [0, 20], sizes = [16, 4], strides = [1, 1]} : vector<16x24xf32> to vector<16x4xf32>
    %cst_445 = arith.constant dense<0.000000e+00> : vector<16x4xf32>
    %1835 = tpu.matmul %1811, %1834, %cst_445 {dimension_numbers = #tpu.dot_dimension_numbers<[1], [0], [0], [1], [0, 0, 1, 1], [], []>} : vector<16x16xf32>, vector<16x4xf32>, vector<16x4xf32> -> vector<16x4xf32>
    %1836 = arith.addf %1833, %1835 : vector<16x4xf32>
    %1837 = arith.maximumf %1826, %1836 : vector<16x4xf32>
    %cst_446 = arith.constant dense<0.000000e+00> : vector<16x24xf32>
    %1838 = tpu.matmul %1654, %1801, %cst_446 {dimension_numbers = #tpu.dot_dimension_numbers<[1], [0], [0], [1], [0, 0, 1, 1], [], []>} : vector<16x8xf32>, vector<8x24xf32>, vector<16x24xf32> -> vector<16x24xf32>
    %cst_447 = arith.constant dense<0.000000e+00> : vector<16x24xf32>
    %1839 = tpu.matmul %1726, %1803, %cst_447 {dimension_numbers = #tpu.dot_dimension_numbers<[1], [0], [0], [1], [0, 0, 1, 1], [], []>} : vector<16x8xf32>, vector<8x24xf32>, vector<16x24xf32> -> vector<16x24xf32>
    %1840 = arith.addf %1838, %1839 : vector<16x24xf32>
    %cst_448 = arith.constant dense<0.000000e+00> : vector<16x24xf32>
    %1841 = tpu.matmul %1798, %1805, %cst_448 {dimension_numbers = #tpu.dot_dimension_numbers<[1], [0], [0], [1], [0, 0, 1, 1], [], []>} : vector<16x8xf32>, vector<8x24xf32>, vector<16x24xf32> -> vector<16x24xf32>
    %1842 = arith.addf %1840, %1841 : vector<16x24xf32>
    %1843 = vector.extract_strided_slice %1842 {offsets = [0, 0], sizes = [16, 4], strides = [1, 1]} : vector<16x24xf32> to vector<16x4xf32>
    %cst_449 = arith.constant dense<0.000000e+00> : vector<16x4xf32>
    %1844 = tpu.matmul %1807, %1843, %cst_449 {dimension_numbers = #tpu.dot_dimension_numbers<[1], [0], [0], [1], [0, 0, 1, 1], [], []>} : vector<16x16xf32>, vector<16x4xf32>, vector<16x4xf32> -> vector<16x4xf32>
    %1845 = vector.broadcast %1799 : vector<16x1xf32> to vector<16x4xf32>
    %1846 = arith.addf %1845, %1844 : vector<16x4xf32>
    %1847 = vector.extract_strided_slice %1842 {offsets = [0, 8], sizes = [16, 4], strides = [1, 1]} : vector<16x24xf32> to vector<16x4xf32>
    %cst_450 = arith.constant dense<0.000000e+00> : vector<16x4xf32>
    %1848 = tpu.matmul %1809, %1847, %cst_450 {dimension_numbers = #tpu.dot_dimension_numbers<[1], [0], [0], [1], [0, 0, 1, 1], [], []>} : vector<16x16xf32>, vector<16x4xf32>, vector<16x4xf32> -> vector<16x4xf32>
    %1849 = arith.addf %1846, %1848 : vector<16x4xf32>
    %1850 = vector.extract_strided_slice %1842 {offsets = [0, 16], sizes = [16, 4], strides = [1, 1]} : vector<16x24xf32> to vector<16x4xf32>
    %cst_451 = arith.constant dense<0.000000e+00> : vector<16x4xf32>
    %1851 = tpu.matmul %1811, %1850, %cst_451 {dimension_numbers = #tpu.dot_dimension_numbers<[1], [0], [0], [1], [0, 0, 1, 1], [], []>} : vector<16x16xf32>, vector<16x4xf32>, vector<16x4xf32> -> vector<16x4xf32>
    %1852 = arith.addf %1849, %1851 : vector<16x4xf32>
    %1853 = vector.extract_strided_slice %1842 {offsets = [0, 4], sizes = [16, 4], strides = [1, 1]} : vector<16x24xf32> to vector<16x4xf32>
    %cst_452 = arith.constant dense<0.000000e+00> : vector<16x4xf32>
    %1854 = tpu.matmul %1807, %1853, %cst_452 {dimension_numbers = #tpu.dot_dimension_numbers<[1], [0], [0], [1], [0, 0, 1, 1], [], []>} : vector<16x16xf32>, vector<16x4xf32>, vector<16x4xf32> -> vector<16x4xf32>
    %1855 = vector.broadcast %1799 : vector<16x1xf32> to vector<16x4xf32>
    %1856 = arith.addf %1855, %1854 : vector<16x4xf32>
    %1857 = vector.extract_strided_slice %1842 {offsets = [0, 12], sizes = [16, 4], strides = [1, 1]} : vector<16x24xf32> to vector<16x4xf32>
    %cst_453 = arith.constant dense<0.000000e+00> : vector<16x4xf32>
    %1858 = tpu.matmul %1809, %1857, %cst_453 {dimension_numbers = #tpu.dot_dimension_numbers<[1], [0], [0], [1], [0, 0, 1, 1], [], []>} : vector<16x16xf32>, vector<16x4xf32>, vector<16x4xf32> -> vector<16x4xf32>
    %1859 = arith.addf %1856, %1858 : vector<16x4xf32>
    %1860 = vector.extract_strided_slice %1842 {offsets = [0, 20], sizes = [16, 4], strides = [1, 1]} : vector<16x24xf32> to vector<16x4xf32>
    %cst_454 = arith.constant dense<0.000000e+00> : vector<16x4xf32>
    %1861 = tpu.matmul %1811, %1860, %cst_454 {dimension_numbers = #tpu.dot_dimension_numbers<[1], [0], [0], [1], [0, 0, 1, 1], [], []>} : vector<16x16xf32>, vector<16x4xf32>, vector<16x4xf32> -> vector<16x4xf32>
    %1862 = arith.addf %1859, %1861 : vector<16x4xf32>
    %1863 = arith.maximumf %1852, %1862 : vector<16x4xf32>
    %c0_455 = arith.constant 0 : index
    %c0_456 = arith.constant 0 : index
    %c0_457 = arith.constant 0 : index
    %1864 = vector.load %arg37[%c0_455, %c0_456, %c0_457] : memref<2x16x4xf32, #tpu.memory_space<vmem>>, vector<1x16x4xf32>
    %1865 = vector.shape_cast %1864 : vector<1x16x4xf32> to vector<16x4xf32>
    %1866 = vector.shape_cast %1837 : vector<16x4xf32> to vector<1x16x4xf32>
    tpu.vector_store %arg37[%c0_455, %c0_456, %c0_457], %1866 {strides = array<i32>} : memref<2x16x4xf32, #tpu.memory_space<vmem>>, vector<1x16x4xf32>,
    %c1_458 = arith.constant 1 : index
    %c0_459 = arith.constant 0 : index
    %c0_460 = arith.constant 0 : index
    %1867 = vector.load %arg37[%c1_458, %c0_459, %c0_460] : memref<2x16x4xf32, #tpu.memory_space<vmem>>, vector<1x16x4xf32>
    %1868 = vector.shape_cast %1867 : vector<1x16x4xf32> to vector<16x4xf32>
    %1869 = vector.shape_cast %1863 : vector<16x4xf32> to vector<1x16x4xf32>
    tpu.vector_store %arg37[%c1_458, %c0_459, %c0_460], %1869 {strides = array<i32>} : memref<2x16x4xf32, #tpu.memory_space<vmem>>, vector<1x16x4xf32>,
    return
  }
  func.func @transform_0(%arg0: i32) -> (i32, i32, i32) {
    %c0_i32 = arith.constant 0 : i32
    %c0_i32_0 = arith.constant 0 : i32
    %c0_i32_1 = arith.constant 0 : i32
    %c0_i32_2 = arith.constant 0 : i32
    return %c0_i32, %c0_i32_0, %c0_i32_1 : i32, i32, i32
  }
  func.func @transform_1(%arg0: i32) -> (i32, i32, i32) {
    %c0_i32 = arith.constant 0 : i32
    %c0_i32_0 = arith.constant 0 : i32
    %c0_i32_1 = arith.constant 0 : i32
    %c0_i32_2 = arith.constant 0 : i32
    return %c0_i32, %c0_i32_0, %c0_i32_1 : i32, i32, i32
  }
  func.func @transform_2(%arg0: i32) -> (i32, i32, i32, i32) {
    %c0_i32 = arith.constant 0 : i32
    %c0_i32_0 = arith.constant 0 : i32
    %c0_i32_1 = arith.constant 0 : i32
    %c0_i32_2 = arith.constant 0 : i32
    %c0_i32_3 = arith.constant 0 : i32
    return %c0_i32, %c0_i32_0, %c0_i32_1, %c0_i32_2 : i32, i32, i32, i32
  }
  func.func @transform_3(%arg0: i32) -> (i32, i32, i32) {
    %c0_i32 = arith.constant 0 : i32
    %c0_i32_0 = arith.constant 0 : i32
    %c0_i32_1 = arith.constant 0 : i32
    %c0_i32_2 = arith.constant 0 : i32
    return %c0_i32, %c0_i32_0, %c0_i32_1 : i32, i32, i32
  }
  func.func @transform_4(%arg0: i32) -> (i32, i32, i32) {
    %c0_i32 = arith.constant 0 : i32
    %c0_i32_0 = arith.constant 0 : i32
    %c0_i32_1 = arith.constant 0 : i32
    %c0_i32_2 = arith.constant 0 : i32
    return %c0_i32, %c0_i32_0, %c0_i32_1 : i32, i32, i32
  }
  func.func @transform_5(%arg0: i32) -> (i32, i32, i32) {
    %c0_i32 = arith.constant 0 : i32
    %c0_i32_0 = arith.constant 0 : i32
    %c0_i32_1 = arith.constant 0 : i32
    %c0_i32_2 = arith.constant 0 : i32
    return %c0_i32, %c0_i32_0, %c0_i32_1 : i32, i32, i32
  }
  func.func @transform_6(%arg0: i32) -> (i32, i32) {
    %c0_i32 = arith.constant 0 : i32
    %c0_i32_0 = arith.constant 0 : i32
    %c0_i32_1 = arith.constant 0 : i32
    return %c0_i32, %c0_i32_0 : i32, i32
  }
  func.func @transform_7(%arg0: i32) -> (i32, i32, i32) {
    %c0_i32 = arith.constant 0 : i32
    %c0_i32_0 = arith.constant 0 : i32
    %c0_i32_1 = arith.constant 0 : i32
    %c0_i32_2 = arith.constant 0 : i32
    return %c0_i32, %c0_i32_0, %c0_i32_1 : i32, i32, i32
  }
  func.func @transform_8(%arg0: i32) -> (i32, i32, i32) {
    %c0_i32 = arith.constant 0 : i32
    %c0_i32_0 = arith.constant 0 : i32
    %c0_i32_1 = arith.constant 0 : i32
    %c0_i32_2 = arith.constant 0 : i32
    return %c0_i32, %c0_i32_0, %c0_i32_1 : i32, i32, i32
  }
  func.func @transform_9(%arg0: i32) -> (i32, i32, i32, i32) {
    %c0_i32 = arith.constant 0 : i32
    %c0_i32_0 = arith.constant 0 : i32
    %c0_i32_1 = arith.constant 0 : i32
    %c0_i32_2 = arith.constant 0 : i32
    %c0_i32_3 = arith.constant 0 : i32
    return %c0_i32, %c0_i32_0, %c0_i32_1, %c0_i32_2 : i32, i32, i32, i32
  }
  func.func @transform_10(%arg0: i32) -> (i32, i32, i32) {
    %c0_i32 = arith.constant 0 : i32
    %c0_i32_0 = arith.constant 0 : i32
    %c0_i32_1 = arith.constant 0 : i32
    %c0_i32_2 = arith.constant 0 : i32
    return %c0_i32, %c0_i32_0, %c0_i32_1 : i32, i32, i32
  }
  func.func @transform_11(%arg0: i32) -> (i32, i32, i32) {
    %c0_i32 = arith.constant 0 : i32
    %c0_i32_0 = arith.constant 0 : i32
    %c0_i32_1 = arith.constant 0 : i32
    %c0_i32_2 = arith.constant 0 : i32
    return %c0_i32, %c0_i32_0, %c0_i32_1 : i32, i32, i32
  }
  func.func @transform_12(%arg0: i32) -> (i32, i32, i32) {
    %c0_i32 = arith.constant 0 : i32
    %c0_i32_0 = arith.constant 0 : i32
    %c0_i32_1 = arith.constant 0 : i32
    %c0_i32_2 = arith.constant 0 : i32
    return %c0_i32, %c0_i32_0, %c0_i32_1 : i32, i32, i32
  }
  func.func @transform_13(%arg0: i32) -> (i32, i32) {
    %c0_i32 = arith.constant 0 : i32
    %c0_i32_0 = arith.constant 0 : i32
    %c0_i32_1 = arith.constant 0 : i32
    return %c0_i32, %c0_i32_0 : i32, i32
  }
  func.func @transform_14(%arg0: i32) -> (i32, i32, i32) {
    %c0_i32 = arith.constant 0 : i32
    %c0_i32_0 = arith.constant 0 : i32
    %c0_i32_1 = arith.constant 0 : i32
    %c0_i32_2 = arith.constant 0 : i32
    return %c0_i32, %c0_i32_0, %c0_i32_1 : i32, i32, i32
  }
  func.func @transform_15(%arg0: i32) -> (i32, i32, i32) {
    %c0_i32 = arith.constant 0 : i32
    %c0_i32_0 = arith.constant 0 : i32
    %c0_i32_1 = arith.constant 0 : i32
    %c0_i32_2 = arith.constant 0 : i32
    return %c0_i32, %c0_i32_0, %c0_i32_1 : i32, i32, i32
  }
  func.func @transform_16(%arg0: i32) -> (i32, i32, i32, i32) {
    %c0_i32 = arith.constant 0 : i32
    %c0_i32_0 = arith.constant 0 : i32
    %c0_i32_1 = arith.constant 0 : i32
    %c0_i32_2 = arith.constant 0 : i32
    %c0_i32_3 = arith.constant 0 : i32
    return %c0_i32, %c0_i32_0, %c0_i32_1, %c0_i32_2 : i32, i32, i32, i32
  }
  func.func @transform_17(%arg0: i32) -> (i32, i32, i32) {
    %c0_i32 = arith.constant 0 : i32
    %c0_i32_0 = arith.constant 0 : i32
    %c0_i32_1 = arith.constant 0 : i32
    %c0_i32_2 = arith.constant 0 : i32
    return %c0_i32, %c0_i32_0, %c0_i32_1 : i32, i32, i32
  }
  func.func @transform_18(%arg0: i32) -> (i32, i32, i32) {
    %c0_i32 = arith.constant 0 : i32
    %c0_i32_0 = arith.constant 0 : i32
    %c0_i32_1 = arith.constant 0 : i32
    %c0_i32_2 = arith.constant 0 : i32
    return %c0_i32, %c0_i32_0, %c0_i32_1 : i32, i32, i32
  }
  func.func @transform_19(%arg0: i32) -> (i32, i32, i32) {
    %c0_i32 = arith.constant 0 : i32
    %c0_i32_0 = arith.constant 0 : i32
    %c0_i32_1 = arith.constant 0 : i32
    %c0_i32_2 = arith.constant 0 : i32
    return %c0_i32, %c0_i32_0, %c0_i32_1 : i32, i32, i32
  }
  func.func @transform_20(%arg0: i32) -> (i32, i32) {
    %c0_i32 = arith.constant 0 : i32
    %c0_i32_0 = arith.constant 0 : i32
    %c0_i32_1 = arith.constant 0 : i32
    return %c0_i32, %c0_i32_0 : i32, i32
  }
  func.func @transform_21(%arg0: i32) -> (i32, i32, i32) {
    %c0_i32 = arith.constant 0 : i32
    %c0_i32_0 = arith.constant 0 : i32
    %c0_i32_1 = arith.constant 0 : i32
    %c0_i32_2 = arith.constant 0 : i32
    return %c0_i32, %c0_i32_0, %c0_i32_1 : i32, i32, i32
  }
  func.func @transform_22(%arg0: i32) -> (i32, i32, i32) {
    %c0_i32 = arith.constant 0 : i32
    %c0_i32_0 = arith.constant 0 : i32
    %c0_i32_1 = arith.constant 0 : i32
    %c0_i32_2 = arith.constant 0 : i32
    return %c0_i32, %c0_i32_0, %c0_i32_1 : i32, i32, i32
  }
  func.func @transform_23(%arg0: i32) -> (i32, i32, i32, i32) {
    %c0_i32 = arith.constant 0 : i32
    %c0_i32_0 = arith.constant 0 : i32
    %c0_i32_1 = arith.constant 0 : i32
    %c0_i32_2 = arith.constant 0 : i32
    %c0_i32_3 = arith.constant 0 : i32
    return %c0_i32, %c0_i32_0, %c0_i32_1, %c0_i32_2 : i32, i32, i32, i32
  }
  func.func @transform_24(%arg0: i32) -> (i32, i32, i32) {
    %c0_i32 = arith.constant 0 : i32
    %c0_i32_0 = arith.constant 0 : i32
    %c0_i32_1 = arith.constant 0 : i32
    %c0_i32_2 = arith.constant 0 : i32
    return %c0_i32, %c0_i32_0, %c0_i32_1 : i32, i32, i32
  }
  func.func @transform_25(%arg0: i32) -> (i32, i32, i32) {
    %c0_i32 = arith.constant 0 : i32
    %c0_i32_0 = arith.constant 0 : i32
    %c0_i32_1 = arith.constant 0 : i32
    %c0_i32_2 = arith.constant 0 : i32
    return %c0_i32, %c0_i32_0, %c0_i32_1 : i32, i32, i32
  }
  func.func @transform_26(%arg0: i32) -> (i32, i32, i32) {
    %c0_i32 = arith.constant 0 : i32
    %c0_i32_0 = arith.constant 0 : i32
    %c0_i32_1 = arith.constant 0 : i32
    %c0_i32_2 = arith.constant 0 : i32
    return %c0_i32, %c0_i32_0, %c0_i32_1 : i32, i32, i32
  }
  func.func @transform_27(%arg0: i32) -> (i32, i32) {
    %c0_i32 = arith.constant 0 : i32
    %c0_i32_0 = arith.constant 0 : i32
    %c0_i32_1 = arith.constant 0 : i32
    return %c0_i32, %c0_i32_0 : i32, i32
  }
  func.func @transform_28(%arg0: i32) -> (i32, i32, i32) {
    %c0_i32 = arith.constant 0 : i32
    %c0_i32_0 = arith.constant 0 : i32
    %c0_i32_1 = arith.constant 0 : i32
    %c0_i32_2 = arith.constant 0 : i32
    return %c0_i32, %c0_i32_0, %c0_i32_1 : i32, i32, i32
  }
  func.func @transform_29(%arg0: i32) -> (i32, i32, i32) {
    %c0_i32 = arith.constant 0 : i32
    %c0_i32_0 = arith.constant 0 : i32
    %c0_i32_1 = arith.constant 0 : i32
    %c0_i32_2 = arith.constant 0 : i32
    return %c0_i32, %c0_i32_0, %c0_i32_1 : i32, i32, i32
  }
  func.func @transform_30(%arg0: i32) -> (i32, i32, i32, i32) {
    %c0_i32 = arith.constant 0 : i32
    %c0_i32_0 = arith.constant 0 : i32
    %c0_i32_1 = arith.constant 0 : i32
    %c0_i32_2 = arith.constant 0 : i32
    %c0_i32_3 = arith.constant 0 : i32
    return %c0_i32, %c0_i32_0, %c0_i32_1, %c0_i32_2 : i32, i32, i32, i32
  }
  func.func @transform_31(%arg0: i32) -> (i32, i32, i32) {
    %c0_i32 = arith.constant 0 : i32
    %c0_i32_0 = arith.constant 0 : i32
    %c0_i32_1 = arith.constant 0 : i32
    %c0_i32_2 = arith.constant 0 : i32
    return %c0_i32, %c0_i32_0, %c0_i32_1 : i32, i32, i32
  }
  func.func @transform_32(%arg0: i32) -> (i32, i32, i32) {
    %c0_i32 = arith.constant 0 : i32
    %c0_i32_0 = arith.constant 0 : i32
    %c0_i32_1 = arith.constant 0 : i32
    %c0_i32_2 = arith.constant 0 : i32
    return %c0_i32, %c0_i32_0, %c0_i32_1 : i32, i32, i32
  }
  func.func @transform_33(%arg0: i32) -> (i32, i32, i32) {
    %c0_i32 = arith.constant 0 : i32
    %c0_i32_0 = arith.constant 0 : i32
    %c0_i32_1 = arith.constant 0 : i32
    %c0_i32_2 = arith.constant 0 : i32
    return %c0_i32, %c0_i32_0, %c0_i32_1 : i32, i32, i32
  }
  func.func @transform_34(%arg0: i32) -> (i32, i32) {
    %c0_i32 = arith.constant 0 : i32
    %c0_i32_0 = arith.constant 0 : i32
    %c0_i32_1 = arith.constant 0 : i32
    return %c0_i32, %c0_i32_0 : i32, i32
  }
  func.func @transform_35(%arg0: i32) -> (i32, i32, i32) {
    %c0_i32 = arith.constant 0 : i32
    %c0_i32_0 = arith.constant 0 : i32
    %c0_i32_1 = arith.constant 0 : i32
    %c0_i32_2 = arith.constant 0 : i32
    return %c0_i32, %c0_i32_0, %c0_i32_1 : i32, i32, i32
  }
  func.func @transform_36(%arg0: i32) -> (i32, i32, i32) {
    %c0_i32 = arith.constant 0 : i32
    %c0_i32_0 = arith.constant 0 : i32
    %c0_i32_1 = arith.constant 0 : i32
    %c0_i32_2 = arith.constant 0 : i32
    return %c0_i32, %c0_i32_0, %c0_i32_1 : i32, i32, i32
  }
}

</mosaic_0001>

<bundles_post_ra>
// kernel: conv_stack_forward.1
= control target key start
LH: loop header
LB: loop body
LE: loop exit
PB: predicated region body
PF: predicated region fallthrough
CT: control target
= control target key end

     0   :  { %s12101_s6 = smov 1   ;;  %s12102_s10 = smov 2   ;;  %s14445_s0 = inlined_call_operand.smem [shape: u32[37], index: -1, kind: input, shape index: {}] }
   0x1   :  { %s12177_s5 = sld [smem:[%s14445_s0]]   ;;  %s12103_s14 = smov 3  }
   0x2   :  { %s12182_s9 = sld [smem:[%s14445_s0 + %s12101_s6]]   ;;  %s12104_s18 = smov 4  }
   0x3   :  { %s12187_s13 = sld [smem:[%s14445_s0 + %s12102_s10]]   ;;  %s12105_s22 = smov 5  }
   0x4   :  { %s12192_s17 = sld [smem:[%s14445_s0 + %s12103_s14]]   ;;  %s12106_s26 = smov 6  }
   0x5   :  { %s12197_s21 = sld [smem:[%s14445_s0 + %s12104_s18]]   ;;  %s12107_s30 = smov 7  }
   0x6   :  { %s12202_s25 = sld [smem:[%s14445_s0 + %s12105_s22]]   ;;  %s12108_s4 = smov 8  }
   0x7   :  { %s12207_s29 = sld [smem:[%s14445_s0 + %s12106_s26]]   ;;  %s12109_s10 = smov 9  }
   0x8   :  { %s12212_s3 = sld [smem:[%s14445_s0 + %s12107_s30]]   ;;  %s12110_s15 = smov 10  }
   0x9   :  { %s12217_s8 = sld [smem:[%s14445_s0 + %s12108_s4]]   ;;  %s12111_s20 = smov 11  }
   0xa   :  { %s12222_s14 = sld [smem:[%s14445_s0 + %s12109_s10]]   ;;  %s12112_s26 = smov 12  }
   0xb   :  { %s12227_s19 = sld [smem:[%s14445_s0 + %s12110_s15]]   ;;  %s12113_s1 = smov 13  }
   0xc   :  { %s12232_s24 = sld [smem:[%s14445_s0 + %s12111_s20]]   ;;  %s12114_s7 = smov 14  }
   0xd   :  { %s12237_s30 = sld [smem:[%s14445_s0 + %s12112_s26]]   ;;  %s12115_s15 = smov 15  }
   0xe   :  { %s12242_s6 = sld [smem:[%s14445_s0 + %s12113_s1]]   ;;  %s12116_s22 = smov 16  }
   0xf   :  { %14500 = sst [smem:[#allocation16_spill]] %s12217_s8  ;;  %s12117_s28 = smov 17  }
  0x10   :  { %s12247_s12 = sld [smem:[%s14445_s0 + %s12114_s7]]   ;;  %s12118_s7 = smov 18  }
  0x11   :  { %14501 = sst [smem:[#allocation17_spill]] %s12227_s19 }
  0x12   :  { %14502 = sst [smem:[#allocation18_spill]] %s12232_s24 }
  0x13   :  { %s12252_s20 = sld [smem:[%s14445_s0 + %s12115_s15]]   ;;  %s12119_s15 = smov 19  }
  0x14   :  { %14503 = sst [smem:[#allocation19_spill]] %s12242_s6 }
  0x15   :  { %s12257_s27 = sld [smem:[%s14445_s0 + %s12116_s22]]   ;;  %s12120_s22 = smov 20  }
  0x16   :  { %s12262_s4 = sld [smem:[%s14445_s0 + %s12117_s28]]   ;;  %s12121_s28 = smov 21  }
  0x17   :  { %s12267_s6 = sld [smem:[%s14445_s0 + %s12118_s7]]   ;;  %s12122_s7 = smov 22  }
  0x19   :  { %14504 = sst [smem:[#allocation20_spill]] %s12252_s20 }
  0x1a   :  { %s12272_s20 = sld [smem:[%s14445_s0 + %s12119_s15]]   ;;  %s12123_s15 = smov 23  }
  0x1b   :  { %14505 = sst [smem:[#allocation21_spill]] %s12257_s27 }
  0x1c   :  { %14506 = sst [smem:[#allocation22_spill]] %s12262_s4 }
  0x1d   :  { %14507 = sst [smem:[#allocation23_spill]] %s12267_s6 }
  0x1e   :  { %s12277_s27 = sld [smem:[%s14445_s0 + %s12120_s22]]   ;;  %s12124_s22 = smov 24  }
  0x1f   :  { %s12282_s4 = sld [smem:[%s14445_s0 + %s12121_s28]]   ;;  %s12125_s28 = smov 25  }
  0x20   :  { %s12287_s6 = sld [smem:[%s14445_s0 + %s12122_s7]]   ;;  %s12126_s7 = smov 26  }
  0x21   :  { %s12292_s24 = sld [smem:[%s14445_s0 + %s12123_s15]]   ;;  %s12127_s15 = smov 27  }
  0x22   :  { %s12302_s19 = sld [smem:[%s14445_s0 + %s12125_s28]]   ;;  %s12129_s28 = smov 29  }
  0x24   :  { %14508 = sst [smem:[#allocation24_spill]] %s12277_s27 }
  0x25   :  { %s12297_s27 = sld [smem:[%s14445_s0 + %s12124_s22]]   ;;  %s12128_s22 = smov 28  }
  0x26   :  { %14509 = sst [smem:[#allocation25_spill]] %s12287_s6 }
  0x27   :  { %14510 = sst [smem:[#allocation26_spill]] %s12292_s24 }
  0x28   :  { %14512 = sst [smem:[#allocation28_spill]] %s12302_s19 }
  0x29   :  { %s12307_s6 = sld [smem:[%s14445_s0 + %s12126_s7]]   ;;  %s12130_s7 = smov 30  }
  0x2a   :  { %s12312_s24 = sld [smem:[%s14445_s0 + %s12127_s15]]   ;;  %s12131_s15 = smov 31  }
  0x2b   :  { %14511 = sst [smem:[#allocation27_spill]] %s12297_s27 }
  0x2c   :  { %s12317_s27 = sld [smem:[%s14445_s0 + %s12128_s22]]   ;;  %s12132_s22 = smov 32  }
  0x2d   :  { %s12322_s19 = sld [smem:[%s14445_s0 + %s12129_s28]]   ;;  %s12133_s28 = smov 33  }
  0x2e   :  { %s12337_s8 = sld [smem:[%s14445_s0 + %s12132_s22]]   ;;  %s12136_s22 = smov 36  }
  0x2f   :  { %14513 = sst [smem:[#allocation29_spill]] %s12307_s6 }
  0x30   :  { %14514 = sst [smem:[#allocation30_spill]] %s12312_s24 }
  0x31   :  { %s12327_s6 = sld [smem:[%s14445_s0 + %s12130_s7]]   ;;  %s12134_s7 = smov 34  }
  0x32   :  { %s12332_s24 = sld [smem:[%s14445_s0 + %s12131_s15]]   ;;  %s12135_s15 = smov 35  }
  0x33   :  { %14515 = sst [smem:[#allocation31_spill]] %s12322_s19 }
  0x34   :  { %14518 = sst [smem:[#allocation34_spill]] %s12337_s8 }
  0x35   :  { %s12342_s19 = sld [smem:[%s14445_s0 + %s12133_s28]]  }
  0x36   :  { %s12357_s8 = sld [smem:[%s14445_s0 + %s12136_s22]]  }
  0x37   :  { %14516 = sst [smem:[#allocation32_spill]] %s12327_s6 }
  0x38   :  { %14517 = sst [smem:[#allocation33_spill]] %s12332_s24 }
  0x39   :  { %s12347_s6 = sld [smem:[%s14445_s0 + %s12134_s7]]  }
  0x3a   :  { %s12352_s24 = sld [smem:[%s14445_s0 + %s12135_s15]]  }
  0x3b   :  { %78 = vsyncpa [#allocation3], 0 }
  0x3c   :  { %79 = vsyncpa [#allocation5], 0 }
  0x3d   :  { %80 = vsyncpa [#allocation8], 0 }
  0x3e   :  { %81 = vsyncpa [#allocation11], 0  ;;  %s12137_s28 = smov [#allocation4]   ;;  %s11961_s2 = scalar_lea.hbm %s12247_s12, 6144 }
  0x3f   :  { %s125_s1 = sshll.u32 %s12137_s28, 4  ;;  %p11962_p0 = scmp.ne.s32.totalorder %s12247_s12, %s11961_s2  ;;  %s126_s1 = int_to_ptr.vmem [resolvable:$true] %s125_s1 }
  0x40   :  { %p11965_p1 = scmp.lt.u32.totalorder %s11961_s2, %s12247_s12 }
  0x42   :  { %p11967_p2 = pnand %p11965_p1, %p11962_p0 }
  0x44   :  { %11970 = shalt.err (!%p11967_p2)
}
  0x45   :  { %s11971_s7 = scalar_lea.vmem %s126_s1, 6144  ;;  %p11976_p4 = scmp.lt.s32.totalorder %s126_s1, %s126_s1 }
  0x46   :  { %p11972_p3 = scmp.ne.s32.totalorder %s126_s1, %s11971_s7  ;;  %p11977_p5 = scmp.lt.s32.totalorder %s11971_s7, %s11971_s7 }
  0x48   :  { %p11978_p6 = por %p11977_p5, %p11976_p4 }
  0x4a   :  { %p11979_p7 = pnand %p11978_p6, %p11972_p3 }
  0x4c   :  { %11982 = shalt.err (!%p11979_p7)
}
  0x4d   :  { %s12138_s0 = smov 256   ;;  %s12139_s10 = smov 16  }
  0x4e   :  { %131 = dma.hbm_to_vmem [thread:$0]  %s12247_s12, 6144, %s126_s1, [#allocation5], %s12138_s0, %s12138_s0, %s12139_s10  }
  0x4f   :  { %s12140_s11 = smov [#allocation7]   ;;  %s12141_s16 = smov [#allocation2]  }
  0x50   :  { %s159_s15 = sshll.u32 %s12140_s11, 4  ;;  %s111_s18 = sshll.u32 %s12141_s16, 4  ;;  %s160_s15 = int_to_ptr.vmem [resolvable:$true] %s159_s15  ;;  %s112_s18 = int_to_ptr.vmem [resolvable:$true] %s111_s18 }
  0x51   :  { %s11983_s22 = scalar_lea.hbm %s12282_s4, 1536 }
  0x52   :  { %p11984_p8 = scmp.ne.s32.totalorder %s12282_s4, %s11983_s22  ;;  %p11987_p9 = scmp.lt.u32.totalorder %s11983_s22, %s12282_s4 }
  0x54   :  { %p11989_p10 = pnand %p11987_p9, %p11984_p8 }
  0x56   :  { %11992 = shalt.err (!%p11989_p10)
}
  0x57   :  { %s11993_s23 = scalar_lea.vmem %s160_s15, 1536  ;;  %p11998_p12 = scmp.lt.s32.totalorder %s160_s15, %s160_s15 }
  0x58   :  { %p11994_p11 = scmp.ne.s32.totalorder %s160_s15, %s11993_s23  ;;  %p11999_p13 = scmp.lt.s32.totalorder %s11993_s23, %s11993_s23 }
  0x5a   :  { %p12000_p0 = por %p11999_p13, %p11998_p12 }
  0x5c   :  { %p12001_p1 = pnand %p12000_p0, %p11994_p11 }
  0x5e   :  { %12004 = shalt.err (!%p12001_p1)
}
  0x5f   :  { %s12142_s26 = smov 128   ;;  %s12143_s12 = smov 8  }
  0x60   :  { %165 = dma.hbm_to_vmem [thread:$0]  %s12282_s4, 1536, %s160_s15, [#allocation8], %s12142_s26, %s12142_s26, %s12143_s12  }
  0x61   :  { %s12005_s28 = scalar_lea.hbm %s12237_s30, 384 }
  0x62   :  { %p12006_p2 = scmp.ne.s32.totalorder %s12237_s30, %s12005_s28  ;;  %p12009_p3 = scmp.lt.u32.totalorder %s12005_s28, %s12237_s30 }
  0x64   :  { %p12011_p4 = pnand %p12009_p3, %p12006_p2 }
  0x66   :  { %12014 = shalt.err (!%p12011_p4)
}
  0x67   :  { %s12015_s1 = scalar_lea.vmem %s112_s18, 384  ;;  %p12020_p6 = scmp.lt.s32.totalorder %s112_s18, %s112_s18 }
  0x68   :  { %p12016_p5 = scmp.ne.s32.totalorder %s112_s18, %s12015_s1  ;;  %p12021_p7 = scmp.lt.s32.totalorder %s12015_s1, %s12015_s1 }
  0x6a   :  { %p12022_p8 = por %p12021_p7, %p12020_p6 }
  0x6c   :  { %p12023_p9 = pnand %p12022_p8, %p12016_p5 }
  0x6e   :  { %12026 = shalt.err (!%p12023_p9)
}
  0x6f   :  { %117 = dma.hbm_to_vmem [thread:$0]  %s12237_s30, 384, %s112_s18, [#allocation3], %s12142_s26, %s12142_s26, %s12143_s12  }
  0x70   :  { %s12144_s4 = smov [#allocation6]   ;;  %s12145_s7 = smov [#allocation9]  }
  0x71   :  { %s145_s2 = sshll.u32 %s12144_s4, 4  ;;  %s183_s0 = sshll.u32 %s12145_s7, 4  ;;  %s146_s2 = int_to_ptr.vmem [resolvable:$true] %s145_s2  ;;  %s184_s0 = int_to_ptr.vmem [resolvable:$true] %s183_s0 }
  0x72   :  { %s12027_s11 = scalar_lea.hbm %s12272_s20, 384 }
  0x73   :  { %p12028_p10 = scmp.ne.s32.totalorder %s12272_s20, %s12027_s11  ;;  %p12031_p11 = scmp.lt.u32.totalorder %s12027_s11, %s12272_s20 }
  0x75   :  { %p12033_p12 = pnand %p12031_p11, %p12028_p10 }
  0x77   :  { %12036 = shalt.err (!%p12033_p12)
}
  0x78   :  { %s12037_s15 = scalar_lea.vmem %s146_s2, 384  ;;  %p12042_p0 = scmp.lt.s32.totalorder %s146_s2, %s146_s2 }
  0x79   :  { %p12038_p13 = scmp.ne.s32.totalorder %s146_s2, %s12037_s15  ;;  %p12043_p1 = scmp.lt.s32.totalorder %s12037_s15, %s12037_s15 }
  0x7b   :  { %p12044_p2 = por %p12043_p1, %p12042_p0 }
  0x7d   :  { %p12045_p3 = pnand %p12044_p2, %p12038_p13 }
  0x7f   :  { %12048 = shalt.err (!%p12045_p3)
}
  0x80   :  { %151 = dma.hbm_to_vmem [thread:$0]  %s12272_s20, 384, %s146_s2, [#allocation5], %s12142_s26, %s12142_s26, %s12143_s12  }
  0x81   :  { %s12049_s30 = scalar_lea.hbm %s12317_s27, 768 }
  0x82   :  { %p12050_p4 = scmp.ne.s32.totalorder %s12317_s27, %s12049_s30  ;;  %p12053_p5 = scmp.lt.u32.totalorder %s12049_s30, %s12317_s27 }
  0x84   :  { %p12055_p6 = pnand %p12053_p5, %p12050_p4 }
  0x86   :  { %12058 = shalt.err (!%p12055_p6)
}
  0x87   :  { %s12059_s16 = scalar_lea.vmem %s184_s0, 768  ;;  %p12064_p8 = scmp.lt.s32.totalorder %s184_s0, %s184_s0 }
  0x88   :  { %p12060_p7 = scmp.ne.s32.totalorder %s184_s0, %s12059_s16  ;;  %p12065_p9 = scmp.lt.s32.totalorder %s12059_s16, %s12059_s16 }
  0x8a   :  { %p12066_p10 = por %p12065_p9, %p12064_p8 }
  0x8c   :  { %p12067_p11 = pnand %p12066_p10, %p12060_p7 }
  0x8e   :  { %12070 = shalt.err (!%p12067_p11)
}
  0x8f   :  { %189 = dma.hbm_to_vmem [thread:$0]  %s12317_s27, 768, %s184_s0, [#allocation8], %s12142_s26, %s12142_s26, %s12143_s12  }
  0x90   :  { %s12146_s20 = smov [#allocation10]   ;;  %s12071_s22 = scalar_lea.hbm %s12352_s24, 384 }
  0x91   :  { %s207_s18 = sshll.u32 %s12146_s20, 4  ;;  %p12072_p12 = scmp.ne.s32.totalorder %s12352_s24, %s12071_s22  ;;  %s208_s18 = int_to_ptr.vmem [resolvable:$true] %s207_s18 }
  0x92   :  { %p12075_p13 = scmp.lt.u32.totalorder %s12071_s22, %s12352_s24 }
  0x94   :  { %p12077_p0 = pnand %p12075_p13, %p12072_p12 }
  0x96   :  { %12080 = shalt.err (!%p12077_p0)
}
  0x97   :  { %s12081_s23 = scalar_lea.vmem %s208_s18, 384  ;;  %p12086_p2 = scmp.lt.s32.totalorder %s208_s18, %s208_s18 }
  0x98   :  { %p12082_p1 = scmp.ne.s32.totalorder %s208_s18, %s12081_s23  ;;  %p12087_p3 = scmp.lt.s32.totalorder %s12081_s23, %s12081_s23 }
  0x9a   :  { %p12088_p4 = por %p12087_p3, %p12086_p2 }
  0x9c   :  { %p12089_p5 = pnand %p12088_p4, %p12082_p1 }
  0x9e   :  { %12092 = shalt.err (!%p12089_p5)
}
  0x9f   :  { %213 = dma.hbm_to_vmem [thread:$0]  %s12352_s24, 384, %s208_s18, [#allocation11], %s12142_s26, %s12142_s26, %s12143_s12  }
  0xa0   :  { %12093 = dma.done.wait [#allocation3], 384  }
  0xa1   :  { %12094 = vsyncadd [#allocation3], 4294966912 }
  0xa2   :  { %12095 = dma.done.wait [#allocation5], 6528  }
  0xa3   :  { %12096 = vsyncadd [#allocation5], 4294960768 }
  0xa4   :  { %12097 = dma.done.wait [#allocation8], 2304  }
  0xa5   :  { %12098 = vsyncadd [#allocation8], 4294964992 }
  0xa6   :  { %12099 = dma.done.wait [#allocation11], 384  }
  0xa7   :  { %12100 = vsyncadd [#allocation11], 4294966912  ;;  %v12147_v0 = vmov 0   ;;  %v243_v1 = vld [vmem:[%s12187_s13 + $0x28] sm:$0xff]  ;;  %v241_v2 = vld [vmem:[%s12187_s13 + $0x18] sm:$0xff]  ;;  %s12148_s24 = smov 1   ;;  %v253_v12 = vlaneseq }
  0xa8   :  { %11778 = vset.pattern.permute.xlu1 %v12147_v0  ;;  %11777 = vset.pattern.permute.xlu0 %v12147_v0  ;;  %v242_v3 = vld [vmem:[%s12187_s13 + $0x20] sm:$0xff]  ;;  %v12407_v5 = vld [vmem:[%s12177_s5 + $0x8] sm:$0xff]  ;;  %s12149_s27 = smov 127   ;;  %v240_v8 = vld [vmem:[%s12187_s13 + $0x10] sm:$0xff]  ;;  %vm12152_vm2 = vmmov 0   ;;  %vm1106_vm3 = vcmask 64512  }
  0xa9   :  { %415 = vperm.xlu1 %11778, %v243_v1   ;;  %402 = vperm.xlu0 %11777, %v241_v2   ;;  %v12403_v4 = vld [vmem:[%s12177_s5] sm:$0xff]  ;;  %v239_v7 = vld [vmem:[%s12187_s13 + $0x8] sm:$0xff]  ;;  %v244_v9 = vld [vmem:[%s12187_s13 + $0x30] sm:$0xff]  ;;  %v12420_v13 = vand.u32 127, %v253_v12  ;;  %s12153_s5 = smov 64   ;;  %vm2444_vm4 = vcmask 1048064  }
  0xaa   :  { %v238_v6 = vld [vmem:[%s12187_s13] sm:$0xff]  ;;  %v245_v10 = vld [vmem:[%s12187_s13 + $0x38] sm:$0xff]  ;;  %vm2565_vm6 = vcmask 523264   ;;  %vm4164_vm7 = vcmask 1047808   ;;  %s12157_s26 = smov 97   ;;  %vm4285_vm9 = vcmask 261120  }
  0xab   :  { %v246_v11 = vld [vmem:[%s12187_s13 + $0x40] sm:$0xff]  ;;  %14519 = vst [vmem:[#allocation35_spill] sm:$0xff] %v12420_v13  ;;  %vm255_vm0 = vcmp.eq.s32.totalorder %v12420_v13, 0  ;;  %vm256_vm1 = vcmp.eq.s32.totalorder %v12420_v13, 127  ;;  %v564_v13 = vld [vmem:[%s12212_s3 + $0x118] sm:$0xff]  ;;  %s14587_s13 = sld [smem:[#allocation16_spill]] }
  0xac   :  { %s14592_s28 = sld [smem:[#allocation20_spill]]  ;;  %s14593_s1 = sld [smem:[#allocation22_spill]]  ;;  %vm5844_vm10 = vcmask 1047680   ;;  %vm5965_vm12 = vcmask 130048   ;;  %vm7628_vm13 = vcmask 1047616   ;;  %vm9750_vm15 = vcmask 31744  }
  0xad   :  { %408 = vperm.xlu0 %11777, %v242_v3   ;;  %257 = vrot.lane.b32.xlu1 %v12403_v4, %s12148_s24  ;;  %s14594_s4 = sld [smem:[#allocation23_spill]]  ;;  %s14595_s2 = sld [smem:[#allocation24_spill]] }
  0xae   :  { %s12158_s7 = smov 80   ;;  %s12159_s0 = smov 112  }
  0xaf   :  { %s12160_s11 = smov 48   ;;  %s14596_s15 = sld [smem:[#allocation26_spill]] }
  0xb0   :  { %s12161_s30 = smov 113   ;;  %s14598_s16 = sld [smem:[#allocation27_spill]] }
  0xb1   :  { %270 = vrot.lane.b32.xlu0 %v12407_v5, %s12148_s24  ;;  %262 = vrot.lane.b32.xlu1 %v12403_v4, %s12149_s27  ;;  %s14599_s20 = sld [smem:[#allocation28_spill]]  ;;  %s14600_s18 = sld [smem:[#allocation29_spill]] }
  0xb2   :  { %s12162_s22 = smov 104   ;;  %s12163_s23 = smov 120  }
  0xb3   :  { %s12164_s24 = smov 88  }
  0xb5   :  { %273 = vrot.lane.b32.xlu0 %v12407_v5, %s12149_s27  ;;  %338 = vperm.xlu1 %11778, %v238_v6  }
  0xb9   :  { %344 = vperm.xlu0 %11777, %v239_v7   ;;  %351 = vperm.xlu1 %11778, %v240_v8  }
  0xbd   :  { %466 = vperm.xlu0 %11777, %v244_v9   ;;  %472 = vperm.xlu1 %11778, %v245_v10  }
  0xc1   :  { %479 = vperm.xlu0 %11777, %v246_v11  }
 0x128   :  { %v416_v14 = vpop.permute.xlu1 %415  ;;  %v403_v15 = vpop.permute.xlu0 %402 }
 0x12c   :  { %v409_v16 = vpop.permute.xlu0 %408  ;;  %v258_v17 = vpop.permute.xlu1 %257 }
 0x12d   :  { %v261_v18 = vsel %vm255_vm0, 0.0, %v258_v17  ;;  %v411_v19 = vmul.f32 %v409_v16, %v12403_v4  ;;  %v421_v30 = vmul.f32 %v12407_v5, %v409_v16  ;;  %v236_v16 = vld [vmem:[%s12182_s9 + $0x8] sm:$0xff]  ;;  %v235_v17 = vld [vmem:[%s12182_s9] sm:$0xff] }
 0x12e   :  { %v267_v20 = vadd.f32 %v261_v18, %v12403_v4  ;;  %v405_v21 = vmul.f32 %v403_v15, %v261_v18 }
 0x130   :  { %v271_v22 = vpop.permute.xlu0 %270  ;;  %v263_v23 = vpop.permute.xlu1 %262  ;;  %v412_v29 = vadd.f32 %v411_v19, %v405_v21 }
 0x131   :  { %v272_v24 = vsel %vm255_vm0, 0.0, %v271_v22  ;;  %v266_v25 = vsel %vm256_vm1, 0.0, %v263_v23 }
 0x132   :  { %v420_v26 = vmul.f32 %v403_v15, %v272_v24  ;;  %v12430_v27 = vadd.f32 %v267_v20, %v266_v25  ;;  %v418_v28 = vmul.f32 %v416_v14, %v266_v25  ;;  %v276_v31 = vadd.f32 %v12407_v5, %v272_v24 }
 0x134   :  { %v274_v32 = vpop.permute.xlu0 %273  ;;  %v339_v33 = vpop.permute.xlu1 %338  ;;  %v12434_v34 = vadd.f32 %v418_v28, %v412_v29  ;;  %v422_v38 = vadd.f32 %v421_v30, %v420_v26  ;;  %v237_v26 = vld [vmem:[%s12182_s9 + $0x10] sm:$0xff]  ;;  %v9802_v30 = vld [vmem:[%s12212_s3 + $0x188] sm:$0xff]  ;;  %s12154_s9 = smov 65  }
 0x135   :  { %v275_v35 = vsel %vm256_vm1, 0.0, %v274_v32  ;;  %v341_v42 = vmul.f32 %v339_v33, %v261_v18  ;;  %v356_v43 = vmul.f32 %v339_v33, %v272_v24  ;;  %v14475_v33 = vmov 0.0|0.0  }
 0x136   :  { %v12436_v36 = vadd.f32 %v276_v31, %v275_v35  ;;  %v423_v37 = vmul.f32 %v416_v14, %v275_v35  ;;  %425 = vadd.xlane.f32.xlu1 %v12434_v34  ;;  %v9805_v31 = vld [vmem:[%s12212_s3 + $0x1a0] sm:$0xff]  ;;  %11051 = vmatprep.subr.bf16.mxu1 %v14475_v33 }
 0x137   :  { %v12481_v32 = vpack.c.bf16 %v9805_v31, %v9802_v30 }
 0x138   :  { %v345_v39 = vpop.permute.xlu0 %344  ;;  %v352_v40 = vpop.permute.xlu1 %351  ;;  %v12439_v41 = vadd.f32 %v423_v37, %v422_v38  ;;  %v9804_v37 = vld [vmem:[%s12212_s3 + $0x198] sm:$0xff]  ;;  %v9803_v38 = vld [vmem:[%s12212_s3 + $0x190] sm:$0xff] }
 0x139   :  { %v347_v44 = vmul.f32 %v345_v39, %v12403_v4  ;;  %v357_v45 = vmul.f32 %v12407_v5, %v345_v39  ;;  %v354_v48 = vmul.f32 %v352_v40, %v266_v25  ;;  %v359_v49 = vmul.f32 %v352_v40, %v275_v35  ;;  %11020 = vmatprep.subr.bf16.mxu0 %v12481_v32  ;;  %v9806_v40 = vld [vmem:[%s12212_s3 + $0x1a8] sm:$0xff] }
 0x13a   :  { %427 = vadd.xlane.f32.xlu0 %v12439_v41 }
 0x13b   :  { %v348_v46 = vadd.f32 %v347_v44, %v341_v42  ;;  %v358_v47 = vadd.f32 %v357_v45, %v356_v43  ;;  %v9808_v42 = vld [vmem:[%s12212_s3 + $0x1b8] sm:$0xff]  ;;  %v9811_v43 = vld [vmem:[%s12212_s3 + $0x1d0] sm:$0xff] }
 0x13c   :  { %v467_v50 = vpop.permute.xlu0 %466  ;;  %v473_v51 = vpop.permute.xlu1 %472 }
 0x13d   :  { %v469_v52 = vmul.f32 %v467_v50, %v261_v18  ;;  %v484_v53 = vmul.f32 %v467_v50, %v272_v24  ;;  %v475_v54 = vmul.f32 %v473_v51, %v12403_v4  ;;  %v485_v55 = vmul.f32 %v12407_v5, %v473_v51  ;;  %v9810_v50 = vld [vmem:[%s12212_s3 + $0x1c8] sm:$0xff]  ;;  %v9809_v51 = vld [vmem:[%s12212_s3 + $0x1c0] sm:$0xff] }
 0x13e   :  { %v12446_v56 = vadd.f32 %v359_v49, %v358_v47  ;;  %v12448_v57 = vadd.f32 %v354_v48, %v348_v46  ;;  %v12493_v46 = vpack.c.bf16 %v9806_v40, %v9803_v38  ;;  %v12495_v47 = vpack.c.bf16 %v9811_v43, %v9808_v42  ;;  %v9807_v49 = vld [vmem:[%s12212_s3 + $0x1b0] sm:$0xff]  ;;  %v248_v38 = vld [vmem:[%s12192_s17 + $0x8] sm:$0xff]  ;;  %v9833_v40 = vld [vmem:[%s12212_s3 + $0x280] sm:$0xff] }
 0x13f   :  { %v476_v59 = vadd.f32 %v475_v54, %v469_v52  ;;  %v486_v60 = vadd.f32 %v485_v55, %v484_v53  ;;  %v12504_v53 = vpack.c.bf16 %v9810_v50, %v9807_v49  ;;  %v9812_v54 = vld [vmem:[%s12212_s3 + $0x1d8] sm:$0xff]  ;;  %v9814_v55 = vld [vmem:[%s12212_s3 + $0x1e8] sm:$0xff] }
 0x140   :  { %363 = vadd.xlane.f32.xlu1 %v12446_v56  ;;  %361 = vadd.xlane.f32.xlu0 %v12448_v57  ;;  %v480_v58 = vpop.permute.xlu0 %479  ;;  %14521 = vst [vmem:[#allocation37_spill] sm:$0xff] %v12493_v46  ;;  %v9836_v42 = vld [vmem:[%s12212_s3 + $0x298] sm:$0xff]  ;;  %v251_v49 = vld [vmem:[%s12197_s21 + $0x8] sm:$0xff] }
 0x141   :  { %v482_v61 = vmul.f32 %v480_v58, %v266_v25  ;;  %v487_v62 = vmul.f32 %v480_v58, %v275_v35  ;;  %v9801_v35 = vld [vmem:[%s12212_s3 + $0x180] sm:$0xff]  ;;  %11053 = vmatpush3.bf16.msra.mxu1 %v12493_v46  ;;  %v9862_v46 = vld [vmem:[%s12212_s3 + $0x368] sm:$0xff] }
 0x142   :  { %v12488_v39 = vpack.c.bf16 %v9804_v37, %v9801_v35  ;;  %11054 = vmatprep.subr.bf16.mxu1 %v14475_v33  ;;  %v9817_v58 = vld [vmem:[%s12212_s3 + $0x200] sm:$0xff]  ;;  %v9831_v35 = vld [vmem:[%s12212_s3 + $0x270] sm:$0xff]  ;;  %v9834_v37 = vld [vmem:[%s12212_s3 + $0x288] sm:$0xff] }
 0x143   :  { %v12452_v63 = vadd.f32 %v487_v62, %v486_v60  ;;  %v12454_v0 = vadd.f32 %v482_v61, %v476_v59  ;;  %v12509_v59 = vpack.c.bf16 %v9812_v54, %v9809_v51  ;;  %v12511_v60 = vpack.c.bf16 %v9817_v58, %v9814_v55  ;;  %v9813_v61 = vld [vmem:[%s12212_s3 + $0x1e0] sm:$0xff]  ;;  %v9816_v62 = vld [vmem:[%s12212_s3 + $0x1f8] sm:$0xff]  ;;  %v9838_v51 = vld [vmem:[%s12212_s3 + $0x2a8] sm:$0xff] }
 0x144   :  { %11022 = vmatpush1.bf16.msra.mxu0 %v12488_v39  ;;  %v9837_v54 = vld [vmem:[%s12212_s3 + $0x2a0] sm:$0xff]  ;;  %v9840_v58 = vld [vmem:[%s12212_s3 + $0x2b8] sm:$0xff] }
 0x145   :  { %14520 = vst [vmem:[#allocation36_spill] sm:$0xff] %v12452_v63  ;;  %491 = vadd.xlane.f32.xlu1 %v12452_v63  ;;  %489 = vadd.xlane.f32.xlu0 %v12454_v0  ;;  %14522 = vst [vmem:[#allocation38_spill] sm:$0xff] %v12509_v59 }
 0x146   :  { %11024 = vmatprep.subr.bf16.mxu0 %v12495_v47  ;;  %11056 = vmatpush3.bf16.msra.mxu1 %v12509_v59  ;;  %v9860_v59 = vld [vmem:[%s12212_s3 + $0x358] sm:$0xff] }
 0x147   :  { %11057 = vmatprep.subr.bf16.mxu1 %v14475_v33 }
 0x148   :  { %11026 = vmatpush1.bf16.msra.mxu0 %v12504_v53 }
 0x149   :  { %11028 = vmatprep.subr.bf16.mxu0 %v12511_v60 }
 0x1c3   :  { %v426_v1 = vpop.xlane.xlu1 %425 }
 0x1c7   :  { %v428_v2 = vpop.xlane.xlu0 %427 }
 0x1c8   :  { %v429_v3 = vadd.f32 %v428_v2, %v426_v1  ;;  %v9815_v1 = vld [vmem:[%s12212_s3 + $0x1f0] sm:$0xff] }
 0x1ca   :  { %v12458_v4 = vmul.f32 0.00390625, %v429_v3  ;;  %v12517_v3 = vpack.c.bf16 %v9816_v62, %v9813_v61  ;;  %v9839_v61 = vld [vmem:[%s12212_s3 + $0x2b0] sm:$0xff]  ;;  %v9842_v62 = vld [vmem:[%s12212_s3 + $0x2c8] sm:$0xff] }
 0x1cc   :  { %v435_v5 = vsub.f32 %v12439_v41, %v12458_v4  ;;  %v431_v6 = vsub.f32 %v12434_v34, %v12458_v4  ;;  %11030 = vmatpush1.bf16.msra.mxu0 %v12517_v3 }
 0x1cd   :  { %v364_v7 = vpop.xlane.xlu1 %363  ;;  %v362_v8 = vpop.xlane.xlu0 %361 }
 0x1ce   :  { %v365_v9 = vadd.f32 %v364_v7, %v362_v8  ;;  %v436_v10 = vmul.f32 %v435_v5, %v435_v5  ;;  %v432_v11 = vmul.f32 %v431_v6, %v431_v6  ;;  %v9818_v5 = vld [vmem:[%s12212_s3 + $0x208] sm:$0xff]  ;;  %v9820_v6 = vld [vmem:[%s12212_s3 + $0x218] sm:$0xff]  ;;  %v9823_v7 = vld [vmem:[%s12212_s3 + $0x230] sm:$0xff] }
 0x1cf   :  { %v12524_v8 = vpack.c.bf16 %v9818_v5, %v9815_v1  ;;  %v9844_v5 = vld [vmem:[%s12212_s3 + $0x2d8] sm:$0xff] }
 0x1d0   :  { %v12464_v12 = vmul.f32 0.00390625, %v365_v9  ;;  %437 = vadd.xlane.f32.xlu1 %v436_v10  ;;  %433 = vadd.xlane.f32.xlu0 %v432_v11  ;;  %v12526_v9 = vpack.c.bf16 %v9823_v7, %v9820_v6  ;;  %v9819_v10 = vld [vmem:[%s12212_s3 + $0x210] sm:$0xff]  ;;  %v9822_v11 = vld [vmem:[%s12212_s3 + $0x228] sm:$0xff] }
 0x1d1   :  { %14523 = vst [vmem:[#allocation39_spill] sm:$0xff] %v12524_v8  ;;  %11059 = vmatpush3.bf16.msra.mxu1 %v12524_v8  ;;  %v9847_v6 = vld [vmem:[%s12212_s3 + $0x2f0] sm:$0xff]  ;;  %v9858_v8 = vld [vmem:[%s12212_s3 + $0x348] sm:$0xff] }
 0x1d2   :  { %v367_v14 = vsub.f32 %v12448_v57, %v12464_v12  ;;  %v492_v18 = vpop.xlane.xlu1 %491  ;;  %v490_v19 = vpop.xlane.xlu0 %489  ;;  %v371_v21 = vsub.f32 %v12446_v56, %v12464_v12  ;;  %11032 = vmatprep.subr.bf16.mxu0 %v12526_v9  ;;  %11060 = vmatprep.subr.bf16.mxu1 %v14475_v33  ;;  %v9843_v7 = vld [vmem:[%s12212_s3 + $0x2d0] sm:$0xff] }
 0x1d3   :  { %v493_v20 = vadd.f32 %v492_v18, %v490_v19  ;;  %v12536_v18 = vpack.c.bf16 %v9822_v11, %v9819_v10  ;;  %v12598_v10 = vpack.c.bf16 %v9847_v6, %v9844_v5  ;;  %v9846_v11 = vld [vmem:[%s12212_s3 + $0x2e8] sm:$0xff] }
 0x1d4   :  { %v368_v15 = vmul.f32 %v367_v14, %v367_v14  ;;  %v372_v23 = vmul.f32 %v371_v21, %v371_v21  ;;  %v9821_v14 = vld [vmem:[%s12212_s3 + $0x220] sm:$0xff] }
 0x1d5   :  { %v12472_v22 = vmul.f32 0.00390625, %v493_v20  ;;  %v9825_v21 = vld [vmem:[%s12212_s3 + $0x240] sm:$0xff]  ;;  %11034 = vmatpush1.bf16.msra.mxu0 %v12536_v18 }
 0x1d6   :  { %369 = vadd.xlane.f32.xlu0 %v368_v15  ;;  %v9824_v15 = vld [vmem:[%s12212_s3 + $0x238] sm:$0xff] }
 0x1d7   :  { %v495_v24 = vsub.f32 %v12454_v0, %v12472_v22  ;;  %v499_v28 = vsub.f32 %v12452_v63, %v12472_v22  ;;  %v12540_v19 = vpack.c.bf16 %v9824_v15, %v9821_v14  ;;  %v9845_v14 = vld [vmem:[%s12212_s3 + $0x2e0] sm:$0xff]  ;;  %v9848_v15 = vld [vmem:[%s12212_s3 + $0x2f8] sm:$0xff]  ;;  %v9874_v63 = vld [vmem:[%s12212_s3 + $0x3c8] sm:$0xff] }
 0x1d9   :  { %v496_v25 = vmul.f32 %v495_v24, %v495_v24  ;;  %v500_v29 = vmul.f32 %v499_v28, %v499_v28  ;;  %14524 = vst [vmem:[#allocation40_spill] sm:$0xff] %v12540_v19  ;;  %v9827_v24 = vld [vmem:[%s12212_s3 + $0x250] sm:$0xff]  ;;  %11062 = vmatpush3.bf16.msra.mxu1 %v12540_v19 }
 0x1da   :  { %v9835_v28 = vld [vmem:[%s12212_s3 + $0x290] sm:$0xff]  ;;  %11063 = vmatprep.subr.bf16.mxu1 %v14475_v33 }
 0x1e1   :  { %287 = vperm.xlu1 %11778, %v236_v16   ;;  %v9826_v16 = vld [vmem:[%s12212_s3 + $0x248] sm:$0xff] }
 0x1ec   :  { %281 = vperm.xlu0 %11777, %v235_v17   ;;  %v9829_v17 = vld [vmem:[%s12212_s3 + $0x260] sm:$0xff] }
 0x1ed   :  { %v12542_v20 = vpack.c.bf16 %v9829_v17, %v9826_v16  ;;  %v14463_v16 = vmov 0.0   ;;  %v12606_v17 = vpack.c.bf16 %v9846_v11, %v9843_v7 }
 0x1ee   :  { %744 = vmatprep.mubr.f32.mxu0 %v14463_v16  ;;  %10379 = vmatprep.mubr.msk.f32.mxu1 %vm12152_vm2, %v14463_v16 }
 0x1ef   :  { %11036 = vmatprep.subr.bf16.mxu0 %v12542_v20 }
 0x205   :  { %373 = vadd.xlane.f32.xlu1 %v372_v23  ;;  %v9828_v23 = vld [vmem:[%s12212_s3 + $0x258] sm:$0xff] }
 0x20b   :  { %497 = vadd.xlane.f32.xlu0 %v496_v25  ;;  %v9830_v25 = vld [vmem:[%s12212_s3 + $0x268] sm:$0xff] }
 0x20c   :  { %v12556_v30 = vpack.c.bf16 %v9830_v25, %v9827_v24  ;;  %v533_v24 = vld [vmem:[%s12212_s3 + $0x20] sm:$0xff] }
 0x20e   :  { %14525 = vst [vmem:[#allocation41_spill] sm:$0xff] %v12556_v30  ;;  %11065 = vmatpush3.bf16.msra.mxu1 %v12556_v30 }
 0x20f   :  { %11066 = vmatprep.subr.bf16.mxu1 %v14475_v33 }
 0x216   :  { %293 = vperm.xlu1 %11778, %v237_v26   ;;  %v9832_v26 = vld [vmem:[%s12212_s3 + $0x278] sm:$0xff] }
 0x217   :  { %v12558_v31 = vpack.c.bf16 %v9835_v28, %v9832_v26 }
 0x23a   :  { %501 = vadd.xlane.f32.xlu1 %v500_v29  ;;  %v12552_v29 = vpack.c.bf16 %v9828_v23, %v9825_v21  ;;  %v12608_v21 = vpack.c.bf16 %v9848_v15, %v9845_v14  ;;  %v530_v23 = vld [vmem:[%s12212_s3 + $0x8] sm:$0xff] }
 0x23b   :  { %v12613_v25 = vpack.c.bf16 %v533_v24, %v530_v23 }
 0x23c   :  { %11038 = vmatpush1.bf16.msra.mxu0 %v12552_v29  ;;  %14528 = vst [vmem:[#allocation44_spill] sm:$0xff] %v12608_v21 }
 0x23d   :  { %11040 = vmatprep.subr.bf16.mxu0 %v12558_v31 }
 0x25d   :  { %v438_v44 = vpop.xlane.xlu1 %437  ;;  %v434_v45 = vpop.xlane.xlu0 %433 }
 0x25e   :  { %v439_v48 = vadd.f32 %v438_v44, %v434_v45  ;;  %v12567_v44 = vpack.c.bf16 %v9834_v37, %v9831_v35  ;;  %v269_v37 = vmul.f32 0.33333334, %v12430_v27 }
 0x260   :  { %v440_v52 = vmul.f32 0.00390625, %v439_v48  ;;  %v12571_v48 = vpack.c.bf16 %v9836_v42, %v9833_v40  ;;  %11042 = vmatpush1.bf16.msra.mxu0 %v12567_v44 }
 0x261   :  { %v288_v28 = vpop.permute.xlu1 %287 }
 0x262   :  { %v441_v2 = vadd.f32 1e-05, %v440_v52  ;;  %14526 = vst [vmem:[#allocation42_spill] sm:$0xff] %v12571_v48  ;;  %v9841_v52 = vld [vmem:[%s12212_s3 + $0x2c0] sm:$0xff]  ;;  %11068 = vmatpush3.bf16.msra.mxu1 %v12571_v48 }
 0x263   :  { %v12580_v55 = vpack.c.bf16 %v9841_v52, %v9838_v51  ;;  %11069 = vmatprep.subr.bf16.mxu1 %v14475_v33  ;;  %v370_v26 = vpop.xlane.xlu0 %369  ;;  %v9853_v48 = vld [vmem:[%s12212_s3 + $0x320] sm:$0xff] }
 0x264   :  { %11829 = vrsqrt.f32 %v441_v2  ;;  %v12588_v2 = vpack.c.bf16 %v9842_v62, %v9839_v61 }
 0x265   :  { %11044 = vmatprep.subr.bf16.mxu0 %v12580_v55 }
 0x266   :  { %14527 = vst [vmem:[#allocation43_spill] sm:$0xff] %v12588_v2  ;;  %11071 = vmatpush3.bf16.msra.mxu1 %v12588_v2  ;;  %v9850_v2 = vld [vmem:[%s12212_s3 + $0x308] sm:$0xff] }
 0x267   :  { %11072 = vmatprep.subr.bf16.mxu1 %v14475_v33 }
 0x26a   :  { %11074 = vmatpush3.bf16.msra.mxu1 %v12608_v21  ;;  %v576_v21 = vld [vmem:[%s12212_s3 + $0x178] sm:$0xff] }
 0x26b   :  { %11107 = vmatprep.subr.bf16.mxu1 %v14475_v33  ;;  %v282_v35 = vpop.permute.xlu0 %281 }
 0x26c   :  { %v284_v40 = vmul.f32 %v282_v35, %v269_v37 }
 0x26e   :  { %v11830_v43 = vpop.eup %11829 }
 0x26f   :  { %v443_v45 = vmul.f32 %v11830_v43, %v248_v38  ;;  %v278_v38 = vmul.f32 0.33333334, %v12436_v36 }
 0x271   :  { %448 = vperm.xlu0 %11777, %v443_v45   ;;  %v444_v50 = vmul.f32 %v443_v45, %v12458_v4  ;;  %v12586_v4 = vpack.c.bf16 %v9840_v58, %v9837_v54  ;;  %v315_v43 = vmul.f32 %v282_v35, %v278_v38 }
 0x273   :  { %v445_v1 = vsub.f32 %v251_v49, %v444_v50  ;;  %11046 = vmatpush1.bf16.msra.mxu0 %v12586_v4  ;;  %v290_v49 = vmul.f32 %v288_v28, %v269_v37  ;;  %v316_v50 = vmul.f32 %v288_v28, %v278_v38 }
 0x274   :  { %11048 = vmatprep.subr.bf16.mxu0 %v12598_v10 }
 0x275   :  { %454 = vperm.xlu1 %11778, %v445_v1   ;;  %v297_v52 = vmax.f32 %v284_v40, %v290_v49  ;;  %v318_v58 = vmax.f32 %v315_v43, %v316_v50 }
 0x277   :  { %11050 = vmatpush1.bf16.msra.mxu0 %v12606_v17 }
 0x278   :  { %11076 = vmatprep.subr.bf16.mxu0 %v12613_v25 }
 0x292   :  { %v374_v42 = vpop.xlane.xlu1 %373 }
 0x293   :  { %v375_v45 = vadd.f32 %v374_v42, %v370_v26 }
 0x295   :  { %v376_v51 = vmul.f32 0.00390625, %v375_v45  ;;  %v250_v45 = vld [vmem:[%s12197_s21] sm:$0xff] }
 0x296   :  { %v294_v54 = vpop.permute.xlu1 %293 }
 0x297   :  { %v377_v61 = vadd.f32 1e-05, %v376_v51  ;;  %v296_v62 = vmul.f32 %v294_v54, %v269_v37  ;;  %v317_v1 = vmul.f32 %v294_v54, %v278_v38  ;;  %v247_v38 = vld [vmem:[%s12192_s17] sm:$0xff] }
 0x299   :  { %11831 = vrsqrt.f32 %v377_v61  ;;  %v298_v5 = vmax.f32 %v297_v52, %v296_v62  ;;  %v319_v6 = vmax.f32 %v318_v58, %v317_v1 }
 0x29b   :  { %v299_v27 = vsub.f32 %v284_v40, %v298_v5  ;;  %v302_v7 = vsub.f32 %v290_v49, %v298_v5  ;;  %v305_v36 = vsub.f32 %v296_v62, %v298_v5  ;;  %v320_v11 = vsub.f32 %v315_v43, %v319_v6 }
 0x29c   :  { %v323_v14 = vsub.f32 %v316_v50, %v319_v6  ;;  %v326_v26 = vsub.f32 %v317_v1, %v319_v6 }
 0x29d   :  { %v300_v15 = vmul.f32 1.442695, %v299_v27  ;;  %v303_v23 = vmul.f32 1.442695, %v302_v7  ;;  %v306_v24 = vmul.f32 1.442695, %v305_v36 }
 0x29e   :  { %v321_v28 = vmul.f32 1.442695, %v320_v11  ;;  %v324_v35 = vmul.f32 1.442695, %v323_v14  ;;  %v327_v37 = vmul.f32 1.442695, %v326_v26  ;;  %v498_v14 = vpop.xlane.xlu0 %497 }
 0x29f   :  { %11833 = vpow2.f32 %v300_v15 }
 0x2a0   :  { %11835 = vpow2.f32 %v303_v23 }
 0x2a1   :  { %11837 = vpow2.f32 %v306_v24 }
 0x2a2   :  { %11839 = vpow2.f32 %v321_v28  ;;  %v249_v28 = vld [vmem:[%s12192_s17 + $0x10] sm:$0xff]  ;;  %s14588_s17 = sld [smem:[#allocation17_spill]] }
 0x2a3   :  { %v11832_v42 = vpop.eup %11831  ;;  %11841 = vpow2.f32 %v324_v35 }
 0x2a4   :  { %v379_v40 = vmul.f32 %v11832_v42, %v247_v38  ;;  %11843 = vpow2.f32 %v327_v37  ;;  %v252_v38 = vld [vmem:[%s12197_s21 + $0x10] sm:$0xff]  ;;  %s14589_s21 = sld [smem:[#allocation18_spill]] }
 0x2a6   :  { %384 = vperm.xlu0 %11777, %v379_v40   ;;  %v380_v43 = vmul.f32 %v379_v40, %v12464_v12 }
 0x2a8   :  { %v381_v49 = vsub.f32 %v250_v45, %v380_v43 }
 0x2a9   :  { %v11834_v50 = vpop.eup %11833 }
 0x2aa   :  { %v11836_v51 = vpop.eup %11835  ;;  %390 = vperm.xlu1 %11778, %v381_v49  }
 0x2ab   :  { %v11838_v52 = vpop.eup %11837  ;;  %v308_v54 = vadd.f32 %v11836_v51, %v11834_v50 }
 0x2ac   :  { %v12624_v58 = vpop.eup %11839 }
 0x2ad   :  { %v12626_v61 = vpop.eup %11841  ;;  %v309_v62 = vadd.f32 %v11838_v52, %v308_v54  ;;  %v532_v54 = vld [vmem:[%s12212_s3 + $0x18] sm:$0xff] }
 0x2ae   :  { %v329_v1 = vadd.f32 %v12626_v61, %v12624_v58  ;;  %v11844_v5 = vpop.eup %11843 }
 0x2af   :  { %11845 = vrcp.f32 %v309_v62  ;;  %v534_v62 = vld [vmem:[%s12212_s3 + $0x28] sm:$0xff] }
 0x2b0   :  { %v330_v6 = vadd.f32 %v11844_v5, %v329_v1  ;;  %v536_v1 = vld [vmem:[%s12212_s3 + $0x38] sm:$0xff] }
 0x2b2   :  { %11847 = vrcp.f32 %v330_v6 }
 0x2b9   :  { %v11846_v12 = vpop.eup %11845 }
 0x2ba   :  { %v12630_v27 = vmul.f32 %v11846_v12, %v11834_v50  ;;  %v12632_v7 = vmul.f32 %v11846_v12, %v11838_v52  ;;  %v529_v50 = vld [vmem:[%s12212_s3] sm:$0xff] }
 0x2bc   :  { %v12634_v36 = vpop.eup %11847 }
 0x2bd   :  { %v12637_v11 = vmul.f32 %v12634_v36, %v11844_v5  ;;  %v539_v5 = vld [vmem:[%s12212_s3 + $0x50] sm:$0xff] }
 0x2bf   :  { %14529 = vst [vmem:[#allocation45_spill] sm:$0xff] %v12637_v11  ;;  %v9869_v11 = vld [vmem:[%s12212_s3 + $0x3a0] sm:$0xff] }
 0x2c7   :  { %v502_v15 = vpop.xlane.xlu1 %501 }
 0x2c8   :  { %v503_v23 = vadd.f32 %v502_v15, %v498_v14  ;;  %v313_v14 = vmul.f32 %v11846_v12, %v11836_v51  ;;  %v12655_v15 = vpack.c.bf16 %v532_v54, %v529_v50  ;;  %v544_v50 = vld [vmem:[%s12212_s3 + $0x78] sm:$0xff]  ;;  %v546_v54 = vld [vmem:[%s12212_s3 + $0x88] sm:$0xff] }
 0x2ca   :  { %v504_v24 = vmul.f32 0.00390625, %v503_v23  ;;  %v535_v23 = vld [vmem:[%s12212_s3 + $0x30] sm:$0xff] }
 0x2cc   :  { %v505_v26 = vadd.f32 1e-05, %v504_v24 }
 0x2ce   :  { %11849 = vrsqrt.f32 %v505_v26  ;;  %v12660_v26 = vpack.c.bf16 %v539_v5, %v536_v1 }
 0x2d8   :  { %v11850_v35 = vpop.eup %11849 }
 0x2d9   :  { %v507_v37 = vmul.f32 %v11850_v35, %v249_v28  ;;  %v538_v28 = vld [vmem:[%s12212_s3 + $0x48] sm:$0xff]  ;;  %v537_v35 = vld [vmem:[%s12212_s3 + $0x40] sm:$0xff] }
 0x2da   :  { %v12669_v51 = vpack.c.bf16 %v538_v28, %v535_v23  ;;  %v550_v23 = vld [vmem:[%s12212_s3 + $0xa8] sm:$0xff]  ;;  %v552_v28 = vld [vmem:[%s12212_s3 + $0xb8] sm:$0xff] }
 0x2db   :  { %512 = vperm.xlu0 %11777, %v507_v37   ;;  %v508_v42 = vmul.f32 %v507_v37, %v12472_v22  ;;  %v531_v22 = vld [vmem:[%s12212_s3 + $0x10] sm:$0xff]  ;;  %v540_v37 = vld [vmem:[%s12212_s3 + $0x58] sm:$0xff] }
 0x2dc   :  { %v12671_v12 = vpack.c.bf16 %v540_v37, %v537_v35  ;;  %v554_v35 = vld [vmem:[%s12212_s3 + $0xc8] sm:$0xff]  ;;  %v557_v37 = vld [vmem:[%s12212_s3 + $0xe0] sm:$0xff] }
 0x2dd   :  { %v509_v40 = vsub.f32 %v252_v38, %v508_v42  ;;  %v542_v38 = vld [vmem:[%s12212_s3 + $0x68] sm:$0xff]  ;;  %v545_v42 = vld [vmem:[%s12212_s3 + $0x80] sm:$0xff] }
 0x2de   :  { %14531 = vst [vmem:[#allocation47_spill] sm:$0xff] %v12671_v12 }
 0x2df   :  { %518 = vperm.xlu1 %11778, %v509_v40   ;;  %v541_v40 = vld [vmem:[%s12212_s3 + $0x60] sm:$0xff] }
 0x2e0   :  { %v12688_v1 = vpack.c.bf16 %v544_v50, %v541_v40  ;;  %v553_v40 = vld [vmem:[%s12212_s3 + $0xc0] sm:$0xff]  ;;  %v12711_v50 = vpack.c.bf16 %v557_v37, %v554_v35  ;;  %v562_v37 = vld [vmem:[%s12212_s3 + $0x108] sm:$0xff] }
 0x2f0   :  { %v12642_v45 = vpop.permute.xlu0 %448 }
 0x2f1   :  { %v451_v43 = vmul.f32 %v12642_v45, %v12434_v34  ;;  %v12657_v34 = vpack.c.bf16 %v534_v62, %v531_v22  ;;  %v548_v22 = vld [vmem:[%s12212_s3 + $0x98] sm:$0xff]  ;;  %v551_v62 = vld [vmem:[%s12212_s3 + $0xb0] sm:$0xff] }
 0x2f3   :  { %14530 = vst [vmem:[#allocation46_spill] sm:$0xff] %v12657_v34 }
 0x2f4   :  { %v12646_v49 = vpop.permute.xlu1 %454 }
 0x2f5   :  { %v457_v52 = vadd.f32 %v12646_v49, %v451_v43  ;;  %v12676_v43 = vpack.c.bf16 %v545_v42, %v542_v38 }
 0x2f7   :  { %v458_v6 = vmax.f32 %v457_v52, 0.0  ;;  %v543_v52 = vld [vmem:[%s12212_s3 + $0x70] sm:$0xff] }
 0x2f8   :  { %v12690_v5 = vpack.c.bf16 %v546_v54, %v543_v52  ;;  %v556_v52 = vld [vmem:[%s12212_s3 + $0xd8] sm:$0xff]  ;;  %v555_v54 = vld [vmem:[%s12212_s3 + $0xd0] sm:$0xff] }
 0x2f9   :  { %v459_v24 = vmul.f32 %v458_v6, %v313_v14  ;;  %v547_v6 = vld [vmem:[%s12212_s3 + $0x90] sm:$0xff]  ;;  %v12695_v14 = vpack.c.bf16 %v551_v62, %v548_v22  ;;  %v558_v22 = vld [vmem:[%s12212_s3 + $0xe8] sm:$0xff]  ;;  %v560_v62 = vld [vmem:[%s12212_s3 + $0xf8] sm:$0xff] }
 0x2fa   :  { %14532 = vst [vmem:[#allocation48_spill] sm:$0xff] %v12690_v5  ;;  %v12704_v38 = vpack.c.bf16 %v550_v23, %v547_v6  ;;  %v563_v6 = vld [vmem:[%s12212_s3 + $0x110] sm:$0xff]  ;;  %v12720_v23 = vpack.c.bf16 %v556_v52, %v553_v40  ;;  %v569_v40 = vld [vmem:[%s12212_s3 + $0x140] sm:$0xff] }
 0x2fb   :  { %745 = vmatmul.mubr.f32.vlgmr.msra.gmra.mrb[0].mxu0 %v459_v24  ;;  %10380 = vmatmul.mubr.f32.vlgmr.msra.gmra.mrb[0].mxu1 %v459_v24  ;;  %v549_v24 = vld [vmem:[%s12212_s3 + $0xa0] sm:$0xff]  ;;  %v12727_v35 = vpack.c.bf16 %v563_v6, %v560_v62  ;;  %v568_v6 = vld [vmem:[%s12212_s3 + $0x138] sm:$0xff] }
 0x2fc   :  { %11078 = vmatpush1.bf16.msra.mxu0 %v12655_v15  ;;  %11109 = vmatpush3.bf16.msra.mxu1 %v12657_v34  ;;  %v12706_v42 = vpack.c.bf16 %v552_v28, %v549_v24  ;;  %v12722_v24 = vpack.c.bf16 %v558_v22, %v555_v54  ;;  %v559_v28 = vld [vmem:[%s12212_s3 + $0xf0] sm:$0xff]  ;;  %v565_v22 = vld [vmem:[%s12212_s3 + $0x120] sm:$0xff] }
 0x2fd   :  { %11080 = vmatprep.subr.bf16.mxu0 %v12660_v26  ;;  %11110 = vmatprep.subr.bf16.mxu1 %v14475_v33  ;;  %v12736_v52 = vpack.c.bf16 %v562_v37, %v559_v28  ;;  %v575_v28 = vld [vmem:[%s12212_s3 + $0x170] sm:$0xff]  ;;  %v573_v34 = vld [vmem:[%s12212_s3 + $0x160] sm:$0xff] }
 0x2fe   :  { %885 = vmatprep.mubr.f32.mxu0 %v14463_v16  ;;  %10414 = vmatprep.mubr.msk.f32.mxu1 %vm12152_vm2, %v14463_v16  ;;  %14533 = vst [vmem:[#allocation49_spill] sm:$0xff] %v12706_v42  ;;  %14534 = vst [vmem:[#allocation50_spill] sm:$0xff] %v12722_v24  ;;  %v561_v16 = vld [vmem:[%s12212_s3 + $0x100] sm:$0xff]  ;;  %v571_v37 = vld [vmem:[%s12212_s3 + $0x150] sm:$0xff] }
 0x2ff   :  { %v12738_v54 = vpack.c.bf16 %v564_v13, %v561_v16  ;;  %v12752_v13 = vpack.c.bf16 %v568_v6, %v565_v22  ;;  %v9852_v6 = vld [vmem:[%s12212_s3 + $0x318] sm:$0xff] }
 0x300   :  { %11082 = vmatpush1.bf16.msra.mxu0 %v12669_v51  ;;  %11112 = vmatpush3.bf16.msra.mxu1 %v12671_v12  ;;  %v572_v12 = vld [vmem:[%s12212_s3 + $0x158] sm:$0xff] }
 0x301   :  { %11084 = vmatprep.subr.bf16.mxu0 %v12676_v43  ;;  %11113 = vmatprep.subr.bf16.mxu1 %v14475_v33  ;;  %14535 = vst [vmem:[#allocation51_spill] sm:$0xff] %v12738_v54 }
 0x304   :  { %11086 = vmatpush1.bf16.msra.mxu0 %v12688_v1  ;;  %11115 = vmatpush3.bf16.msra.mxu1 %v12690_v5  ;;  %v567_v5 = vld [vmem:[%s12212_s3 + $0x130] sm:$0xff] }
 0x305   :  { %11088 = vmatprep.subr.bf16.mxu0 %v12695_v14  ;;  %11116 = vmatprep.subr.bf16.mxu1 %v14475_v33 }
 0x308   :  { %11090 = vmatpush1.bf16.msra.mxu0 %v12704_v38  ;;  %11118 = vmatpush3.bf16.msra.mxu1 %v12706_v42  ;;  %v566_v42 = vld [vmem:[%s12212_s3 + $0x128] sm:$0xff] }
 0x309   :  { %11092 = vmatprep.subr.bf16.mxu0 %v12711_v50  ;;  %11119 = vmatprep.subr.bf16.mxu1 %v14475_v33  ;;  %v12743_v62 = vpack.c.bf16 %v569_v40, %v566_v42  ;;  %v12759_v42 = vpack.c.bf16 %v575_v28, %v572_v12  ;;  %v574_v40 = vld [vmem:[%s12212_s3 + $0x168] sm:$0xff]  ;;  %v12774_v12 = vpack.c.bf16 %v9853_v48, %v9850_v2  ;;  %v9849_v48 = vld [vmem:[%s12212_s3 + $0x300] sm:$0xff]  ;;  %v9851_v28 = vld [vmem:[%s12212_s3 + $0x310] sm:$0xff] }
 0x30c   :  { %11094 = vmatpush1.bf16.msra.mxu0 %v12720_v23  ;;  %11121 = vmatpush3.bf16.msra.mxu1 %v12722_v24  ;;  %v570_v24 = vld [vmem:[%s12212_s3 + $0x148] sm:$0xff] }
 0x30d   :  { %11096 = vmatprep.subr.bf16.mxu0 %v12727_v35  ;;  %11122 = vmatprep.subr.bf16.mxu1 %v14475_v33  ;;  %v12754_v16 = vpack.c.bf16 %v570_v24, %v567_v5  ;;  %v12768_v5 = vpack.c.bf16 %v574_v40, %v571_v37  ;;  %v12770_v24 = vpack.c.bf16 %v576_v21, %v573_v34  ;;  %v9854_v37 = vld [vmem:[%s12212_s3 + $0x328] sm:$0xff]  ;;  %v9856_v40 = vld [vmem:[%s12212_s3 + $0x338] sm:$0xff] }
 0x30f   :  { %14536 = vst [vmem:[#allocation52_spill] sm:$0xff] %v12754_v16  ;;  %14537 = vst [vmem:[#allocation53_spill] sm:$0xff] %v12770_v24 }
 0x310   :  { %11098 = vmatpush1.bf16.msra.mxu0 %v12736_v52  ;;  %11124 = vmatpush3.bf16.msra.mxu1 %v12738_v54  ;;  %v12795_v54 = vpack.c.bf16 %v9854_v37, %v9851_v28  ;;  %v9864_v28 = vld [vmem:[%s12212_s3 + $0x378] sm:$0xff]  ;;  %v9866_v37 = vld [vmem:[%s12212_s3 + $0x388] sm:$0xff] }
 0x311   :  { %11100 = vmatprep.subr.bf16.mxu0 %v12743_v62  ;;  %11125 = vmatprep.subr.bf16.mxu1 %v14475_v33 }
 0x312   :  { %14538 = vst [vmem:[#allocation54_spill] sm:$0xff] %v12795_v54 }
 0x314   :  { %11102 = vmatpush1.bf16.msra.mxu0 %v12752_v13  ;;  %11127 = vmatpush3.bf16.msra.mxu1 %v12754_v16  ;;  %v12793_v16 = vpack.c.bf16 %v9852_v6, %v9849_v48 }
 0x315   :  { %11104 = vmatprep.subr.bf16.mxu0 %v12759_v42  ;;  %11128 = vmatprep.subr.bf16.mxu1 %v14475_v33 }
 0x318   :  { %11106 = vmatpush1.bf16.msra.mxu0 %v12768_v5  ;;  %11130 = vmatpush3.bf16.msra.mxu1 %v12770_v24 }
 0x319   :  { %11132 = vmatprep.subr.bf16.mxu0 %v12774_v12  ;;  %11163 = vmatprep.subr.bf16.mxu1 %v14475_v33  ;;  %v9859_v33 = vld [vmem:[%s12212_s3 + $0x350] sm:$0xff] }
 0x31a   :  { %v12799_v19 = vpack.c.bf16 %v9859_v33, %v9856_v40  ;;  %v9868_v40 = vld [vmem:[%s12212_s3 + $0x398] sm:$0xff] }
 0x325   :  { %v12780_v22 = vpop.permute.xlu0 %384 }
 0x326   :  { %v387_v21 = vmul.f32 %v12780_v22, %v12448_v57  ;;  %v9855_v57 = vld [vmem:[%s12212_s3 + $0x330] sm:$0xff] }
 0x327   :  { %v12808_v48 = vpack.c.bf16 %v9858_v8, %v9855_v57  ;;  %v9871_v8 = vld [vmem:[%s12212_s3 + $0x3b0] sm:$0xff] }
 0x329   :  { %v12784_v34 = vpop.permute.xlu1 %390  ;;  %14539 = vst [vmem:[#allocation55_spill] sm:$0xff] %v12808_v48 }
 0x32a   :  { %v393_v2 = vadd.f32 %v12784_v34, %v387_v21  ;;  %v9857_v21 = vld [vmem:[%s12212_s3 + $0x340] sm:$0xff] }
 0x32b   :  { %v12810_v33 = vpack.c.bf16 %v9860_v59, %v9857_v21  ;;  %v14543_v59 = vmov 0.0   ;;  %v9867_v21 = vld [vmem:[%s12212_s3 + $0x390] sm:$0xff] }
 0x32c   :  { %v394_v24 = vmax.f32 %v393_v2, 0.0  ;;  %v9865_v2 = vld [vmem:[%s12212_s3 + $0x380] sm:$0xff] }
 0x32d   :  { %14540 = vst [vmem:[#allocation56_spill] sm:$0xff] %v12810_v33  ;;  %v12815_v6 = vpack.c.bf16 %v9865_v2, %v9862_v46  ;;  %v12834_v2 = vpack.c.bf16 %v9871_v8, %v9868_v40  ;;  %v9876_v8 = vld [vmem:[%s12212_s3 + $0x3d8] sm:$0xff] }
 0x32e   :  { %v395_v30 = vmul.f32 %v394_v24, %v12630_v27  ;;  %v9861_v27 = vld [vmem:[%s12212_s3 + $0x360] sm:$0xff]  ;;  %v14541_v24 = vmov 0.0|0.0  }
 0x32f   :  { %14542 = vst [vmem:[#allocation57_spill] sm:$0xff] %v12815_v6  ;;  %v12827_v46 = vpack.c.bf16 %v9864_v28, %v9861_v27  ;;  %14546 = vst [vmem:[#allocation60_spill] sm:$0xff] %v12834_v2  ;;  %v9877_v27 = vld [vmem:[%s12212_s3 + $0x3e0] sm:$0xff] }
 0x330   :  { %886 = vmatmul.mubr.f32.vlgmr.msra.gmra.mrb[0].mxu0 %v395_v30  ;;  %10415 = vmatmul.mubr.f32.vlgmr.msra.gmra.mrb[0].mxu1 %v395_v30  ;;  %v9863_v30 = vld [vmem:[%s12212_s3 + $0x370] sm:$0xff]  ;;  %v12850_v40 = vpack.c.bf16 %v9877_v27, %v9874_v63  ;;  %v9882_v27 = vld [vmem:[%s12212_s3 + $0x408] sm:$0xff] }
 0x331   :  { %11134 = vmatpush1.bf16.msra.mxu0 %v12793_v16  ;;  %11165 = vmatpush3.bf16.msra.mxu1 %v12795_v54  ;;  %14544 = vst [vmem:[#allocation58_spill] sm:$0xff] %v12827_v46  ;;  %v12829_v57 = vpack.c.bf16 %v9866_v37, %v9863_v30  ;;  %v9870_v54 = vld [vmem:[%s12212_s3 + $0x3a8] sm:$0xff]  ;;  %v9873_v37 = vld [vmem:[%s12212_s3 + $0x3c0] sm:$0xff] }
 0x332   :  { %11136 = vmatprep.subr.bf16.mxu0 %v12799_v19  ;;  %11166 = vmatprep.subr.bf16.mxu1 %v14541_v24  ;;  %v12843_v28 = vpack.c.bf16 %v9870_v54, %v9867_v21  ;;  %14549 = vst [vmem:[#allocation63_spill] sm:$0xff] %v12850_v40  ;;  %v9883_v54 = vld [vmem:[%s12212_s3 + $0x410] sm:$0xff] }
 0x333   :  { %1026 = vmatprep.mubr.f32.mxu0 %v14543_v59  ;;  %10449 = vmatprep.mubr.msk.f32.mxu1 %vm12152_vm2, %v14543_v59  ;;  %14545 = vst [vmem:[#allocation59_spill] sm:$0xff] %v12829_v57  ;;  %v9879_v21 = vld [vmem:[%s12212_s3 + $0x3f0] sm:$0xff] }
 0x334   :  { %14547 = vst [vmem:[#allocation61_spill] sm:$0xff] %v12843_v28 }
 0x335   :  { %11138 = vmatpush1.bf16.msra.mxu0 %v12808_v48  ;;  %11168 = vmatpush3.bf16.msra.mxu1 %v12810_v33  ;;  %v9872_v33 = vld [vmem:[%s12212_s3 + $0x3b8] sm:$0xff] }
 0x336   :  { %11140 = vmatprep.subr.bf16.mxu0 %v12815_v6  ;;  %11169 = vmatprep.subr.bf16.mxu1 %v14541_v24  ;;  %v12845_v30 = vpack.c.bf16 %v9872_v33, %v9869_v11  ;;  %v9880_v6 = vld [vmem:[%s12212_s3 + $0x3f8] sm:$0xff]  ;;  %v12859_v11 = vpack.c.bf16 %v9876_v8, %v9873_v37  ;;  %v9889_v37 = vld [vmem:[%s12212_s3 + $0x440] sm:$0xff] }
 0x337   :  { %v12866_v63 = vpack.c.bf16 %v9883_v54, %v9880_v6  ;;  %v9885_v8 = vld [vmem:[%s12212_s3 + $0x420] sm:$0xff]  ;;  %v9888_v54 = vld [vmem:[%s12212_s3 + $0x438] sm:$0xff] }
 0x338   :  { %14548 = vst [vmem:[#allocation62_spill] sm:$0xff] %v12845_v30  ;;  %14550 = vst [vmem:[#allocation64_spill] sm:$0xff] %v12859_v11  ;;  %v9892_v48 = vld [vmem:[%s12212_s3 + $0x458] sm:$0xff] }
 0x339   :  { %11142 = vmatpush1.bf16.msra.mxu0 %v12827_v46  ;;  %11171 = vmatpush3.bf16.msra.mxu1 %v12829_v57  ;;  %v9875_v46 = vld [vmem:[%s12212_s3 + $0x3d0] sm:$0xff]  ;;  %v9878_v57 = vld [vmem:[%s12212_s3 + $0x3e8] sm:$0xff]  ;;  %14552 = vst [vmem:[#allocation66_spill] sm:$0xff] %v12866_v63 }
 0x33a   :  { %11144 = vmatprep.subr.bf16.mxu0 %v12834_v2  ;;  %11172 = vmatprep.subr.bf16.mxu1 %v14541_v24  ;;  %v12861_v33 = vpack.c.bf16 %v9878_v57, %v9875_v46  ;;  %v9886_v2 = vld [vmem:[%s12212_s3 + $0x428] sm:$0xff]  ;;  %v12875_v46 = vpack.c.bf16 %v9882_v27, %v9879_v21  ;;  %v9891_v21 = vld [vmem:[%s12212_s3 + $0x450] sm:$0xff] }
 0x33b   :  { %v12882_v6 = vpack.c.bf16 %v9889_v37, %v9886_v2  ;;  %v9894_v27 = vld [vmem:[%s12212_s3 + $0x468] sm:$0xff]  ;;  %v9893_v37 = vld [vmem:[%s12212_s3 + $0x460] sm:$0xff] }
 0x33c   :  { %14551 = vst [vmem:[#allocation65_spill] sm:$0xff] %v12861_v33  ;;  %14553 = vst [vmem:[#allocation67_spill] sm:$0xff] %v12875_v46 }
 0x33d   :  { %11146 = vmatpush1.bf16.msra.mxu0 %v12843_v28  ;;  %11174 = vmatpush3.bf16.msra.mxu1 %v12845_v30  ;;  %v9881_v28 = vld [vmem:[%s12212_s3 + $0x400] sm:$0xff]  ;;  %v9884_v30 = vld [vmem:[%s12212_s3 + $0x418] sm:$0xff] }
 0x33e   :  { %11148 = vmatprep.subr.bf16.mxu0 %v12850_v40  ;;  %11175 = vmatprep.subr.bf16.mxu1 %v14541_v24  ;;  %v12877_v57 = vpack.c.bf16 %v9884_v30, %v9881_v28  ;;  %v9887_v40 = vld [vmem:[%s12212_s3 + $0x430] sm:$0xff]  ;;  %v12891_v28 = vpack.c.bf16 %v9888_v54, %v9885_v8 }
 0x341   :  { %11150 = vmatpush1.bf16.msra.mxu0 %v12859_v11  ;;  %11177 = vmatpush3.bf16.msra.mxu1 %v12861_v33  ;;  %v9890_v11 = vld [vmem:[%s12212_s3 + $0x448] sm:$0xff]  ;;  %v9895_v33 = vld [vmem:[%s12212_s3 + $0x470] sm:$0xff] }
 0x342   :  { %11152 = vmatprep.subr.bf16.mxu0 %v12866_v63  ;;  %11178 = vmatprep.subr.bf16.mxu1 %v14541_v24  ;;  %v12893_v30 = vpack.c.bf16 %v9890_v11, %v9887_v40  ;;  %v12898_v2 = vpack.c.bf16 %v9895_v33, %v9892_v48  ;;  %v9896_v63 = vld [vmem:[%s12212_s3 + $0x478] sm:$0xff]  ;;  %s14590_s3 = sld [smem:[#allocation19_spill]] }
 0x343   :  { %v12907_v8 = vpack.c.bf16 %v9896_v63, %v9893_v37 }
 0x345   :  { %11154 = vmatpush1.bf16.msra.mxu0 %v12875_v46  ;;  %11180 = vmatpush3.bf16.msra.mxu1 %v12877_v57  ;;  %v12905_v46 = vpack.c.bf16 %v9894_v27, %v9891_v21  ;;  %v12928_v21 = vld [vmem:[%s12202_s25] sm:$0xff] }
 0x346   :  { %11156 = vmatprep.subr.bf16.mxu0 %v12882_v6  ;;  %11181 = vmatprep.subr.bf16.mxu1 %v14541_v24 }
 0x349   :  { %11158 = vmatpush1.bf16.msra.mxu0 %v12891_v28  ;;  %11183 = vmatpush3.bf16.msra.mxu1 %v12893_v30 }
 0x34a   :  { %11160 = vmatprep.subr.bf16.mxu0 %v12898_v2  ;;  %11184 = vmatprep.subr.bf16.mxu1 %v14541_v24 }
 0x34d   :  { %11162 = vmatpush1.bf16.msra.mxu0 %v12905_v46  ;;  %11186 = vmatpush3.bf16.msra.mxu1 %v12907_v8 }
 0x34e   :  { %10452 = vmatprep.subr.mxu0 %v14543_v59  ;;  %10467 = vmatprep.subr.mxu1 %v14543_v59 }
 0x35a   :  { %v12915_v48 = vpop.permute.xlu0 %512 }
 0x35b   :  { %v515_v40 = vmul.f32 %v12915_v48, %v12454_v0 }
 0x35e   :  { %v12919_v11 = vpop.permute.xlu1 %518 }
 0x35f   :  { %v521_v33 = vadd.f32 %v12919_v11, %v515_v40  ;;  %v12940_v40 = vld [vmem:[%s12202_s25 + $0x8] sm:$0xff] }
 0x361   :  { %v522_v63 = vmax.f32 %v521_v33, 0.0  ;;  %v12948_v33 = vld [vmem:[%s12202_s25 + $0x10] sm:$0xff]  ;;  %s12155_s25 = smov 96  }
 0x363   :  { %v523_v54 = vmul.f32 %v522_v63, %v12632_v7 }
 0x365   :  { %1027 = vmatmul.mubr.f32.vlgmr.msra.gmra.mrb[0].mxu0 %v523_v54  ;;  %10450 = vmatmul.mubr.f32.vlgmr.msra.gmra.mrb[0].mxu1 %v523_v54 }
 0x366   :  { %10454 = vmatprep.mubr.msk.f32.mxu0 %vm12152_vm2, %v14543_v59  ;;  %10469 = vmatprep.mubr.msk.f32.mxu1 %vm12152_vm2, %v14543_v59 }
 0x438   :  { %v1028_v0 = vpop.f32.mrb[0].mxu0  ;;  %v1099_v27 = vpop.f32.mrb[0].mxu1 }
 0x439   :  { %v10451_v37 = vpop.f32.mrb[1].mxu1  ;;  %1335 = vrot.lane.b32.xlu0 %v1028_v0, %s12153_s5  ;;  %v1030_v7 = vpop.f32.mrb[1].mxu0  ;;  %10453 = vmatpush3.msra.mxu0 %v1028_v0 }
 0x43a   :  { %10455 = vmatmul.mubr.msk.f32.vlgmr.msra.gmra.mrb[2].mxu0 %vm1106_vm3, %v12928_v21  ;;  %10457 = vmatprep.subr.mxu0 %v14543_v59 }
 0x43b   :  { %1410 = vrot.lane.b32.xlu1 %v1030_v7, %s12153_s5  ;;  %10458 = vmatpush3.msra.mxu0 %v1030_v7 }
 0x43c   :  { %10459 = vmatprep.mubr.msk.f32.mxu0 %vm12152_vm2, %v14543_v59  ;;  %10462 = vmatprep.subr.mxu0 %v14543_v59 }
 0x43d   :  { %1485 = vrot.lane.b32.xlu0 %v1099_v27, %s12153_s5 }
 0x442   :  { %10460 = vmatmul.mubr.msk.f32.vlgmr.msra.gmra.mrb[2].mxu0 %vm1106_vm3, %v12940_v40 }
 0x443   :  { %10463 = vmatpush3.msra.mxu0 %v1099_v27  ;;  %10464 = vmatprep.mubr.msk.f32.mxu0 %vm12152_vm2, %v14543_v59 }
 0x444   :  { %11188 = vmatprep.subr.bf16.mxu0 %v12481_v32  ;;  %v460_v32 = vmul.f32 %v12642_v45, %v12439_v41  ;;  %v396_v41 = vmul.f32 %v12780_v22, %v12446_v56  ;;  %v14554_v56 = vld [vmem:[#allocation55_spill] sm:$0xff]  ;;  %v14564_v45 = vld [vmem:[#allocation45_spill] sm:$0xff]  ;;  %v14579_v22 = vld [vmem:[#allocation52_spill] sm:$0xff] }
 0x44a   :  { %10465 = vmatmul.mubr.msk.f32.vlgmr.msra.gmra.mrb[2].mxu0 %vm1106_vm3, %v12948_v33 }
 0x44b   :  { %11190 = vmatpush1.bf16.msra.mxu0 %v12488_v39  ;;  %1624 = vmatprep.mubr.f32.mxu0 %v14543_v59  ;;  %v461_v39 = vadd.f32 %v460_v32, %v12646_v49 }
 0x44c   :  { %11192 = vmatprep.subr.bf16.mxu0 %v12495_v47 }
 0x44d   :  { %v462_v47 = vmax.f32 %v461_v39, 0.0 }
 0x44f   :  { %11194 = vmatpush1.bf16.msra.mxu0 %v12504_v53  ;;  %v334_v53 = vmul.f32 %v12634_v36, %v12626_v61 }
 0x450   :  { %11196 = vmatprep.subr.bf16.mxu0 %v12511_v60 }
 0x451   :  { %v12973_v60 = vmul.f32 %v462_v47, %v334_v53 }
 0x453   :  { %11198 = vmatpush1.bf16.msra.mxu0 %v12517_v3  ;;  %v397_v3 = vadd.f32 %v396_v41, %v12784_v34  ;;  %v14580_v34 = vld [vmem:[#allocation53_spill] sm:$0xff] }
 0x454   :  { %11200 = vmatprep.subr.bf16.mxu0 %v12526_v9 }
 0x455   :  { %v398_v9 = vmax.f32 %v397_v3, 0.0  ;;  %v2431_v3 = vld [vmem:[%s12222_s14 + $0x18] sm:$0xff] }
 0x457   :  { %11202 = vmatpush1.bf16.msra.mxu0 %v12536_v18  ;;  %v333_v18 = vmul.f32 %v12634_v36, %v12624_v58 }
 0x458   :  { %11204 = vmatprep.subr.bf16.mxu0 %v12542_v20 }
 0x459   :  { %v12998_v20 = vmul.f32 %v398_v9, %v333_v18  ;;  %v2433_v9 = vld [vmem:[%s12222_s14 + $0x28] sm:$0xff] }
 0x45b   :  { %11206 = vmatpush1.bf16.msra.mxu0 %v12552_v29  ;;  %v14555_v29 = vld [vmem:[#allocation57_spill] sm:$0xff] }
 0x45c   :  { %11208 = vmatprep.subr.bf16.mxu0 %v12558_v31  ;;  %v14556_v31 = vld [vmem:[#allocation58_spill] sm:$0xff] }
 0x45f   :  { %11210 = vmatpush1.bf16.msra.mxu0 %v12567_v44  ;;  %v14557_v44 = vld [vmem:[#allocation60_spill] sm:$0xff] }
 0x460   :  { %11212 = vmatprep.subr.bf16.mxu0 %v12580_v55  ;;  %v14558_v55 = vld [vmem:[#allocation61_spill] sm:$0xff] }
 0x463   :  { %11214 = vmatpush1.bf16.msra.mxu0 %v12586_v4  ;;  %v14559_v4 = vld [vmem:[#allocation63_spill] sm:$0xff] }
 0x464   :  { %11216 = vmatprep.subr.bf16.mxu0 %v12598_v10  ;;  %v14560_v10 = vld [vmem:[#allocation64_spill] sm:$0xff] }
 0x467   :  { %11218 = vmatpush1.bf16.msra.mxu0 %v12606_v17  ;;  %v14561_v17 = vld [vmem:[#allocation66_spill] sm:$0xff] }
 0x468   :  { %11244 = vmatprep.subr.bf16.mxu0 %v12613_v25  ;;  %v14562_v25 = vld [vmem:[#allocation36_spill] sm:$0xff] }
 0x469   :  { %v524_v58 = vmul.f32 %v12915_v48, %v14562_v25  ;;  %v14585_v48 = vld [vmem:[#allocation65_spill] sm:$0xff] }
 0x46a   :  { %1625 = vmatmul.mubr.f32.vlgmr.msra.gmra.mrb[4].mxu0 %v12973_v60 }
 0x46b   :  { %11246 = vmatpush1.bf16.msra.mxu0 %v12655_v15  ;;  %1765 = vmatprep.mubr.f32.mxu0 %v14543_v59  ;;  %v525_v61 = vadd.f32 %v524_v58, %v12919_v11  ;;  %v2428_v58 = vld [vmem:[%s12222_s14] sm:$0xff] }
 0x46c   :  { %11248 = vmatprep.subr.bf16.mxu0 %v12660_v26 }
 0x46d   :  { %v526_v36 = vmax.f32 %v525_v61, 0.0  ;;  %v2435_v61 = vld [vmem:[%s12222_s14 + $0x38] sm:$0xff] }
 0x46f   :  { %11250 = vmatpush1.bf16.msra.mxu0 %v12669_v51  ;;  %v13022_v49 = vmul.f32 %v526_v36, %v14564_v45 }
 0x470   :  { %11252 = vmatprep.subr.bf16.mxu0 %v12676_v43  ;;  %v14565_v43 = vld [vmem:[#allocation37_spill] sm:$0xff] }
 0x473   :  { %11254 = vmatpush1.bf16.msra.mxu0 %v12688_v1  ;;  %v14566_v1 = vld [vmem:[#allocation38_spill] sm:$0xff] }
 0x474   :  { %11256 = vmatprep.subr.bf16.mxu0 %v12695_v14  ;;  %v14567_v14 = vld [vmem:[#allocation39_spill] sm:$0xff] }
 0x477   :  { %11258 = vmatpush1.bf16.msra.mxu0 %v12704_v38  ;;  %v14568_v38 = vld [vmem:[#allocation40_spill] sm:$0xff] }
 0x478   :  { %11260 = vmatprep.subr.bf16.mxu0 %v12711_v50  ;;  %v14569_v50 = vld [vmem:[#allocation41_spill] sm:$0xff] }
 0x47b   :  { %11262 = vmatpush1.bf16.msra.mxu0 %v12720_v23  ;;  %v14570_v23 = vld [vmem:[#allocation42_spill] sm:$0xff] }
 0x47c   :  { %11264 = vmatprep.subr.bf16.mxu0 %v12727_v35  ;;  %v14571_v35 = vld [vmem:[#allocation43_spill] sm:$0xff] }
 0x47f   :  { %11266 = vmatpush1.bf16.msra.mxu0 %v12736_v52  ;;  %v14572_v52 = vld [vmem:[#allocation44_spill] sm:$0xff] }
 0x480   :  { %11268 = vmatprep.subr.bf16.mxu0 %v12743_v62  ;;  %v14573_v62 = vld [vmem:[#allocation46_spill] sm:$0xff] }
 0x483   :  { %11270 = vmatpush1.bf16.msra.mxu0 %v12752_v13  ;;  %v14574_v13 = vld [vmem:[#allocation47_spill] sm:$0xff] }
 0x484   :  { %11272 = vmatprep.subr.bf16.mxu0 %v12759_v42  ;;  %v14576_v42 = vld [vmem:[#allocation49_spill] sm:$0xff] }
 0x487   :  { %11274 = vmatpush1.bf16.msra.mxu0 %v12768_v5  ;;  %v14577_v5 = vld [vmem:[#allocation50_spill] sm:$0xff] }
 0x488   :  { %11300 = vmatprep.subr.bf16.mxu0 %v12774_v12  ;;  %v14578_v12 = vld [vmem:[#allocation51_spill] sm:$0xff] }
 0x48a   :  { %1766 = vmatmul.mubr.f32.vlgmr.msra.gmra.mrb[4].mxu0 %v12998_v20 }
 0x48b   :  { %11302 = vmatpush1.bf16.msra.mxu0 %v12793_v16  ;;  %1906 = vmatprep.mubr.f32.mxu0 %v14543_v59  ;;  %v14575_v16 = vld [vmem:[#allocation48_spill] sm:$0xff] }
 0x48c   :  { %11304 = vmatprep.subr.bf16.mxu0 %v12799_v19  ;;  %v14563_v19 = vld [vmem:[#allocation67_spill] sm:$0xff] }
 0x48f   :  { %11306 = vmatpush1.bf16.msra.mxu0 %v14554_v56 }
 0x490   :  { %11308 = vmatprep.subr.bf16.mxu0 %v14555_v29 }
 0x493   :  { %11310 = vmatpush1.bf16.msra.mxu0 %v14556_v31 }
 0x494   :  { %11312 = vmatprep.subr.bf16.mxu0 %v14557_v44 }
 0x497   :  { %11314 = vmatpush1.bf16.msra.mxu0 %v14558_v55 }
 0x498   :  { %11316 = vmatprep.subr.bf16.mxu0 %v14559_v4 }
 0x49b   :  { %11318 = vmatpush1.bf16.msra.mxu0 %v14560_v10  ;;  %v2432_v10 = vld [vmem:[%s12222_s14 + $0x20] sm:$0xff] }
 0x49c   :  { %11320 = vmatprep.subr.bf16.mxu0 %v14561_v17 }
 0x49f   :  { %11322 = vmatpush1.bf16.msra.mxu0 %v14563_v19  ;;  %v2430_v19 = vld [vmem:[%s12222_s14 + $0x10] sm:$0xff] }
 0x4a0   :  { %11324 = vmatprep.subr.bf16.mxu0 %v12882_v6  ;;  %v14582_v6 = vld [vmem:[#allocation56_spill] sm:$0xff] }
 0x4a3   :  { %11326 = vmatpush1.bf16.msra.mxu0 %v12891_v28  ;;  %v14583_v28 = vld [vmem:[#allocation59_spill] sm:$0xff] }
 0x4a4   :  { %11328 = vmatprep.subr.bf16.mxu0 %v12898_v2  ;;  %v14584_v2 = vld [vmem:[#allocation62_spill] sm:$0xff] }
 0x4a7   :  { %11330 = vmatpush1.bf16.msra.mxu0 %v12905_v46  ;;  %v14581_v46 = vld [vmem:[#allocation54_spill] sm:$0xff] }
 0x4a8   :  { %10587 = vmatprep.subr.mxu0 %v14543_v59 }
 0x4aa   :  { %1907 = vmatmul.mubr.f32.vlgmr.msra.gmra.mrb[4].mxu0 %v13022_v49 }
 0x4ab   :  { %v1336_v15 = vpop.permute.xlu0 %1335  ;;  %10589 = vmatprep.mubr.msk.f32.mxu0 %vm12152_vm2, %v14543_v59 }
 0x4ac   :  { %10468 = vmatpush3.msra.mxu1 %v1336_v15  ;;  %v2434_v15 = vld [vmem:[%s12222_s14 + $0x30] sm:$0xff] }
 0x4ad   :  { %v1411_v26 = vpop.permute.xlu1 %1410  ;;  %10470 = vmatmul.mubr.msk.f32.vlgmr.msra.gmra.mrb[2].mxu1 %vm1106_vm3, %v12928_v21  ;;  %10472 = vmatprep.subr.mxu1 %v14543_v59 }
 0x4ae   :  { %10473 = vmatpush3.msra.mxu1 %v1411_v26  ;;  %10474 = vmatprep.mubr.msk.f32.mxu1 %vm12152_vm2, %v14543_v59  ;;  %v2436_v26 = vld [vmem:[%s12222_s14 + $0x40] sm:$0xff] }
 0x4af   :  { %10477 = vmatprep.subr.mxu1 %v14543_v59  ;;  %v1486_v51 = vpop.permute.xlu0 %1485 }
 0x4b5   :  { %10475 = vmatmul.mubr.msk.f32.vlgmr.msra.gmra.mrb[2].mxu1 %vm1106_vm3, %v12940_v40 }
 0x4b6   :  { %10478 = vmatpush3.msra.mxu1 %v1486_v51  ;;  %10479 = vmatprep.mubr.msk.f32.mxu1 %vm12152_vm2, %v14543_v59 }
 0x4b7   :  { %11219 = vmatprep.subr.bf16.mxu1 %v14541_v24 }
 0x4bd   :  { %10480 = vmatmul.mubr.msk.f32.vlgmr.msra.gmra.mrb[2].mxu1 %vm1106_vm3, %v12948_v33 }
 0x4be   :  { %11221 = vmatpush3.bf16.msra.mxu1 %v14565_v43  ;;  %10514 = vmatprep.mubr.msk.f32.mxu1 %vm12152_vm2, %v14543_v59 }
 0x4bf   :  { %11222 = vmatprep.subr.bf16.mxu1 %v14541_v24 }
 0x4c2   :  { %11224 = vmatpush3.bf16.msra.mxu1 %v14566_v1 }
 0x4c3   :  { %11225 = vmatprep.subr.bf16.mxu1 %v14541_v24 }
 0x4c6   :  { %11227 = vmatpush3.bf16.msra.mxu1 %v14567_v14  ;;  %v14586_v14 = vld [vmem:[#allocation35_spill] sm:$0xff] }
 0x4c7   :  { %11228 = vmatprep.subr.bf16.mxu1 %v14541_v24  ;;  %vm2443_vm5 = vcmp.eq.s32.totalorder %v14586_v14, 63  ;;  %vm4163_vm8 = vcmp.eq.s32.totalorder %v14586_v14, 31  ;;  %vm5843_vm11 = vcmp.eq.s32.totalorder %v14586_v14, 15  ;;  %vm7627_vm14 = vcmp.eq.s32.totalorder %v14586_v14, 7 }
 0x4ca   :  { %11230 = vmatpush3.bf16.msra.mxu1 %v14568_v38 }
 0x4cb   :  { %11231 = vmatprep.subr.bf16.mxu1 %v14541_v24 }
 0x4ce   :  { %11233 = vmatpush3.bf16.msra.mxu1 %v14569_v50 }
 0x4cf   :  { %11234 = vmatprep.subr.bf16.mxu1 %v14541_v24 }
 0x4d2   :  { %11236 = vmatpush3.bf16.msra.mxu1 %v14570_v23 }
 0x4d3   :  { %11237 = vmatprep.subr.bf16.mxu1 %v14541_v24 }
 0x4d6   :  { %11239 = vmatpush3.bf16.msra.mxu1 %v14571_v35 }
 0x4d7   :  { %11240 = vmatprep.subr.bf16.mxu1 %v14541_v24 }
 0x4da   :  { %11242 = vmatpush3.bf16.msra.mxu1 %v14572_v52 }
 0x4db   :  { %11275 = vmatprep.subr.bf16.mxu1 %v14541_v24 }
 0x4dd   :  { %10515 = vmatmul.mubr.f32.vlgmr.msra.gmra.mrb[4].mxu1 %v12973_v60 }
 0x4de   :  { %11277 = vmatpush3.bf16.msra.mxu1 %v14573_v62  ;;  %10549 = vmatprep.mubr.msk.f32.mxu1 %vm12152_vm2, %v14543_v59 }
 0x4df   :  { %11278 = vmatprep.subr.bf16.mxu1 %v14541_v24 }
 0x4e2   :  { %11280 = vmatpush3.bf16.msra.mxu1 %v14574_v13 }
 0x4e3   :  { %11281 = vmatprep.subr.bf16.mxu1 %v14541_v24 }
 0x4e6   :  { %11283 = vmatpush3.bf16.msra.mxu1 %v14575_v16 }
 0x4e7   :  { %11284 = vmatprep.subr.bf16.mxu1 %v14541_v24 }
 0x4ea   :  { %11286 = vmatpush3.bf16.msra.mxu1 %v14576_v42 }
 0x4eb   :  { %11287 = vmatprep.subr.bf16.mxu1 %v14541_v24 }
 0x4ee   :  { %11289 = vmatpush3.bf16.msra.mxu1 %v14577_v5 }
 0x4ef   :  { %11290 = vmatprep.subr.bf16.mxu1 %v14541_v24 }
 0x4f2   :  { %11292 = vmatpush3.bf16.msra.mxu1 %v14578_v12 }
 0x4f3   :  { %11293 = vmatprep.subr.bf16.mxu1 %v14541_v24 }
 0x4f6   :  { %11295 = vmatpush3.bf16.msra.mxu1 %v14579_v22 }
 0x4f7   :  { %11296 = vmatprep.subr.bf16.mxu1 %v14541_v24 }
 0x4fa   :  { %11298 = vmatpush3.bf16.msra.mxu1 %v14580_v34 }
 0x4fb   :  { %11331 = vmatprep.subr.bf16.mxu1 %v14541_v24 }
 0x4fd   :  { %10550 = vmatmul.mubr.f32.vlgmr.msra.gmra.mrb[4].mxu1 %v12998_v20 }
 0x4fe   :  { %11333 = vmatpush3.bf16.msra.mxu1 %v14581_v46  ;;  %10584 = vmatprep.mubr.msk.f32.mxu1 %vm12152_vm2, %v14543_v59 }
 0x4ff   :  { %11334 = vmatprep.subr.bf16.mxu1 %v14541_v24 }
 0x502   :  { %11336 = vmatpush3.bf16.msra.mxu1 %v14582_v6 }
 0x503   :  { %11337 = vmatprep.subr.bf16.mxu1 %v14541_v24 }
 0x506   :  { %11339 = vmatpush3.bf16.msra.mxu1 %v14583_v28 }
 0x507   :  { %11340 = vmatprep.subr.bf16.mxu1 %v14541_v24 }
 0x50a   :  { %11342 = vmatpush3.bf16.msra.mxu1 %v14584_v2 }
 0x50b   :  { %11343 = vmatprep.subr.bf16.mxu1 %v14541_v24 }
 0x50e   :  { %11345 = vmatpush3.bf16.msra.mxu1 %v14585_v48 }
 0x50f   :  { %11346 = vmatprep.subr.bf16.mxu1 %v14541_v24 }
 0x512   :  { %11348 = vmatpush3.bf16.msra.mxu1 %v12877_v57 }
 0x513   :  { %11349 = vmatprep.subr.bf16.mxu1 %v14541_v24 }
 0x516   :  { %11351 = vmatpush3.bf16.msra.mxu1 %v12893_v30  ;;  %v528_v30 = vld [vmem:[%s12207_s29] sm:$0xff]  ;;  %s12156_s29 = smov 32  }
 0x517   :  { %11352 = vmatprep.subr.bf16.mxu1 %v14541_v24 }
 0x51a   :  { %11354 = vmatpush3.bf16.msra.mxu1 %v12907_v8 }
 0x51b   :  { %10602 = vmatprep.subr.mxu1 %v14543_v59 }
 0x51d   :  { %10585 = vmatmul.mubr.f32.vlgmr.msra.gmra.mrb[4].mxu1 %v13022_v49  ;;  %v1329_v11 = vpop.f32.mrb[2].mxu0  ;;  %v2429_v49 = vld [vmem:[%s12222_s14 + $0x8] sm:$0xff]  ;;  %s14591_s14 = sld [smem:[#allocation21_spill]] }
 0x51e   :  { %v10466_v63 = vpop.f32.mrb[3].mxu0  ;;  %10604 = vmatprep.mubr.msk.f32.mxu1 %vm12152_vm2, %v14543_v59 }
 0x57d   :  { %v1908_v54 = vpop.f32.mrb[4].mxu0 }
 0x57e   :  { %2200 = vrot.lane.b32.xlu1 %v1908_v54, %s12153_s5  ;;  %v1910_v57 = vpop.f32.mrb[5].mxu0  ;;  %10588 = vmatpush3.msra.mxu0 %v1908_v54 }
 0x57f   :  { %10592 = vmatprep.subr.mxu0 %v14543_v59  ;;  %2275 = vrot.lane.b32.xlu0 %v1910_v57, %s12153_s5 }
 0x580   :  { %10590 = vmatmul.mubr.msk.f32.vlgmr.msra.gmra.mrb[6].mxu0 %vm1106_vm3, %v12928_v21 }
 0x581   :  { %10593 = vmatpush3.msra.mxu0 %v1910_v57  ;;  %10594 = vmatprep.mubr.msk.f32.mxu0 %vm12152_vm2, %v14543_v59 }
 0x582   :  { %10597 = vmatprep.subr.mxu0 %v14543_v59 }
 0x583   :  { %1182 = vperm.xlu0 %11777, %v528_v30  }
 0x588   :  { %10595 = vmatmul.mubr.msk.f32.vlgmr.msra.gmra.mrb[6].mxu0 %vm1106_vm3, %v12940_v40 }
 0x589   :  { %10599 = vmatprep.mubr.msk.f32.mxu0 %vm12152_vm2, %v14543_v59 }
 0x590   :  { %v1554_v8 = vpop.f32.mrb[2].mxu1 }
 0x591   :  { %v10481_v0 = vpop.f32.mrb[3].mxu1 }
 0x5f0   :  { %v1979_v27 = vpop.f32.mrb[4].mxu1  ;;  %v2201_v37 = vpop.permute.xlu1 %2200 }
 0x5f1   :  { %v10586_v7 = vpop.f32.mrb[5].mxu1  ;;  %2350 = vrot.lane.b32.xlu1 %v1979_v27, %s12153_s5  ;;  %10603 = vmatpush3.msra.mxu1 %v2201_v37  ;;  %v2276_v32 = vpop.permute.xlu0 %2275 }
 0x5f2   :  { %10598 = vmatpush3.msra.mxu0 %v1979_v27  ;;  %10607 = vmatprep.subr.mxu1 %v14543_v59 }
 0x5f3   :  { %10600 = vmatmul.mubr.msk.f32.vlgmr.msra.gmra.mrb[6].mxu0 %vm1106_vm3, %v12948_v33  ;;  %10605 = vmatmul.mubr.msk.f32.vlgmr.msra.gmra.mrb[6].mxu1 %vm1106_vm3, %v12928_v21 }
 0x5f4   :  { %10608 = vmatpush3.msra.mxu1 %v2276_v32  ;;  %10609 = vmatprep.mubr.msk.f32.mxu1 %vm12152_vm2, %v14543_v59 }
 0x5f5   :  { %10612 = vmatprep.subr.mxu1 %v14543_v59  ;;  %2868 = vmatprep.mubr.f32.mxu0 %v14543_v59 }
 0x5fb   :  { %10610 = vmatmul.mubr.msk.f32.vlgmr.msra.gmra.mrb[6].mxu1 %vm1106_vm3, %v12940_v40 }
 0x5fc   :  { %10614 = vmatprep.mubr.msk.f32.mxu1 %vm12152_vm2, %v14543_v59 }
 0x602   :  { %v1183_v39 = vpop.permute.xlu0 %1182 }
 0x603   :  { %v11553_v47 = vadd.f32 %v1329_v11, %v1183_v39  ;;  %v11554_v53 = vadd.f32 %v1554_v8, %v1183_v39 }
 0x605   :  { %v13127_v21 = vmax.f32 %v11553_v47, %v11554_v53 }
 0x607   :  { %2445 = vrot.lane.b32.xlu1 %v13127_v21, %s12153_s5 }
 0x663   :  { %v2351_v60 = vpop.permute.xlu1 %2350 }
 0x664   :  { %10613 = vmatpush3.msra.mxu1 %v2351_v60 }
 0x665   :  { %10615 = vmatmul.mubr.msk.f32.vlgmr.msra.gmra.mrb[6].mxu1 %vm1106_vm3, %v12948_v33  ;;  %10617 = vmatprep.subr.mxu1 %v14543_v59 }
 0x666   :  { %10619 = vmatprep.mubr.msk.f32.mxu1 %vm12152_vm2, %v14543_v59 }
 0x679   :  { %v2446_v40 = vpop.permute.xlu1 %2445 }
 0x67a   :  { %v2447_v41 = vsel %vm2444_vm4, %v2446_v40, %v13127_v21 }
 0x67b   :  { %2448 = vrot.lane.b32.xlu1 %v2447_v41, %s12153_s5 }
 0x67f   :  { %2611 = vperm.xlu1 %11778, %v2431_v3  }
 0x683   :  { %2624 = vperm.xlu1 %11778, %v2433_v9  }
 0x6c6   :  { %v2194_v18 = vpop.f32.mrb[6].mxu0 }
 0x6c7   :  { %v10601_v20 = vpop.f32.mrb[7].mxu0  ;;  %v11555_v56 = vadd.f32 %v2194_v18, %v1183_v39 }
 0x6ed   :  { %v2449_v17 = vpop.permute.xlu1 %2448 }
 0x6ee   :  { %v2450_v25 = vsel %vm2444_vm4, %v2449_v17, %v13127_v21 }
 0x6fe   :  { %v2612_v43 = vpop.permute.xlu1 %2611 }
 0x702   :  { %v2625_v52 = vpop.permute.xlu1 %2624 }
 0x738   :  { %v2419_v33 = vpop.f32.mrb[6].mxu1 }
 0x739   :  { %v11556_v29 = vadd.f32 %v2419_v33, %v1183_v39  ;;  %v10616_v31 = vpop.f32.mrb[7].mxu1 }
 0x73b   :  { %v13141_v44 = vmax.f32 %v11555_v56, %v11556_v29 }
 0x73d   :  { %2465 = vrot.lane.b32.xlu0 %v13141_v44, %s12153_s5 }
 0x7af   :  { %v2466_v55 = vpop.permute.xlu0 %2465 }
 0x7b0   :  { %v2467_v4 = vsel %vm2444_vm4, %v2466_v55, %v13141_v44 }
 0x7b1   :  { %2468 = vrot.lane.b32.xlu0 %v2467_v4, %s12153_s5 }
 0x7b5   :  { %2617 = vperm.xlu0 %11777, %v2432_v10  }
 0x7b9   :  { %2452 = vrot.lane.b32.xlu0 %v2450_v25, %s12154_s9 }
 0x7bd   :  { %2458 = vrot.lane.b32.xlu0 %v2450_v25, %s12149_s27 }
 0x7c1   :  { %2542 = vperm.xlu0 %11777, %v2428_v58  }
 0x7c5   :  { %2555 = vperm.xlu0 %11777, %v2430_v19  }
 0x7c9   :  { %2685 = vperm.xlu0 %11777, %v2435_v61  }
 0x823   :  { %v2469_v36 = vpop.permute.xlu0 %2468 }
 0x824   :  { %v2470_v45 = vsel %vm2444_vm4, %v2469_v36, %v13141_v44 }
 0x825   :  { %2472 = vrot.lane.b32.xlu1 %v2470_v45, %s12154_s9  ;;  %s14602_s9 = sld [smem:[#allocation32_spill]] }
 0x829   :  { %2476 = vrot.lane.b32.xlu1 %v2470_v45, %s12149_s27 }
 0x82d   :  { %2548 = vperm.xlu1 %11778, %v2429_v49  }
 0x831   :  { %2679 = vperm.xlu1 %11778, %v2434_v15  }
 0x834   :  { %v2618_v51 = vpop.permute.xlu0 %2617 }
 0x835   :  { %2692 = vperm.xlu1 %11778, %v2436_v26   ;;  %v2620_v23 = vmul.f32 %v2618_v51, %v13127_v21  ;;  %v2630_v46 = vmul.f32 %v2618_v51, %v13141_v44 }
 0x838   :  { %v2453_v1 = vpop.permute.xlu0 %2452 }
 0x839   :  { %v13163_v38 = vsel %vm255_vm0, 0.0, %v2453_v1 }
 0x83a   :  { %v2614_v50 = vmul.f32 %v2612_v43, %v13163_v38 }
 0x83c   :  { %v2459_v35 = vpop.permute.xlu0 %2458  ;;  %v2621_v16 = vadd.f32 %v2620_v23, %v2614_v50 }
 0x83d   :  { %v13170_v62 = vsel %vm2443_vm5, 0.0, %v2459_v35 }
 0x83e   :  { %v2627_v13 = vmul.f32 %v2625_v52, %v13170_v62 }
 0x840   :  { %v13173_v42 = vadd.f32 %v2627_v13, %v2621_v16  ;;  %v2543_v30 = vpop.permute.xlu0 %2542 }
 0x841   :  { %v2545_v27 = vmul.f32 %v2543_v30, %v13163_v38 }
 0x842   :  { %v2634_v5 = vsel %vm2565_vm6, %v13173_v42, 0.0 }
 0x843   :  { %2635 = vadd.xlane.f32.xlu0 %v2634_v5 }
 0x844   :  { %v2556_v8 = vpop.permute.xlu0 %2555 }
 0x845   :  { %v2558_v39 = vmul.f32 %v2556_v8, %v13170_v62 }
 0x848   :  { %v2686_v60 = vpop.permute.xlu0 %2685 }
 0x849   :  { %v2688_v20 = vmul.f32 %v2686_v60, %v13127_v21  ;;  %v2698_v33 = vmul.f32 %v2686_v60, %v13141_v44  ;;  %v2763_v60 = vld [vmem:[#allocation4 + $0x80] sm:$0xff] }
 0x897   :  { %v2473_v12 = vpop.permute.xlu1 %2472 }
 0x898   :  { %v2475_v22 = vsel %vm255_vm0, 0.0, %v2473_v12 }
 0x899   :  { %v2629_v34 = vmul.f32 %v2612_v43, %v2475_v22  ;;  %v2480_v6 = vadd.f32 %v2475_v22, %v13141_v44  ;;  %v2560_v37 = vmul.f32 %v2543_v30, %v2475_v22 }
 0x89b   :  { %v2477_v28 = vpop.permute.xlu1 %2476  ;;  %v2631_v63 = vadd.f32 %v2630_v46, %v2629_v34 }
 0x89c   :  { %v2479_v2 = vsel %vm2443_vm5, 0.0, %v2477_v28 }
 0x89d   :  { %v13183_v48 = vadd.f32 %v2480_v6, %v2479_v2  ;;  %v2632_v11 = vmul.f32 %v2625_v52, %v2479_v2  ;;  %v2563_v41 = vmul.f32 %v2556_v8, %v2479_v2 }
 0x89f   :  { %v13185_v54 = vadd.f32 %v2632_v11, %v2631_v63 }
 0x8a1   :  { %v2637_v57 = vsel %vm2565_vm6, %v13185_v54, 0.0 }
 0x8a2   :  { %2638 = vadd.xlane.f32.xlu1 %v2637_v57 }
 0x8ac   :  { %v2549_v0 = vpop.permute.xlu1 %2548 }
 0x8ad   :  { %v2551_v7 = vmul.f32 %v2549_v0, %v13127_v21  ;;  %v2561_v32 = vmul.f32 %v2549_v0, %v13141_v44  ;;  %v2425_v0 = vld [vmem:[%s14587_s13] sm:$0xff] }
 0x8af   :  { %v2552_v47 = vadd.f32 %v2551_v7, %v2545_v27  ;;  %v2562_v53 = vadd.f32 %v2561_v32, %v2560_v37  ;;  %v2426_v27 = vld [vmem:[%s14587_s13 + $0x8] sm:$0xff] }
 0x8b0   :  { %v2680_v40 = vpop.permute.xlu1 %2679 }
 0x8b1   :  { %v2682_v3 = vmul.f32 %v2680_v40, %v13163_v38  ;;  %v2697_v9 = vmul.f32 %v2680_v40, %v2475_v22  ;;  %v13194_v18 = vadd.f32 %v2558_v39, %v2552_v47  ;;  %v13200_v29 = vadd.f32 %v2563_v41, %v2562_v53  ;;  %v2427_v39 = vld [vmem:[%s14587_s13 + $0x10] sm:$0xff]  ;;  %v2764_v47 = vld [vmem:[#allocation4 + $0x88] sm:$0xff]  ;;  %v2765_v41 = vld [vmem:[#allocation4 + $0x90] sm:$0xff]  ;;  %s12165_s13 = smov 121  }
 0x8b2   :  { %v2766_v53 = vld [vmem:[#allocation4 + $0x98] sm:$0xff] }
 0x8b3   :  { %v2566_v56 = vsel %vm2565_vm6, %v13194_v18, 0.0  ;;  %v2689_v55 = vadd.f32 %v2688_v20, %v2682_v3  ;;  %v2699_v4 = vadd.f32 %v2698_v33, %v2697_v9  ;;  %v2569_v25 = vsel %vm2565_vm6, %v13200_v29, 0.0  ;;  %v2768_v3 = vld [vmem:[#allocation4 + $0xa8] sm:$0xff]  ;;  %v2770_v9 = vld [vmem:[#allocation4 + $0xb8] sm:$0xff] }
 0x8b4   :  { %v2693_v31 = vpop.permute.xlu1 %2692  ;;  %2567 = vadd.xlane.f32.xlu0 %v2566_v56  ;;  %v13240_v40 = vpack.c.bf16 %v2766_v53, %v2764_v47  ;;  %v13242_v20 = vpack.c.bf16 %v2765_v41, %v2763_v60  ;;  %v13244_v33 = vpack.c.bf16 %v2770_v9, %v2768_v3  ;;  %v2767_v56 = vld [vmem:[#allocation4 + $0xa0] sm:$0xff]  ;;  %v2462_v47 = vadd.f32 %v13163_v38, %v13127_v21 }
 0x8b5   :  { %v2695_v10 = vmul.f32 %v2693_v31, %v13170_v62  ;;  %v2700_v17 = vmul.f32 %v2693_v31, %v2479_v2  ;;  %v2769_v31 = vld [vmem:[#allocation4 + $0xb0] sm:$0xff] }
 0x8b6   :  { %11356 = vmatprep.subr.bf16.mxu0 %v13240_v40  ;;  %v2463_v60 = vadd.f32 %v2462_v47, %v13170_v62 }
 0x8b7   :  { %v13205_v58 = vadd.f32 %v2695_v10, %v2689_v55  ;;  %v13207_v19 = vadd.f32 %v2700_v17, %v2699_v4  ;;  %11358 = vmatpush1.bf16.msra.mxu0 %v13242_v20  ;;  %v13248_v55 = vpack.c.bf16 %v2769_v31, %v2767_v56 }
 0x8b8   :  { %2570 = vadd.xlane.f32.xlu0 %v2569_v25  ;;  %11360 = vmatprep.subr.bf16.mxu0 %v13244_v33  ;;  %v2464_v9 = vmul.f32 0.33333334, %v2463_v60 }
 0x8b9   :  { %v2702_v44 = vsel %vm2565_vm6, %v13205_v58, 0.0  ;;  %v2705_v61 = vsel %vm2565_vm6, %v13207_v19, 0.0 }
 0x8ba   :  { %2703 = vadd.xlane.f32.xlu1 %v2702_v44 }
 0x8bb   :  { %11362 = vmatpush1.bf16.msra.mxu0 %v13248_v55 }
 0x8bc   :  { %2706 = vadd.xlane.f32.xlu0 %v2705_v61  ;;  %v2438_v61 = vld [vmem:[%s14588_s17 + $0x8] sm:$0xff] }
 0x8d0   :  { %v2636_v36 = vpop.xlane.xlu0 %2635 }
 0x92f   :  { %v2639_v45 = vpop.xlane.xlu1 %2638 }
 0x930   :  { %v2640_v49 = vadd.f32 %v2639_v45, %v2636_v36 }
 0x932   :  { %v13213_v15 = vmul.f32 0.0078125, %v2640_v49  ;;  %v2441_v49 = vld [vmem:[%s14589_s21 + $0x8] sm:$0xff] }
 0x934   :  { %v2647_v26 = vsub.f32 %v13185_v54, %v13213_v15  ;;  %v2642_v51 = vsub.f32 %v13173_v42, %v13213_v15 }
 0x936   :  { %v2648_v43 = vmul.f32 %v2647_v26, %v2647_v26  ;;  %v2643_v1 = vmul.f32 %v2642_v51, %v2642_v51  ;;  %v2772_v51 = vld [vmem:[#allocation4 + $0xc8] sm:$0xff] }
 0x938   :  { %v2649_v50 = vsel %vm2565_vm6, %v2648_v43, 0.0  ;;  %v2644_v23 = vsel %vm2565_vm6, %v2643_v1, 0.0  ;;  %v2774_v43 = vld [vmem:[#allocation4 + $0xd8] sm:$0xff]  ;;  %v2771_v1 = vld [vmem:[#allocation4 + $0xc0] sm:$0xff] }
 0x939   :  { %2650 = vadd.xlane.f32.xlu0 %v2649_v50  ;;  %2645 = vadd.xlane.f32.xlu1 %v2644_v23  ;;  %v13255_v50 = vpack.c.bf16 %v2774_v43, %v2772_v51  ;;  %v2773_v23 = vld [vmem:[#allocation4 + $0xd0] sm:$0xff]  ;;  %v2439_v51 = vld [vmem:[%s14588_s17 + $0x10] sm:$0xff] }
 0x93b   :  { %11364 = vmatprep.subr.bf16.mxu0 %v13255_v50 }
 0x941   :  { %v2568_v35 = vpop.xlane.xlu0 %2567 }
 0x945   :  { %v2571_v52 = vpop.xlane.xlu0 %2570 }
 0x946   :  { %v2572_v13 = vadd.f32 %v2571_v52, %v2568_v35 }
 0x947   :  { %v2704_v5 = vpop.xlane.xlu1 %2703 }
 0x948   :  { %v13221_v16 = vmul.f32 0.0078125, %v2572_v13 }
 0x949   :  { %v2707_v12 = vpop.xlane.xlu0 %2706 }
 0x94a   :  { %v2708_v22 = vadd.f32 %v2707_v12, %v2704_v5  ;;  %v2579_v34 = vsub.f32 %v13200_v29, %v13221_v16  ;;  %v2574_v46 = vsub.f32 %v13194_v18, %v13221_v16  ;;  %v13257_v5 = vpack.c.bf16 %v2773_v23, %v2771_v1  ;;  %v2442_v23 = vld [vmem:[%s14589_s21 + $0x10] sm:$0xff] }
 0x94c   :  { %v13227_v6 = vmul.f32 0.0078125, %v2708_v22  ;;  %v2580_v28 = vmul.f32 %v2579_v34, %v2579_v34  ;;  %v2575_v2 = vmul.f32 %v2574_v46, %v2574_v46  ;;  %11366 = vmatpush1.bf16.msra.mxu0 %v13257_v5  ;;  %v2776_v34 = vld [vmem:[#allocation4 + $0xe8] sm:$0xff]  ;;  %v2778_v46 = vld [vmem:[#allocation4 + $0xf8] sm:$0xff] }
 0x94e   :  { %v2581_v11 = vsel %vm2565_vm6, %v2580_v28, 0.0  ;;  %v2576_v63 = vsel %vm2565_vm6, %v2575_v2, 0.0  ;;  %v2715_v57 = vsub.f32 %v13207_v19, %v13227_v6  ;;  %v2710_v37 = vsub.f32 %v13205_v58, %v13227_v6  ;;  %v2775_v28 = vld [vmem:[#allocation4 + $0xe0] sm:$0xff] }
 0x94f   :  { %2582 = vadd.xlane.f32.xlu0 %v2581_v11  ;;  %2577 = vadd.xlane.f32.xlu1 %v2576_v63  ;;  %v13261_v2 = vpack.c.bf16 %v2778_v46, %v2776_v34  ;;  %v2777_v11 = vld [vmem:[#allocation4 + $0xf0] sm:$0xff] }
 0x950   :  { %v2716_v30 = vmul.f32 %v2715_v57, %v2715_v57  ;;  %v2711_v7 = vmul.f32 %v2710_v37, %v2710_v37  ;;  %v13263_v63 = vpack.c.bf16 %v2777_v11, %v2775_v28  ;;  %v2747_v57 = vld [vmem:[#allocation4 + $0x8] sm:$0xff] }
 0x951   :  { %11368 = vmatprep.subr.bf16.mxu0 %v13261_v2 }
 0x952   :  { %v2717_v8 = vsel %vm2565_vm6, %v2716_v30, 0.0  ;;  %v2712_v32 = vsel %vm2565_vm6, %v2711_v7, 0.0  ;;  %v2749_v30 = vld [vmem:[#allocation4 + $0x18] sm:$0xff]  ;;  %11370 = vmatpush1.bf16.msra.mxu0 %v13263_v63  ;;  %v2440_v7 = vld [vmem:[%s14589_s21] sm:$0xff]  ;;  %s12166_s21 = smov 116  }
 0x953   :  { %2718 = vadd.xlane.f32.xlu0 %v2717_v8  ;;  %v13266_v8 = vpack.c.bf16 %v2749_v30, %v2747_v57 }
 0x955   :  { %11372 = vmatprep.subr.bf16.mxu0 %v13266_v8 }
 0x960   :  { %2485 = vperm.xlu1 %11778, %v2425_v0   ;;  %v2437_v0 = vld [vmem:[%s14588_s17] sm:$0xff]  ;;  %s14605_s17 = sld [smem:[#allocation34_spill]] }
 0x969   :  { %2491 = vperm.xlu0 %11777, %v2426_v27  }
 0x984   :  { %2713 = vadd.xlane.f32.xlu1 %v2712_v32 }
 0x995   :  { %2497 = vperm.xlu1 %11778, %v2427_v39  }
 0x9c6   :  { %v2646_v4 = vpop.xlane.xlu1 %2645  ;;  %v2651_v10 = vpop.xlane.xlu0 %2650 }
 0x9c7   :  { %v2652_v17 = vadd.f32 %v2651_v10, %v2646_v4 }
 0x9c9   :  { %v2653_v25 = vmul.f32 0.0078125, %v2652_v17 }
 0x9cb   :  { %v2654_v44 = vadd.f32 1e-05, %v2653_v25 }
 0x9cd   :  { %11851 = vrsqrt.f32 %v2654_v44 }
 0x9d7   :  { %v11852_v36 = vpop.eup %11851 }
 0x9d8   :  { %v2656_v45 = vmul.f32 %v11852_v36, %v2438_v61 }
 0x9da   :  { %2661 = vperm.xlu1 %11778, %v2656_v45   ;;  %v2657_v26 = vmul.f32 %v2656_v45, %v13213_v15 }
 0x9dc   :  { %v2578_v35 = vpop.xlane.xlu1 %2577  ;;  %v2583_v52 = vpop.xlane.xlu0 %2582  ;;  %v2658_v13 = vsub.f32 %v2441_v49, %v2657_v26 }
 0x9dd   :  { %v2584_v12 = vadd.f32 %v2583_v52, %v2578_v35 }
 0x9de   :  { %2667 = vperm.xlu0 %11777, %v2658_v13  }
 0x9df   :  { %v2585_v22 = vmul.f32 0.0078125, %v2584_v12 }
 0x9e0   :  { %v2719_v53 = vpop.xlane.xlu0 %2718  ;;  %v13276_v41 = vpop.permute.xlu1 %2485 }
 0x9e1   :  { %v2586_v15 = vadd.f32 1e-05, %v2585_v22  ;;  %v2488_v10 = vmul.f32 %v13276_v41, %v2464_v9 }
 0x9e3   :  { %11853 = vrsqrt.f32 %v2586_v15 }
 0x9e8   :  { %v13278_v3 = vpop.permute.xlu0 %2491 }
 0x9e9   :  { %v2494_v31 = vmul.f32 %v13278_v3, %v2464_v9 }
 0x9eb   :  { %v2501_v25 = vmax.f32 %v2488_v10, %v2494_v31 }
 0x9ed   :  { %v11854_v27 = vpop.eup %11853 }
 0x9ee   :  { %v2588_v37 = vmul.f32 %v11854_v27, %v2437_v0  ;;  %v2746_v0 = vld [vmem:[#allocation4] sm:$0xff]  ;;  %v2748_v27 = vld [vmem:[#allocation4 + $0x10] sm:$0xff] }
 0x9ef   :  { %v13297_v47 = vpack.c.bf16 %v2748_v27, %v2746_v0 }
 0x9f0   :  { %2593 = vperm.xlu1 %11778, %v2588_v37   ;;  %v2589_v32 = vmul.f32 %v2588_v37, %v13221_v16  ;;  %v2751_v37 = vld [vmem:[#allocation4 + $0x28] sm:$0xff] }
 0x9f2   :  { %v2590_v39 = vsub.f32 %v2440_v7, %v2589_v32  ;;  %v2753_v7 = vld [vmem:[#allocation4 + $0x38] sm:$0xff] }
 0x9f3   :  { %v13299_v60 = vpack.c.bf16 %v2753_v7, %v2751_v37  ;;  %v2784_v37 = vld [vmem:[#allocation4 + $0x120] sm:$0xff]  ;;  %v2786_v7 = vld [vmem:[#allocation4 + $0x130] sm:$0xff] }
 0x9f4   :  { %2599 = vperm.xlu0 %11777, %v2590_v39  }
 0xa11   :  { %v2714_v56 = vpop.xlane.xlu1 %2713 }
 0xa12   :  { %v2720_v4 = vadd.f32 %v2719_v53, %v2714_v56  ;;  %v2752_v56 = vld [vmem:[#allocation4 + $0x30] sm:$0xff] }
 0xa14   :  { %v2721_v16 = vmul.f32 0.0078125, %v2720_v4  ;;  %v2757_v4 = vld [vmem:[#allocation4 + $0x58] sm:$0xff] }
 0xa15   :  { %v13282_v17 = vpop.permute.xlu1 %2497 }
 0xa16   :  { %v2722_v21 = vadd.f32 1e-05, %v2721_v16  ;;  %v2500_v38 = vmul.f32 %v13282_v17, %v2464_v9  ;;  %v2750_v9 = vld [vmem:[#allocation4 + $0x20] sm:$0xff] }
 0xa17   :  { %v2754_v16 = vld [vmem:[#allocation4 + $0x40] sm:$0xff] }
 0xa18   :  { %11855 = vrsqrt.f32 %v2722_v21  ;;  %v2502_v62 = vmax.f32 %v2501_v25, %v2500_v38  ;;  %v2756_v25 = vld [vmem:[#allocation4 + $0x50] sm:$0xff]  ;;  %v2759_v21 = vld [vmem:[#allocation4 + $0x68] sm:$0xff] }
 0xa1a   :  { %v2503_v44 = vsub.f32 %v2488_v10, %v2502_v62  ;;  %v2506_v61 = vsub.f32 %v2494_v31, %v2502_v62  ;;  %v2509_v36 = vsub.f32 %v2500_v38, %v2502_v62  ;;  %v2755_v31 = vld [vmem:[#allocation4 + $0x48] sm:$0xff]  ;;  %v2761_v38 = vld [vmem:[#allocation4 + $0x78] sm:$0xff]  ;;  %v13310_v62 = vpack.c.bf16 %v2756_v25, %v2754_v16  ;;  %v2792_v16 = vld [vmem:[#allocation4 + $0x160] sm:$0xff] }
 0xa1b   :  { %v13307_v10 = vpack.c.bf16 %v2757_v4, %v2755_v31  ;;  %v2794_v25 = vld [vmem:[#allocation4 + $0x170] sm:$0xff] }
 0xa1c   :  { %v2504_v45 = vmul.f32 1.442695, %v2503_v44  ;;  %v2507_v49 = vmul.f32 1.442695, %v2506_v61  ;;  %v2510_v26 = vmul.f32 1.442695, %v2509_v36  ;;  %v13313_v44 = vpack.c.bf16 %v2761_v38, %v2759_v21 }
 0xa1d   :  { %v2758_v61 = vld [vmem:[#allocation4 + $0x60] sm:$0xff]  ;;  %v2760_v36 = vld [vmem:[#allocation4 + $0x70] sm:$0xff]  ;;  %v13349_v21 = vpack.c.bf16 %v2794_v25, %v2792_v16 }
 0xa1e   :  { %11857 = vpow2.f32 %v2504_v45  ;;  %v2781_v45 = vld [vmem:[#allocation4 + $0x108] sm:$0xff] }
 0xa1f   :  { %11859 = vpow2.f32 %v2507_v49  ;;  %v2783_v49 = vld [vmem:[#allocation4 + $0x118] sm:$0xff] }
 0xa20   :  { %11861 = vpow2.f32 %v2510_v26  ;;  %v13316_v26 = vpack.c.bf16 %v2760_v36, %v2758_v61 }
 0xa22   :  { %v11856_v43 = vpop.eup %11855 }
 0xa23   :  { %v2724_v1 = vmul.f32 %v11856_v43, %v2439_v51  ;;  %v13319_v51 = vpack.c.bf16 %v2783_v49, %v2781_v45 }
 0xa25   :  { %2729 = vperm.xlu1 %11778, %v2724_v1   ;;  %v2725_v35 = vmul.f32 %v2724_v1, %v13227_v6 }
 0xa27   :  { %v2726_v52 = vsub.f32 %v2442_v23, %v2725_v35 }
 0xa28   :  { %v11858_v13 = vpop.eup %11857 }
 0xa29   :  { %v11860_v12 = vpop.eup %11859  ;;  %2735 = vperm.xlu0 %11777, %v2726_v52   ;;  %v2780_v52 = vld [vmem:[#allocation4 + $0x100] sm:$0xff] }
 0xa2a   :  { %v2512_v22 = vadd.f32 %v11860_v12, %v11858_v13  ;;  %v11862_v15 = vpop.eup %11861 }
 0xa2c   :  { %v2513_v34 = vadd.f32 %v11862_v15, %v2512_v22  ;;  %v2785_v22 = vld [vmem:[#allocation4 + $0x128] sm:$0xff] }
 0xa2e   :  { %11863 = vrcp.f32 %v2513_v34 }
 0xa38   :  { %v11864_v46 = vpop.eup %11863 }
 0xa39   :  { %v13288_v28 = vmul.f32 %v11864_v46, %v11862_v15  ;;  %v2517_v32 = vmul.f32 %v11864_v46, %v11860_v12  ;;  %v2782_v12 = vld [vmem:[#allocation4 + $0x110] sm:$0xff]  ;;  %v2787_v15 = vld [vmem:[#allocation4 + $0x138] sm:$0xff]  ;;  %v2516_v34 = vmul.f32 %v11864_v46, %v11858_v13  ;;  %v2788_v46 = vld [vmem:[#allocation4 + $0x140] sm:$0xff] }
 0xa3a   :  { %v13332_v27 = vpack.c.bf16 %v2787_v15, %v2785_v22 }
 0xa59   :  { %v13290_v11 = vpop.permute.xlu1 %2661 }
 0xa5a   :  { %v2664_v57 = vmul.f32 %v13290_v11, %v13173_v42  ;;  %v13303_v42 = vpack.c.bf16 %v2752_v56, %v2750_v9  ;;  %v2793_v9 = vld [vmem:[#allocation4 + $0x168] sm:$0xff]  ;;  %v2795_v56 = vld [vmem:[#allocation4 + $0x178] sm:$0xff] }
 0xa5b   :  { %v13346_v4 = vpack.c.bf16 %v2795_v56, %v2793_v9 }
 0xa5d   :  { %v13294_v30 = vpop.permute.xlu0 %2667 }
 0xa5e   :  { %v2670_v6 = vadd.f32 %v13294_v30, %v2664_v57 }
 0xa60   :  { %v2671_v39 = vmax.f32 %v2670_v6, 0.0  ;;  %v13330_v6 = vpack.c.bf16 %v2782_v12, %v2780_v52  ;;  %v13365_v52 = vld [vmem:[#allocation2] sm:$0xff] }
 0xa62   :  { %v2672_v53 = vmul.f32 %v2671_v39, %v2517_v32  ;;  %v2791_v32 = vld [vmem:[#allocation4 + $0x158] sm:$0xff]  ;;  %v13336_v39 = vpack.c.bf16 %v2786_v7, %v2784_v37  ;;  %v13380_v37 = vld [vmem:[#allocation2 + $0x8] sm:$0xff] }
 0xa64   :  { %9911 = vmatmul.mubr.msk.f32.vlgmr.msra.gmra.mrb[8].mxu0 %vm2565_vm6, %v2672_v53  ;;  %v2790_v53 = vld [vmem:[#allocation4 + $0x150] sm:$0xff] }
 0xa65   :  { %11374 = vmatpush1.bf16.msra.mxu0 %v13297_v47  ;;  %2942 = vmatprep.mubr.f32.mxu0 %v14543_v59  ;;  %v13343_v31 = vpack.c.bf16 %v2790_v53, %v2788_v46 }
 0xa66   :  { %11376 = vmatprep.subr.bf16.mxu0 %v13299_v60 }
 0xa69   :  { %11378 = vmatpush1.bf16.msra.mxu0 %v13303_v42 }
 0xa6a   :  { %11380 = vmatprep.subr.bf16.mxu0 %v13307_v10 }
 0xa6d   :  { %11382 = vmatpush1.bf16.msra.mxu0 %v13310_v62 }
 0xa6e   :  { %11384 = vmatprep.subr.bf16.mxu0 %v13313_v44 }
 0xa6f   :  { %v13321_v43 = vpop.permute.xlu1 %2593 }
 0xa70   :  { %v2596_v1 = vmul.f32 %v13321_v43, %v13194_v18  ;;  %v2789_v18 = vld [vmem:[#allocation4 + $0x148] sm:$0xff] }
 0xa71   :  { %11386 = vmatpush1.bf16.msra.mxu0 %v13316_v26  ;;  %v13340_v13 = vpack.c.bf16 %v2791_v32, %v2789_v18 }
 0xa72   :  { %11388 = vmatprep.subr.bf16.mxu0 %v13319_v51 }
 0xa73   :  { %v13327_v23 = vpop.permute.xlu0 %2599 }
 0xa74   :  { %v2602_v35 = vadd.f32 %v13327_v23, %v2596_v1 }
 0xa76   :  { %v2603_v57 = vmax.f32 %v2602_v35, 0.0 }
 0xa78   :  { %v2604_v0 = vmul.f32 %v2603_v57, %v2516_v34 }
 0xa7a   :  { %9912 = vmatmul.mubr.msk.f32.vlgmr.msra.gmra.mrb[8].mxu0 %vm2565_vm6, %v2604_v0 }
 0xa7b   :  { %11390 = vmatpush1.bf16.msra.mxu0 %v13330_v6  ;;  %3016 = vmatprep.mubr.f32.mxu0 %v14543_v59 }
 0xa7c   :  { %11392 = vmatprep.subr.bf16.mxu0 %v13332_v27 }
 0xa7f   :  { %11394 = vmatpush1.bf16.msra.mxu0 %v13336_v39 }
 0xa80   :  { %11396 = vmatprep.subr.bf16.mxu0 %v13340_v13 }
 0xa83   :  { %11398 = vmatpush1.bf16.msra.mxu0 %v13343_v31 }
 0xa84   :  { %11400 = vmatprep.subr.bf16.mxu0 %v13346_v4 }
 0xa87   :  { %11402 = vmatpush1.bf16.msra.mxu0 %v13349_v21 }
 0xa88   :  { %10647 = vmatprep.subr.mxu0 %v14543_v59 }
 0xaa4   :  { %v13354_v38 = vpop.permute.xlu1 %2729 }
 0xaa5   :  { %v2732_v61 = vmul.f32 %v13354_v38, %v13205_v58 }
 0xaa8   :  { %v13358_v36 = vpop.permute.xlu0 %2735 }
 0xaa9   :  { %v2738_v45 = vadd.f32 %v13358_v36, %v2732_v61 }
 0xaab   :  { %v2739_v49 = vmax.f32 %v2738_v45, 0.0 }
 0xaad   :  { %v2740_v1 = vmul.f32 %v2739_v49, %v13288_v28  ;;  %v2482_v28 = vmul.f32 0.33333334, %v13183_v48  ;;  %v2673_v49 = vmul.f32 %v13290_v11, %v13185_v54  ;;  %v2605_v54 = vmul.f32 %v13321_v43, %v13200_v29 }
 0xaae   :  { %v2741_v29 = vmul.f32 %v13354_v38, %v13207_v19 }
 0xaaf   :  { %9913 = vmatmul.mubr.msk.f32.vlgmr.msra.gmra.mrb[8].mxu0 %vm2565_vm6, %v2740_v1  ;;  %v2520_v12 = vmul.f32 %v13278_v3, %v2482_v28  ;;  %v2519_v22 = vmul.f32 %v13276_v41, %v2482_v28  ;;  %v2521_v15 = vmul.f32 %v13282_v17, %v2482_v28  ;;  %v13388_v17 = vld [vmem:[#allocation2 + $0x10] sm:$0xff]  ;;  %v2674_v1 = vadd.f32 %v2673_v49, %v13294_v30 }
 0xab0   :  { %10649 = vmatprep.mubr.msk.f32.mxu0 %vm12152_vm2, %v14543_v59 }
 0xab1   :  { %v2522_v34 = vmax.f32 %v2519_v22, %v2520_v12 }
 0xab3   :  { %v2523_v57 = vmax.f32 %v2522_v34, %v2521_v15 }
 0xab5   :  { %v2524_v0 = vsub.f32 %v2519_v22, %v2523_v57  ;;  %v2527_v7 = vsub.f32 %v2520_v12, %v2523_v57  ;;  %v2530_v3 = vsub.f32 %v2521_v15, %v2523_v57 }
 0xab7   :  { %v2525_v48 = vmul.f32 1.442695, %v2524_v0  ;;  %v2528_v41 = vmul.f32 1.442695, %v2527_v7  ;;  %v2531_v32 = vmul.f32 1.442695, %v2530_v3 }
 0xab8   :  { %v4152_v0 = vld [vmem:[%s14591_s14 + $0x20] sm:$0xff] }
 0xab9   :  { %11865 = vpow2.f32 %v2525_v48  ;;  %v4150_v48 = vld [vmem:[%s14591_s14 + $0x10] sm:$0xff] }
 0xaba   :  { %11867 = vpow2.f32 %v2528_v41  ;;  %v4155_v41 = vld [vmem:[%s14591_s14 + $0x38] sm:$0xff] }
 0xabb   :  { %11869 = vpow2.f32 %v2531_v32  ;;  %v4149_v32 = vld [vmem:[%s14591_s14 + $0x8] sm:$0xff] }
 0xac3   :  { %v11866_v9 = vpop.eup %11865 }
 0xac4   :  { %v11868_v56 = vpop.eup %11867 }
 0xac5   :  { %v2533_v16 = vadd.f32 %v11868_v56, %v11866_v9  ;;  %v11870_v61 = vpop.eup %11869 }
 0xac7   :  { %v2534_v45 = vadd.f32 %v11870_v61, %v2533_v16 }
 0xac9   :  { %11871 = vrcp.f32 %v2534_v45 }
 0xb82   :  { %v3018_v35 = vpop.f32.mrb[8].mxu0 }
 0xb83   :  { %3256 = vrot.lane.b32.xlu0 %v3018_v35, %s12155_s25  ;;  %3105 = vrot.lane.b32.xlu1 %v3018_v35, %s12153_s5  ;;  %v3020_v58 = vpop.f32.mrb[9].mxu0 }
 0xb84   :  { %10618 = vmatpush3.msra.mxu1 %v3018_v35 }
 0xb85   :  { %10620 = vmatmul.mubr.msk.f32.vlgmr.msra.gmra.mrb[8].mxu1 %vm1106_vm3, %v13365_v52  ;;  %10622 = vmatprep.subr.mxu1 %v14543_v59 }
 0xb86   :  { %10624 = vmatprep.mubr.msk.f32.mxu1 %vm12152_vm2, %v14543_v59 }
 0xb87   :  { %3330 = vrot.lane.b32.xlu1 %v3018_v35, %s12156_s29  ;;  %3405 = vrot.lane.b32.xlu0 %v3020_v58, %s12155_s25  ;;  %v2675_v35 = vmax.f32 %v2674_v1, 0.0 }
 0xbf5   :  { %v3106_v18 = vpop.permute.xlu1 %3105  ;;  %v3257_v46 = vpop.permute.xlu0 %3256 }
 0xbf6   :  { %10623 = vmatpush3.msra.mxu1 %v3106_v18  ;;  %v4148_v18 = vld [vmem:[%s14591_s14] sm:$0xff] }
 0xbf7   :  { %10625 = vmatmul.mubr.msk.f32.vlgmr.msra.gmra.mrb[8].mxu1 %vm1106_vm3, %v13380_v37  ;;  %10627 = vmatprep.subr.mxu1 %v14543_v59 }
 0xbf8   :  { %10628 = vmatpush3.msra.mxu1 %v3020_v58  ;;  %10629 = vmatprep.mubr.msk.f32.mxu1 %vm12152_vm2, %v14543_v59 }
 0xbf9   :  { %10632 = vmatprep.subr.mxu1 %v14543_v59  ;;  %v3331_v53 = vpop.permute.xlu1 %3330  ;;  %v3406_v25 = vpop.permute.xlu0 %3405 }
 0xbff   :  { %10630 = vmatmul.mubr.msk.f32.vlgmr.msra.gmra.mrb[8].mxu1 %vm1106_vm3, %v13388_v17 }
 0xc00   :  { %10633 = vmatpush3.msra.mxu1 %v3257_v46  ;;  %10634 = vmatprep.mubr.msk.f32.mxu1 %vm12152_vm2, %v14543_v59  ;;  %v4154_v46 = vld [vmem:[%s14591_s14 + $0x30] sm:$0xff] }
 0xc01   :  { %10637 = vmatprep.subr.mxu1 %v14543_v59 }
 0xc03   :  { %10635 = vmatmul.mubr.msk.f32.vlgmr.msra.gmra.mrb[10].mxu1 %vm1106_vm3, %v13365_v52 }
 0xc04   :  { %10638 = vmatpush3.msra.mxu1 %v3331_v53  ;;  %10639 = vmatprep.mubr.msk.f32.mxu1 %vm12152_vm2, %v14543_v59  ;;  %v4156_v53 = vld [vmem:[%s14591_s14 + $0x40] sm:$0xff] }
 0xc05   :  { %10642 = vmatprep.subr.mxu1 %v14543_v59 }
 0xc0b   :  { %10640 = vmatmul.mubr.msk.f32.vlgmr.msra.gmra.mrb[10].mxu1 %vm1106_vm3, %v13380_v37 }
 0xc0c   :  { %10643 = vmatpush3.msra.mxu1 %v3406_v25  ;;  %10644 = vmatprep.mubr.msk.f32.mxu1 %vm12152_vm2, %v14543_v59 }
 0xc0d   :  { %11404 = vmatprep.subr.bf16.mxu1 %v13240_v40  ;;  %v11872_v40 = vpop.eup %11871 }
 0xc13   :  { %10645 = vmatmul.mubr.msk.f32.vlgmr.msra.gmra.mrb[10].mxu1 %vm1106_vm3, %v13388_v17 }
 0xc14   :  { %11406 = vmatpush1.bf16.msra.mxu1 %v13242_v20  ;;  %3547 = vmatprep.mubr.f32.mxu1 %v14543_v59  ;;  %v2538_v20 = vmul.f32 %v11872_v40, %v11868_v56 }
 0xc15   :  { %11408 = vmatprep.subr.bf16.mxu1 %v13244_v33  ;;  %v2606_v33 = vadd.f32 %v2605_v54, %v13327_v23 }
 0xc16   :  { %v2676_v58 = vmul.f32 %v2675_v35, %v2538_v20 }
 0xc18   :  { %11410 = vmatpush1.bf16.msra.mxu1 %v13248_v55  ;;  %v2607_v55 = vmax.f32 %v2606_v33, 0.0 }
 0xc19   :  { %11412 = vmatprep.subr.bf16.mxu1 %v13255_v50  ;;  %v2537_v50 = vmul.f32 %v11872_v40, %v11866_v9 }
 0xc1c   :  { %11414 = vmatpush1.bf16.msra.mxu1 %v13257_v5  ;;  %v2608_v5 = vmul.f32 %v2607_v55, %v2537_v50 }
 0xc1d   :  { %11416 = vmatprep.subr.bf16.mxu1 %v13261_v2  ;;  %v2742_v2 = vadd.f32 %v2741_v29, %v13358_v36 }
 0xc20   :  { %11418 = vmatpush1.bf16.msra.mxu1 %v13263_v63  ;;  %v2743_v63 = vmax.f32 %v2742_v2, 0.0 }
 0xc21   :  { %11420 = vmatprep.subr.bf16.mxu1 %v13266_v8  ;;  %v2539_v8 = vmul.f32 %v11872_v40, %v11870_v61 }
 0xc23   :  { %9920 = vmatmul.mubr.msk.f32.vlgmr.msra.gmra.mrb[12].mxu1 %vm2565_vm6, %v2676_v58  ;;  %v2744_v11 = vmul.f32 %v2743_v63, %v2539_v8 }
 0xc24   :  { %11422 = vmatpush1.bf16.msra.mxu1 %v13297_v47  ;;  %3621 = vmatprep.mubr.f32.mxu1 %v14543_v59 }
 0xc25   :  { %11424 = vmatprep.subr.bf16.mxu1 %v13299_v60 }
 0xc28   :  { %11426 = vmatpush1.bf16.msra.mxu1 %v13303_v42 }
 0xc29   :  { %11428 = vmatprep.subr.bf16.mxu1 %v13307_v10 }
 0xc2c   :  { %11430 = vmatpush1.bf16.msra.mxu1 %v13310_v62  ;;  %v2745_v62 = vld [vmem:[%s14590_s3] sm:$0xff] }
 0xc2d   :  { %11432 = vmatprep.subr.bf16.mxu1 %v13313_v44 }
 0xc30   :  { %11434 = vmatpush1.bf16.msra.mxu1 %v13316_v26 }
 0xc31   :  { %11436 = vmatprep.subr.bf16.mxu1 %v13319_v51 }
 0xc33   :  { %9921 = vmatmul.mubr.msk.f32.vlgmr.msra.gmra.mrb[12].mxu1 %vm2565_vm6, %v2608_v5 }
 0xc34   :  { %11438 = vmatpush1.bf16.msra.mxu1 %v13330_v6  ;;  %3695 = vmatprep.mubr.f32.mxu1 %v14543_v59 }
 0xc35   :  { %11440 = vmatprep.subr.bf16.mxu1 %v13332_v27 }
 0xc38   :  { %11442 = vmatpush1.bf16.msra.mxu1 %v13336_v39 }
 0xc39   :  { %11444 = vmatprep.subr.bf16.mxu1 %v13340_v13 }
 0xc3c   :  { %11446 = vmatpush1.bf16.msra.mxu1 %v13343_v31 }
 0xc3d   :  { %11448 = vmatprep.subr.bf16.mxu1 %v13346_v4  ;;  %v4151_v4 = vld [vmem:[%s14591_s14 + $0x18] sm:$0xff] }
 0xc40   :  { %11450 = vmatpush1.bf16.msra.mxu1 %v13349_v21  ;;  %v4153_v21 = vld [vmem:[%s14591_s14 + $0x28] sm:$0xff] }
 0xc41   :  { %10710 = vmatprep.subr.mxu1 %v14543_v59 }
 0xc43   :  { %9922 = vmatmul.mubr.msk.f32.vlgmr.msra.gmra.mrb[12].mxu1 %vm2565_vm6, %v2744_v11 }
 0xc44   :  { %10712 = vmatprep.mubr.msk.f32.mxu1 %vm12152_vm2, %v14543_v59 }
 0xcd2   :  { %v3251_v19 = vpop.f32.mrb[8].mxu1 }
 0xcd3   :  { %v10631_v30 = vpop.f32.mrb[9].mxu1 }
 0xce6   :  { %v3474_v47 = vpop.f32.mrb[10].mxu1 }
 0xce7   :  { %v10646_v60 = vpop.f32.mrb[11].mxu1 }
 0xd16   :  { %v3697_v42 = vpop.f32.mrb[12].mxu1 }
 0xd17   :  { %3921 = vrot.lane.b32.xlu0 %v3697_v42, %s12155_s25  ;;  %3776 = vrot.lane.b32.xlu1 %v3697_v42, %s12153_s5  ;;  %v3699_v10 = vpop.f32.mrb[13].mxu1 }
 0xd18   :  { %10648 = vmatpush3.msra.mxu0 %v3697_v42 }
 0xd19   :  { %10650 = vmatmul.mubr.msk.f32.vlgmr.msra.gmra.mrb[10].mxu0 %vm1106_vm3, %v13365_v52  ;;  %10652 = vmatprep.subr.mxu0 %v14543_v59 }
 0xd1a   :  { %10654 = vmatprep.mubr.msk.f32.mxu0 %vm12152_vm2, %v14543_v59 }
 0xd1b   :  { %3995 = vrot.lane.b32.xlu1 %v3697_v42, %s12156_s29  ;;  %4070 = vrot.lane.b32.xlu0 %v3699_v10, %s12155_s25 }
 0xd1f   :  { %3100 = vperm.xlu1 %11778, %v2745_v62  }
 0xd89   :  { %v3777_v44 = vpop.permute.xlu1 %3776  ;;  %v3922_v26 = vpop.permute.xlu0 %3921 }
 0xd8a   :  { %10653 = vmatpush3.msra.mxu0 %v3777_v44 }
 0xd8b   :  { %10655 = vmatmul.mubr.msk.f32.vlgmr.msra.gmra.mrb[10].mxu0 %vm1106_vm3, %v13380_v37  ;;  %10657 = vmatprep.subr.mxu0 %v14543_v59 }
 0xd8c   :  { %10658 = vmatpush3.msra.mxu0 %v3699_v10  ;;  %10659 = vmatprep.mubr.msk.f32.mxu0 %vm12152_vm2, %v14543_v59 }
 0xd8d   :  { %10662 = vmatprep.subr.mxu0 %v14543_v59  ;;  %v3996_v51 = vpop.permute.xlu1 %3995  ;;  %v4071_v23 = vpop.permute.xlu0 %4070 }
 0xd93   :  { %10660 = vmatmul.mubr.msk.f32.vlgmr.msra.gmra.mrb[10].mxu0 %vm1106_vm3, %v13388_v17 }
 0xd94   :  { %10663 = vmatpush3.msra.mxu0 %v3922_v26  ;;  %10664 = vmatprep.mubr.msk.f32.mxu0 %vm12152_vm2, %v14543_v59 }
 0xd95   :  { %10667 = vmatprep.subr.mxu0 %v14543_v59 }
 0xd97   :  { %10665 = vmatmul.mubr.msk.f32.vlgmr.msra.gmra.mrb[12].mxu0 %vm1106_vm3, %v13365_v52 }
 0xd98   :  { %10668 = vmatpush3.msra.mxu0 %v3996_v51  ;;  %10669 = vmatprep.mubr.msk.f32.mxu0 %vm12152_vm2, %v14543_v59 }
 0xd99   :  { %10672 = vmatprep.subr.mxu0 %v14543_v59 }
 0xd9e   :  { %v3101_v43 = vpop.permute.xlu1 %3100 }
 0xd9f   :  { %v11557_v6 = vadd.f32 %v3251_v19, %v3101_v43  ;;  %v11558_v27 = vadd.f32 %v3474_v47, %v3101_v43  ;;  %10670 = vmatmul.mubr.msk.f32.vlgmr.msra.gmra.mrb[12].mxu0 %vm1106_vm3, %v13380_v37 }
 0xda0   :  { %10673 = vmatpush3.msra.mxu0 %v4071_v23  ;;  %10674 = vmatprep.mubr.msk.f32.mxu0 %vm12152_vm2, %v14543_v59 }
 0xda1   :  { %v13478_v39 = vmax.f32 %v11557_v6, %v11558_v27  ;;  %11451 = vmatprep.subr.bf16.mxu0 %v14541_v24 }
 0xda3   :  { %4165 = vrot.lane.b32.xlu0 %v13478_v39, %s12156_s29 }
 0xda7   :  { %10675 = vmatmul.mubr.msk.f32.vlgmr.msra.gmra.mrb[12].mxu0 %vm1106_vm3, %v13388_v17 }
 0xda8   :  { %10685 = vmatprep.mubr.msk.f32.mxu0 %vm12152_vm2, %v14543_v59 }
 0xe15   :  { %v4166_v13 = vpop.permute.xlu0 %4165 }
 0xe16   :  { %v4167_v31 = vsel %vm4164_vm7, %v4166_v13, %v13478_v39 }
 0xe17   :  { %4168 = vrot.lane.b32.xlu0 %v4167_v31, %s12156_s29 }
 0xe1b   :  { %4331 = vperm.xlu0 %11777, %v4151_v4  }
 0xe1f   :  { %4344 = vperm.xlu0 %11777, %v4153_v21  }
 0xe66   :  { %v3916_v38 = vpop.f32.mrb[10].mxu0 }
 0xe67   :  { %v10661_v36 = vpop.f32.mrb[11].mxu0  ;;  %v11559_v28 = vadd.f32 %v3916_v38, %v3101_v43 }
 0xe7a   :  { %v4139_v52 = vpop.f32.mrb[12].mxu0 }
 0xe7b   :  { %v11560_v12 = vadd.f32 %v4139_v52, %v3101_v43  ;;  %v10676_v22 = vpop.f32.mrb[13].mxu0 }
 0xe7d   :  { %v13492_v15 = vmax.f32 %v11559_v28, %v11560_v12 }
 0xe7f   :  { %4185 = vrot.lane.b32.xlu1 %v13492_v15, %s12156_s29 }
 0xe89   :  { %v4169_v37 = vpop.permute.xlu0 %4168 }
 0xe8a   :  { %v4170_v7 = vsel %vm4164_vm7, %v4169_v37, %v13478_v39 }
 0xe9a   :  { %v4332_v56 = vpop.permute.xlu0 %4331 }
 0xe9e   :  { %v4345_v1 = vpop.permute.xlu0 %4344 }
 0xef1   :  { %v4186_v34 = vpop.permute.xlu1 %4185 }
 0xef2   :  { %v4187_v57 = vsel %vm4164_vm7, %v4186_v34, %v13492_v15 }
 0xef3   :  { %4188 = vrot.lane.b32.xlu1 %v4187_v57, %s12156_s29 }
 0xef7   :  { %4337 = vperm.xlu1 %11778, %v4152_v0  }
 0xefb   :  { %4172 = vrot.lane.b32.xlu1 %v4170_v7, %s12157_s26 }
 0xeff   :  { %4178 = vrot.lane.b32.xlu1 %v4170_v7, %s12149_s27 }
 0xf03   :  { %4262 = vperm.xlu1 %11778, %v4148_v18  }
 0xf07   :  { %4275 = vperm.xlu1 %11778, %v4150_v48  }
 0xf0b   :  { %4405 = vperm.xlu1 %11778, %v4155_v41  }
 0xf65   :  { %v4189_v3 = vpop.permute.xlu1 %4188 }
 0xf66   :  { %v4190_v17 = vsel %vm4164_vm7, %v4189_v3, %v13492_v15 }
 0xf67   :  { %4192 = vrot.lane.b32.xlu0 %v4190_v17, %s12157_s26 }
 0xf6b   :  { %4196 = vrot.lane.b32.xlu0 %v4190_v17, %s12149_s27 }
 0xf6f   :  { %4268 = vperm.xlu0 %11777, %v4149_v32  }
 0xf73   :  { %4399 = vperm.xlu0 %11777, %v4154_v46  }
 0xf76   :  { %v4338_v9 = vpop.permute.xlu1 %4337 }
 0xf77   :  { %4412 = vperm.xlu0 %11777, %v4156_v53   ;;  %v4340_v45 = vmul.f32 %v4338_v9, %v13478_v39  ;;  %v4350_v5 = vmul.f32 %v4338_v9, %v13492_v15 }
 0xf7a   :  { %v4173_v16 = vpop.permute.xlu1 %4172 }
 0xf7b   :  { %v13514_v25 = vsel %vm255_vm0, 0.0, %v4173_v16 }
 0xf7c   :  { %v4334_v61 = vmul.f32 %v4332_v56, %v13514_v25 }
 0xf7e   :  { %v4179_v49 = vpop.permute.xlu1 %4178  ;;  %v4341_v35 = vadd.f32 %v4340_v45, %v4334_v61 }
 0xf7f   :  { %v13521_v40 = vsel %vm4163_vm8, 0.0, %v4179_v49 }
 0xf80   :  { %v4347_v20 = vmul.f32 %v4345_v1, %v13521_v40 }
 0xf82   :  { %v13524_v58 = vadd.f32 %v4347_v20, %v4341_v35  ;;  %v4263_v60 = vpop.permute.xlu1 %4262 }
 0xf83   :  { %v4265_v62 = vmul.f32 %v4263_v60, %v13514_v25 }
 0xf84   :  { %v4354_v54 = vsel %vm4285_vm9, %v13524_v58, 0.0 }
 0xf85   :  { %4355 = vadd.xlane.f32.xlu1 %v4354_v54 }
 0xf86   :  { %v4276_v42 = vpop.permute.xlu1 %4275 }
 0xf87   :  { %v4278_v43 = vmul.f32 %v4276_v42, %v13521_v40 }
 0xf8a   :  { %v4406_v13 = vpop.permute.xlu1 %4405 }
 0xf8b   :  { %v4408_v52 = vmul.f32 %v4406_v13, %v13478_v39  ;;  %v4418_v28 = vmul.f32 %v4406_v13, %v13492_v15 }
 0xfd9   :  { %v4193_v33 = vpop.permute.xlu0 %4192 }
 0xfda   :  { %v4195_v55 = vsel %vm255_vm0, 0.0, %v4193_v33 }
 0xfdb   :  { %v4349_v50 = vmul.f32 %v4332_v56, %v4195_v55  ;;  %v4200_v29 = vadd.f32 %v4195_v55, %v13492_v15  ;;  %v4280_v44 = vmul.f32 %v4263_v60, %v4195_v55 }
 0xfdd   :  { %v4197_v2 = vpop.permute.xlu0 %4196  ;;  %v4351_v8 = vadd.f32 %v4350_v5, %v4349_v50 }
 0xfde   :  { %v4199_v63 = vsel %vm4163_vm8, 0.0, %v4197_v2 }
 0xfdf   :  { %v13534_v11 = vadd.f32 %v4200_v29, %v4199_v63  ;;  %v4352_v19 = vmul.f32 %v4345_v1, %v4199_v63  ;;  %v4283_v23 = vmul.f32 %v4276_v42, %v4199_v63 }
 0xfe1   :  { %v13536_v30 = vadd.f32 %v4352_v19, %v4351_v8 }
 0xfe3   :  { %v4357_v47 = vsel %vm4285_vm9, %v13536_v30, 0.0 }
 0xfe4   :  { %4358 = vadd.xlane.f32.xlu0 %v4357_v47 }
 0xfee   :  { %v4269_v10 = vpop.permute.xlu0 %4268 }
 0xfef   :  { %v4271_v26 = vmul.f32 %v4269_v10, %v13478_v39  ;;  %v4281_v51 = vmul.f32 %v4269_v10, %v13492_v15 }
 0xff1   :  { %v4272_v6 = vadd.f32 %v4271_v26, %v4265_v62  ;;  %v4282_v27 = vadd.f32 %v4281_v51, %v4280_v44  ;;  %v4146_v26 = vld [vmem:[%s14592_s28 + $0x8] sm:$0xff]  ;;  %v4147_v51 = vld [vmem:[%s14592_s28 + $0x10] sm:$0xff] }
 0xff2   :  { %v4400_v31 = vpop.permute.xlu0 %4399 }
 0xff3   :  { %v4402_v4 = vmul.f32 %v4400_v31, %v13514_v25  ;;  %v4417_v21 = vmul.f32 %v4400_v31, %v4195_v55  ;;  %v13545_v38 = vadd.f32 %v4283_v23, %v4282_v27  ;;  %v13547_v36 = vadd.f32 %v4278_v43, %v4272_v6  ;;  %v4145_v43 = vld [vmem:[%s14592_s28] sm:$0xff] }
 0xff5   :  { %v4289_v12 = vsel %vm4285_vm9, %v13545_v38, 0.0  ;;  %v4286_v22 = vsel %vm4285_vm9, %v13547_v36, 0.0  ;;  %v4409_v57 = vadd.f32 %v4408_v52, %v4402_v4  ;;  %v4419_v0 = vadd.f32 %v4418_v28, %v4417_v21  ;;  %v4158_v4 = vld [vmem:[%s14593_s1 + $0x8] sm:$0xff] }
 0xff6   :  { %v4413_v34 = vpop.permute.xlu0 %4412  ;;  %4290 = vadd.xlane.f32.xlu1 %v4289_v12  ;;  %4287 = vadd.xlane.f32.xlu0 %v4286_v22 }
 0xff7   :  { %v4415_v37 = vmul.f32 %v4413_v34, %v13521_v40  ;;  %v4420_v7 = vmul.f32 %v4413_v34, %v4199_v63  ;;  %v4161_v34 = vld [vmem:[%s14594_s4 + $0x8] sm:$0xff] }
 0xff9   :  { %v13556_v18 = vadd.f32 %v4415_v37, %v4409_v57  ;;  %v13558_v48 = vadd.f32 %v4420_v7, %v4419_v0  ;;  %v4471_v0 = vld [vmem:[#allocation7 + $0x20] sm:$0xff]  ;;  %v4472_v37 = vld [vmem:[#allocation7 + $0x28] sm:$0xff] }
 0xffb   :  { %v4425_v15 = vsel %vm4285_vm9, %v13558_v48, 0.0  ;;  %v4422_v41 = vsel %vm4285_vm9, %v13556_v18, 0.0 }
 0xffc   :  { %4426 = vadd.xlane.f32.xlu1 %v4425_v15  ;;  %4423 = vadd.xlane.f32.xlu0 %v4422_v41  ;;  %v13589_v15 = vpack.c.bf16 %v4472_v37, %v4471_v0 }
 0xffe   :  { %11453 = vmatpush3.bf16.msra.mxu0 %v13589_v15 }
 0xfff   :  { %11454 = vmatprep.subr.bf16.mxu0 %v14541_v24 }
0x1012   :  { %v4356_v3 = vpop.xlane.xlu1 %4355 }
0x1071   :  { %v4359_v17 = vpop.xlane.xlu0 %4358 }
0x1072   :  { %v4360_v32 = vadd.f32 %v4359_v17, %v4356_v3 }
0x1074   :  { %v4361_v46 = vmul.f32 0.015625, %v4360_v32 }
0x1076   :  { %v4367_v53 = vsub.f32 %v13536_v30, %v4361_v46  ;;  %v4362_v9 = vsub.f32 %v13524_v58, %v4361_v46 }
0x1078   :  { %v4368_v56 = vmul.f32 %v4367_v53, %v4367_v53  ;;  %v4363_v16 = vmul.f32 %v4362_v9, %v4362_v9  ;;  %v4473_v9 = vld [vmem:[#allocation7 + $0x30] sm:$0xff] }
0x107a   :  { %v4369_v61 = vsel %vm4285_vm9, %v4368_v56, 0.0  ;;  %v4364_v45 = vsel %vm4285_vm9, %v4363_v16, 0.0  ;;  %v4474_v56 = vld [vmem:[#allocation7 + $0x38] sm:$0xff] }
0x107b   :  { %4370 = vadd.xlane.f32.xlu1 %v4369_v61  ;;  %4365 = vadd.xlane.f32.xlu0 %v4364_v45  ;;  %v13593_v61 = vpack.c.bf16 %v4474_v56, %v4473_v9  ;;  %v4157_v45 = vld [vmem:[%s14593_s1] sm:$0xff]  ;;  %v4466_v9 = vld [vmem:[#allocation7] sm:$0xff]  ;;  %v4467_v56 = vld [vmem:[#allocation7 + $0x8] sm:$0xff] }
0x107d   :  { %11456 = vmatpush3.bf16.msra.mxu0 %v13593_v61 }
0x107e   :  { %11457 = vmatprep.subr.bf16.mxu0 %v14541_v24 }
0x1083   :  { %v4288_v49 = vpop.xlane.xlu0 %4287  ;;  %v4291_v1 = vpop.xlane.xlu1 %4290 }
0x1084   :  { %v4292_v35 = vadd.f32 %v4291_v1, %v4288_v49 }
0x1086   :  { %v13568_v20 = vmul.f32 0.015625, %v4292_v35  ;;  %v4160_v35 = vld [vmem:[%s14594_s4] sm:$0xff] }
0x1088   :  { %v4299_v54 = vsub.f32 %v13545_v38, %v13568_v20  ;;  %v4294_v33 = vsub.f32 %v13547_v36, %v13568_v20 }
0x1089   :  { %v4424_v55 = vpop.xlane.xlu0 %4423  ;;  %v4427_v50 = vpop.xlane.xlu1 %4426 }
0x108a   :  { %v4428_v5 = vadd.f32 %v4427_v50, %v4424_v55  ;;  %v4300_v29 = vmul.f32 %v4299_v54, %v4299_v54  ;;  %v4295_v2 = vmul.f32 %v4294_v33, %v4294_v33  ;;  %v4159_v33 = vld [vmem:[%s14593_s1 + $0x10] sm:$0xff] }
0x108c   :  { %v13574_v63 = vmul.f32 0.015625, %v4428_v5  ;;  %v4301_v8 = vsel %vm4285_vm9, %v4300_v29, 0.0  ;;  %v4296_v19 = vsel %vm4285_vm9, %v4295_v2, 0.0  ;;  %v4162_v29 = vld [vmem:[%s14594_s4 + $0x10] sm:$0xff] }
0x108d   :  { %4302 = vadd.xlane.f32.xlu1 %v4301_v8  ;;  %4297 = vadd.xlane.f32.xlu0 %v4296_v19  ;;  %v4182_v19 = vadd.f32 %v13514_v25, %v13478_v39 }
0x108e   :  { %v4435_v47 = vsub.f32 %v13558_v48, %v13574_v63  ;;  %v4430_v60 = vsub.f32 %v13556_v18, %v13574_v63 }
0x1090   :  { %v4436_v42 = vmul.f32 %v4435_v47, %v4435_v47  ;;  %v4431_v10 = vmul.f32 %v4430_v60, %v4430_v60  ;;  %v4183_v47 = vadd.f32 %v4182_v19, %v13521_v40  ;;  %v4202_v40 = vmul.f32 0.33333334, %v13534_v11 }
0x1092   :  { %v4437_v62 = vsel %vm4285_vm9, %v4436_v42, 0.0  ;;  %v4432_v44 = vsel %vm4285_vm9, %v4431_v10, 0.0  ;;  %v4184_v10 = vmul.f32 0.33333334, %v4183_v47 }
0x1093   :  { %4438 = vadd.xlane.f32.xlu1 %v4437_v62  ;;  %4433 = vadd.xlane.f32.xlu0 %v4432_v44 }
0x10a4   :  { %4211 = vperm.xlu1 %11778, %v4146_v26  }
0x10a8   :  { %4217 = vperm.xlu1 %11778, %v4147_v51  }
0x10a9   :  { %4205 = vperm.xlu0 %11777, %v4145_v43  }
0x1108   :  { %v4366_v23 = vpop.xlane.xlu0 %4365  ;;  %v4371_v6 = vpop.xlane.xlu1 %4370 }
0x1109   :  { %v4372_v27 = vadd.f32 %v4371_v6, %v4366_v23 }
0x110b   :  { %v4373_v13 = vmul.f32 0.015625, %v4372_v27 }
0x110d   :  { %v4374_v31 = vadd.f32 1e-05, %v4373_v13 }
0x110f   :  { %11873 = vrsqrt.f32 %v4374_v31 }
0x1119   :  { %v11874_v21 = vpop.eup %11873 }
0x111a   :  { %v4298_v52 = vpop.xlane.xlu0 %4297  ;;  %v4303_v28 = vpop.xlane.xlu1 %4302  ;;  %v4376_v12 = vmul.f32 %v11874_v21, %v4158_v4 }
0x111b   :  { %v4304_v22 = vadd.f32 %v4303_v28, %v4298_v52 }
0x111c   :  { %4381 = vperm.xlu0 %11777, %v4376_v12   ;;  %v4377_v57 = vmul.f32 %v4376_v12, %v4361_v46 }
0x111d   :  { %v4305_v7 = vmul.f32 0.015625, %v4304_v22 }
0x111e   :  { %v4378_v41 = vsub.f32 %v4161_v34, %v4377_v57 }
0x111f   :  { %v4306_v3 = vadd.f32 1e-05, %v4305_v7 }
0x1120   :  { %v4434_v17 = vpop.xlane.xlu0 %4433  ;;  %4387 = vperm.xlu1 %11778, %v4378_v41   ;;  %v4439_v32 = vpop.xlane.xlu1 %4438 }
0x1121   :  { %11875 = vrsqrt.f32 %v4306_v3  ;;  %v4440_v53 = vadd.f32 %v4439_v32, %v4434_v17 }
0x1123   :  { %v4441_v46 = vmul.f32 0.015625, %v4440_v53 }
0x1124   :  { %v4212_v60 = vpop.permute.xlu1 %4211 }
0x1125   :  { %v4442_v16 = vadd.f32 1e-05, %v4441_v46  ;;  %v4214_v62 = vmul.f32 %v4212_v60, %v4184_v10  ;;  %v4240_v52 = vmul.f32 %v4212_v60, %v4202_v40  ;;  %v4476_v60 = vld [vmem:[#allocation7 + $0x40] sm:$0xff] }
0x1127   :  { %11877 = vrsqrt.f32 %v4442_v16 }
0x1128   :  { %v4206_v42 = vpop.permute.xlu0 %4205  ;;  %v4218_v44 = vpop.permute.xlu1 %4217 }
0x1129   :  { %v4220_v51 = vmul.f32 %v4218_v44, %v4184_v10  ;;  %v4239_v4 = vmul.f32 %v4206_v42, %v4202_v40  ;;  %v4241_v34 = vmul.f32 %v4218_v44, %v4202_v40 }
0x112b   :  { %v11876_v49 = vpop.eup %11875  ;;  %v4242_v12 = vmax.f32 %v4239_v4, %v4240_v52 }
0x112c   :  { %v4308_v1 = vmul.f32 %v11876_v49, %v4157_v45  ;;  %v11458_v49 = vpack.c.bf16 %v4467_v56, %v4466_v9 }
0x112d   :  { %v4243_v57 = vmax.f32 %v4242_v12, %v4241_v34 }
0x112e   :  { %4313 = vperm.xlu0 %11777, %v4308_v1   ;;  %v4309_v54 = vmul.f32 %v4308_v1, %v13568_v20  ;;  %v4208_v20 = vmul.f32 %v4206_v42, %v4184_v10  ;;  %v4477_v42 = vld [vmem:[#allocation7 + $0x48] sm:$0xff] }
0x112f   :  { %v4244_v0 = vsub.f32 %v4239_v4, %v4243_v57  ;;  %v4247_v37 = vsub.f32 %v4240_v52, %v4243_v57  ;;  %v4250_v53 = vsub.f32 %v4241_v34, %v4243_v57 }
0x1130   :  { %v4310_v55 = vsub.f32 %v4160_v35, %v4309_v54  ;;  %v4221_v26 = vmax.f32 %v4208_v20, %v4214_v62  ;;  %v4468_v54 = vld [vmem:[#allocation7 + $0x10] sm:$0xff] }
0x1131   :  { %v11878_v50 = vpop.eup %11877  ;;  %v4245_v41 = vmul.f32 1.442695, %v4244_v0  ;;  %v4248_v3 = vmul.f32 1.442695, %v4247_v37  ;;  %v4251_v1 = vmul.f32 1.442695, %v4250_v53 }
0x1132   :  { %4319 = vperm.xlu1 %11778, %v4310_v55   ;;  %v4444_v5 = vmul.f32 %v11878_v50, %v4159_v33  ;;  %v4222_v43 = vmax.f32 %v4221_v26, %v4220_v51  ;;  %v4469_v33 = vld [vmem:[#allocation7 + $0x18] sm:$0xff]  ;;  %v11464_v26 = vpack.c.bf16 %v4477_v42, %v4476_v60  ;;  %v13647_v37 = vld [vmem:[#allocation6] sm:$0xff] }
0x1133   :  { %v11461_v55 = vpack.c.bf16 %v4469_v33, %v4468_v54 }
0x1134   :  { %4449 = vperm.xlu0 %11777, %v4444_v5   ;;  %v4445_v2 = vmul.f32 %v4444_v5, %v13574_v63  ;;  %v4223_v23 = vsub.f32 %v4208_v20, %v4222_v43  ;;  %v4226_v6 = vsub.f32 %v4214_v62, %v4222_v43  ;;  %v4229_v13 = vsub.f32 %v4220_v51, %v4222_v43 }
0x1136   :  { %v4446_v8 = vsub.f32 %v4162_v29, %v4445_v2  ;;  %v4224_v27 = vmul.f32 1.442695, %v4223_v23  ;;  %v4227_v63 = vmul.f32 1.442695, %v4226_v6  ;;  %v4230_v31 = vmul.f32 1.442695, %v4229_v13 }
0x1137   :  { %v4478_v23 = vld [vmem:[#allocation7 + $0x50] sm:$0xff]  ;;  %v4479_v6 = vld [vmem:[#allocation7 + $0x58] sm:$0xff] }
0x1138   :  { %4455 = vperm.xlu1 %11778, %v4446_v8   ;;  %11879 = vpow2.f32 %v4224_v27 }
0x1139   :  { %11881 = vpow2.f32 %v4227_v63 }
0x113a   :  { %11883 = vpow2.f32 %v4230_v31 }
0x1142   :  { %v11880_v39 = vpop.eup %11879 }
0x1143   :  { %v11882_v25 = vpop.eup %11881 }
0x1144   :  { %v4232_v21 = vadd.f32 %v11882_v25, %v11880_v39  ;;  %v13607_v28 = vpop.eup %11883 }
0x1146   :  { %v4233_v22 = vadd.f32 %v13607_v28, %v4232_v21 }
0x1148   :  { %11885 = vrcp.f32 %v4233_v22 }
0x1149   :  { %11887 = vpow2.f32 %v4245_v41 }
0x114a   :  { %11889 = vpow2.f32 %v4248_v3 }
0x114b   :  { %11891 = vpow2.f32 %v4251_v1 }
0x1152   :  { %v11886_v32 = vpop.eup %11885 }
0x1153   :  { %v4237_v16 = vmul.f32 %v11886_v32, %v11882_v25  ;;  %v4236_v62 = vmul.f32 %v11886_v32, %v11880_v39  ;;  %v4238_v39 = vmul.f32 %v11886_v32, %v13607_v28  ;;  %v4482_v32 = vld [vmem:[#allocation6 + $0x8] sm:$0xff] }
0x119b   :  { %v4382_v7 = vpop.permute.xlu0 %4381 }
0x119c   :  { %v4384_v17 = vmul.f32 %v4382_v7, %v13524_v58  ;;  %v11888_v58 = vpop.eup %11887  ;;  %v4393_v31 = vmul.f32 %v4382_v7, %v13536_v30 }
0x119d   :  { %v11890_v50 = vpop.eup %11889 }
0x119e   :  { %v4253_v29 = vadd.f32 %v11890_v50, %v11888_v58  ;;  %v11892_v19 = vpop.eup %11891 }
0x119f   :  { %v4388_v11 = vpop.permute.xlu1 %4387 }
0x11a0   :  { %v4390_v46 = vadd.f32 %v4388_v11, %v4384_v17  ;;  %v4254_v10 = vadd.f32 %v11892_v19, %v4253_v29  ;;  %v4465_v17 = vld [vmem:[%s14595_s2] sm:$0xff] }
0x11a2   :  { %v4391_v45 = vmax.f32 %v4390_v46, 0.0  ;;  %11893 = vrcp.f32 %v4254_v10  ;;  %v4484_v46 = vld [vmem:[#allocation6 + $0x10] sm:$0xff] }
0x11a4   :  { %v4392_v35 = vmul.f32 %v4391_v45, %v4237_v16 }
0x11a6   :  { %10686 = vmatmul.mubr.msk.f32.vlgmr.msra.gmra.mrb[14].mxu0 %vm4285_vm9, %v4392_v35 }
0x11a7   :  { %11459 = vmatpush3.bf16.msra.mxu0 %v11458_v49  ;;  %10696 = vmatprep.mubr.msk.f32.mxu0 %vm12152_vm2, %v14543_v59 }
0x11a8   :  { %11460 = vmatprep.subr.bf16.mxu0 %v14541_v24 }
0x11ab   :  { %11462 = vmatpush3.bf16.msra.mxu0 %v11461_v55 }
0x11ac   :  { %11463 = vmatprep.subr.bf16.mxu0 %v14541_v24  ;;  %v11894_v40 = vpop.eup %11893 }
0x11ad   :  { %v4314_v5 = vpop.permute.xlu0 %4313  ;;  %v4258_v21 = vmul.f32 %v11894_v40, %v11890_v50  ;;  %v4257_v12 = vmul.f32 %v11894_v40, %v11888_v58  ;;  %v4259_v57 = vmul.f32 %v11894_v40, %v11892_v19  ;;  %v5829_v40 = vld [vmem:[%s14596_s15 + $0x8] sm:$0xff] }
0x11ae   :  { %v4316_v2 = vmul.f32 %v4314_v5, %v13547_v36  ;;  %v11467_v36 = vpack.c.bf16 %v4479_v6, %v4478_v23  ;;  %v4325_v30 = vmul.f32 %v4314_v5, %v13545_v38 }
0x11b1   :  { %v4320_v8 = vpop.permute.xlu1 %4319 }
0x11b2   :  { %v4322_v47 = vadd.f32 %v4320_v8, %v4316_v2  ;;  %v4326_v28 = vadd.f32 %v4325_v30, %v4320_v8 }
0x11b3   :  { %v4450_v20 = vpop.permute.xlu0 %4449 }
0x11b4   :  { %v4323_v44 = vmax.f32 %v4322_v47, 0.0  ;;  %v4452_v43 = vmul.f32 %v4450_v20, %v13556_v18  ;;  %v4394_v18 = vadd.f32 %v4393_v31, %v4388_v11  ;;  %v4461_v22 = vmul.f32 %v4450_v20, %v13558_v48  ;;  %v5830_v31 = vld [vmem:[%s14596_s15 + $0x10] sm:$0xff] }
0x11b6   :  { %v4324_v51 = vmul.f32 %v4323_v44, %v4236_v62  ;;  %v4395_v4 = vmax.f32 %v4394_v18, 0.0 }
0x11b7   :  { %v4456_v27 = vpop.permute.xlu1 %4455 }
0x11b8   :  { %v4458_v63 = vadd.f32 %v4456_v27, %v4452_v43  ;;  %10697 = vmatmul.mubr.msk.f32.vlgmr.msra.gmra.mrb[14].mxu0 %vm4285_vm9, %v4324_v51  ;;  %v4396_v52 = vmul.f32 %v4395_v4, %v4258_v21  ;;  %v4462_v34 = vadd.f32 %v4461_v22, %v4456_v27  ;;  %v5831_v51 = vld [vmem:[%s14596_s15 + $0x18] sm:$0xff]  ;;  %v5833_v43 = vld [vmem:[%s14596_s15 + $0x28] sm:$0xff]  ;;  %v5832_v27 = vld [vmem:[%s14596_s15 + $0x20] sm:$0xff] }
0x11b9   :  { %11465 = vmatpush3.bf16.msra.mxu0 %v11464_v26  ;;  %10707 = vmatprep.mubr.msk.f32.mxu0 %vm12152_vm2, %v14543_v59  ;;  %v5834_v4 = vld [vmem:[%s14596_s15 + $0x30] sm:$0xff]  ;;  %v5836_v21 = vld [vmem:[%s14596_s15 + $0x40] sm:$0xff] }
0x11ba   :  { %v4459_v13 = vmax.f32 %v4458_v63, 0.0  ;;  %11466 = vmatprep.subr.bf16.mxu0 %v14541_v24  ;;  %v5828_v63 = vld [vmem:[%s14596_s15] sm:$0xff] }
0x11bc   :  { %v4460_v25 = vmul.f32 %v4459_v13, %v4238_v39  ;;  %v5835_v39 = vld [vmem:[%s14596_s15 + $0x38] sm:$0xff] }
0x11bd   :  { %11468 = vmatpush3.bf16.msra.mxu0 %v11467_v36 }
0x11be   :  { %11469 = vmatprep.subr.bf16.mxu0 %v14541_v24 }
0x11c0   :  { %10708 = vmatmul.mubr.msk.f32.vlgmr.msra.gmra.mrb[14].mxu0 %vm4285_vm9, %v4460_v25 }
0x11c1   :  { %11471 = vmatpush3.bf16.msra.mxu0 %v13589_v15  ;;  %10748 = vmatprep.mubr.msk.f32.mxu0 %vm12152_vm2, %v14543_v59  ;;  %v4327_v15 = vmax.f32 %v4326_v28, 0.0 }
0x11c2   :  { %11472 = vmatprep.subr.bf16.mxu0 %v14541_v24 }
0x11c3   :  { %v4328_v38 = vmul.f32 %v4327_v15, %v4257_v12 }
0x11c5   :  { %11474 = vmatpush3.bf16.msra.mxu0 %v13593_v61  ;;  %v4463_v61 = vmax.f32 %v4462_v34, 0.0 }
0x11c6   :  { %11475 = vmatprep.subr.bf16.mxu0 %v14541_v24 }
0x11c7   :  { %v4464_v0 = vmul.f32 %v4463_v61, %v4259_v57 }
0x11c8   :  { %10749 = vmatmul.mubr.msk.f32.vlgmr.msra.gmra.mrb[16].mxu0 %vm4285_vm9, %v4396_v52 }
0x11c9   :  { %11477 = vmatpush3.bf16.msra.mxu0 %v11458_v49  ;;  %10759 = vmatprep.mubr.msk.f32.mxu0 %vm12152_vm2, %v14543_v59 }
0x11ca   :  { %11478 = vmatprep.subr.bf16.mxu0 %v14541_v24 }
0x11cd   :  { %11480 = vmatpush3.bf16.msra.mxu0 %v11461_v55 }
0x11ce   :  { %11481 = vmatprep.subr.bf16.mxu0 %v14541_v24 }
0x11d0   :  { %10760 = vmatmul.mubr.msk.f32.vlgmr.msra.gmra.mrb[16].mxu0 %vm4285_vm9, %v4328_v38 }
0x11d1   :  { %11483 = vmatpush3.bf16.msra.mxu0 %v11464_v26  ;;  %10770 = vmatprep.mubr.msk.f32.mxu0 %vm12152_vm2, %v14543_v59 }
0x11d2   :  { %11484 = vmatprep.subr.bf16.mxu0 %v14541_v24 }
0x11d5   :  { %11486 = vmatpush3.bf16.msra.mxu0 %v11467_v36 }
0x11d6   :  { %11487 = vmatprep.subr.bf16.mxu0 %v14541_v24 }
0x11d8   :  { %10771 = vmatmul.mubr.msk.f32.vlgmr.msra.gmra.mrb[16].mxu0 %vm4285_vm9, %v4464_v0 }
0x11d9   :  { %10807 = vmatprep.mubr.msk.f32.mxu0 %vm12152_vm2, %v14543_v59 }
0x1293   :  { %v4700_v48 = vpop.f32.mrb[14].mxu0 }
0x1294   :  { %4862 = vrot.lane.b32.xlu1 %v4700_v48, %s12153_s5  ;;  %4785 = vrot.lane.b32.xlu0 %v4700_v48, %s12155_s25  ;;  %v10709_v7 = vpop.f32.mrb[15].mxu0 }
0x1295   :  { %10711 = vmatpush3.msra.mxu1 %v4700_v48 }
0x1296   :  { %10713 = vmatmul.mubr.msk.f32.vlgmr.msra.gmra.mrb[14].mxu1 %vm1106_vm3, %v13647_v37  ;;  %10715 = vmatprep.subr.mxu1 %v14543_v59 }
0x1297   :  { %10717 = vmatprep.mubr.msk.f32.mxu1 %vm12152_vm2, %v14543_v59 }
0x1298   :  { %5013 = vrot.lane.b32.xlu1 %v4700_v48, %s12158_s7  ;;  %4939 = vrot.lane.b32.xlu0 %v4700_v48, %s12159_s0 }
0x129c   :  { %5087 = vrot.lane.b32.xlu0 %v4700_v48, %s12160_s11 }
0x12ab   :  { %v5377_v41 = vpop.f32.mrb[16].mxu0 }
0x12ac   :  { %5528 = vrot.lane.b32.xlu0 %v5377_v41, %s12153_s5  ;;  %5454 = vrot.lane.b32.xlu1 %v5377_v41, %s12155_s25  ;;  %v10772_v3 = vpop.f32.mrb[17].mxu0  ;;  %s14601_s5 = sld [smem:[#allocation30_spill]] }
0x12b0   :  { %5676 = vrot.lane.b32.xlu0 %v5377_v41, %s12158_s7  ;;  %5602 = vrot.lane.b32.xlu1 %v5377_v41, %s12159_s0 }
0x12b4   :  { %4780 = vperm.xlu0 %11777, %v4465_v17   ;;  %5750 = vrot.lane.b32.xlu1 %v5377_v41, %s12160_s11 }
0x1306   :  { %v4786_v11 = vpop.permute.xlu0 %4785  ;;  %v4863_v53 = vpop.permute.xlu1 %4862 }
0x1307   :  { %10716 = vmatpush3.msra.mxu1 %v4786_v11 }
0x1308   :  { %10718 = vmatmul.mubr.msk.f32.vlgmr.msra.gmra.mrb[14].mxu1 %vm1106_vm3, %v4482_v32  ;;  %10720 = vmatprep.subr.mxu1 %v14543_v59 }
0x1309   :  { %10721 = vmatpush3.msra.mxu1 %v4863_v53  ;;  %10722 = vmatprep.mubr.msk.f32.mxu1 %vm12152_vm2, %v14543_v59 }
0x130a   :  { %10725 = vmatprep.subr.mxu1 %v14543_v59  ;;  %v4940_v9 = vpop.permute.xlu0 %4939  ;;  %v5014_v56 = vpop.permute.xlu1 %5013 }
0x130e   :  { %v5088_v16 = vpop.permute.xlu0 %5087 }
0x1310   :  { %10723 = vmatmul.mubr.msk.f32.vlgmr.msra.gmra.mrb[14].mxu1 %vm1106_vm3, %v4484_v46 }
0x1311   :  { %10726 = vmatpush3.msra.mxu1 %v4940_v9  ;;  %10727 = vmatprep.mubr.msk.f32.mxu1 %vm12152_vm2, %v14543_v59 }
0x1312   :  { %10730 = vmatprep.subr.mxu1 %v14543_v59 }
0x1314   :  { %10728 = vmatmul.mubr.msk.f32.vlgmr.msra.gmra.mrb[16].mxu1 %vm1106_vm3, %v13647_v37 }
0x1315   :  { %10731 = vmatpush3.msra.mxu1 %v5014_v56  ;;  %10732 = vmatprep.mubr.msk.f32.mxu1 %vm12152_vm2, %v14543_v59 }
0x1316   :  { %10735 = vmatprep.subr.mxu1 %v14543_v59 }
0x131c   :  { %10733 = vmatmul.mubr.msk.f32.vlgmr.msra.gmra.mrb[16].mxu1 %vm1106_vm3, %v4482_v32 }
0x131d   :  { %10736 = vmatpush3.msra.mxu1 %v5088_v16  ;;  %10737 = vmatprep.mubr.msk.f32.mxu1 %vm12152_vm2, %v14543_v59 }
0x131e   :  { %10773 = vmatprep.subr.mxu1 %v14543_v59  ;;  %v5455_v45 = vpop.permute.xlu1 %5454  ;;  %v5529_v49 = vpop.permute.xlu0 %5528 }
0x1322   :  { %v5603_v1 = vpop.permute.xlu1 %5602  ;;  %v5677_v35 = vpop.permute.xlu0 %5676 }
0x1324   :  { %10738 = vmatmul.mubr.msk.f32.vlgmr.msra.gmra.mrb[16].mxu1 %vm1106_vm3, %v4484_v46 }
0x1325   :  { %10774 = vmatpush3.msra.mxu1 %v5377_v41  ;;  %10775 = vmatprep.mubr.msk.f32.mxu1 %vm12152_vm2, %v14543_v59 }
0x1326   :  { %10778 = vmatprep.subr.mxu1 %v14543_v59  ;;  %v5751_v54 = vpop.permute.xlu1 %5750 }
0x1328   :  { %10776 = vmatmul.mubr.msk.f32.vlgmr.msra.gmra.mrb[18].mxu1 %vm1106_vm3, %v13647_v37 }
0x1329   :  { %10779 = vmatpush3.msra.mxu1 %v5455_v45  ;;  %10780 = vmatprep.mubr.msk.f32.mxu1 %vm12152_vm2, %v14543_v59 }
0x132a   :  { %10783 = vmatprep.subr.mxu1 %v14543_v59 }
0x1330   :  { %10781 = vmatmul.mubr.msk.f32.vlgmr.msra.gmra.mrb[18].mxu1 %vm1106_vm3, %v4482_v32 }
0x1331   :  { %10784 = vmatpush3.msra.mxu1 %v5529_v49  ;;  %10785 = vmatprep.mubr.msk.f32.mxu1 %vm12152_vm2, %v14543_v59 }
0x1332   :  { %10788 = vmatprep.subr.mxu1 %v14543_v59 }
0x1333   :  { %v4781_v58 = vpop.permute.xlu0 %4780 }
0x1338   :  { %10786 = vmatmul.mubr.msk.f32.vlgmr.msra.gmra.mrb[18].mxu1 %vm1106_vm3, %v4484_v46 }
0x1339   :  { %10789 = vmatpush3.msra.mxu1 %v5603_v1  ;;  %10790 = vmatprep.mubr.msk.f32.mxu1 %vm12152_vm2, %v14543_v59 }
0x133a   :  { %10793 = vmatprep.subr.mxu1 %v14543_v59 }
0x133c   :  { %10791 = vmatmul.mubr.msk.f32.vlgmr.msra.gmra.mrb[20].mxu1 %vm1106_vm3, %v13647_v37 }
0x133d   :  { %10794 = vmatpush3.msra.mxu1 %v5677_v35  ;;  %10795 = vmatprep.mubr.msk.f32.mxu1 %vm12152_vm2, %v14543_v59 }
0x133e   :  { %10798 = vmatprep.subr.mxu1 %v14543_v59 }
0x1344   :  { %10796 = vmatmul.mubr.msk.f32.vlgmr.msra.gmra.mrb[20].mxu1 %vm1106_vm3, %v4482_v32 }
0x1345   :  { %10799 = vmatpush3.msra.mxu1 %v5751_v54  ;;  %10800 = vmatprep.mubr.msk.f32.mxu1 %vm12152_vm2, %v14543_v59 }
0x134c   :  { %10801 = vmatmul.mubr.msk.f32.vlgmr.msra.gmra.mrb[20].mxu1 %vm1106_vm3, %v4484_v46 }
0x13e3   :  { %v4934_v33 = vpop.f32.mrb[14].mxu1 }
0x13e4   :  { %v10724_v55 = vpop.f32.mrb[15].mxu1  ;;  %v11561_v5 = vadd.f32 %v4934_v33, %v4781_v58 }
0x13f7   :  { %v5156_v50 = vpop.f32.mrb[16].mxu1 }
0x13f8   :  { %v11562_v29 = vadd.f32 %v5156_v50, %v4781_v58  ;;  %v10739_v2 = vpop.f32.mrb[17].mxu1 }
0x13fa   :  { %v13705_v8 = vmax.f32 %v11561_v5, %v11562_v29 }
0x13fc   :  { %5845 = vrot.lane.b32.xlu1 %v13705_v8, %s12139_s10 }
0x140b   :  { %v5597_v19 = vpop.f32.mrb[18].mxu1 }
0x140c   :  { %v10787_v47 = vpop.f32.mrb[19].mxu1  ;;  %v11563_v42 = vadd.f32 %v5597_v19, %v4781_v58 }
0x141f   :  { %v5819_v60 = vpop.f32.mrb[20].mxu1 }
0x1420   :  { %v11564_v10 = vadd.f32 %v5819_v60, %v4781_v58  ;;  %v10802_v20 = vpop.f32.mrb[21].mxu1 }
0x1422   :  { %v13709_v62 = vmax.f32 %v11563_v42, %v11564_v10 }
0x1424   :  { %5865 = vrot.lane.b32.xlu0 %v13709_v62, %s12139_s10 }
0x146e   :  { %v5846_v44 = vpop.permute.xlu1 %5845 }
0x146f   :  { %v5847_v26 = vsel %vm5844_vm10, %v5846_v44, %v13705_v8 }
0x1470   :  { %5848 = vrot.lane.b32.xlu1 %v5847_v26, %s12139_s10 }
0x1474   :  { %6011 = vperm.xlu1 %11778, %v5831_v51  }
0x1478   :  { %6024 = vperm.xlu1 %11778, %v5833_v43  }
0x1496   :  { %v5866_v23 = vpop.permute.xlu0 %5865 }
0x1497   :  { %v5867_v6 = vsel %vm5844_vm10, %v5866_v23, %v13709_v62 }
0x1498   :  { %5868 = vrot.lane.b32.xlu0 %v5867_v6, %s12139_s10  ;;  %s14597_s10 = sld [smem:[#allocation25_spill]] }
0x149c   :  { %6017 = vperm.xlu0 %11777, %v5832_v27  }
0x14a0   :  { %5942 = vperm.xlu0 %11777, %v5828_v63  }
0x14e2   :  { %v5849_v36 = vpop.permute.xlu1 %5848 }
0x14e3   :  { %v5850_v13 = vsel %vm5844_vm10, %v5849_v36, %v13705_v8 }
0x14e4   :  { %5852 = vrot.lane.b32.xlu0 %v5850_v13, %s12161_s30 }
0x14e8   :  { %5858 = vrot.lane.b32.xlu0 %v5850_v13, %s12149_s27 }
0x14ec   :  { %5955 = vperm.xlu0 %11777, %v5830_v31  }
0x14f0   :  { %6085 = vperm.xlu0 %11777, %v5835_v39  }
0x14f3   :  { %v6012_v28 = vpop.permute.xlu1 %6011 }
0x14f7   :  { %v6025_v57 = vpop.permute.xlu1 %6024 }
0x150a   :  { %v5869_v18 = vpop.permute.xlu0 %5868 }
0x150b   :  { %v5870_v25 = vsel %vm5844_vm10, %v5869_v18, %v13709_v62 }
0x150c   :  { %5872 = vrot.lane.b32.xlu1 %v5870_v25, %s12161_s30 }
0x1510   :  { %5876 = vrot.lane.b32.xlu1 %v5870_v25, %s12149_s27 }
0x1514   :  { %5948 = vperm.xlu1 %11778, %v5829_v40  }
0x1518   :  { %6079 = vperm.xlu1 %11778, %v5834_v4  }
0x151b   :  { %v6018_v30 = vpop.permute.xlu0 %6017 }
0x151c   :  { %6092 = vperm.xlu1 %11778, %v5836_v21   ;;  %v6020_v38 = vmul.f32 %v6018_v30, %v13705_v8  ;;  %v6030_v53 = vmul.f32 %v6018_v30, %v13709_v62 }
0x151f   :  { %v5943_v52 = vpop.permute.xlu0 %5942 }
0x1556   :  { %v5853_v15 = vpop.permute.xlu0 %5852 }
0x1557   :  { %v5855_v12 = vsel %vm255_vm0, 0.0, %v5853_v15 }
0x1558   :  { %v6014_v22 = vmul.f32 %v6012_v28, %v5855_v12  ;;  %v5862_v34 = vadd.f32 %v5855_v12, %v13705_v8  ;;  %v5945_v55 = vmul.f32 %v5943_v52, %v5855_v12 }
0x155a   :  { %v5859_v61 = vpop.permute.xlu0 %5858  ;;  %v6021_v48 = vadd.f32 %v6020_v38, %v6014_v22 }
0x155b   :  { %v5861_v0 = vsel %vm5843_vm11, 0.0, %v5859_v61 }
0x155c   :  { %v13741_v37 = vadd.f32 %v5862_v34, %v5861_v0  ;;  %v6027_v7 = vmul.f32 %v6025_v57, %v5861_v0 }
0x155e   :  { %v13743_v41 = vadd.f32 %v6027_v7, %v6021_v48 }
0x1560   :  { %v6034_v3 = vsel %vm5965_vm12, %v13743_v41, 0.0 }
0x1561   :  { %6035 = vadd.xlane.f32.xlu0 %v6034_v3 }
0x156b   :  { %v5956_v54 = vpop.permute.xlu0 %5955 }
0x156c   :  { %v5958_v29 = vmul.f32 %v5956_v54, %v5861_v0 }
0x156f   :  { %v6086_v47 = vpop.permute.xlu0 %6085 }
0x1570   :  { %v6088_v26 = vmul.f32 %v6086_v47, %v13705_v8  ;;  %v6098_v51 = vmul.f32 %v6086_v47, %v13709_v62 }
0x157e   :  { %v5873_v17 = vpop.permute.xlu1 %5872 }
0x157f   :  { %v5875_v32 = vsel %vm255_vm0, 0.0, %v5873_v17 }
0x1580   :  { %v6029_v11 = vmul.f32 %v6012_v28, %v5875_v32  ;;  %v5880_v46 = vadd.f32 %v5875_v32, %v13709_v62  ;;  %v5960_v58 = vmul.f32 %v5943_v52, %v5875_v32 }
0x1582   :  { %v5877_v9 = vpop.permute.xlu1 %5876  ;;  %v6031_v16 = vadd.f32 %v6030_v53, %v6029_v11 }
0x1583   :  { %v5879_v56 = vsel %vm5843_vm11, 0.0, %v5877_v9 }
0x1584   :  { %v13753_v45 = vadd.f32 %v5880_v46, %v5879_v56  ;;  %v6032_v49 = vmul.f32 %v6025_v57, %v5879_v56  ;;  %v5963_v42 = vmul.f32 %v5956_v54, %v5879_v56 }
0x1586   :  { %v13755_v1 = vadd.f32 %v6032_v49, %v6031_v16 }
0x1588   :  { %v6037_v35 = vsel %vm5965_vm12, %v13755_v1, 0.0 }
0x1589   :  { %6038 = vadd.xlane.f32.xlu1 %v6037_v35 }
0x1593   :  { %v5949_v33 = vpop.permute.xlu1 %5948 }
0x1594   :  { %v5951_v50 = vmul.f32 %v5949_v33, %v13705_v8  ;;  %v5961_v5 = vmul.f32 %v5949_v33, %v13709_v62 }
0x1596   :  { %v5952_v2 = vadd.f32 %v5951_v50, %v5945_v55  ;;  %v5962_v19 = vadd.f32 %v5961_v5, %v5960_v58  ;;  %v5825_v55 = vld [vmem:[%s14597_s10] sm:$0xff]  ;;  %v5827_v58 = vld [vmem:[%s14597_s10 + $0x10] sm:$0xff]  ;;  %v5826_v50 = vld [vmem:[%s14597_s10 + $0x8] sm:$0xff] }
0x1597   :  { %v6080_v60 = vpop.permute.xlu1 %6079 }
0x1598   :  { %v6082_v10 = vmul.f32 %v6080_v60, %v5855_v12  ;;  %v6097_v20 = vmul.f32 %v6080_v60, %v5875_v32  ;;  %v13761_v44 = vadd.f32 %v5958_v29, %v5952_v2  ;;  %v13767_v23 = vadd.f32 %v5963_v42, %v5962_v19  ;;  %v5838_v60 = vld [vmem:[%s14598_s16 + $0x8] sm:$0xff] }
0x159a   :  { %v5966_v43 = vsel %vm5965_vm12, %v13761_v44, 0.0  ;;  %v6089_v27 = vadd.f32 %v6088_v26, %v6082_v10  ;;  %v6099_v63 = vadd.f32 %v6098_v51, %v6097_v20  ;;  %v5969_v8 = vsel %vm5965_vm12, %v13767_v23, 0.0  ;;  %v5841_v20 = vld [vmem:[%s14599_s20 + $0x8] sm:$0xff] }
0x159b   :  { %v6093_v6 = vpop.permute.xlu1 %6092  ;;  %5967 = vadd.xlane.f32.xlu0 %v5966_v43 }
0x159c   :  { %v6095_v36 = vmul.f32 %v6093_v6, %v5861_v0  ;;  %v6100_v13 = vmul.f32 %v6093_v6, %v5879_v56 }
0x159e   :  { %v13769_v31 = vadd.f32 %v6095_v36, %v6089_v27  ;;  %v13771_v39 = vadd.f32 %v6100_v13, %v6099_v63 }
0x159f   :  { %5970 = vadd.xlane.f32.xlu0 %v5969_v8 }
0x15a0   :  { %v6102_v62 = vsel %vm5965_vm12, %v13769_v31, 0.0  ;;  %v6105_v18 = vsel %vm5965_vm12, %v13771_v39, 0.0 }
0x15a1   :  { %6103 = vadd.xlane.f32.xlu1 %v6102_v62 }
0x15a3   :  { %6106 = vadd.xlane.f32.xlu0 %v6105_v18  ;;  %v6150_v18 = vld [vmem:[#allocation9 + $0x10] sm:$0xff] }
0x15ee   :  { %v6036_v25 = vpop.xlane.xlu0 %6035 }
0x1616   :  { %v6039_v40 = vpop.xlane.xlu1 %6038 }
0x1617   :  { %v6040_v4 = vadd.f32 %v6039_v40, %v6036_v25  ;;  %v6151_v25 = vld [vmem:[#allocation9 + $0x18] sm:$0xff] }
0x1619   :  { %v6041_v21 = vmul.f32 0.03125, %v6040_v4  ;;  %v13804_v4 = vpack.c.bf16 %v6151_v25, %v6150_v18 }
0x161b   :  { %v6047_v30 = vsub.f32 %v13755_v1, %v6041_v21  ;;  %v6042_v52 = vsub.f32 %v13743_v41, %v6041_v21  ;;  %11489 = vmatpush3.bf16.msra.mxu0 %v13804_v4 }
0x161c   :  { %11490 = vmatprep.subr.bf16.mxu0 %v14541_v24 }
0x161d   :  { %v6048_v28 = vmul.f32 %v6047_v30, %v6047_v30  ;;  %v6043_v15 = vmul.f32 %v6042_v52, %v6042_v52  ;;  %v5837_v30 = vld [vmem:[%s14598_s16] sm:$0xff] }
0x161f   :  { %v6049_v12 = vsel %vm5965_vm12, %v6048_v28, 0.0  ;;  %v6044_v22 = vsel %vm5965_vm12, %v6043_v15, 0.0  ;;  %v5840_v15 = vld [vmem:[%s14599_s20] sm:$0xff] }
0x1620   :  { %6050 = vadd.xlane.f32.xlu0 %v6049_v12  ;;  %6045 = vadd.xlane.f32.xlu1 %v6044_v22  ;;  %v5839_v22 = vld [vmem:[%s14598_s16 + $0x10] sm:$0xff] }
0x1628   :  { %v5968_v38 = vpop.xlane.xlu0 %5967 }
0x162c   :  { %v5971_v34 = vpop.xlane.xlu0 %5970 }
0x162d   :  { %v5972_v61 = vadd.f32 %v5971_v34, %v5968_v38 }
0x162e   :  { %v6104_v0 = vpop.xlane.xlu1 %6103 }
0x162f   :  { %v13783_v57 = vmul.f32 0.03125, %v5972_v61 }
0x1630   :  { %v6107_v48 = vpop.xlane.xlu0 %6106 }
0x1631   :  { %v6108_v7 = vadd.f32 %v6107_v48, %v6104_v0  ;;  %v5979_v3 = vsub.f32 %v13767_v23, %v13783_v57  ;;  %v5974_v17 = vsub.f32 %v13761_v44, %v13783_v57  ;;  %v5842_v0 = vld [vmem:[%s14599_s20 + $0x10] sm:$0xff] }
0x1633   :  { %v13789_v32 = vmul.f32 0.03125, %v6108_v7  ;;  %v5980_v11 = vmul.f32 %v5979_v3, %v5979_v3  ;;  %v5975_v53 = vmul.f32 %v5974_v17, %v5974_v17 }
0x1635   :  { %v5981_v46 = vsel %vm5965_vm12, %v5980_v11, 0.0  ;;  %v5976_v9 = vsel %vm5965_vm12, %v5975_v53, 0.0  ;;  %v6115_v56 = vsub.f32 %v13771_v39, %v13789_v32  ;;  %v6110_v16 = vsub.f32 %v13769_v31, %v13789_v32 }
0x1636   :  { %5982 = vadd.xlane.f32.xlu0 %v5981_v46  ;;  %5977 = vadd.xlane.f32.xlu1 %v5976_v9  ;;  %v5864_v11 = vmul.f32 0.33333334, %v13741_v37 }
0x1637   :  { %v6116_v49 = vmul.f32 %v6115_v56, %v6115_v56  ;;  %v6111_v35 = vmul.f32 %v6110_v16, %v6110_v16 }
0x1639   :  { %v6117_v54 = vsel %vm5965_vm12, %v6116_v49, 0.0  ;;  %v6112_v33 = vsel %vm5965_vm12, %v6111_v35, 0.0 }
0x163a   :  { %6118 = vadd.xlane.f32.xlu0 %v6117_v54  ;;  %6113 = vadd.xlane.f32.xlu1 %v6112_v33 }
0x164b   :  { %5885 = vperm.xlu1 %11778, %v5825_v55  }
0x164f   :  { %5897 = vperm.xlu1 %11778, %v5827_v58  }
0x1650   :  { %5891 = vperm.xlu0 %11777, %v5826_v50  }
0x16ad   :  { %v6046_v5 = vpop.xlane.xlu1 %6045  ;;  %v6051_v29 = vpop.xlane.xlu0 %6050 }
0x16ae   :  { %v6052_v2 = vadd.f32 %v6051_v29, %v6046_v5 }
0x16b0   :  { %v6053_v19 = vmul.f32 0.03125, %v6052_v2 }
0x16b2   :  { %v6054_v47 = vadd.f32 1e-05, %v6053_v19 }
0x16b4   :  { %11895 = vrsqrt.f32 %v6054_v47 }
0x16be   :  { %v11896_v42 = vpop.eup %11895 }
0x16bf   :  { %v6056_v10 = vmul.f32 %v11896_v42, %v5838_v60 }
0x16c1   :  { %6061 = vperm.xlu1 %11778, %v6056_v10   ;;  %v6057_v26 = vmul.f32 %v6056_v10, %v6041_v21  ;;  %v6147_v10 = vld [vmem:[#allocation9] sm:$0xff] }
0x16c3   :  { %v5978_v51 = vpop.xlane.xlu1 %5977  ;;  %v5983_v43 = vpop.xlane.xlu0 %5982  ;;  %v6058_v6 = vsub.f32 %v5841_v20, %v6057_v26  ;;  %v6148_v20 = vld [vmem:[#allocation9 + $0x8] sm:$0xff] }
0x16c4   :  { %v5984_v27 = vadd.f32 %v5983_v43, %v5978_v51  ;;  %v13831_v43 = vpack.c.bf16 %v6148_v20, %v6147_v10 }
0x16c5   :  { %6067 = vperm.xlu0 %11777, %v6058_v6  }
0x16c6   :  { %v5985_v63 = vmul.f32 0.03125, %v5984_v27 }
0x16c7   :  { %v6114_v36 = vpop.xlane.xlu1 %6113  ;;  %v6119_v13 = vpop.xlane.xlu0 %6118 }
0x16c8   :  { %v5986_v8 = vadd.f32 1e-05, %v5985_v63  ;;  %v6120_v62 = vadd.f32 %v6119_v13, %v6114_v36 }
0x16ca   :  { %11897 = vrsqrt.f32 %v5986_v8  ;;  %v6121_v40 = vmul.f32 0.03125, %v6120_v62  ;;  %v6153_v8 = vld [vmem:[#allocation9 + $0x20] sm:$0xff]  ;;  %v6154_v62 = vld [vmem:[#allocation9 + $0x28] sm:$0xff] }
0x16cb   :  { %v13814_v3 = vpop.permute.xlu1 %5885 }
0x16cc   :  { %v6122_v21 = vadd.f32 1e-05, %v6121_v40 }
0x16ce   :  { %11899 = vrsqrt.f32 %v6122_v21  ;;  %v13849_v21 = vpack.c.bf16 %v6154_v62, %v6153_v8 }
0x16cf   :  { %v13816_v17 = vpop.permute.xlu0 %5891  ;;  %v13821_v46 = vpop.permute.xlu1 %5897 }
0x16d0   :  { %v5894_v53 = vmul.f32 %v13816_v17, %v5864_v11  ;;  %v5900_v56 = vmul.f32 %v13821_v46, %v5864_v11 }
0x16d4   :  { %v11898_v52 = vpop.eup %11897 }
0x16d5   :  { %v5988_v28 = vmul.f32 %v11898_v52, %v5837_v30 }
0x16d7   :  { %5993 = vperm.xlu1 %11778, %v5988_v28   ;;  %v5989_v12 = vmul.f32 %v5988_v28, %v13783_v57  ;;  %v5888_v57 = vmul.f32 %v13814_v3, %v5864_v11 }
0x16d8   :  { %v11900_v38 = vpop.eup %11899 }
0x16d9   :  { %v5990_v34 = vsub.f32 %v5840_v15, %v5989_v12  ;;  %v6124_v61 = vmul.f32 %v11900_v38, %v5839_v22  ;;  %v5901_v9 = vmax.f32 %v5888_v57, %v5894_v53 }
0x16db   :  { %5999 = vperm.xlu0 %11777, %v5990_v34   ;;  %6129 = vperm.xlu1 %11778, %v6124_v61   ;;  %v6125_v48 = vmul.f32 %v6124_v61, %v13789_v32  ;;  %v5902_v16 = vmax.f32 %v5901_v9, %v5900_v56  ;;  %v13869_v34 = vld [vmem:[%s14600_s18 + $0x8] sm:$0xff]  ;;  %v13872_v61 = vld [vmem:[%s14600_s18 + $0x10] sm:$0xff] }
0x16dd   :  { %v6126_v7 = vsub.f32 %v5842_v0, %v6125_v48  ;;  %v5903_v49 = vsub.f32 %v5888_v57, %v5902_v16  ;;  %v5906_v32 = vsub.f32 %v5894_v53, %v5902_v16  ;;  %v5909_v33 = vsub.f32 %v5900_v56, %v5902_v16 }
0x16de   :  { %v5882_v0 = vmul.f32 0.33333334, %v13753_v45 }
0x16df   :  { %6135 = vperm.xlu0 %11777, %v6126_v7   ;;  %v5904_v35 = vmul.f32 1.442695, %v5903_v49  ;;  %v5907_v54 = vmul.f32 1.442695, %v5906_v32  ;;  %v5910_v55 = vmul.f32 1.442695, %v5909_v33 }
0x16e0   :  { %v5920_v48 = vmul.f32 %v13816_v17, %v5882_v0  ;;  %v5919_v7 = vmul.f32 %v13814_v3, %v5882_v0  ;;  %v5921_v53 = vmul.f32 %v13821_v46, %v5882_v0 }
0x16e1   :  { %11901 = vpow2.f32 %v5904_v35 }
0x16e2   :  { %11903 = vpow2.f32 %v5907_v54  ;;  %v5922_v11 = vmax.f32 %v5919_v7, %v5920_v48 }
0x16e3   :  { %11905 = vpow2.f32 %v5910_v55 }
0x16e4   :  { %v5923_v57 = vmax.f32 %v5922_v11, %v5921_v53  ;;  %v7603_v11 = vld [vmem:[%s14602_s9 + $0x30] sm:$0xff] }
0x16e6   :  { %v5924_v9 = vsub.f32 %v5919_v7, %v5923_v57  ;;  %v5927_v56 = vsub.f32 %v5920_v48, %v5923_v57  ;;  %v5930_v32 = vsub.f32 %v5921_v53, %v5923_v57  ;;  %v7604_v53 = vld [vmem:[%s14602_s9 + $0x38] sm:$0xff]  ;;  %v7607_v57 = vld [vmem:[%s14602_s9 + $0x50] sm:$0xff] }
0x16e8   :  { %v5925_v16 = vmul.f32 1.442695, %v5924_v9  ;;  %v5928_v49 = vmul.f32 1.442695, %v5927_v56  ;;  %v5931_v35 = vmul.f32 1.442695, %v5930_v32 }
0x16eb   :  { %v11902_v37 = vpop.eup %11901 }
0x16ec   :  { %v11904_v58 = vpop.eup %11903 }
0x16ed   :  { %v5912_v50 = vadd.f32 %v11904_v58, %v11902_v37  ;;  %v11906_v5 = vpop.eup %11905 }
0x16ef   :  { %v5913_v29 = vadd.f32 %v11906_v5, %v5912_v50 }
0x16f1   :  { %11907 = vrcp.f32 %v5913_v29 }
0x16f2   :  { %11909 = vpow2.f32 %v5925_v16 }
0x16f3   :  { %11911 = vpow2.f32 %v5928_v49 }
0x16f4   :  { %11913 = vpow2.f32 %v5931_v35 }
0x16fb   :  { %v11908_v47 = vpop.eup %11907 }
0x16fc   :  { %v5917_v26 = vmul.f32 %v11908_v47, %v11904_v58  ;;  %v5916_v18 = vmul.f32 %v11908_v47, %v11902_v37  ;;  %v5918_v15 = vmul.f32 %v11908_v47, %v11906_v5  ;;  %v11910_v45 = vpop.eup %11909  ;;  %v13886_v37 = vld [vmem:[%s14600_s18 + $0x18] sm:$0xff]  ;;  %v13889_v58 = vld [vmem:[%s14600_s18 + $0x20] sm:$0xff]  ;;  %v13902_v47 = vld [vmem:[%s14600_s18 + $0x28] sm:$0xff] }
0x16fd   :  { %v11912_v54 = vpop.eup %11911 }
0x16fe   :  { %v5933_v17 = vadd.f32 %v11912_v54, %v11910_v45  ;;  %v11914_v33 = vpop.eup %11913 }
0x1700   :  { %v5934_v3 = vadd.f32 %v11914_v33, %v5933_v17 }
0x1702   :  { %11915 = vrcp.f32 %v5934_v3 }
0x1740   :  { %v13824_v2 = vpop.permute.xlu1 %6061 }
0x1741   :  { %v6064_v19 = vmul.f32 %v13824_v2, %v13743_v41  ;;  %v6073_v50 = vmul.f32 %v13824_v2, %v13755_v1  ;;  %v11916_v1 = vpop.eup %11915 }
0x1744   :  { %v13828_v60 = vpop.permute.xlu0 %6067 }
0x1745   :  { %v6070_v42 = vadd.f32 %v13828_v60, %v6064_v19  ;;  %v6074_v29 = vadd.f32 %v6073_v50, %v13828_v60  ;;  %v5938_v60 = vmul.f32 %v11916_v1, %v11912_v54  ;;  %v7598_v50 = vld [vmem:[%s14602_s9 + $0x8] sm:$0xff] }
0x1747   :  { %v6071_v51 = vmax.f32 %v6070_v42, 0.0  ;;  %v6075_v42 = vmax.f32 %v6074_v29, 0.0  ;;  %v7609_v29 = vld [vmem:[%s14602_s9 + $0x60] sm:$0xff] }
0x1749   :  { %v6072_v6 = vmul.f32 %v6071_v51, %v5917_v26  ;;  %v6076_v20 = vmul.f32 %v6075_v42, %v5938_v60  ;;  %v5937_v51 = vmul.f32 %v11916_v1, %v11910_v45 }
0x174b   :  { %10808 = vmatmul.mubr.msk.f32.vlgmr.msra.gmra.mrb[18].mxu0 %vm5965_vm12, %v6072_v6 }
0x174c   :  { %11492 = vmatpush3.bf16.msra.mxu0 %v13831_v43  ;;  %10814 = vmatprep.mubr.msk.f32.mxu0 %vm12152_vm2, %v14543_v59 }
0x174d   :  { %11493 = vmatprep.subr.bf16.mxu0 %v14541_v24 }
0x1756   :  { %v13838_v41 = vpop.permute.xlu1 %5993 }
0x1757   :  { %v5996_v27 = vmul.f32 %v13838_v41, %v13761_v44  ;;  %v6005_v10 = vmul.f32 %v13838_v41, %v13767_v23 }
0x175a   :  { %v13842_v63 = vpop.permute.xlu0 %5999  ;;  %v13844_v36 = vpop.permute.xlu1 %6129 }
0x175b   :  { %v6002_v13 = vadd.f32 %v13842_v63, %v5996_v27  ;;  %v6132_v40 = vmul.f32 %v13844_v36, %v13769_v31  ;;  %v13860_v31 = vld [vmem:[%s14600_s18] sm:$0xff]  ;;  %v6006_v26 = vadd.f32 %v6005_v10, %v13842_v63 }
0x175c   :  { %10826 = vmatprep.mubr.msk.f32.mxu1 %vm1106_vm3, %v13860_v31 }
0x175d   :  { %v6003_v25 = vmax.f32 %v6002_v13, 0.0  ;;  %v6007_v23 = vmax.f32 %v6006_v26, 0.0  ;;  %v6145_v13 = vld [vmem:[%s14601_s5] sm:$0xff]  ;;  %v7606_v26 = vld [vmem:[%s14602_s9 + $0x48] sm:$0xff] }
0x175e   :  { %v13851_v52 = vpop.permute.xlu0 %6135 }
0x175f   :  { %v6004_v30 = vmul.f32 %v6003_v25, %v5916_v18  ;;  %v6138_v44 = vadd.f32 %v13851_v52, %v6132_v40  ;;  %v6008_v6 = vmul.f32 %v6007_v23, %v5937_v51  ;;  %v6146_v18 = vld [vmem:[%s14601_s5 + $0x8] sm:$0xff] }
0x1761   :  { %10815 = vmatmul.mubr.msk.f32.vlgmr.msra.gmra.mrb[18].mxu0 %vm5965_vm12, %v6004_v30  ;;  %v6139_v28 = vmax.f32 %v6138_v44, 0.0 }
0x1762   :  { %11495 = vmatpush3.bf16.msra.mxu0 %v13849_v21  ;;  %10821 = vmatprep.mubr.msk.f32.mxu0 %vm12152_vm2, %v14543_v59 }
0x1763   :  { %v6140_v12 = vmul.f32 %v6139_v28, %v5918_v15 }
0x1769   :  { %10822 = vmatmul.mubr.msk.f32.vlgmr.msra.gmra.mrb[18].mxu0 %vm5965_vm12, %v6140_v12 }
0x176a   :  { %10841 = vmatprep.mubr.msk.f32.mxu0 %vm1106_vm3, %v13860_v31 }
0x183c   :  { %v6378_v22 = vpop.f32.mrb[18].mxu0 }
0x183d   :  { %6563 = vrot.lane.b32.xlu0 %v6378_v22, %s12155_s25  ;;  %6477 = vrot.lane.b32.xlu1 %v6378_v22, %s12159_s0  ;;  %v10823_v38 = vpop.f32.mrb[19].mxu0 }
0x183e   :  { %10824 = vmatprep.subr.mxu1 %v6378_v22 }
0x183f   :  { %10825 = vmatpush3.msra.mxu1 %v6378_v22 }
0x1840   :  { %10827 = vmatmul.mubr.msk.f32.vlgmr.msra.gmra.mrb[22].mxu1 %vm1106_vm3, %v13869_v34 }
0x1841   :  { %6729 = vrot.lane.b32.xlu0 %v6378_v22, %s12162_s22  ;;  %6649 = vrot.lane.b32.xlu1 %v6378_v22, %s12163_s23 }
0x1842   :  { %10831 = vmatprep.mubr.msk.f32.mxu1 %vm1106_vm3, %v13872_v61 }
0x1845   :  { %6809 = vrot.lane.b32.xlu1 %v6378_v22, %s12164_s24 }
0x18af   :  { %v6564_v55 = vpop.permute.xlu0 %6563  ;;  %v6478_v46 = vpop.permute.xlu1 %6477 }
0x18b0   :  { %10829 = vmatprep.subr.mxu1 %v6478_v46 }
0x18b1   :  { %10830 = vmatpush3.msra.mxu1 %v6478_v46 }
0x18b2   :  { %10832 = vmatmul.mubr.msk.f32.vlgmr.msra.gmra.mrb[22].mxu1 %vm1106_vm3, %v13886_v37  ;;  %10834 = vmatprep.subr.mxu1 %v6564_v55 }
0x18b3   :  { %v6650_v5 = vpop.permute.xlu1 %6649  ;;  %10835 = vmatpush3.msra.mxu1 %v6564_v55  ;;  %10836 = vmatprep.mubr.msk.f32.mxu1 %vm1106_vm3, %v13889_v58  ;;  %v6730_v19 = vpop.permute.xlu0 %6729 }
0x18b4   :  { %10839 = vmatprep.subr.mxu0 %v6650_v5  ;;  %11496 = vmatprep.subr.bf16.mxu1 %v14541_v24 }
0x18b5   :  { %10840 = vmatpush3.msra.mxu0 %v6650_v5  ;;  %v7601_v5 = vld [vmem:[%s14602_s9 + $0x20] sm:$0xff] }
0x18b6   :  { %10842 = vmatmul.mubr.msk.f32.vlgmr.msra.gmra.mrb[20].mxu0 %vm1106_vm3, %v13869_v34  ;;  %10844 = vmatprep.subr.mxu0 %v6730_v19 }
0x18b7   :  { %10845 = vmatpush3.msra.mxu0 %v6730_v19  ;;  %v6810_v2 = vpop.permute.xlu1 %6809  ;;  %10846 = vmatprep.mubr.msk.f32.mxu0 %vm1106_vm3, %v13872_v61  ;;  %v7610_v19 = vld [vmem:[%s14602_s9 + $0x68] sm:$0xff] }
0x18b8   :  { %10849 = vmatprep.subr.mxu0 %v6810_v2 }
0x18ba   :  { %10837 = vmatmul.mubr.msk.f32.vlgmr.msra.gmra.mrb[22].mxu1 %vm1106_vm3, %v13902_v47 }
0x18bb   :  { %11498 = vmatpush3.bf16.msra.mxu1 %v13804_v4  ;;  %10858 = vmatprep.mubr.msk.f32.mxu1 %vm12152_vm2, %v14543_v59  ;;  %v6141_v4 = vmul.f32 %v13844_v36, %v13771_v39  ;;  %v5939_v39 = vmul.f32 %v11916_v1, %v11914_v33  ;;  %v7613_v1 = vld [vmem:[%s14602_s9 + $0x80] sm:$0xff] }
0x18bc   :  { %11499 = vmatprep.subr.bf16.mxu1 %v14541_v24 }
0x18bd   :  { %v6142_v41 = vadd.f32 %v6141_v4, %v13851_v52  ;;  %v7608_v4 = vld [vmem:[%s14602_s9 + $0x58] sm:$0xff] }
0x18be   :  { %10847 = vmatmul.mubr.msk.f32.vlgmr.msra.gmra.mrb[20].mxu0 %vm1106_vm3, %v13886_v37  ;;  %10859 = vmatmul.mubr.msk.f32.vlgmr.msra.gmra.mrb[24].mxu1 %vm5965_vm12, %v6076_v20  ;;  %v7605_v20 = vld [vmem:[%s14602_s9 + $0x40] sm:$0xff] }
0x18bf   :  { %10850 = vmatpush3.msra.mxu0 %v6810_v2  ;;  %11501 = vmatpush3.bf16.msra.mxu1 %v13831_v43 }
0x18c0   :  { %10865 = vmatprep.mubr.msk.f32.mxu1 %vm12152_vm2, %v14543_v59  ;;  %11502 = vmatprep.subr.bf16.mxu1 %v14541_v24  ;;  %v6143_v24 = vmax.f32 %v6142_v41, 0.0 }
0x18c1   :  { %10851 = vmatprep.mubr.msk.f32.mxu0 %vm1106_vm3, %v13889_v58 }
0x18c2   :  { %v6144_v43 = vmul.f32 %v6143_v24, %v5939_v39  ;;  %v7600_v24 = vld [vmem:[%s14602_s9 + $0x18] sm:$0xff] }
0x18c6   :  { %10866 = vmatmul.mubr.msk.f32.vlgmr.msra.gmra.mrb[24].mxu1 %vm5965_vm12, %v6008_v6  ;;  %10852 = vmatmul.mubr.msk.f32.vlgmr.msra.gmra.mrb[20].mxu0 %vm1106_vm3, %v13902_v47  ;;  %v7599_v6 = vld [vmem:[%s14602_s9 + $0x10] sm:$0xff] }
0x18c7   :  { %11504 = vmatpush3.bf16.msra.mxu1 %v13849_v21  ;;  %10872 = vmatprep.mubr.msk.f32.mxu1 %vm12152_vm2, %v14543_v59 }
0x18c8   :  { %10877 = vmatprep.mubr.msk.f32.mxu0 %vm1106_vm3, %v13860_v31 }
0x18ce   :  { %10873 = vmatmul.mubr.msk.f32.vlgmr.msra.gmra.mrb[24].mxu1 %vm5965_vm12, %v6144_v43 }
0x18cf   :  { %10892 = vmatprep.mubr.msk.f32.mxu1 %vm1106_vm3, %v13860_v31 }
0x198d   :  { %v10838_v27 = vpop.f32.mrb[22].mxu1 }
0x198e   :  { %v6638_v63 = vpop.f32.mrb[23].mxu1 }
0x1999   :  { %v10853_v8 = vpop.f32.mrb[20].mxu0 }
0x199a   :  { %v6878_v62 = vpop.f32.mrb[21].mxu0 }
0x19a1   :  { %v7106_v36 = vpop.f32.mrb[24].mxu1 }
0x19a2   :  { %7189 = vrot.lane.b32.xlu1 %v7106_v36, %s12159_s0  ;;  %7349 = vrot.lane.b32.xlu0 %v7106_v36, %s12163_s23  ;;  %v10874_v59 = vpop.f32.mrb[25].mxu1 }
0x19a3   :  { %10875 = vmatprep.subr.mxu0 %v7106_v36 }
0x19a4   :  { %10876 = vmatpush3.msra.mxu0 %v7106_v36 }
0x19a5   :  { %10878 = vmatmul.mubr.msk.f32.vlgmr.msra.gmra.mrb[22].mxu0 %vm1106_vm3, %v13869_v34 }
0x19a6   :  { %7269 = vrot.lane.b32.xlu1 %v7106_v36, %s12155_s25  ;;  %7429 = vrot.lane.b32.xlu0 %v7106_v36, %s12162_s22  ;;  %s12167_s25 = smov 124  }
0x19a7   :  { %10882 = vmatprep.mubr.msk.f32.mxu0 %vm1106_vm3, %v13872_v61 }
0x19aa   :  { %6466 = vperm.xlu1 %11778, %v6145_v13   ;;  %7509 = vrot.lane.b32.xlu0 %v7106_v36, %s12164_s24 }
0x19ae   :  { %6471 = vperm.xlu0 %11777, %v6146_v18  }
0x1a14   :  { %v7190_v25 = vpop.permute.xlu1 %7189  ;;  %v7350_v40 = vpop.permute.xlu0 %7349 }
0x1a15   :  { %10880 = vmatprep.subr.mxu0 %v7190_v25  ;;  %10890 = vmatprep.subr.mxu1 %v7350_v40 }
0x1a16   :  { %10881 = vmatpush3.msra.mxu0 %v7190_v25  ;;  %10891 = vmatpush3.msra.mxu1 %v7350_v40 }
0x1a17   :  { %10883 = vmatmul.mubr.msk.f32.vlgmr.msra.gmra.mrb[22].mxu0 %vm1106_vm3, %v13886_v37  ;;  %10893 = vmatmul.mubr.msk.f32.vlgmr.msra.gmra.mrb[26].mxu1 %vm1106_vm3, %v13869_v34 }
0x1a18   :  { %v7270_v21 = vpop.permute.xlu1 %7269  ;;  %v7430_v30 = vpop.permute.xlu0 %7429  ;;  %10887 = vmatprep.mubr.msk.f32.mxu0 %vm1106_vm3, %v13889_v58  ;;  %10897 = vmatprep.mubr.msk.f32.mxu1 %vm1106_vm3, %v13872_v61 }
0x1a19   :  { %10885 = vmatprep.subr.mxu0 %v7270_v21  ;;  %10895 = vmatprep.subr.mxu1 %v7430_v30 }
0x1a1a   :  { %10886 = vmatpush3.msra.mxu0 %v7270_v21  ;;  %10896 = vmatpush3.msra.mxu1 %v7430_v30  ;;  %v7611_v21 = vld [vmem:[%s14602_s9 + $0x70] sm:$0xff] }
0x1a1c   :  { %v7510_v52 = vpop.permute.xlu0 %7509 }
0x1a1d   :  { %10900 = vmatprep.subr.mxu1 %v7510_v52 }
0x1a1f   :  { %10888 = vmatmul.mubr.msk.f32.vlgmr.msra.gmra.mrb[22].mxu0 %vm1106_vm3, %v13902_v47  ;;  %10898 = vmatmul.mubr.msk.f32.vlgmr.msra.gmra.mrb[26].mxu1 %vm1106_vm3, %v13886_v37 }
0x1a20   :  { %10901 = vmatpush3.msra.mxu1 %v7510_v52  ;;  %10902 = vmatprep.mubr.msk.f32.mxu1 %vm1106_vm3, %v13889_v58  ;;  %v7597_v58 = vld [vmem:[%s14602_s9] sm:$0xff] }
0x1a27   :  { %10903 = vmatmul.mubr.msk.f32.vlgmr.msra.gmra.mrb[26].mxu1 %vm1106_vm3, %v13902_v47 }
0x1a29   :  { %v6467_v44 = vpop.permute.xlu1 %6466 }
0x1a2a   :  { %v11566_v28 = vadd.f32 %v6638_v63, %v6467_v44  ;;  %v11568_v15 = vadd.f32 %v6878_v62, %v6467_v44 }
0x1a2c   :  { %v13965_v12 = vmax.f32 %v11566_v28, %v11568_v15  ;;  %v7612_v15 = vld [vmem:[%s14602_s9 + $0x78] sm:$0xff] }
0x1a2d   :  { %v6472_v31 = vpop.permute.xlu0 %6471 }
0x1a2e   :  { %v11565_v22 = vadd.f32 %v10838_v27, %v6472_v31  ;;  %v11567_v38 = vadd.f32 %v10853_v8, %v6472_v31  ;;  %7629 = vrot.lane.b32.xlu1 %v13965_v12, %s12143_s12  ;;  %v7602_v27 = vld [vmem:[%s14602_s9 + $0x28] sm:$0xff] }
0x1a30   :  { %v13969_v34 = vmax.f32 %v11565_v22, %v11567_v38 }
0x1a32   :  { %7632 = vrot.lane.b32.xlu1 %v13969_v34, %s12143_s12 }
0x1aa0   :  { %v7630_v61 = vpop.permute.xlu1 %7629 }
0x1aa1   :  { %v7631_v0 = vsel %vm7628_vm13, %v7630_v61, %v13965_v12 }
0x1aa2   :  { %7635 = vrot.lane.b32.xlu1 %v7631_v0, %s12143_s12 }
0x1aa4   :  { %v7633_v48 = vpop.permute.xlu1 %7632 }
0x1aa5   :  { %v7634_v7 = vsel %vm7628_vm13, %v7633_v48, %v13969_v34  ;;  %v7614_v48 = vld [vmem:[%s14602_s9 + $0x88] sm:$0xff] }
0x1aa6   :  { %7637 = vrot.lane.b32.xlu1 %v7634_v7, %s12143_s12 }
0x1aaa   :  { %7955 = vperm.xlu1 %11778, %v7603_v11  }
0x1aae   :  { %7960 = vperm.xlu1 %11778, %v7604_v53  }
0x1ab2   :  { %7981 = vperm.xlu1 %11778, %v7607_v57  }
0x1af2   :  { %v10889_v9 = vpop.f32.mrb[22].mxu0 }
0x1af3   :  { %v7338_v56 = vpop.f32.mrb[23].mxu0  ;;  %v11569_v49 = vadd.f32 %v10889_v9, %v6472_v31 }
0x1af4   :  { %v11570_v45 = vadd.f32 %v7338_v56, %v6467_v44 }
0x1afa   :  { %v10904_v16 = vpop.f32.mrb[26].mxu1 }
0x1afb   :  { %v11571_v32 = vadd.f32 %v10904_v16, %v6472_v31  ;;  %v7578_v35 = vpop.f32.mrb[27].mxu1 }
0x1afc   :  { %v11572_v54 = vadd.f32 %v7578_v35, %v6467_v44 }
0x1afd   :  { %v13982_v17 = vmax.f32 %v11569_v49, %v11571_v32 }
0x1afe   :  { %v13984_v33 = vmax.f32 %v11570_v45, %v11572_v54 }
0x1b00   :  { %7667 = vrot.lane.b32.xlu0 %v13984_v33, %s12143_s12 }
0x1b04   :  { %7670 = vrot.lane.b32.xlu0 %v13982_v17, %s12143_s12 }
0x1b14   :  { %v7636_v3 = vpop.permute.xlu1 %7635 }
0x1b15   :  { %v7639_v55 = vsel %vm7628_vm13, %v7636_v3, %v13965_v12 }
0x1b16   :  { %7643 = vrot.lane.b32.xlu1 %v7639_v55, %s12165_s13 }
0x1b18   :  { %v7638_v46 = vpop.permute.xlu1 %7637 }
0x1b19   :  { %v7640_v37 = vsel %vm7628_vm13, %v7638_v46, %v13969_v34 }
0x1b1a   :  { %7645 = vrot.lane.b32.xlu1 %v7640_v37, %s12165_s13 }
0x1b1e   :  { %7653 = vrot.lane.b32.xlu1 %v7639_v55, %s12149_s27 }
0x1b22   :  { %7819 = vperm.xlu1 %11778, %v7597_v58  }
0x1b26   :  { %7655 = vrot.lane.b32.xlu1 %v7640_v37, %s12149_s27 }
0x1b29   :  { %v14009_v10 = vpop.permute.xlu1 %7955 }
0x1b2a   :  { %7824 = vperm.xlu1 %11778, %v7598_v50  }
0x1b2d   :  { %v14014_v23 = vpop.permute.xlu1 %7960 }
0x1b2e   :  { %7845 = vperm.xlu1 %11778, %v7601_v5  }
0x1b31   :  { %v14017_v51 = vpop.permute.xlu1 %7981 }
0x1b32   :  { %8091 = vperm.xlu1 %11778, %v7609_v29  }
0x1b36   :  { %8096 = vperm.xlu1 %11778, %v7610_v19  }
0x1b3a   :  { %8117 = vperm.xlu1 %11778, %v7613_v1  }
0x1b72   :  { %v7668_v2 = vpop.permute.xlu0 %7667 }
0x1b73   :  { %v7669_v47 = vsel %vm7628_vm13, %v7668_v2, %v13984_v33 }
0x1b74   :  { %7673 = vrot.lane.b32.xlu0 %v7669_v47, %s12143_s12 }
0x1b76   :  { %v7671_v42 = vpop.permute.xlu0 %7670 }
0x1b77   :  { %v7672_v60 = vsel %vm7628_vm13, %v7671_v42, %v13982_v17 }
0x1b78   :  { %7675 = vrot.lane.b32.xlu0 %v7672_v60, %s12143_s12  ;;  %s14603_s12 = sld [smem:[#allocation31_spill]] }
0x1b7c   :  { %7967 = vperm.xlu0 %11777, %v7605_v20  }
0x1b80   :  { %7972 = vperm.xlu0 %11777, %v7606_v26  }
0x1b84   :  { %7986 = vperm.xlu0 %11777, %v7608_v4  }
0x1b88   :  { %7831 = vperm.xlu0 %11777, %v7599_v6   ;;  %v7644_v41 = vpop.permute.xlu1 %7643 }
0x1b89   :  { %v14023_v43 = vsel %vm255_vm0, 0.0, %v7644_v41 }
0x1b8a   :  { %v7661_v63 = vadd.f32 %v14023_v43, %v13965_v12  ;;  %v7963_v44 = vmul.f32 %v14009_v10, %v14023_v43 }
0x1b8c   :  { %7836 = vperm.xlu0 %11777, %v7600_v24   ;;  %v7646_v39 = vpop.permute.xlu1 %7645 }
0x1b8d   :  { %v14080_v1 = vsel %vm255_vm0, 0.0, %v7646_v39 }
0x1b8e   :  { %v7964_v60 = vmul.f32 %v14014_v23, %v14080_v1 }
0x1b90   :  { %7850 = vperm.xlu0 %11777, %v7602_v27   ;;  %v7654_v36 = vpop.permute.xlu1 %7653 }
0x1b91   :  { %v14031_v59 = vsel %vm7627_vm14, 0.0, %v7654_v36 }
0x1b92   :  { %v14034_v13 = vadd.f32 %v7661_v63, %v14031_v59  ;;  %v7989_v31 = vmul.f32 %v14017_v51, %v14031_v59 }
0x1ba1   :  { %v7820_v40 = vpop.permute.xlu1 %7819 }
0x1ba2   :  { %v7827_v9 = vmul.f32 %v7820_v40, %v14023_v43 }
0x1ba5   :  { %v7656_v30 = vpop.permute.xlu1 %7655 }
0x1ba6   :  { %v14091_v4 = vsel %vm7627_vm14, 0.0, %v7656_v30 }
0x1ba9   :  { %v7825_v0 = vpop.permute.xlu1 %7824 }
0x1bad   :  { %v7846_v53 = vpop.permute.xlu1 %7845 }
0x1bae   :  { %v7853_v16 = vmul.f32 %v7846_v53, %v14031_v59 }
0x1be6   :  { %v7674_v8 = vpop.permute.xlu0 %7673 }
0x1be7   :  { %v7677_v25 = vsel %vm7628_vm13, %v7674_v8, %v13984_v33 }
0x1bea   :  { %v7676_v62 = vpop.permute.xlu0 %7675 }
0x1beb   :  { %v7678_v18 = vsel %vm7628_vm13, %v7676_v62, %v13982_v17 }
0x1bec   :  { %7683 = vrot.lane.b32.xlu0 %v7678_v18, %s12165_s13 }
0x1bf0   :  { %7691 = vrot.lane.b32.xlu0 %v7678_v18, %s12149_s27 }
0x1bf4   :  { %7681 = vrot.lane.b32.xlu0 %v7677_v25, %s12165_s13 }
0x1bf8   :  { %7689 = vrot.lane.b32.xlu0 %v7677_v25, %s12149_s27  ;;  %s14604_s27 = sld [smem:[#allocation33_spill]] }
0x1bfb   :  { %v7968_v52 = vpop.permute.xlu0 %7967 }
0x1bfc   :  { %v7975_v28 = vmul.f32 %v7968_v52, %v13965_v12  ;;  %8103 = vperm.xlu0 %11777, %v7611_v21   ;;  %v7995_v6 = vmul.f32 %v7968_v52, %v13984_v33 }
0x1bfe   :  { %v7977_v22 = vadd.f32 %v7975_v28, %v7963_v44 }
0x1bff   :  { %v7973_v38 = vpop.permute.xlu0 %7972 }
0x1c00   :  { %v14051_v61 = vadd.f32 %v7989_v31, %v7977_v22  ;;  %8108 = vperm.xlu0 %11777, %v7612_v15   ;;  %v7996_v46 = vmul.f32 %v7973_v38, %v13982_v17  ;;  %v7976_v39 = vmul.f32 %v7973_v38, %v13969_v34  ;;  %v8092_v31 = vpop.permute.xlu1 %8091 }
0x1c02   :  { %v8003_v7 = vsel %vm1106_vm3, %v14051_v61, 0.0  ;;  %v7978_v52 = vadd.f32 %v7976_v39, %v7964_v60 }
0x1c03   :  { %v7987_v11 = vpop.permute.xlu0 %7986  ;;  %8004 = vadd.xlane.f32.xlu1 %v8003_v7  ;;  %v7828_v7 = vmul.f32 %v7825_v0, %v14080_v1 }
0x1c04   :  { %8122 = vperm.xlu0 %11777, %v7614_v48   ;;  %v7990_v27 = vmul.f32 %v7987_v11, %v14091_v4 }
0x1c06   :  { %v14112_v22 = vadd.f32 %v7990_v27, %v7978_v52 }
0x1c07   :  { %v7832_v57 = vpop.permute.xlu0 %7831 }
0x1c08   :  { %v7839_v56 = vmul.f32 %v7832_v57, %v13965_v12  ;;  %v7859_v41 = vmul.f32 %v7832_v57, %v13984_v33 }
0x1c0a   :  { %v7841_v49 = vadd.f32 %v7839_v56, %v7827_v9  ;;  %v8097_v9 = vpop.permute.xlu1 %8096 }
0x1c0b   :  { %v7837_v35 = vpop.permute.xlu0 %7836 }
0x1c0c   :  { %v14059_v32 = vadd.f32 %v7853_v16, %v7841_v49  ;;  %v7860_v36 = vmul.f32 %v7837_v35, %v13982_v17 }
0x1c0e   :  { %v7867_v49 = vsel %vm1106_vm3, %v14059_v32, 0.0 }
0x1c0f   :  { %v7851_v45 = vpop.permute.xlu0 %7850 }
0x1c5e   :  { %v7684_v54 = vpop.permute.xlu0 %7683 }
0x1c5f   :  { %v14063_v3 = vsel %vm255_vm0, 0.0, %v7684_v54 }
0x1c60   :  { %v7994_v55 = vmul.f32 %v14014_v23, %v14063_v3  ;;  %v7698_v37 = vadd.f32 %v14063_v3, %v13982_v17  ;;  %v7858_v23 = vmul.f32 %v7825_v0, %v14063_v3  ;;  %v8099_v0 = vmul.f32 %v8092_v31, %v14023_v43 }
0x1c62   :  { %v7692_v58 = vpop.permute.xlu0 %7691  ;;  %v7998_v5 = vadd.f32 %v7996_v46, %v7994_v55  ;;  %v7862_v44 = vadd.f32 %v7860_v36, %v7858_v23 }
0x1c63   :  { %v14072_v50 = vsel %vm7627_vm14, 0.0, %v7692_v58 }
0x1c64   :  { %v14075_v29 = vadd.f32 %v7698_v37, %v14072_v50  ;;  %v8000_v19 = vmul.f32 %v7987_v11, %v14072_v50  ;;  %v7864_v8 = vmul.f32 %v7851_v45, %v14072_v50  ;;  %v7854_v11 = vmul.f32 %v7851_v45, %v14091_v4 }
0x1c66   :  { %v7682_v2 = vpop.permute.xlu0 %7681  ;;  %v14082_v47 = vadd.f32 %v8000_v19, %v7998_v5  ;;  %v14118_v48 = vadd.f32 %v7864_v8, %v7862_v44 }
0x1c67   :  { %v7687_v42 = vsel %vm255_vm0, 0.0, %v7682_v2 }
0x1c68   :  { %v7857_v20 = vmul.f32 %v7820_v40, %v7687_v42  ;;  %v7993_v26 = vmul.f32 %v14009_v10, %v7687_v42  ;;  %v8012_v24 = vsel %vm1106_vm3, %v14082_v47, 0.0  ;;  %v7697_v63 = vadd.f32 %v7687_v42, %v13984_v33 }
0x1c69   :  { %8013 = vadd.xlane.f32.xlu1 %v8012_v24  ;;  %v7876_v57 = vsel %vm1106_vm3, %v14118_v48, 0.0  ;;  %v8129_v54 = vmul.f32 %v8092_v31, %v7687_v42 }
0x1c6a   :  { %v7690_v10 = vpop.permute.xlu0 %7689  ;;  %v7861_v62 = vadd.f32 %v7859_v41, %v7857_v20  ;;  %v7997_v25 = vadd.f32 %v7995_v6, %v7993_v26  ;;  %v8130_v26 = vmul.f32 %v8097_v9, %v14063_v3 }
0x1c6b   :  { %v7695_v18 = vsel %vm7627_vm14, 0.0, %v7690_v10 }
0x1c6c   :  { %v14105_v40 = vadd.f32 %v7697_v63, %v7695_v18  ;;  %v7863_v21 = vmul.f32 %v7846_v53, %v7695_v18  ;;  %v7999_v30 = vmul.f32 %v14017_v51, %v7695_v18  ;;  %v7840_v51 = vmul.f32 %v7837_v35, %v13969_v34  ;;  %v8118_v35 = vpop.permute.xlu1 %8117 }
0x1c6d   :  { %v8006_v53 = vsel %vm1106_vm3, %v14112_v22, 0.0  ;;  %v8125_v58 = vmul.f32 %v8118_v35, %v14031_v59  ;;  %v8135_v5 = vmul.f32 %v8118_v35, %v7695_v18 }
0x1c6e   :  { %v14108_v28 = vadd.f32 %v7999_v30, %v7997_v25  ;;  %v14110_v15 = vadd.f32 %v7863_v21, %v7861_v62  ;;  %v7842_v56 = vadd.f32 %v7840_v51, %v7828_v7 }
0x1c70   :  { %v8009_v38 = vsel %vm1106_vm3, %v14108_v28, 0.0  ;;  %v7873_v14 = vsel %vm1106_vm3, %v14110_v15, 0.0  ;;  %v14127_v16 = vadd.f32 %v7854_v11, %v7842_v56 }
0x1c71   :  { %8010 = vadd.xlane.f32.xlu0 %v8009_v38  ;;  %7874 = vadd.xlane.f32.xlu1 %v7873_v14 }
0x1c72   :  { %v7870_v37 = vsel %vm1106_vm3, %v14127_v16, 0.0 }
0x1c75   :  { %8007 = vadd.xlane.f32.xlu0 %v8006_v53  ;;  %7877 = vadd.xlane.f32.xlu1 %v7876_v57 }
0x1c79   :  { %7868 = vadd.xlane.f32.xlu0 %v7867_v49 }
0x1c7b   :  { %v8104_v45 = vpop.permute.xlu0 %8103 }
0x1c7c   :  { %v8111_v55 = vmul.f32 %v8104_v45, %v13965_v12  ;;  %v8131_v46 = vmul.f32 %v8104_v45, %v13984_v33  ;;  %v8100_v33 = vmul.f32 %v8097_v9, %v14080_v1 }
0x1c7d   :  { %7871 = vadd.xlane.f32.xlu0 %v7870_v37 }
0x1c7e   :  { %v8113_v19 = vadd.f32 %v8111_v55, %v8099_v0  ;;  %v8133_v2 = vadd.f32 %v8131_v46, %v8129_v54 }
0x1c7f   :  { %v8109_v60 = vpop.permute.xlu0 %8108 }
0x1c80   :  { %v14137_v20 = vadd.f32 %v8125_v58, %v8113_v19  ;;  %v14139_v43 = vadd.f32 %v8135_v5, %v8133_v2  ;;  %v8112_v42 = vmul.f32 %v8109_v60, %v13969_v34  ;;  %v8132_v12 = vmul.f32 %v8109_v60, %v13982_v17 }
0x1c82   :  { %v8145_v6 = vsel %vm1106_vm3, %v14139_v43, 0.0  ;;  %v8139_v59 = vsel %vm1106_vm3, %v14137_v20, 0.0  ;;  %v8114_v24 = vadd.f32 %v8112_v42, %v8100_v33  ;;  %v8134_v39 = vadd.f32 %v8132_v12, %v8130_v26 }
0x1c83   :  { %v8123_v41 = vpop.permute.xlu0 %8122  ;;  %8146 = vadd.xlane.f32.xlu1 %v8145_v6  ;;  %8140 = vadd.xlane.f32.xlu0 %v8139_v59 }
0x1c84   :  { %v8126_v27 = vmul.f32 %v8123_v41, %v14091_v4  ;;  %v8136_v23 = vmul.f32 %v8123_v41, %v14072_v50 }
0x1c86   :  { %v14151_v17 = vadd.f32 %v8126_v27, %v8114_v24  ;;  %v14153_v63 = vadd.f32 %v8136_v23, %v8134_v39 }
0x1c88   :  { %v8148_v3 = vsel %vm1106_vm3, %v14153_v63, 0.0  ;;  %v8142_v10 = vsel %vm1106_vm3, %v14151_v17, 0.0 }
0x1c89   :  { %8149 = vadd.xlane.f32.xlu1 %v8148_v3  ;;  %8143 = vadd.xlane.f32.xlu0 %v8142_v10 }
0x1c90   :  { %v8005_v36 = vpop.xlane.xlu1 %8004 }
0x1cf6   :  { %v8014_v18 = vpop.xlane.xlu1 %8013 }
0x1cfe   :  { %v8011_v8 = vpop.xlane.xlu0 %8010  ;;  %v7875_v44 = vpop.xlane.xlu1 %7874 }
0x1cff   :  { %v8015_v62 = vadd.f32 %v8011_v8, %v8005_v36 }
0x1d01   :  { %v14159_v25 = vmul.f32 0.0625, %v8015_v62 }
0x1d02   :  { %v8008_v21 = vpop.xlane.xlu0 %8007  ;;  %v7878_v0 = vpop.xlane.xlu1 %7877 }
0x1d03   :  { %v8016_v50 = vadd.f32 %v8014_v18, %v8008_v21  ;;  %v8029_v30 = vsub.f32 %v14108_v28, %v14159_v25  ;;  %v8019_v52 = vsub.f32 %v14051_v61, %v14159_v25 }
0x1d05   :  { %v14165_v31 = vmul.f32 0.0625, %v8016_v50  ;;  %v8031_v38 = vmul.f32 %v8029_v30, %v8029_v30  ;;  %v8021_v14 = vmul.f32 %v8019_v52, %v8019_v52 }
0x1d06   :  { %v7869_v51 = vpop.xlane.xlu0 %7868 }
0x1d07   :  { %v7879_v7 = vadd.f32 %v7875_v44, %v7869_v51  ;;  %v8033_v11 = vsel %vm1106_vm3, %v8031_v38, 0.0  ;;  %v8023_v53 = vsel %vm1106_vm3, %v8021_v14, 0.0  ;;  %v8030_v57 = vsub.f32 %v14082_v47, %v14165_v31 }
0x1d08   :  { %8034 = vadd.xlane.f32.xlu1 %v8033_v11  ;;  %8024 = vadd.xlane.f32.xlu0 %v8023_v53  ;;  %v8020_v9 = vsub.f32 %v14112_v22, %v14165_v31  ;;  %v7593_v53 = vld [vmem:[%s14603_s12 + $0x10] sm:$0xff] }
0x1d09   :  { %v14173_v56 = vmul.f32 0.0625, %v7879_v7  ;;  %v8032_v49 = vmul.f32 %v8030_v57, %v8030_v57  ;;  %v7592_v57 = vld [vmem:[%s14603_s12 + $0x8] sm:$0xff] }
0x1d0a   :  { %v7872_v35 = vpop.xlane.xlu0 %7871  ;;  %v8022_v45 = vmul.f32 %v8020_v9, %v8020_v9  ;;  %v7591_v9 = vld [vmem:[%s14603_s12] sm:$0xff] }
0x1d0b   :  { %v7880_v54 = vadd.f32 %v7878_v0, %v7872_v35  ;;  %v8036_v55 = vsel %vm1106_vm3, %v8032_v49, 0.0  ;;  %v7893_v46 = vsub.f32 %v14110_v15, %v14173_v56  ;;  %v7883_v37 = vsub.f32 %v14059_v32, %v14173_v56  ;;  %v7595_v49 = vld [vmem:[%s14603_s12 + $0x20] sm:$0xff]  ;;  %v7594_v0 = vld [vmem:[%s14603_s12 + $0x18] sm:$0xff]  ;;  %v7596_v35 = vld [vmem:[%s14603_s12 + $0x28] sm:$0xff] }
0x1d0c   :  { %8037 = vadd.xlane.f32.xlu1 %v8036_v55  ;;  %v8026_v58 = vsel %vm1106_vm3, %v8022_v45, 0.0 }
0x1d0d   :  { %v14181_v5 = vmul.f32 0.0625, %v7880_v54  ;;  %8027 = vadd.xlane.f32.xlu0 %v8026_v58  ;;  %v7895_v19 = vmul.f32 %v7893_v46, %v7893_v46  ;;  %v7885_v2 = vmul.f32 %v7883_v37, %v7883_v37 }
0x1d0f   :  { %v7897_v60 = vsel %vm1106_vm3, %v7895_v19, 0.0  ;;  %v7887_v42 = vsel %vm1106_vm3, %v7885_v2, 0.0  ;;  %v7894_v12 = vsub.f32 %v14118_v48, %v14181_v5  ;;  %v7884_v33 = vsub.f32 %v14127_v16, %v14181_v5 }
0x1d10   :  { %v8147_v26 = vpop.xlane.xlu1 %8146  ;;  %7898 = vadd.xlane.f32.xlu1 %v7897_v60  ;;  %v8141_v6 = vpop.xlane.xlu0 %8140 }
0x1d11   :  { %7888 = vadd.xlane.f32.xlu0 %v7887_v42  ;;  %v8151_v59 = vadd.f32 %v8147_v26, %v8141_v6  ;;  %v7896_v41 = vmul.f32 %v7894_v12, %v7894_v12  ;;  %v7886_v24 = vmul.f32 %v7884_v33, %v7884_v33 }
0x1d13   :  { %v14189_v39 = vmul.f32 0.0625, %v8151_v59  ;;  %v7900_v27 = vsel %vm1106_vm3, %v7896_v41, 0.0  ;;  %v7890_v23 = vsel %vm1106_vm3, %v7886_v24, 0.0 }
0x1d14   :  { %7901 = vadd.xlane.f32.xlu1 %v7900_v27 }
0x1d15   :  { %7891 = vadd.xlane.f32.xlu0 %v7890_v23  ;;  %v8165_v3 = vsub.f32 %v14139_v43, %v14189_v39  ;;  %v8155_v10 = vsub.f32 %v14137_v20, %v14189_v39  ;;  %v7617_v23 = vld [vmem:[%s14604_s27 + $0x10] sm:$0xff] }
0x1d16   :  { %v8150_v36 = vpop.xlane.xlu1 %8149  ;;  %v8144_v8 = vpop.xlane.xlu0 %8143 }
0x1d17   :  { %v8152_v62 = vadd.f32 %v8150_v36, %v8144_v8  ;;  %v8167_v18 = vmul.f32 %v8165_v3, %v8165_v3  ;;  %v8157_v21 = vmul.f32 %v8155_v10, %v8155_v10 }
0x1d19   :  { %v14197_v50 = vmul.f32 0.0625, %v8152_v62  ;;  %v8169_v30 = vsel %vm1106_vm3, %v8167_v18, 0.0  ;;  %v8159_v52 = vsel %vm1106_vm3, %v8157_v21, 0.0 }
0x1d1a   :  { %8170 = vadd.xlane.f32.xlu1 %v8169_v30  ;;  %8160 = vadd.xlane.f32.xlu0 %v8159_v52  ;;  %v7623_v30 = vld [vmem:[%s14605_s17 + $0x10] sm:$0xff] }
0x1d1b   :  { %v8166_v44 = vsub.f32 %v14153_v63, %v14197_v50  ;;  %v8156_v38 = vsub.f32 %v14151_v17, %v14197_v50 }
0x1d1d   :  { %v8168_v14 = vmul.f32 %v8166_v44, %v8166_v44  ;;  %v8158_v51 = vmul.f32 %v8156_v38, %v8156_v38  ;;  %v7618_v44 = vld [vmem:[%s14604_s27 + $0x18] sm:$0xff] }
0x1d1f   :  { %v8172_v7 = vsel %vm1106_vm3, %v8168_v14, 0.0  ;;  %v8162_v11 = vsel %vm1106_vm3, %v8158_v51, 0.0 }
0x1d20   :  { %8173 = vadd.xlane.f32.xlu1 %v8172_v7  ;;  %8163 = vadd.xlane.f32.xlu0 %v8162_v11 }
0x1d31   :  { %7717 = vperm.xlu1 %11778, %v7593_v53  }
0x1d35   :  { %7710 = vperm.xlu1 %11778, %v7592_v57  }
0x1d36   :  { %7705 = vperm.xlu0 %11777, %v7591_v9   ;;  %v7624_v9 = vld [vmem:[%s14605_s17 + $0x18] sm:$0xff] }
0x1d39   :  { %7729 = vperm.xlu1 %11778, %v7595_v49   ;;  %v7615_v49 = vld [vmem:[%s14604_s27] sm:$0xff] }
0x1d3a   :  { %7722 = vperm.xlu0 %11777, %v7594_v0  }
0x1d3e   :  { %7734 = vperm.xlu0 %11777, %v7596_v35  }
0x1d95   :  { %v8035_v45 = vpop.xlane.xlu1 %8034  ;;  %v8025_v54 = vpop.xlane.xlu0 %8024 }
0x1d96   :  { %v8039_v55 = vadd.f32 %v8035_v45, %v8025_v54 }
0x1d98   :  { %v8041_v46 = vmul.f32 0.0625, %v8039_v55 }
0x1d99   :  { %v8038_v37 = vpop.xlane.xlu1 %8037 }
0x1d9a   :  { %v8043_v58 = vadd.f32 1e-05, %v8041_v46  ;;  %v8028_v19 = vpop.xlane.xlu0 %8027 }
0x1d9b   :  { %v8040_v2 = vadd.f32 %v8038_v37, %v8028_v19  ;;  %v7616_v19 = vld [vmem:[%s14604_s27 + $0x8] sm:$0xff] }
0x1d9c   :  { %11917 = vrsqrt.f32 %v8043_v58  ;;  %v7621_v58 = vld [vmem:[%s14605_s17] sm:$0xff] }
0x1d9d   :  { %v8042_v60 = vmul.f32 0.0625, %v8040_v2  ;;  %v7899_v42 = vpop.xlane.xlu1 %7898 }
0x1d9e   :  { %v7889_v12 = vpop.xlane.xlu0 %7888 }
0x1d9f   :  { %v8044_v33 = vadd.f32 1e-05, %v8042_v60  ;;  %v7903_v26 = vadd.f32 %v7899_v42, %v7889_v12  ;;  %v7702_v12 = vmul.f32 0.33333334, %v14075_v29 }
0x1da1   :  { %11919 = vrsqrt.f32 %v8044_v33  ;;  %v7905_v6 = vmul.f32 0.0625, %v7903_v26  ;;  %v7902_v59 = vpop.xlane.xlu1 %7901 }
0x1da2   :  { %v7892_v41 = vpop.xlane.xlu0 %7891 }
0x1da3   :  { %v7907_v24 = vadd.f32 1e-05, %v7905_v6  ;;  %v7904_v27 = vadd.f32 %v7902_v59, %v7892_v41  ;;  %v7622_v41 = vld [vmem:[%s14605_s17 + $0x8] sm:$0xff] }
0x1da5   :  { %11921 = vrsqrt.f32 %v7907_v24  ;;  %v7906_v3 = vmul.f32 0.0625, %v7904_v27  ;;  %v7619_v24 = vld [vmem:[%s14604_s27 + $0x20] sm:$0xff] }
0x1da6   :  { %v11918_v10 = vpop.eup %11917 }
0x1da7   :  { %v7908_v36 = vadd.f32 1e-05, %v7906_v3  ;;  %v8171_v8 = vpop.xlane.xlu1 %8170  ;;  %v8161_v62 = vpop.xlane.xlu0 %8160  ;;  %v8047_v18 = vmul.f32 %v11918_v10, %v7617_v23 }
0x1da8   :  { %v8175_v21 = vadd.f32 %v8171_v8, %v8161_v62 }
0x1da9   :  { %11923 = vrsqrt.f32 %v7908_v36  ;;  %8055 = vperm.xlu1 %11778, %v8047_v18   ;;  %v8049_v52 = vmul.f32 %v8047_v18, %v14159_v25  ;;  %v7701_v25 = vmul.f32 0.33333334, %v14105_v40 }
0x1daa   :  { %v8177_v38 = vmul.f32 0.0625, %v8175_v21  ;;  %v7625_v21 = vld [vmem:[%s14605_s17 + $0x20] sm:$0xff] }
0x1dab   :  { %v11920_v14 = vpop.eup %11919  ;;  %v8051_v51 = vsub.f32 %v7623_v30, %v8049_v52  ;;  %v14244_v30 = vld [vmem:[#allocation10 + $0x8] sm:$0xff] }
0x1dac   :  { %v8179_v7 = vadd.f32 1e-05, %v8177_v38  ;;  %v8048_v11 = vmul.f32 %v11920_v14, %v7618_v44  ;;  %10905 = vmatprep.subr.mxu0 %v14244_v30 }
0x1dad   :  { %v8174_v53 = vpop.xlane.xlu1 %8173  ;;  %8067 = vperm.xlu1 %11778, %v8051_v51   ;;  %v8164_v57 = vpop.xlane.xlu0 %8163  ;;  %v7620_v51 = vld [vmem:[%s14604_s27 + $0x28] sm:$0xff]  ;;  %10906 = vmatpush3.msra.mxu0 %v14244_v30 }
0x1dae   :  { %11925 = vrsqrt.f32 %v8179_v7  ;;  %8060 = vperm.xlu0 %11777, %v8048_v11   ;;  %v8176_v0 = vadd.f32 %v8174_v53, %v8164_v57  ;;  %v8050_v35 = vmul.f32 %v8048_v11, %v14165_v31 }
0x1daf   :  { %v11922_v45 = vpop.eup %11921 }
0x1db0   :  { %v8178_v54 = vmul.f32 0.0625, %v8176_v0  ;;  %v8052_v55 = vsub.f32 %v7624_v9, %v8050_v35  ;;  %v7911_v46 = vmul.f32 %v11922_v45, %v7615_v49  ;;  %v14253_v49 = vld [vmem:[#allocation10] sm:$0xff] }
0x1db1   :  { %v14221_v37 = vpop.permute.xlu1 %7717  ;;  %10910 = vmatprep.subr.mxu0 %v14253_v49 }
0x1db2   :  { %v8180_v2 = vadd.f32 1e-05, %v8178_v54  ;;  %v7777_v60 = vmul.f32 %v14221_v37, %v7701_v25  ;;  %8072 = vperm.xlu0 %11777, %v8052_v55   ;;  %7919 = vperm.xlu1 %11778, %v7911_v46   ;;  %v7913_v42 = vmul.f32 %v7911_v46, %v14173_v56 }
0x1db3   :  { %v11924_v31 = vpop.eup %11923 }
0x1db4   :  { %11927 = vrsqrt.f32 %v8180_v2  ;;  %v7915_v40 = vsub.f32 %v7621_v58, %v7913_v42  ;;  %v7912_v33 = vmul.f32 %v11924_v31, %v7616_v19  ;;  %v7626_v19 = vld [vmem:[%s14605_s17 + $0x28] sm:$0xff] }
0x1db5   :  { %v14228_v26 = vpop.permute.xlu1 %7710  ;;  %v14230_v6 = vpop.permute.xlu0 %7705 }
0x1db6   :  { %v7776_v59 = vmul.f32 %v14228_v26, %v7702_v12  ;;  %7931 = vperm.xlu1 %11778, %v7915_v40   ;;  %7924 = vperm.xlu0 %11777, %v7912_v33   ;;  %v7775_v27 = vmul.f32 %v14230_v6, %v7701_v25  ;;  %v7914_v56 = vmul.f32 %v7912_v33, %v14181_v5 }
0x1db8   :  { %v11926_v23 = vpop.eup %11925  ;;  %v7781_v29 = vmax.f32 %v7775_v27, %v7777_v60  ;;  %v7916_v10 = vsub.f32 %v7622_v41, %v7914_v56 }
0x1db9   :  { %v14237_v3 = vpop.permute.xlu1 %7729  ;;  %v14239_v36 = vpop.permute.xlu0 %7722  ;;  %v8183_v8 = vmul.f32 %v11926_v23, %v7619_v24 }
0x1dba   :  { %v7779_v62 = vmul.f32 %v14237_v3, %v7701_v25  ;;  %v7778_v18 = vmul.f32 %v14239_v36, %v7702_v12  ;;  %7936 = vperm.xlu0 %11777, %v7916_v10  }
0x1dbb   :  { %8191 = vperm.xlu1 %11778, %v8183_v8   ;;  %v8185_v5 = vmul.f32 %v8183_v8, %v14189_v39 }
0x1dbc   :  { %v7783_v52 = vmax.f32 %v7781_v29, %v7779_v62  ;;  %v7782_v44 = vmax.f32 %v7776_v59, %v7778_v18 }
0x1dbd   :  { %v14248_v38 = vpop.permute.xlu0 %7734  ;;  %v8187_v14 = vsub.f32 %v7625_v21, %v8185_v5 }
0x1dbe   :  { %v11928_v7 = vpop.eup %11927  ;;  %v7785_v11 = vsub.f32 %v7775_v27, %v7783_v52  ;;  %v7791_v53 = vsub.f32 %v7777_v60, %v7783_v52  ;;  %v7797_v57 = vsub.f32 %v7779_v62, %v7783_v52  ;;  %v7780_v9 = vmul.f32 %v14248_v38, %v7702_v12 }
0x1dbf   :  { %8203 = vperm.xlu1 %11778, %v8187_v14   ;;  %v8184_v39 = vmul.f32 %v11928_v7, %v7620_v51  ;;  %v7665_v14 = vmul.f32 0.33333334, %v14034_v13 }
0x1dc0   :  { %v7787_v0 = vmul.f32 1.442695, %v7785_v11  ;;  %v7793_v35 = vmul.f32 1.442695, %v7791_v53  ;;  %v7784_v45 = vmax.f32 %v7782_v44, %v7780_v9  ;;  %v7799_v54 = vmul.f32 1.442695, %v7797_v57 }
0x1dc1   :  { %8196 = vperm.xlu0 %11777, %v8184_v39   ;;  %v8186_v25 = vmul.f32 %v8184_v39, %v14197_v50  ;;  %v7662_v44 = vadd.f32 %v14080_v1, %v13969_v34  ;;  %v7713_v7 = vmul.f32 %v14230_v6, %v7665_v14  ;;  %v7725_v53 = vmul.f32 %v14221_v37, %v7665_v14 }
0x1dc2   :  { %v7786_v55 = vsub.f32 %v7776_v59, %v7784_v45  ;;  %v7792_v46 = vsub.f32 %v7778_v18, %v7784_v45  ;;  %v7798_v58 = vsub.f32 %v7780_v9, %v7784_v45  ;;  %11929 = vpow2.f32 %v7787_v0 }
0x1dc3   :  { %11931 = vpow2.f32 %v7793_v35  ;;  %v8188_v60 = vsub.f32 %v7626_v19, %v8186_v25  ;;  %v7664_v51 = vadd.f32 %v7662_v44, %v14091_v4  ;;  %v7737_v57 = vmul.f32 %v14237_v3, %v7665_v14 }
0x1dc4   :  { %v7789_v2 = vmul.f32 1.442695, %v7786_v55  ;;  %11933 = vpow2.f32 %v7799_v54  ;;  %v7795_v42 = vmul.f32 1.442695, %v7792_v46  ;;  %v7801_v31 = vmul.f32 1.442695, %v7798_v58 }
0x1dc5   :  { %8208 = vperm.xlu0 %11777, %v8188_v60   ;;  %v7666_v11 = vmul.f32 0.33333334, %v7664_v51  ;;  %v7739_v9 = vmax.f32 %v7713_v7, %v7725_v53 }
0x1dc6   :  { %11935 = vpow2.f32 %v7789_v2 }
0x1dc7   :  { %11937 = vpow2.f32 %v7795_v42  ;;  %v7726_v39 = vmul.f32 %v14239_v36, %v7666_v11  ;;  %v7714_v0 = vmul.f32 %v14228_v26, %v7666_v11  ;;  %v7741_v35 = vmax.f32 %v7739_v9, %v7737_v57 }
0x1dc8   :  { %11939 = vpow2.f32 %v7801_v31  ;;  %v7738_v45 = vmul.f32 %v14248_v38, %v7666_v11 }
0x1dc9   :  { %v7740_v34 = vmax.f32 %v7714_v0, %v7726_v39  ;;  %v7743_v1 = vsub.f32 %v7713_v7, %v7741_v35  ;;  %v7749_v25 = vsub.f32 %v7725_v53, %v7741_v35  ;;  %v7755_v46 = vsub.f32 %v7737_v57, %v7741_v35 }
0x1dcb   :  { %v7742_v13 = vmax.f32 %v7740_v34, %v7738_v45  ;;  %v7745_v4 = vmul.f32 1.442695, %v7743_v1  ;;  %v7751_v6 = vmul.f32 1.442695, %v7749_v25  ;;  %v7757_v58 = vmul.f32 1.442695, %v7755_v46 }
0x1dcc   :  { %v11930_v12 = vpop.eup %11929 }
0x1dcd   :  { %v11932_v40 = vpop.eup %11931  ;;  %v7744_v54 = vsub.f32 %v7714_v0, %v7742_v13  ;;  %v7750_v55 = vsub.f32 %v7726_v39, %v7742_v13  ;;  %v7756_v36 = vsub.f32 %v7738_v45, %v7742_v13 }
0x1dce   :  { %v7803_v33 = vadd.f32 %v11932_v40, %v11930_v12  ;;  %v11934_v50 = vpop.eup %11933 }
0x1dcf   :  { %v7747_v37 = vmul.f32 1.442695, %v7744_v54  ;;  %v7753_v3 = vmul.f32 1.442695, %v7750_v55  ;;  %v7759_v26 = vmul.f32 1.442695, %v7756_v36 }
0x1dd0   :  { %v7805_v41 = vadd.f32 %v11934_v50, %v7803_v33  ;;  %v11936_v59 = vpop.eup %11935 }
0x1dd1   :  { %v11938_v24 = vpop.eup %11937 }
0x1dd2   :  { %11941 = vrcp.f32 %v7805_v41  ;;  %v7804_v27 = vadd.f32 %v11938_v24, %v11936_v59  ;;  %v11940_v56 = vpop.eup %11939 }
0x1dd4   :  { %v7806_v23 = vadd.f32 %v11940_v56, %v7804_v27 }
0x1dd6   :  { %11943 = vrcp.f32 %v7806_v23 }
0x1dd7   :  { %11945 = vpow2.f32 %v7745_v4 }
0x1dd8   :  { %11947 = vpow2.f32 %v7751_v6  ;;  %v14299_v6 = vld [vmem:[#allocation10 + $0x10] sm:$0xff] }
0x1dd9   :  { %11949 = vpow2.f32 %v7747_v37 }
0x1dda   :  { %11951 = vpow2.f32 %v7753_v3 }
0x1ddb   :  { %11953 = vpow2.f32 %v7757_v58 }
0x1ddc   :  { %v11942_v29 = vpop.eup %11941  ;;  %11955 = vpow2.f32 %v7759_v26 }
0x1ddd   :  { %v14258_v10 = vmul.f32 %v11942_v29, %v11932_v40  ;;  %v14260_v8 = vmul.f32 %v11942_v29, %v11930_v12  ;;  %v14262_v62 = vmul.f32 %v11942_v29, %v11934_v50 }
0x1de0   :  { %v11944_v18 = vpop.eup %11943 }
0x1de1   :  { %v14264_v21 = vmul.f32 %v11944_v18, %v11938_v24  ;;  %v14266_v5 = vmul.f32 %v11944_v18, %v11936_v59  ;;  %v14268_v52 = vmul.f32 %v11944_v18, %v11940_v56  ;;  %v11946_v38 = vpop.eup %11945 }
0x1de2   :  { %v11948_v19 = vpop.eup %11947 }
0x1de3   :  { %v11950_v2 = vpop.eup %11949  ;;  %v7761_v60 = vadd.f32 %v11948_v19, %v11946_v38 }
0x1de4   :  { %v11952_v42 = vpop.eup %11951 }
0x1de5   :  { %v14280_v31 = vpop.eup %11953  ;;  %v7762_v40 = vadd.f32 %v11952_v42, %v11950_v2 }
0x1de6   :  { %v7763_v12 = vadd.f32 %v14280_v31, %v7761_v60  ;;  %v14283_v33 = vpop.eup %11955 }
0x1de7   :  { %v7764_v50 = vadd.f32 %v14283_v33, %v7762_v40 }
0x1de8   :  { %11957 = vrcp.f32 %v7763_v12 }
0x1de9   :  { %11959 = vrcp.f32 %v7764_v50 }
0x1df2   :  { %v11958_v27 = vpop.eup %11957 }
0x1df3   :  { %v7771_v44 = vmul.f32 %v11958_v27, %v11948_v19  ;;  %v11960_v7 = vpop.eup %11959  ;;  %v7769_v55 = vmul.f32 %v11958_v27, %v11946_v38 }
0x1df4   :  { %v7772_v35 = vmul.f32 %v11960_v7, %v11952_v42  ;;  %v7770_v19 = vmul.f32 %v11960_v7, %v11950_v2 }
0x1e28   :  { %v8056_v41 = vpop.permute.xlu1 %8055 }
0x1e29   :  { %v8063_v59 = vmul.f32 %v8056_v41, %v14051_v61  ;;  %v8081_v24 = vmul.f32 %v8056_v41, %v14108_v28 }
0x1e2c   :  { %v8068_v56 = vpop.permute.xlu1 %8067 }
0x1e2d   :  { %v8075_v23 = vadd.f32 %v8068_v56, %v8063_v59  ;;  %v8083_v29 = vadd.f32 %v8081_v24, %v8068_v56  ;;  %v8061_v18 = vpop.permute.xlu0 %8060  ;;  %v7773_v59 = vmul.f32 %v11958_v27, %v14280_v31 }
0x1e2e   :  { %v8064_v11 = vmul.f32 %v8061_v18, %v14112_v22  ;;  %v8082_v53 = vmul.f32 %v8061_v18, %v14082_v47  ;;  %v7774_v18 = vmul.f32 %v11960_v7, %v14283_v33 }
0x1e2f   :  { %v8077_v14 = vmax.f32 %v8075_v23, 0.0  ;;  %v8085_v51 = vmax.f32 %v8083_v29, 0.0 }
0x1e31   :  { %v8079_v57 = vmul.f32 %v8077_v14, %v7771_v44  ;;  %v14291_v9 = vmul.f32 %v8085_v51, %v14258_v10  ;;  %v7920_v61 = vpop.permute.xlu1 %7919  ;;  %v8073_v39 = vpop.permute.xlu0 %8072 }
0x1e32   :  { %v8076_v28 = vadd.f32 %v8073_v39, %v8064_v11  ;;  %v8084_v0 = vadd.f32 %v8082_v53, %v8073_v39  ;;  %v7927_v45 = vmul.f32 %v7920_v61, %v14059_v32  ;;  %v7945_v34 = vmul.f32 %v7920_v61, %v14110_v15  ;;  %v8225_v53 = vld [vmem:[%s12347_s6] sm:$0xff]  ;;  %v14344_v61 = vld [vmem:[%s12342_s19 + $0x10] sm:$0xff] }
0x1e33   :  { %10907 = vmatprep.mubr.msk.f32.mxu0 %vm1106_vm3, %v8079_v57  ;;  %v14341_v57 = vld [vmem:[%s12342_s19 + $0x8] sm:$0xff] }
0x1e34   :  { %v8078_v1 = vmax.f32 %v8076_v28, 0.0  ;;  %v8086_v13 = vmax.f32 %v8084_v0, 0.0 }
0x1e35   :  { %v7932_v22 = vpop.permute.xlu1 %7931  ;;  %v7925_v25 = vpop.permute.xlu0 %7924 }
0x1e36   :  { %v8080_v47 = vmul.f32 %v8078_v1, %v7772_v35  ;;  %v14297_v4 = vmul.f32 %v8086_v13, %v14264_v21  ;;  %v7939_v10 = vadd.f32 %v7932_v22, %v7927_v45  ;;  %v7947_v54 = vadd.f32 %v7945_v34, %v7932_v22  ;;  %v14354_v22 = vld [vmem:[%s12342_s19 + $0x18] sm:$0xff] }
0x1e37   :  { %v7928_v32 = vmul.f32 %v7925_v25, %v14127_v16  ;;  %v7946_v15 = vmul.f32 %v7925_v25, %v14118_v48  ;;  %v14357_v25 = vld [vmem:[%s12342_s19 + $0x20] sm:$0xff] }
0x1e38   :  { %v7941_v46 = vmax.f32 %v7939_v10, 0.0  ;;  %v7949_v37 = vmax.f32 %v7947_v54, 0.0  ;;  %10908 = vmatmul.mubr.msk.f32.vlgmr.msra.gmra.mrb[24].mxu0 %vm1106_vm3, %v8080_v47  ;;  %v14365_v47 = vld [vmem:[%s12342_s19 + $0x28] sm:$0xff] }
0x1e39   :  { %10911 = vmatpush3.msra.mxu0 %v14253_v49  ;;  %v7937_v21 = vpop.permute.xlu0 %7936 }
0x1e3a   :  { %v7943_v3 = vmul.f32 %v7941_v46, %v7769_v55  ;;  %v14306_v58 = vmul.f32 %v7949_v37, %v14260_v8  ;;  %v8192_v36 = vpop.permute.xlu1 %8191  ;;  %10915 = vmatprep.subr.mxu0 %v14299_v6  ;;  %v7940_v26 = vadd.f32 %v7937_v21, %v7928_v32  ;;  %v7948_v38 = vadd.f32 %v7946_v15, %v7937_v21 }
0x1e3b   :  { %v8199_v16 = vmul.f32 %v8192_v36, %v14137_v20  ;;  %v8217_v48 = vmul.f32 %v8192_v36, %v14139_v43 }
0x1e3c   :  { %10912 = vmatprep.mubr.msk.f32.mxu0 %vm1106_vm3, %v7943_v3  ;;  %v7942_v60 = vmax.f32 %v7940_v26, 0.0  ;;  %v7950_v42 = vmax.f32 %v7948_v38, 0.0 }
0x1e3e   :  { %v8204_v12 = vpop.permute.xlu1 %8203  ;;  %v7944_v40 = vmul.f32 %v7942_v60, %v7770_v19  ;;  %v14313_v8 = vmul.f32 %v7950_v42, %v14266_v5 }
0x1e3f   :  { %v8211_v50 = vadd.f32 %v8204_v12, %v8199_v16  ;;  %v8219_v41 = vadd.f32 %v8217_v48, %v8204_v12 }
0x1e40   :  { %10913 = vmatmul.mubr.msk.f32.vlgmr.msra.gmra.mrb[24].mxu0 %vm1106_vm3, %v7944_v40  ;;  %v8197_v2 = vpop.permute.xlu0 %8196 }
0x1e41   :  { %v8213_v24 = vmax.f32 %v8211_v50, 0.0  ;;  %v8221_v56 = vmax.f32 %v8219_v41, 0.0  ;;  %10916 = vmatpush3.msra.mxu0 %v14299_v6  ;;  %v8200_v5 = vmul.f32 %v8197_v2, %v14151_v17  ;;  %v8218_v23 = vmul.f32 %v8197_v2, %v14153_v63  ;;  %v14330_v17 = vld [vmem:[%s12342_s19] sm:$0xff] }
0x1e42   :  { %10924 = vmatprep.mubr.msk.f32.mxu1 %vm5965_vm12, %v14330_v17 }
0x1e43   :  { %v8215_v20 = vmul.f32 %v8213_v24, %v7773_v59  ;;  %v14319_v43 = vmul.f32 %v8221_v56, %v14262_v62 }
0x1e44   :  { %v8209_v29 = vpop.permute.xlu0 %8208 }
0x1e45   :  { %10917 = vmatprep.mubr.msk.f32.mxu0 %vm1106_vm3, %v8215_v20  ;;  %v8212_v31 = vadd.f32 %v8209_v29, %v8200_v5  ;;  %v8220_v27 = vadd.f32 %v8218_v23, %v8209_v29 }
0x1e47   :  { %v8214_v44 = vmax.f32 %v8212_v31, 0.0  ;;  %v8222_v14 = vmax.f32 %v8220_v27, 0.0 }
0x1e49   :  { %v8216_v51 = vmul.f32 %v8214_v44, %v7774_v18  ;;  %v14326_v62 = vmul.f32 %v8222_v14, %v14268_v52  ;;  %v8226_v52 = vld [vmem:[%s12347_s6 + $0x8] sm:$0xff]  ;;  %s12168_s6 = smov 108  }
0x1e4b   :  { %10918 = vmatmul.mubr.msk.f32.vlgmr.msra.gmra.mrb[24].mxu0 %vm1106_vm3, %v8216_v51 }
0x1e4c   :  { %10945 = vmatprep.mubr.msk.f32.mxu0 %vm5965_vm12, %v14330_v17 }
0x1f1e   :  { %v10919_v63 = vpop.f32.mrb[24].mxu0 }
0x1f1f   :  { %v8474_v33 = vpop.f32.mrb[25].mxu0 }
0x1f20   :  { %v11784_v7 = vpack.i.bf16 %v10919_v63, %v8474_v33  ;;  %v11505_v11 = vpack.c.bf16 %v10919_v63, %v8474_v33 }
0x1f22   :  { %11785 = vrot.lane.b32.xlu0 %v11784_v7, %s12159_s0  ;;  %11780 = vrot.lane.b32.xlu1 %v11784_v7, %s12163_s23 }
0x1f23   :  { %11506 = vmatprep.subr.bf16.mxu1 %v11505_v11 }
0x1f24   :  { %11508 = vmatpush3.bf16.msra.mxu1 %v11505_v11 }
0x1f26   :  { %8573 = vperm.xlu0 %11777, %v8226_v52   ;;  %8568 = vperm.xlu1 %11778, %v8225_v53  }
0x1f27   :  { %10925 = vmatmul.mubr.msk.f32.vlgmr.msra.gmra.mrb[28].mxu1 %vm5965_vm12, %v14341_v57 }
0x1f28   :  { %10931 = vmatprep.mubr.msk.f32.mxu1 %vm5965_vm12, %v14344_v61 }
0x1f2a   :  { %11795 = vrot.lane.b32.xlu0 %v11784_v7, %s12166_s21  ;;  %11790 = vrot.lane.b32.xlu1 %v11784_v7, %s12167_s25 }
0x1f2e   :  { %11800 = vrot.lane.b32.xlu1 %v11784_v7, %s12168_s6 }
0x1f94   :  { %v11786_v39 = vpop.permute.xlu0 %11785  ;;  %v11781_v28 = vpop.permute.xlu1 %11780 }
0x1f95   :  { %v11788_v0 = vunpack.i.h.bf16 %v11786_v39  ;;  %v11787_v35 = vunpack.i.l.bf16 %v11786_v39  ;;  %v11783_v45 = vunpack.i.h.bf16 %v11781_v28  ;;  %v11782_v34 = vunpack.i.l.bf16 %v11781_v28 }
0x1f97   :  { %v11509_v1 = vpack.c.bf16 %v11783_v45, %v11782_v34  ;;  %v11513_v13 = vpack.c.bf16 %v11788_v0, %v11787_v35 }
0x1f99   :  { %11510 = vmatprep.subr.bf16.mxu1 %v11509_v1 }
0x1f9a   :  { %11512 = vmatpush3.bf16.msra.mxu1 %v11509_v1 }
0x1f9b   :  { %11514 = vmatprep.subr.bf16.mxu1 %v11513_v13 }
0x1f9d   :  { %10932 = vmatmul.mubr.msk.f32.vlgmr.msra.gmra.mrb[28].mxu1 %vm5965_vm12, %v14354_v22 }
0x1f9e   :  { %11516 = vmatpush3.bf16.msra.mxu1 %v11513_v13  ;;  %10938 = vmatprep.mubr.msk.f32.mxu1 %vm5965_vm12, %v14357_v25 }
0x1f9f   :  { %10962 = vmatprep.subr.mxu1 %v14244_v30 }
0x1fa5   :  { %v14367_v10 = vpop.permute.xlu0 %8573  ;;  %v14369_v54 = vpop.permute.xlu1 %8568  ;;  %10939 = vmatmul.mubr.msk.f32.vlgmr.msra.gmra.mrb[28].mxu1 %vm5965_vm12, %v14365_v47 }
0x1fa6   :  { %10964 = vmatprep.mubr.msk.f32.mxu1 %vm1106_vm3, %v14291_v9  ;;  %10963 = vmatpush3.msra.mxu1 %v14244_v30 }
0x1fa7   :  { %10967 = vmatprep.subr.mxu1 %v14253_v49 }
0x1fa9   :  { %v11796_v55 = vpop.permute.xlu0 %11795  ;;  %v11791_v46 = vpop.permute.xlu1 %11790  ;;  %10965 = vmatmul.mubr.msk.f32.vlgmr.msra.gmra.mrb[30].mxu1 %vm1106_vm3, %v14297_v4 }
0x1faa   :  { %v11798_v37 = vunpack.i.h.bf16 %v11796_v55  ;;  %v11797_v32 = vunpack.i.l.bf16 %v11796_v55  ;;  %v11793_v15 = vunpack.i.h.bf16 %v11791_v46  ;;  %v11792_v3 = vunpack.i.l.bf16 %v11791_v46  ;;  %10969 = vmatprep.mubr.msk.f32.mxu1 %vm1106_vm3, %v14306_v58  ;;  %10968 = vmatpush3.msra.mxu1 %v14253_v49 }
0x1fab   :  { %10972 = vmatprep.subr.mxu1 %v14299_v6 }
0x1fac   :  { %v11517_v9 = vpack.c.bf16 %v11793_v15, %v11792_v3  ;;  %v11521_v21 = vpack.c.bf16 %v11798_v37, %v11797_v32 }
0x1fad   :  { %v11801_v30 = vpop.permute.xlu1 %11800 }
0x1fae   :  { %v11803_v36 = vunpack.i.h.bf16 %v11801_v30  ;;  %v11802_v26 = vunpack.i.l.bf16 %v11801_v30  ;;  %11518 = vmatprep.subr.bf16.mxu0 %v11517_v9 }
0x1faf   :  { %11520 = vmatpush3.bf16.msra.mxu0 %v11517_v9 }
0x1fb0   :  { %11522 = vmatprep.subr.bf16.mxu0 %v11521_v21  ;;  %v11525_v4 = vpack.c.bf16 %v11803_v36, %v11802_v26 }
0x1fb1   :  { %10970 = vmatmul.mubr.msk.f32.vlgmr.msra.gmra.mrb[30].mxu1 %vm1106_vm3, %v14313_v8 }
0x1fb2   :  { %10946 = vmatmul.mubr.msk.f32.vlgmr.msra.gmra.mrb[26].mxu0 %vm5965_vm12, %v14341_v57  ;;  %10974 = vmatprep.mubr.msk.f32.mxu1 %vm1106_vm3, %v14319_v43 }
0x1fb3   :  { %11524 = vmatpush3.bf16.msra.mxu0 %v11521_v21  ;;  %10973 = vmatpush3.msra.mxu1 %v14299_v6 }
0x1fb4   :  { %11526 = vmatprep.subr.bf16.mxu0 %v11525_v4  ;;  %10952 = vmatprep.mubr.msk.f32.mxu0 %vm5965_vm12, %v14344_v61 }
0x1fb9   :  { %10975 = vmatmul.mubr.msk.f32.vlgmr.msra.gmra.mrb[30].mxu1 %vm1106_vm3, %v14326_v62 }
0x1fba   :  { %10953 = vmatmul.mubr.msk.f32.vlgmr.msra.gmra.mrb[26].mxu0 %vm5965_vm12, %v14354_v22  ;;  %11002 = vmatprep.mubr.msk.f32.mxu1 %vm5965_vm12, %v14330_v17 }
0x1fbb   :  { %11528 = vmatpush3.bf16.msra.mxu0 %v11525_v4  ;;  %10959 = vmatprep.mubr.msk.f32.mxu0 %vm5965_vm12, %v14357_v25 }
0x1fc2   :  { %10960 = vmatmul.mubr.msk.f32.vlgmr.msra.gmra.mrb[26].mxu0 %vm5965_vm12, %v14365_v47 }
0x1fc3   :  { %10981 = vmatprep.mubr.msk.f32.mxu0 %vm5965_vm12, %v14330_v17 }
0x2078   :  { %v10940_v49 = vpop.f32.mrb[28].mxu1 }
0x2079   :  { %v8747_v6 = vpop.f32.mrb[29].mxu1  ;;  %v11573_v16 = vadd.f32 %v10940_v49, %v14367_v10 }
0x207a   :  { %v11574_v40 = vadd.f32 %v8747_v6, %v14369_v54 }
0x208c   :  { %v10976_v58 = vpop.f32.mrb[30].mxu1 }
0x208d   :  { %v9243_v38 = vpop.f32.mrb[31].mxu1 }
0x208e   :  { %v11809_v19 = vpack.i.bf16 %v10976_v58, %v9243_v38  ;;  %v11529_v60 = vpack.c.bf16 %v10976_v58, %v9243_v38 }
0x2090   :  { %11810 = vrot.lane.b32.xlu1 %v11809_v19, %s12159_s0  ;;  %11805 = vrot.lane.b32.xlu0 %v11809_v19, %s12163_s23 }
0x2091   :  { %11530 = vmatprep.subr.bf16.mxu0 %v11529_v60 }
0x2092   :  { %11532 = vmatpush3.bf16.msra.mxu0 %v11529_v60 }
0x2094   :  { %11820 = vrot.lane.b32.xlu1 %v11809_v19, %s12166_s21  ;;  %11815 = vrot.lane.b32.xlu0 %v11809_v19, %s12167_s25 }
0x2095   :  { %v10961_v42 = vpop.f32.mrb[26].mxu0  ;;  %10982 = vmatmul.mubr.msk.f32.vlgmr.msra.gmra.mrb[28].mxu0 %vm5965_vm12, %v14341_v57 }
0x2096   :  { %v11575_v48 = vadd.f32 %v10961_v42, %v14367_v10  ;;  %v8996_v12 = vpop.f32.mrb[27].mxu0  ;;  %10988 = vmatprep.mubr.msk.f32.mxu0 %vm5965_vm12, %v14344_v61 }
0x2097   :  { %v11576_v8 = vadd.f32 %v8996_v12, %v14369_v54 }
0x2098   :  { %v9008_v50 = vmax.f32 %v11573_v16, %v11575_v48  ;;  %11825 = vrot.lane.b32.xlu0 %v11809_v19, %s12168_s6 }
0x2099   :  { %v9007_v41 = vmax.f32 %v11574_v40, %v11576_v8 }
0x209a   :  { %9752 = vst.msk [vmem:[%s12357_s8 + $0x8] sm:$0xff] %vm9750_vm15, %v9008_v50 }
0x209b   :  { %9751 = vst.msk [vmem:[%s12357_s8] sm:$0xff] %vm9750_vm15, %v9007_v41 }
0x2102   :  { %v11811_v59 = vpop.permute.xlu1 %11810  ;;  %v11806_v24 = vpop.permute.xlu0 %11805 }
0x2103   :  { %v11813_v56 = vunpack.i.h.bf16 %v11811_v59  ;;  %v11812_v2 = vunpack.i.l.bf16 %v11811_v59  ;;  %v11808_v20 = vunpack.i.h.bf16 %v11806_v24  ;;  %v11807_v43 = vunpack.i.l.bf16 %v11806_v24 }
0x2105   :  { %v11533_v5 = vpack.c.bf16 %v11808_v20, %v11807_v43  ;;  %v11537_v23 = vpack.c.bf16 %v11813_v56, %v11812_v2 }
0x2106   :  { %v11821_v29 = vpop.permute.xlu1 %11820  ;;  %v11816_v31 = vpop.permute.xlu0 %11815 }
0x2107   :  { %v11823_v27 = vunpack.i.h.bf16 %v11821_v29  ;;  %v11822_v18 = vunpack.i.l.bf16 %v11821_v29  ;;  %v11818_v44 = vunpack.i.h.bf16 %v11816_v31  ;;  %v11817_v14 = vunpack.i.l.bf16 %v11816_v31  ;;  %11534 = vmatprep.subr.bf16.mxu0 %v11533_v5 }
0x2108   :  { %11536 = vmatpush3.bf16.msra.mxu0 %v11533_v5 }
0x2109   :  { %v11541_v51 = vpack.c.bf16 %v11818_v44, %v11817_v14  ;;  %11538 = vmatprep.subr.bf16.mxu0 %v11537_v23  ;;  %v11545_v17 = vpack.c.bf16 %v11823_v27, %v11822_v18 }
0x210a   :  { %v11826_v62 = vpop.permute.xlu0 %11825 }
0x210b   :  { %v11828_v63 = vunpack.i.h.bf16 %v11826_v62  ;;  %v11827_v33 = vunpack.i.l.bf16 %v11826_v62  ;;  %10989 = vmatmul.mubr.msk.f32.vlgmr.msra.gmra.mrb[28].mxu0 %vm5965_vm12, %v14354_v22  ;;  %11542 = vmatprep.subr.bf16.mxu1 %v11541_v51 }
0x210c   :  { %11540 = vmatpush3.bf16.msra.mxu0 %v11537_v23  ;;  %11544 = vmatpush3.bf16.msra.mxu1 %v11541_v51 }
0x210d   :  { %11546 = vmatprep.subr.bf16.mxu1 %v11545_v17  ;;  %10995 = vmatprep.mubr.msk.f32.mxu0 %vm5965_vm12, %v14357_v25  ;;  %v11549_v7 = vpack.c.bf16 %v11828_v63, %v11827_v33 }
0x210f   :  { %11003 = vmatmul.mubr.msk.f32.vlgmr.msra.gmra.mrb[32].mxu1 %vm5965_vm12, %v14341_v57 }
0x2110   :  { %11548 = vmatpush3.bf16.msra.mxu1 %v11545_v17  ;;  %11009 = vmatprep.mubr.msk.f32.mxu1 %vm5965_vm12, %v14344_v61 }
0x2111   :  { %11550 = vmatprep.subr.bf16.mxu1 %v11549_v7 }
0x2113   :  { %10996 = vmatmul.mubr.msk.f32.vlgmr.msra.gmra.mrb[28].mxu0 %vm5965_vm12, %v14365_v47 }
0x2117   :  { %11010 = vmatmul.mubr.msk.f32.vlgmr.msra.gmra.mrb[32].mxu1 %vm5965_vm12, %v14354_v22 }
0x2118   :  { %11552 = vmatpush3.bf16.msra.mxu1 %v11549_v7  ;;  %11016 = vmatprep.mubr.msk.f32.mxu1 %vm5965_vm12, %v14357_v25 }
0x211f   :  { %11017 = vmatmul.mubr.msk.f32.vlgmr.msra.gmra.mrb[32].mxu1 %vm5965_vm12, %v14365_v47 }
0x21e6   :  { %v10997_v11 = vpop.f32.mrb[28].mxu0 }
0x21e7   :  { %v9488_v52 = vpop.f32.mrb[29].mxu0  ;;  %v11577_v57 = vadd.f32 %v10997_v11, %v14367_v10 }
0x21e8   :  { %v11578_v28 = vadd.f32 %v9488_v52, %v14369_v54 }
0x21f2   :  { %v11018_v53 = vpop.f32.mrb[32].mxu1 }
0x21f3   :  { %v11579_v61 = vadd.f32 %v11018_v53, %v14367_v10  ;;  %v9737_v39 = vpop.f32.mrb[33].mxu1 }
0x21f4   :  { %v11580_v0 = vadd.f32 %v9737_v39, %v14369_v54 }
0x21f5   :  { %v9749_v35 = vmax.f32 %v11577_v57, %v11579_v61 }
0x21f6   :  { %v9748_v45 = vmax.f32 %v11578_v28, %v11580_v0 }
0x21f7   :  { %10022 = vst.msk [vmem:[%s12357_s8 + $0x18] sm:$0xff] %vm9750_vm15, %v9749_v35 }
0x21f8   :  { %10021 = vst.msk [vmem:[%s12357_s8 + $0x10] sm:$0xff] %vm9750_vm15, %v9748_v45 }
0x21f9   :  { %9760 = vsyncpa [#allocation3], 1 }
0x21fa   :  { %9761 = vsyncpa [#allocation5], 1 }
0x21fb   :  { %9762 = vsyncpa [#allocation8], 1 }
0x21fc   :  { %9763 = vsyncpa [#allocation11], 1 }

</bundles_post_ra>
